<compile_context>
chip_gen: v6e
topology: v6e:2x2x1
jax: 0.10.0
libtpu: 0.0.40
codegen_flags: <defaults>
</compile_context>

<pallas_src>
import jax
import jax.numpy as jnp
from jax.experimental import pallas as pl
from jax.experimental.pallas import tpu as pltpu


def _round_up(x, m):
    return (x + m - 1) // m * m


def _make_chamfer_kernel(N, M, BB, Np, TM, n_mtiles):
    inv_n = 1.0 / float(N)
    inv_m = 1.0 / float(M)

    def kernel(t_ref, s_ref, o_ref, rowmin_ref, colsum_ref):
        # t_ref:      (BB, Np, 3)  template block, points on sublanes
        # s_ref:      (BB, 3, TM)  source tile, points lane-dense
        # o_ref:      (BB, 128)    per-batch scalar, broadcast over 128 lanes
        # rowmin_ref: (BB, Np, 1)  running min_j ||t_i - s_j||^2 (template->source)
        # colsum_ref: (BB, 1, 1)   running sum_j sqrt(min_i ||t_i - s_j||^2)
        j = pl.program_id(1)

        @pl.when(j == 0)
        def _init():
            rowmin_ref[...] = jnp.full_like(rowmin_ref, jnp.inf)
            colsum_ref[...] = jnp.zeros_like(colsum_ref)

        # validity of the source points covered by this M tile (lane axis)
        col_ids = j * TM + jax.lax.broadcasted_iota(jnp.int32, (1, TM), 1)
        col_valid = col_ids < M                                        # (1, TM)

        # validity of template points (static: only needed if N was padded)
        if Np > N:
            row_valid = jax.lax.broadcasted_iota(jnp.int32, (Np, 1), 0) < N
        else:
            row_valid = None

        # Static unrolled loop over the BB sub-batches; everything stays 2-D.
        for b in range(BB):
            t = t_ref[b].astype(jnp.float32)                           # (Np, 3)
            s = s_ref[b].astype(jnp.float32)                           # (3, TM)

            # pairwise squared distances via broadcast-difference (VPU only)
            diff0 = t[:, 0:1] - s[0:1, :]                              # (Np, TM)
            d = diff0 * diff0
            for k in (1, 2):
                diff = t[:, k:k + 1] - s[k:k + 1, :]
                d = d + diff * diff

            # template -> source: running row-min across M tiles
            d_t2s = jnp.where(col_valid, d, jnp.inf)
            tile_rowmin = jnp.min(d_t2s, axis=1, keepdims=True)        # (Np, 1)
            rowmin_ref[b] = jnp.minimum(rowmin_ref[b], tile_rowmin)

            # source -> template: this tile's column-min is final; fold into sum
            d_s2t = d if row_valid is None else jnp.where(row_valid, d, jnp.inf)
            colmin = jnp.min(d_s2t, axis=0, keepdims=True)             # (1, TM)
            col_sqrt = jnp.where(col_valid, jnp.sqrt(colmin), 0.0)
            colsum_ref[b] = colsum_ref[b] + jnp.sum(
                col_sqrt, axis=1, keepdims=True)

        @pl.when(j == n_mtiles - 1)
        def _finalize():
            for b in range(BB):
                rm_sqrt = jnp.sqrt(rowmin_ref[b])                      # (Np, 1)
                if row_valid is not None:
                    rm_sqrt = jnp.where(row_valid, rm_sqrt, 0.0)
                mean_t2s = jnp.sum(rm_sqrt, axis=0, keepdims=True) * inv_n  # (1,1)
                mean_s2t = colsum_ref[b] * inv_m                             # (1,1)
                loss = 0.5 * (mean_t2s + mean_s2t)
                o_ref[b:b + 1, :] = jnp.broadcast_to(loss, (1, 128))

    return kernel


def chamfer_distance_loss(template, source, reduction="mean", *, tm=None):
    """Matches ChamferDistanceLoss.forward. template: (B, N, 3), source: (B, M, 3)."""
    B, N, D = template.shape
    B2, M, D2 = source.shape
    assert D == 3 and D2 == 3 and B2 == B, "point clouds must be (B, *, 3)"

    BB = 8                                   # batches per grid step
    Bp = _round_up(B, BB)
    Np = _round_up(N, 8)                     # sublane-align template points
    if tm is None:
        # M tile (lane axis). Capped so N*TM f32 intermediates + scratch stay
        # well inside v7x's 64 MiB VMEM while amortizing per-step overhead.
        tm = min(512, _round_up(M, 128))
    TM = _round_up(tm, 128)
    Mp = _round_up(M, TM)
    n_mtiles = Mp // TM

    t = jnp.pad(template.astype(jnp.float32), ((0, Bp - B), (0, Np - N), (0, 0)))
    s = jnp.pad(source.astype(jnp.float32), ((0, Bp - B), (0, Mp - M), (0, 0)))
    s = jnp.transpose(s, (0, 2, 1))          # (Bp, 3, Mp): lane-dense source points

    kernel = _make_chamfer_kernel(N, M, BB, Np, TM, n_mtiles)

    out = pl.pallas_call(
        kernel,
        out_shape=jax.ShapeDtypeStruct((Bp, 128), jnp.float32),
        grid_spec=pltpu.PrefetchScalarGridSpec(
            num_scalar_prefetch=0,
            grid=(Bp // BB, n_mtiles),
            in_specs=[
                pl.BlockSpec((BB, Np, 3), lambda i, j: (i, 0, 0)),
                pl.BlockSpec((BB, 3, TM), lambda i, j: (i, 0, j)),
            ],
            out_specs=pl.BlockSpec((BB, 128), lambda i, j: (i, 0)),
            scratch_shapes=[
                pltpu.VMEM((BB, Np, 1), jnp.float32),   # running row-min
                pltpu.VMEM((BB, 1, 1), jnp.float32),    # running sqrt col-sum
            ],
        ),
        compiler_params=pltpu.CompilerParams(
            dimension_semantics=("parallel", "arbitrary"),
            vmem_limit_bytes=32 * 1024 * 1024,
        ),
    )(t, s)

    per_batch = out[:B, 0]                   # (B,) chamfer loss per example

    if reduction == "none":
        return per_batch
    if reduction == "mean":
        return jnp.mean(per_batch, axis=0)
    if reduction == "sum":
        return jnp.sum(per_batch, axis=0)
    raise ValueError(f"unknown reduction {reduction!r}")


def _chamfer_reference(template, source, reduction="mean"):
    # pure-JAX reference of the PyTorch semantics
    d = jnp.sum((template[:, :, None, :] - source[:, None, :, :]) ** 2, axis=-1)
    cost_p0_p1 = jnp.min(d, axis=2)  # (B, N)
    cost_p1_p0 = jnp.min(d, axis=1)  # (B, M)
    per_batch = 0.5 * (jnp.mean(jnp.sqrt(cost_p0_p1), axis=-1)
                       + jnp.mean(jnp.sqrt(cost_p1_p0), axis=-1))
    if reduction == "none":
        return per_batch
    if reduction == "mean":
        return jnp.mean(per_batch, axis=0)
    return jnp.sum(per_batch, axis=0)


if __name__ == "__main__":
    key = jax.random.PRNGKey(0)
    k1, k2, k3, k4 = jax.random.split(key, 4)

    # Case 1: unaligned N / M (exercises padding masks) + two M tiles.
    B, N, M = 2, 100, 200
    template = jax.random.normal(k1, (B, N, 3), dtype=jnp.float32)
    source = jax.random.normal(k2, (B, M, 3), dtype=jnp.float32)
    loss = jax.block_until_ready(
        chamfer_distance_loss(template, source, reduction="mean", tm=128))
    ref = _chamfer_reference(template, source, reduction="mean")
    assert jnp.allclose(loss, ref, rtol=1e-4, atol=1e-4), (loss, ref)

    # Case 2: aligned sizes, single M tile, 'none' reduction.
    B, N, M = 3, 64, 128
    template = jax.random.normal(k3, (B, N, 3), dtype=jnp.float32)
    source = jax.random.normal(k4, (B, M, 3), dtype=jnp.float32)
    loss_n = jax.block_until_ready(
        chamfer_distance_loss(template, source, reduction="none"))
    ref_n = _chamfer_reference(template, source, reduction="none")
    assert jnp.allclose(loss_n, ref_n, rtol=1e-4, atol=1e-4), (loss_n, ref_n)

    print("KERNEL_OK")
</pallas_src>

<mosaic_0001>
module attributes {stable_mosaic.version = 11 : i64} {
  func.func @kernel(%arg0: i32, %arg1: i32, %arg2: memref<8x104x3xf32, #tpu.memory_space<vmem>>, %arg3: memref<8x3x128xf32, #tpu.memory_space<vmem>>, %arg4: memref<8x128xf32, #tpu.memory_space<vmem>>, %arg5: memref<8x104x1xf32, #tpu.memory_space<vmem>>, %arg6: memref<8x1x1xf32, #tpu.memory_space<vmem>>) attributes {dimension_semantics = [#tpu.dimension_semantics<parallel>, #tpu.dimension_semantics<arbitrary>], iteration_bounds = array<i64: 1, 2>, scalar_prefetch = 0 : i64, scratch_operands = 2 : i64, tpu.core_type = #tpu.core_type<tc>, window_params = [{transform_indices = @transform_0, window_bounds = array<i64: 8, 104, 3>}, {transform_indices = @transform_1, window_bounds = array<i64: 8, 3, 128>}, {transform_indices = @transform_2, window_bounds = array<i64: 8, 128>}]} {
    %c0_i32 = arith.constant 0 : i32
    %0 = arith.cmpi eq, %arg1, %c0_i32 : i32
    %1 = arith.extui %0 : i1 to i32
    %c0_i32_0 = arith.constant 0 : i32
    %2 = arith.cmpi ne, %1, %c0_i32_0 : i32
    scf.if %2 {
      %cst_185 = arith.constant 0x7F800000 : f32
      %439 = vector.broadcast %cst_185 : f32 to vector<8x104x1xf32>
      %c0_186 = arith.constant 0 : index
      %c0_187 = arith.constant 0 : index
      %c0_188 = arith.constant 0 : index
      %440 = vector.load %arg5[%c0_186, %c0_187, %c0_188] : memref<8x104x1xf32, #tpu.memory_space<vmem>>, vector<8x104x1xf32>
      tpu.vector_store %arg5[%c0_186, %c0_187, %c0_188], %439 {strides = array<i32>} : memref<8x104x1xf32, #tpu.memory_space<vmem>>, vector<8x104x1xf32>,
      %cst_189 = arith.constant 0.000000e+00 : f32
      %441 = vector.broadcast %cst_189 : f32 to vector<8x1x1xf32>
      %c0_190 = arith.constant 0 : index
      %c0_191 = arith.constant 0 : index
      %c0_192 = arith.constant 0 : index
      %442 = vector.load %arg6[%c0_190, %c0_191, %c0_192] : memref<8x1x1xf32, #tpu.memory_space<vmem>>, vector<8x1x1xf32>
      tpu.vector_store %arg6[%c0_190, %c0_191, %c0_192], %441 {strides = array<i32>} : memref<8x1x1xf32, #tpu.memory_space<vmem>>, vector<8x1x1xf32>,
    } else {
    }
    %c128_i32 = arith.constant 128 : i32
    %3 = arith.muli %arg1, %c128_i32 : i32
    %4 = tpu.iota {dimensions = array<i32: 1>} : vector<1x128xi32>
    %5 = vector.broadcast %3 : i32 to vector<1x128xi32>
    %6 = arith.addi %5, %4 : vector<1x128xi32>
    %c200_i32 = arith.constant 200 : i32
    %7 = vector.broadcast %c200_i32 : i32 to vector<1x128xi32>
    %8 = arith.cmpi slt, %6, %7 : vector<1x128xi32>
    %9 = tpu.iota {dimensions = array<i32: 0>} : vector<104x1xi32>
    %c100_i32 = arith.constant 100 : i32
    %10 = vector.broadcast %c100_i32 : i32 to vector<104x1xi32>
    %11 = arith.cmpi slt, %9, %10 : vector<104x1xi32>
    %c0 = arith.constant 0 : index
    %c0_1 = arith.constant 0 : index
    %c0_2 = arith.constant 0 : index
    %12 = vector.load %arg2[%c0, %c0_1, %c0_2] : memref<8x104x3xf32, #tpu.memory_space<vmem>>, vector<1x104x3xf32>
    %13 = vector.shape_cast %12 : vector<1x104x3xf32> to vector<104x3xf32>
    %c0_3 = arith.constant 0 : index
    %c0_4 = arith.constant 0 : index
    %c0_5 = arith.constant 0 : index
    %14 = vector.load %arg3[%c0_3, %c0_4, %c0_5] : memref<8x3x128xf32, #tpu.memory_space<vmem>>, vector<1x3x128xf32>
    %15 = vector.shape_cast %14 : vector<1x3x128xf32> to vector<3x128xf32>
    %16 = vector.extract_strided_slice %13 {offsets = [0, 0], sizes = [104, 1], strides = [1, 1]} : vector<104x3xf32> to vector<104x1xf32>
    %17 = vector.extract_strided_slice %15 {offsets = [0, 0], sizes = [1, 128], strides = [1, 1]} : vector<3x128xf32> to vector<1x128xf32>
    %18 = vector.broadcast %16 : vector<104x1xf32> to vector<104x128xf32>
    %19 = vector.broadcast %17 : vector<1x128xf32> to vector<104x128xf32>
    %20 = arith.subf %18, %19 : vector<104x128xf32>
    %21 = arith.mulf %20, %20 : vector<104x128xf32>
    %22 = vector.extract_strided_slice %13 {offsets = [0, 1], sizes = [104, 1], strides = [1, 1]} : vector<104x3xf32> to vector<104x1xf32>
    %23 = vector.extract_strided_slice %15 {offsets = [1, 0], sizes = [1, 128], strides = [1, 1]} : vector<3x128xf32> to vector<1x128xf32>
    %24 = vector.broadcast %22 : vector<104x1xf32> to vector<104x128xf32>
    %25 = vector.broadcast %23 : vector<1x128xf32> to vector<104x128xf32>
    %26 = arith.subf %24, %25 : vector<104x128xf32>
    %27 = arith.mulf %26, %26 : vector<104x128xf32>
    %28 = arith.addf %21, %27 : vector<104x128xf32>
    %29 = vector.extract_strided_slice %13 {offsets = [0, 2], sizes = [104, 1], strides = [1, 1]} : vector<104x3xf32> to vector<104x1xf32>
    %30 = vector.extract_strided_slice %15 {offsets = [2, 0], sizes = [1, 128], strides = [1, 1]} : vector<3x128xf32> to vector<1x128xf32>
    %31 = vector.broadcast %29 : vector<104x1xf32> to vector<104x128xf32>
    %32 = vector.broadcast %30 : vector<1x128xf32> to vector<104x128xf32>
    %33 = arith.subf %31, %32 : vector<104x128xf32>
    %34 = arith.mulf %33, %33 : vector<104x128xf32>
    %35 = arith.addf %28, %34 : vector<104x128xf32>
    %cst = arith.constant 0x7F800000 : f32
    %36 = vector.shape_cast %8 : vector<1x128xi1> to vector<1x128xi1>
    %37 = vector.broadcast %36 : vector<1x128xi1> to vector<104x128xi1>
    %38 = vector.broadcast %cst : f32 to vector<104x128xf32>
    %39 = arith.select %37, %35, %38 : vector<104x128xi1>, vector<104x128xf32>
    %cst_6 = arith.constant dense<0x7F800000> : vector<104xf32>
    %40 = vector.multi_reduction <minimumf>, %39, %cst_6 [1] : vector<104x128xf32> to vector<104xf32>
    %41 = vector.shape_cast %40 : vector<104xf32> to vector<104x1xf32>
    %c0_7 = arith.constant 0 : index
    %c0_8 = arith.constant 0 : index
    %c0_9 = arith.constant 0 : index
    %42 = vector.load %arg5[%c0_7, %c0_8, %c0_9] : memref<8x104x1xf32, #tpu.memory_space<vmem>>, vector<1x104x1xf32>
    %43 = vector.shape_cast %42 : vector<1x104x1xf32> to vector<104x1xf32>
    %44 = arith.minimumf %43, %41 : vector<104x1xf32>
    %c0_10 = arith.constant 0 : index
    %c0_11 = arith.constant 0 : index
    %c0_12 = arith.constant 0 : index
    %45 = vector.load %arg5[%c0_10, %c0_11, %c0_12] : memref<8x104x1xf32, #tpu.memory_space<vmem>>, vector<1x104x1xf32>
    %46 = vector.shape_cast %45 : vector<1x104x1xf32> to vector<104x1xf32>
    %47 = vector.shape_cast %44 : vector<104x1xf32> to vector<1x104x1xf32>
    tpu.vector_store %arg5[%c0_10, %c0_11, %c0_12], %47 {strides = array<i32>} : memref<8x104x1xf32, #tpu.memory_space<vmem>>, vector<1x104x1xf32>,
    %cst_13 = arith.constant 0x7F800000 : f32
    %48 = vector.shape_cast %11 : vector<104x1xi1> to vector<104x1xi1>
    %49 = vector.broadcast %48 : vector<104x1xi1> to vector<104x128xi1>
    %50 = vector.broadcast %cst_13 : f32 to vector<104x128xf32>
    %51 = arith.select %49, %35, %50 : vector<104x128xi1>, vector<104x128xf32>
    %cst_14 = arith.constant dense<0x7F800000> : vector<128xf32>
    %52 = vector.multi_reduction <minimumf>, %51, %cst_14 [0] : vector<104x128xf32> to vector<128xf32>
    %53 = vector.shape_cast %52 : vector<128xf32> to vector<1x128xf32>
    %54 = math.sqrt %53 : vector<1x128xf32>
    %cst_15 = arith.constant 0.000000e+00 : f32
    %55 = vector.broadcast %cst_15 : f32 to vector<1x128xf32>
    %56 = arith.select %8, %54, %55 : vector<1x128xi1>, vector<1x128xf32>
    %c0_16 = arith.constant 0 : index
    %c0_17 = arith.constant 0 : index
    %c0_18 = arith.constant 0 : index
    %57 = vector.load %arg6[%c0_16, %c0_17, %c0_18] : memref<8x1x1xf32, #tpu.memory_space<vmem>>, vector<1x1x1xf32>
    %58 = vector.shape_cast %57 : vector<1x1x1xf32> to vector<1x1xf32>
    %cst_19 = arith.constant dense<0.000000e+00> : vector<1xf32>
    %59 = vector.multi_reduction <add>, %56, %cst_19 [1] : vector<1x128xf32> to vector<1xf32>
    %60 = vector.shape_cast %59 : vector<1xf32> to vector<1x1xf32>
    %61 = arith.addf %58, %60 : vector<1x1xf32>
    %c0_20 = arith.constant 0 : index
    %c0_21 = arith.constant 0 : index
    %c0_22 = arith.constant 0 : index
    %62 = vector.load %arg6[%c0_20, %c0_21, %c0_22] : memref<8x1x1xf32, #tpu.memory_space<vmem>>, vector<1x1x1xf32>
    %63 = vector.shape_cast %62 : vector<1x1x1xf32> to vector<1x1xf32>
    %64 = vector.shape_cast %61 : vector<1x1xf32> to vector<1x1x1xf32>
    tpu.vector_store %arg6[%c0_20, %c0_21, %c0_22], %64 {strides = array<i32>} : memref<8x1x1xf32, #tpu.memory_space<vmem>>, vector<1x1x1xf32>,
    %c1 = arith.constant 1 : index
    %c0_23 = arith.constant 0 : index
    %c0_24 = arith.constant 0 : index
    %65 = vector.load %arg2[%c1, %c0_23, %c0_24] : memref<8x104x3xf32, #tpu.memory_space<vmem>>, vector<1x104x3xf32>
    %66 = vector.shape_cast %65 : vector<1x104x3xf32> to vector<104x3xf32>
    %c1_25 = arith.constant 1 : index
    %c0_26 = arith.constant 0 : index
    %c0_27 = arith.constant 0 : index
    %67 = vector.load %arg3[%c1_25, %c0_26, %c0_27] : memref<8x3x128xf32, #tpu.memory_space<vmem>>, vector<1x3x128xf32>
    %68 = vector.shape_cast %67 : vector<1x3x128xf32> to vector<3x128xf32>
    %69 = vector.extract_strided_slice %66 {offsets = [0, 0], sizes = [104, 1], strides = [1, 1]} : vector<104x3xf32> to vector<104x1xf32>
    %70 = vector.extract_strided_slice %68 {offsets = [0, 0], sizes = [1, 128], strides = [1, 1]} : vector<3x128xf32> to vector<1x128xf32>
    %71 = vector.broadcast %69 : vector<104x1xf32> to vector<104x128xf32>
    %72 = vector.broadcast %70 : vector<1x128xf32> to vector<104x128xf32>
    %73 = arith.subf %71, %72 : vector<104x128xf32>
    %74 = arith.mulf %73, %73 : vector<104x128xf32>
    %75 = vector.extract_strided_slice %66 {offsets = [0, 1], sizes = [104, 1], strides = [1, 1]} : vector<104x3xf32> to vector<104x1xf32>
    %76 = vector.extract_strided_slice %68 {offsets = [1, 0], sizes = [1, 128], strides = [1, 1]} : vector<3x128xf32> to vector<1x128xf32>
    %77 = vector.broadcast %75 : vector<104x1xf32> to vector<104x128xf32>
    %78 = vector.broadcast %76 : vector<1x128xf32> to vector<104x128xf32>
    %79 = arith.subf %77, %78 : vector<104x128xf32>
    %80 = arith.mulf %79, %79 : vector<104x128xf32>
    %81 = arith.addf %74, %80 : vector<104x128xf32>
    %82 = vector.extract_strided_slice %66 {offsets = [0, 2], sizes = [104, 1], strides = [1, 1]} : vector<104x3xf32> to vector<104x1xf32>
    %83 = vector.extract_strided_slice %68 {offsets = [2, 0], sizes = [1, 128], strides = [1, 1]} : vector<3x128xf32> to vector<1x128xf32>
    %84 = vector.broadcast %82 : vector<104x1xf32> to vector<104x128xf32>
    %85 = vector.broadcast %83 : vector<1x128xf32> to vector<104x128xf32>
    %86 = arith.subf %84, %85 : vector<104x128xf32>
    %87 = arith.mulf %86, %86 : vector<104x128xf32>
    %88 = arith.addf %81, %87 : vector<104x128xf32>
    %cst_28 = arith.constant 0x7F800000 : f32
    %89 = vector.shape_cast %8 : vector<1x128xi1> to vector<1x128xi1>
    %90 = vector.broadcast %89 : vector<1x128xi1> to vector<104x128xi1>
    %91 = vector.broadcast %cst_28 : f32 to vector<104x128xf32>
    %92 = arith.select %90, %88, %91 : vector<104x128xi1>, vector<104x128xf32>
    %cst_29 = arith.constant dense<0x7F800000> : vector<104xf32>
    %93 = vector.multi_reduction <minimumf>, %92, %cst_29 [1] : vector<104x128xf32> to vector<104xf32>
    %94 = vector.shape_cast %93 : vector<104xf32> to vector<104x1xf32>
    %c1_30 = arith.constant 1 : index
    %c0_31 = arith.constant 0 : index
    %c0_32 = arith.constant 0 : index
    %95 = vector.load %arg5[%c1_30, %c0_31, %c0_32] : memref<8x104x1xf32, #tpu.memory_space<vmem>>, vector<1x104x1xf32>
    %96 = vector.shape_cast %95 : vector<1x104x1xf32> to vector<104x1xf32>
    %97 = arith.minimumf %96, %94 : vector<104x1xf32>
    %c1_33 = arith.constant 1 : index
    %c0_34 = arith.constant 0 : index
    %c0_35 = arith.constant 0 : index
    %98 = vector.load %arg5[%c1_33, %c0_34, %c0_35] : memref<8x104x1xf32, #tpu.memory_space<vmem>>, vector<1x104x1xf32>
    %99 = vector.shape_cast %98 : vector<1x104x1xf32> to vector<104x1xf32>
    %100 = vector.shape_cast %97 : vector<104x1xf32> to vector<1x104x1xf32>
    tpu.vector_store %arg5[%c1_33, %c0_34, %c0_35], %100 {strides = array<i32>} : memref<8x104x1xf32, #tpu.memory_space<vmem>>, vector<1x104x1xf32>,
    %cst_36 = arith.constant 0x7F800000 : f32
    %101 = vector.shape_cast %11 : vector<104x1xi1> to vector<104x1xi1>
    %102 = vector.broadcast %101 : vector<104x1xi1> to vector<104x128xi1>
    %103 = vector.broadcast %cst_36 : f32 to vector<104x128xf32>
    %104 = arith.select %102, %88, %103 : vector<104x128xi1>, vector<104x128xf32>
    %cst_37 = arith.constant dense<0x7F800000> : vector<128xf32>
    %105 = vector.multi_reduction <minimumf>, %104, %cst_37 [0] : vector<104x128xf32> to vector<128xf32>
    %106 = vector.shape_cast %105 : vector<128xf32> to vector<1x128xf32>
    %107 = math.sqrt %106 : vector<1x128xf32>
    %cst_38 = arith.constant 0.000000e+00 : f32
    %108 = vector.broadcast %cst_38 : f32 to vector<1x128xf32>
    %109 = arith.select %8, %107, %108 : vector<1x128xi1>, vector<1x128xf32>
    %c1_39 = arith.constant 1 : index
    %c0_40 = arith.constant 0 : index
    %c0_41 = arith.constant 0 : index
    %110 = vector.load %arg6[%c1_39, %c0_40, %c0_41] : memref<8x1x1xf32, #tpu.memory_space<vmem>>, vector<1x1x1xf32>
    %111 = vector.shape_cast %110 : vector<1x1x1xf32> to vector<1x1xf32>
    %cst_42 = arith.constant dense<0.000000e+00> : vector<1xf32>
    %112 = vector.multi_reduction <add>, %109, %cst_42 [1] : vector<1x128xf32> to vector<1xf32>
    %113 = vector.shape_cast %112 : vector<1xf32> to vector<1x1xf32>
    %114 = arith.addf %111, %113 : vector<1x1xf32>
    %c1_43 = arith.constant 1 : index
    %c0_44 = arith.constant 0 : index
    %c0_45 = arith.constant 0 : index
    %115 = vector.load %arg6[%c1_43, %c0_44, %c0_45] : memref<8x1x1xf32, #tpu.memory_space<vmem>>, vector<1x1x1xf32>
    %116 = vector.shape_cast %115 : vector<1x1x1xf32> to vector<1x1xf32>
    %117 = vector.shape_cast %114 : vector<1x1xf32> to vector<1x1x1xf32>
    tpu.vector_store %arg6[%c1_43, %c0_44, %c0_45], %117 {strides = array<i32>} : memref<8x1x1xf32, #tpu.memory_space<vmem>>, vector<1x1x1xf32>,
    %c2 = arith.constant 2 : index
    %c0_46 = arith.constant 0 : index
    %c0_47 = arith.constant 0 : index
    %118 = vector.load %arg2[%c2, %c0_46, %c0_47] : memref<8x104x3xf32, #tpu.memory_space<vmem>>, vector<1x104x3xf32>
    %119 = vector.shape_cast %118 : vector<1x104x3xf32> to vector<104x3xf32>
    %c2_48 = arith.constant 2 : index
    %c0_49 = arith.constant 0 : index
    %c0_50 = arith.constant 0 : index
    %120 = vector.load %arg3[%c2_48, %c0_49, %c0_50] : memref<8x3x128xf32, #tpu.memory_space<vmem>>, vector<1x3x128xf32>
    %121 = vector.shape_cast %120 : vector<1x3x128xf32> to vector<3x128xf32>
    %122 = vector.extract_strided_slice %119 {offsets = [0, 0], sizes = [104, 1], strides = [1, 1]} : vector<104x3xf32> to vector<104x1xf32>
    %123 = vector.extract_strided_slice %121 {offsets = [0, 0], sizes = [1, 128], strides = [1, 1]} : vector<3x128xf32> to vector<1x128xf32>
    %124 = vector.broadcast %122 : vector<104x1xf32> to vector<104x128xf32>
    %125 = vector.broadcast %123 : vector<1x128xf32> to vector<104x128xf32>
    %126 = arith.subf %124, %125 : vector<104x128xf32>
    %127 = arith.mulf %126, %126 : vector<104x128xf32>
    %128 = vector.extract_strided_slice %119 {offsets = [0, 1], sizes = [104, 1], strides = [1, 1]} : vector<104x3xf32> to vector<104x1xf32>
    %129 = vector.extract_strided_slice %121 {offsets = [1, 0], sizes = [1, 128], strides = [1, 1]} : vector<3x128xf32> to vector<1x128xf32>
    %130 = vector.broadcast %128 : vector<104x1xf32> to vector<104x128xf32>
    %131 = vector.broadcast %129 : vector<1x128xf32> to vector<104x128xf32>
    %132 = arith.subf %130, %131 : vector<104x128xf32>
    %133 = arith.mulf %132, %132 : vector<104x128xf32>
    %134 = arith.addf %127, %133 : vector<104x128xf32>
    %135 = vector.extract_strided_slice %119 {offsets = [0, 2], sizes = [104, 1], strides = [1, 1]} : vector<104x3xf32> to vector<104x1xf32>
    %136 = vector.extract_strided_slice %121 {offsets = [2, 0], sizes = [1, 128], strides = [1, 1]} : vector<3x128xf32> to vector<1x128xf32>
    %137 = vector.broadcast %135 : vector<104x1xf32> to vector<104x128xf32>
    %138 = vector.broadcast %136 : vector<1x128xf32> to vector<104x128xf32>
    %139 = arith.subf %137, %138 : vector<104x128xf32>
    %140 = arith.mulf %139, %139 : vector<104x128xf32>
    %141 = arith.addf %134, %140 : vector<104x128xf32>
    %cst_51 = arith.constant 0x7F800000 : f32
    %142 = vector.shape_cast %8 : vector<1x128xi1> to vector<1x128xi1>
    %143 = vector.broadcast %142 : vector<1x128xi1> to vector<104x128xi1>
    %144 = vector.broadcast %cst_51 : f32 to vector<104x128xf32>
    %145 = arith.select %143, %141, %144 : vector<104x128xi1>, vector<104x128xf32>
    %cst_52 = arith.constant dense<0x7F800000> : vector<104xf32>
    %146 = vector.multi_reduction <minimumf>, %145, %cst_52 [1] : vector<104x128xf32> to vector<104xf32>
    %147 = vector.shape_cast %146 : vector<104xf32> to vector<104x1xf32>
    %c2_53 = arith.constant 2 : index
    %c0_54 = arith.constant 0 : index
    %c0_55 = arith.constant 0 : index
    %148 = vector.load %arg5[%c2_53, %c0_54, %c0_55] : memref<8x104x1xf32, #tpu.memory_space<vmem>>, vector<1x104x1xf32>
    %149 = vector.shape_cast %148 : vector<1x104x1xf32> to vector<104x1xf32>
    %150 = arith.minimumf %149, %147 : vector<104x1xf32>
    %c2_56 = arith.constant 2 : index
    %c0_57 = arith.constant 0 : index
    %c0_58 = arith.constant 0 : index
    %151 = vector.load %arg5[%c2_56, %c0_57, %c0_58] : memref<8x104x1xf32, #tpu.memory_space<vmem>>, vector<1x104x1xf32>
    %152 = vector.shape_cast %151 : vector<1x104x1xf32> to vector<104x1xf32>
    %153 = vector.shape_cast %150 : vector<104x1xf32> to vector<1x104x1xf32>
    tpu.vector_store %arg5[%c2_56, %c0_57, %c0_58], %153 {strides = array<i32>} : memref<8x104x1xf32, #tpu.memory_space<vmem>>, vector<1x104x1xf32>,
    %cst_59 = arith.constant 0x7F800000 : f32
    %154 = vector.shape_cast %11 : vector<104x1xi1> to vector<104x1xi1>
    %155 = vector.broadcast %154 : vector<104x1xi1> to vector<104x128xi1>
    %156 = vector.broadcast %cst_59 : f32 to vector<104x128xf32>
    %157 = arith.select %155, %141, %156 : vector<104x128xi1>, vector<104x128xf32>
    %cst_60 = arith.constant dense<0x7F800000> : vector<128xf32>
    %158 = vector.multi_reduction <minimumf>, %157, %cst_60 [0] : vector<104x128xf32> to vector<128xf32>
    %159 = vector.shape_cast %158 : vector<128xf32> to vector<1x128xf32>
    %160 = math.sqrt %159 : vector<1x128xf32>
    %cst_61 = arith.constant 0.000000e+00 : f32
    %161 = vector.broadcast %cst_61 : f32 to vector<1x128xf32>
    %162 = arith.select %8, %160, %161 : vector<1x128xi1>, vector<1x128xf32>
    %c2_62 = arith.constant 2 : index
    %c0_63 = arith.constant 0 : index
    %c0_64 = arith.constant 0 : index
    %163 = vector.load %arg6[%c2_62, %c0_63, %c0_64] : memref<8x1x1xf32, #tpu.memory_space<vmem>>, vector<1x1x1xf32>
    %164 = vector.shape_cast %163 : vector<1x1x1xf32> to vector<1x1xf32>
    %cst_65 = arith.constant dense<0.000000e+00> : vector<1xf32>
    %165 = vector.multi_reduction <add>, %162, %cst_65 [1] : vector<1x128xf32> to vector<1xf32>
    %166 = vector.shape_cast %165 : vector<1xf32> to vector<1x1xf32>
    %167 = arith.addf %164, %166 : vector<1x1xf32>
    %c2_66 = arith.constant 2 : index
    %c0_67 = arith.constant 0 : index
    %c0_68 = arith.constant 0 : index
    %168 = vector.load %arg6[%c2_66, %c0_67, %c0_68] : memref<8x1x1xf32, #tpu.memory_space<vmem>>, vector<1x1x1xf32>
    %169 = vector.shape_cast %168 : vector<1x1x1xf32> to vector<1x1xf32>
    %170 = vector.shape_cast %167 : vector<1x1xf32> to vector<1x1x1xf32>
    tpu.vector_store %arg6[%c2_66, %c0_67, %c0_68], %170 {strides = array<i32>} : memref<8x1x1xf32, #tpu.memory_space<vmem>>, vector<1x1x1xf32>,
    %c3 = arith.constant 3 : index
    %c0_69 = arith.constant 0 : index
    %c0_70 = arith.constant 0 : index
    %171 = vector.load %arg2[%c3, %c0_69, %c0_70] : memref<8x104x3xf32, #tpu.memory_space<vmem>>, vector<1x104x3xf32>
    %172 = vector.shape_cast %171 : vector<1x104x3xf32> to vector<104x3xf32>
    %c3_71 = arith.constant 3 : index
    %c0_72 = arith.constant 0 : index
    %c0_73 = arith.constant 0 : index
    %173 = vector.load %arg3[%c3_71, %c0_72, %c0_73] : memref<8x3x128xf32, #tpu.memory_space<vmem>>, vector<1x3x128xf32>
    %174 = vector.shape_cast %173 : vector<1x3x128xf32> to vector<3x128xf32>
    %175 = vector.extract_strided_slice %172 {offsets = [0, 0], sizes = [104, 1], strides = [1, 1]} : vector<104x3xf32> to vector<104x1xf32>
    %176 = vector.extract_strided_slice %174 {offsets = [0, 0], sizes = [1, 128], strides = [1, 1]} : vector<3x128xf32> to vector<1x128xf32>
    %177 = vector.broadcast %175 : vector<104x1xf32> to vector<104x128xf32>
    %178 = vector.broadcast %176 : vector<1x128xf32> to vector<104x128xf32>
    %179 = arith.subf %177, %178 : vector<104x128xf32>
    %180 = arith.mulf %179, %179 : vector<104x128xf32>
    %181 = vector.extract_strided_slice %172 {offsets = [0, 1], sizes = [104, 1], strides = [1, 1]} : vector<104x3xf32> to vector<104x1xf32>
    %182 = vector.extract_strided_slice %174 {offsets = [1, 0], sizes = [1, 128], strides = [1, 1]} : vector<3x128xf32> to vector<1x128xf32>
    %183 = vector.broadcast %181 : vector<104x1xf32> to vector<104x128xf32>
    %184 = vector.broadcast %182 : vector<1x128xf32> to vector<104x128xf32>
    %185 = arith.subf %183, %184 : vector<104x128xf32>
    %186 = arith.mulf %185, %185 : vector<104x128xf32>
    %187 = arith.addf %180, %186 : vector<104x128xf32>
    %188 = vector.extract_strided_slice %172 {offsets = [0, 2], sizes = [104, 1], strides = [1, 1]} : vector<104x3xf32> to vector<104x1xf32>
    %189 = vector.extract_strided_slice %174 {offsets = [2, 0], sizes = [1, 128], strides = [1, 1]} : vector<3x128xf32> to vector<1x128xf32>
    %190 = vector.broadcast %188 : vector<104x1xf32> to vector<104x128xf32>
    %191 = vector.broadcast %189 : vector<1x128xf32> to vector<104x128xf32>
    %192 = arith.subf %190, %191 : vector<104x128xf32>
    %193 = arith.mulf %192, %192 : vector<104x128xf32>
    %194 = arith.addf %187, %193 : vector<104x128xf32>
    %cst_74 = arith.constant 0x7F800000 : f32
    %195 = vector.shape_cast %8 : vector<1x128xi1> to vector<1x128xi1>
    %196 = vector.broadcast %195 : vector<1x128xi1> to vector<104x128xi1>
    %197 = vector.broadcast %cst_74 : f32 to vector<104x128xf32>
    %198 = arith.select %196, %194, %197 : vector<104x128xi1>, vector<104x128xf32>
    %cst_75 = arith.constant dense<0x7F800000> : vector<104xf32>
    %199 = vector.multi_reduction <minimumf>, %198, %cst_75 [1] : vector<104x128xf32> to vector<104xf32>
    %200 = vector.shape_cast %199 : vector<104xf32> to vector<104x1xf32>
    %c3_76 = arith.constant 3 : index
    %c0_77 = arith.constant 0 : index
    %c0_78 = arith.constant 0 : index
    %201 = vector.load %arg5[%c3_76, %c0_77, %c0_78] : memref<8x104x1xf32, #tpu.memory_space<vmem>>, vector<1x104x1xf32>
    %202 = vector.shape_cast %201 : vector<1x104x1xf32> to vector<104x1xf32>
    %203 = arith.minimumf %202, %200 : vector<104x1xf32>
    %c3_79 = arith.constant 3 : index
    %c0_80 = arith.constant 0 : index
    %c0_81 = arith.constant 0 : index
    %204 = vector.load %arg5[%c3_79, %c0_80, %c0_81] : memref<8x104x1xf32, #tpu.memory_space<vmem>>, vector<1x104x1xf32>
    %205 = vector.shape_cast %204 : vector<1x104x1xf32> to vector<104x1xf32>
    %206 = vector.shape_cast %203 : vector<104x1xf32> to vector<1x104x1xf32>
    tpu.vector_store %arg5[%c3_79, %c0_80, %c0_81], %206 {strides = array<i32>} : memref<8x104x1xf32, #tpu.memory_space<vmem>>, vector<1x104x1xf32>,
    %cst_82 = arith.constant 0x7F800000 : f32
    %207 = vector.shape_cast %11 : vector<104x1xi1> to vector<104x1xi1>
    %208 = vector.broadcast %207 : vector<104x1xi1> to vector<104x128xi1>
    %209 = vector.broadcast %cst_82 : f32 to vector<104x128xf32>
    %210 = arith.select %208, %194, %209 : vector<104x128xi1>, vector<104x128xf32>
    %cst_83 = arith.constant dense<0x7F800000> : vector<128xf32>
    %211 = vector.multi_reduction <minimumf>, %210, %cst_83 [0] : vector<104x128xf32> to vector<128xf32>
    %212 = vector.shape_cast %211 : vector<128xf32> to vector<1x128xf32>
    %213 = math.sqrt %212 : vector<1x128xf32>
    %cst_84 = arith.constant 0.000000e+00 : f32
    %214 = vector.broadcast %cst_84 : f32 to vector<1x128xf32>
    %215 = arith.select %8, %213, %214 : vector<1x128xi1>, vector<1x128xf32>
    %c3_85 = arith.constant 3 : index
    %c0_86 = arith.constant 0 : index
    %c0_87 = arith.constant 0 : index
    %216 = vector.load %arg6[%c3_85, %c0_86, %c0_87] : memref<8x1x1xf32, #tpu.memory_space<vmem>>, vector<1x1x1xf32>
    %217 = vector.shape_cast %216 : vector<1x1x1xf32> to vector<1x1xf32>
    %cst_88 = arith.constant dense<0.000000e+00> : vector<1xf32>
    %218 = vector.multi_reduction <add>, %215, %cst_88 [1] : vector<1x128xf32> to vector<1xf32>
    %219 = vector.shape_cast %218 : vector<1xf32> to vector<1x1xf32>
    %220 = arith.addf %217, %219 : vector<1x1xf32>
    %c3_89 = arith.constant 3 : index
    %c0_90 = arith.constant 0 : index
    %c0_91 = arith.constant 0 : index
    %221 = vector.load %arg6[%c3_89, %c0_90, %c0_91] : memref<8x1x1xf32, #tpu.memory_space<vmem>>, vector<1x1x1xf32>
    %222 = vector.shape_cast %221 : vector<1x1x1xf32> to vector<1x1xf32>
    %223 = vector.shape_cast %220 : vector<1x1xf32> to vector<1x1x1xf32>
    tpu.vector_store %arg6[%c3_89, %c0_90, %c0_91], %223 {strides = array<i32>} : memref<8x1x1xf32, #tpu.memory_space<vmem>>, vector<1x1x1xf32>,
    %c4 = arith.constant 4 : index
    %c0_92 = arith.constant 0 : index
    %c0_93 = arith.constant 0 : index
    %224 = vector.load %arg2[%c4, %c0_92, %c0_93] : memref<8x104x3xf32, #tpu.memory_space<vmem>>, vector<1x104x3xf32>
    %225 = vector.shape_cast %224 : vector<1x104x3xf32> to vector<104x3xf32>
    %c4_94 = arith.constant 4 : index
    %c0_95 = arith.constant 0 : index
    %c0_96 = arith.constant 0 : index
    %226 = vector.load %arg3[%c4_94, %c0_95, %c0_96] : memref<8x3x128xf32, #tpu.memory_space<vmem>>, vector<1x3x128xf32>
    %227 = vector.shape_cast %226 : vector<1x3x128xf32> to vector<3x128xf32>
    %228 = vector.extract_strided_slice %225 {offsets = [0, 0], sizes = [104, 1], strides = [1, 1]} : vector<104x3xf32> to vector<104x1xf32>
    %229 = vector.extract_strided_slice %227 {offsets = [0, 0], sizes = [1, 128], strides = [1, 1]} : vector<3x128xf32> to vector<1x128xf32>
    %230 = vector.broadcast %228 : vector<104x1xf32> to vector<104x128xf32>
    %231 = vector.broadcast %229 : vector<1x128xf32> to vector<104x128xf32>
    %232 = arith.subf %230, %231 : vector<104x128xf32>
    %233 = arith.mulf %232, %232 : vector<104x128xf32>
    %234 = vector.extract_strided_slice %225 {offsets = [0, 1], sizes = [104, 1], strides = [1, 1]} : vector<104x3xf32> to vector<104x1xf32>
    %235 = vector.extract_strided_slice %227 {offsets = [1, 0], sizes = [1, 128], strides = [1, 1]} : vector<3x128xf32> to vector<1x128xf32>
    %236 = vector.broadcast %234 : vector<104x1xf32> to vector<104x128xf32>
    %237 = vector.broadcast %235 : vector<1x128xf32> to vector<104x128xf32>
    %238 = arith.subf %236, %237 : vector<104x128xf32>
    %239 = arith.mulf %238, %238 : vector<104x128xf32>
    %240 = arith.addf %233, %239 : vector<104x128xf32>
    %241 = vector.extract_strided_slice %225 {offsets = [0, 2], sizes = [104, 1], strides = [1, 1]} : vector<104x3xf32> to vector<104x1xf32>
    %242 = vector.extract_strided_slice %227 {offsets = [2, 0], sizes = [1, 128], strides = [1, 1]} : vector<3x128xf32> to vector<1x128xf32>
    %243 = vector.broadcast %241 : vector<104x1xf32> to vector<104x128xf32>
    %244 = vector.broadcast %242 : vector<1x128xf32> to vector<104x128xf32>
    %245 = arith.subf %243, %244 : vector<104x128xf32>
    %246 = arith.mulf %245, %245 : vector<104x128xf32>
    %247 = arith.addf %240, %246 : vector<104x128xf32>
    %cst_97 = arith.constant 0x7F800000 : f32
    %248 = vector.shape_cast %8 : vector<1x128xi1> to vector<1x128xi1>
    %249 = vector.broadcast %248 : vector<1x128xi1> to vector<104x128xi1>
    %250 = vector.broadcast %cst_97 : f32 to vector<104x128xf32>
    %251 = arith.select %249, %247, %250 : vector<104x128xi1>, vector<104x128xf32>
    %cst_98 = arith.constant dense<0x7F800000> : vector<104xf32>
    %252 = vector.multi_reduction <minimumf>, %251, %cst_98 [1] : vector<104x128xf32> to vector<104xf32>
    %253 = vector.shape_cast %252 : vector<104xf32> to vector<104x1xf32>
    %c4_99 = arith.constant 4 : index
    %c0_100 = arith.constant 0 : index
    %c0_101 = arith.constant 0 : index
    %254 = vector.load %arg5[%c4_99, %c0_100, %c0_101] : memref<8x104x1xf32, #tpu.memory_space<vmem>>, vector<1x104x1xf32>
    %255 = vector.shape_cast %254 : vector<1x104x1xf32> to vector<104x1xf32>
    %256 = arith.minimumf %255, %253 : vector<104x1xf32>
    %c4_102 = arith.constant 4 : index
    %c0_103 = arith.constant 0 : index
    %c0_104 = arith.constant 0 : index
    %257 = vector.load %arg5[%c4_102, %c0_103, %c0_104] : memref<8x104x1xf32, #tpu.memory_space<vmem>>, vector<1x104x1xf32>
    %258 = vector.shape_cast %257 : vector<1x104x1xf32> to vector<104x1xf32>
    %259 = vector.shape_cast %256 : vector<104x1xf32> to vector<1x104x1xf32>
    tpu.vector_store %arg5[%c4_102, %c0_103, %c0_104], %259 {strides = array<i32>} : memref<8x104x1xf32, #tpu.memory_space<vmem>>, vector<1x104x1xf32>,
    %cst_105 = arith.constant 0x7F800000 : f32
    %260 = vector.shape_cast %11 : vector<104x1xi1> to vector<104x1xi1>
    %261 = vector.broadcast %260 : vector<104x1xi1> to vector<104x128xi1>
    %262 = vector.broadcast %cst_105 : f32 to vector<104x128xf32>
    %263 = arith.select %261, %247, %262 : vector<104x128xi1>, vector<104x128xf32>
    %cst_106 = arith.constant dense<0x7F800000> : vector<128xf32>
    %264 = vector.multi_reduction <minimumf>, %263, %cst_106 [0] : vector<104x128xf32> to vector<128xf32>
    %265 = vector.shape_cast %264 : vector<128xf32> to vector<1x128xf32>
    %266 = math.sqrt %265 : vector<1x128xf32>
    %cst_107 = arith.constant 0.000000e+00 : f32
    %267 = vector.broadcast %cst_107 : f32 to vector<1x128xf32>
    %268 = arith.select %8, %266, %267 : vector<1x128xi1>, vector<1x128xf32>
    %c4_108 = arith.constant 4 : index
    %c0_109 = arith.constant 0 : index
    %c0_110 = arith.constant 0 : index
    %269 = vector.load %arg6[%c4_108, %c0_109, %c0_110] : memref<8x1x1xf32, #tpu.memory_space<vmem>>, vector<1x1x1xf32>
    %270 = vector.shape_cast %269 : vector<1x1x1xf32> to vector<1x1xf32>
    %cst_111 = arith.constant dense<0.000000e+00> : vector<1xf32>
    %271 = vector.multi_reduction <add>, %268, %cst_111 [1] : vector<1x128xf32> to vector<1xf32>
    %272 = vector.shape_cast %271 : vector<1xf32> to vector<1x1xf32>
    %273 = arith.addf %270, %272 : vector<1x1xf32>
    %c4_112 = arith.constant 4 : index
    %c0_113 = arith.constant 0 : index
    %c0_114 = arith.constant 0 : index
    %274 = vector.load %arg6[%c4_112, %c0_113, %c0_114] : memref<8x1x1xf32, #tpu.memory_space<vmem>>, vector<1x1x1xf32>
    %275 = vector.shape_cast %274 : vector<1x1x1xf32> to vector<1x1xf32>
    %276 = vector.shape_cast %273 : vector<1x1xf32> to vector<1x1x1xf32>
    tpu.vector_store %arg6[%c4_112, %c0_113, %c0_114], %276 {strides = array<i32>} : memref<8x1x1xf32, #tpu.memory_space<vmem>>, vector<1x1x1xf32>,
    %c5 = arith.constant 5 : index
    %c0_115 = arith.constant 0 : index
    %c0_116 = arith.constant 0 : index
    %277 = vector.load %arg2[%c5, %c0_115, %c0_116] : memref<8x104x3xf32, #tpu.memory_space<vmem>>, vector<1x104x3xf32>
    %278 = vector.shape_cast %277 : vector<1x104x3xf32> to vector<104x3xf32>
    %c5_117 = arith.constant 5 : index
    %c0_118 = arith.constant 0 : index
    %c0_119 = arith.constant 0 : index
    %279 = vector.load %arg3[%c5_117, %c0_118, %c0_119] : memref<8x3x128xf32, #tpu.memory_space<vmem>>, vector<1x3x128xf32>
    %280 = vector.shape_cast %279 : vector<1x3x128xf32> to vector<3x128xf32>
    %281 = vector.extract_strided_slice %278 {offsets = [0, 0], sizes = [104, 1], strides = [1, 1]} : vector<104x3xf32> to vector<104x1xf32>
    %282 = vector.extract_strided_slice %280 {offsets = [0, 0], sizes = [1, 128], strides = [1, 1]} : vector<3x128xf32> to vector<1x128xf32>
    %283 = vector.broadcast %281 : vector<104x1xf32> to vector<104x128xf32>
    %284 = vector.broadcast %282 : vector<1x128xf32> to vector<104x128xf32>
    %285 = arith.subf %283, %284 : vector<104x128xf32>
    %286 = arith.mulf %285, %285 : vector<104x128xf32>
    %287 = vector.extract_strided_slice %278 {offsets = [0, 1], sizes = [104, 1], strides = [1, 1]} : vector<104x3xf32> to vector<104x1xf32>
    %288 = vector.extract_strided_slice %280 {offsets = [1, 0], sizes = [1, 128], strides = [1, 1]} : vector<3x128xf32> to vector<1x128xf32>
    %289 = vector.broadcast %287 : vector<104x1xf32> to vector<104x128xf32>
    %290 = vector.broadcast %288 : vector<1x128xf32> to vector<104x128xf32>
    %291 = arith.subf %289, %290 : vector<104x128xf32>
    %292 = arith.mulf %291, %291 : vector<104x128xf32>
    %293 = arith.addf %286, %292 : vector<104x128xf32>
    %294 = vector.extract_strided_slice %278 {offsets = [0, 2], sizes = [104, 1], strides = [1, 1]} : vector<104x3xf32> to vector<104x1xf32>
    %295 = vector.extract_strided_slice %280 {offsets = [2, 0], sizes = [1, 128], strides = [1, 1]} : vector<3x128xf32> to vector<1x128xf32>
    %296 = vector.broadcast %294 : vector<104x1xf32> to vector<104x128xf32>
    %297 = vector.broadcast %295 : vector<1x128xf32> to vector<104x128xf32>
    %298 = arith.subf %296, %297 : vector<104x128xf32>
    %299 = arith.mulf %298, %298 : vector<104x128xf32>
    %300 = arith.addf %293, %299 : vector<104x128xf32>
    %cst_120 = arith.constant 0x7F800000 : f32
    %301 = vector.shape_cast %8 : vector<1x128xi1> to vector<1x128xi1>
    %302 = vector.broadcast %301 : vector<1x128xi1> to vector<104x128xi1>
    %303 = vector.broadcast %cst_120 : f32 to vector<104x128xf32>
    %304 = arith.select %302, %300, %303 : vector<104x128xi1>, vector<104x128xf32>
    %cst_121 = arith.constant dense<0x7F800000> : vector<104xf32>
    %305 = vector.multi_reduction <minimumf>, %304, %cst_121 [1] : vector<104x128xf32> to vector<104xf32>
    %306 = vector.shape_cast %305 : vector<104xf32> to vector<104x1xf32>
    %c5_122 = arith.constant 5 : index
    %c0_123 = arith.constant 0 : index
    %c0_124 = arith.constant 0 : index
    %307 = vector.load %arg5[%c5_122, %c0_123, %c0_124] : memref<8x104x1xf32, #tpu.memory_space<vmem>>, vector<1x104x1xf32>
    %308 = vector.shape_cast %307 : vector<1x104x1xf32> to vector<104x1xf32>
    %309 = arith.minimumf %308, %306 : vector<104x1xf32>
    %c5_125 = arith.constant 5 : index
    %c0_126 = arith.constant 0 : index
    %c0_127 = arith.constant 0 : index
    %310 = vector.load %arg5[%c5_125, %c0_126, %c0_127] : memref<8x104x1xf32, #tpu.memory_space<vmem>>, vector<1x104x1xf32>
    %311 = vector.shape_cast %310 : vector<1x104x1xf32> to vector<104x1xf32>
    %312 = vector.shape_cast %309 : vector<104x1xf32> to vector<1x104x1xf32>
    tpu.vector_store %arg5[%c5_125, %c0_126, %c0_127], %312 {strides = array<i32>} : memref<8x104x1xf32, #tpu.memory_space<vmem>>, vector<1x104x1xf32>,
    %cst_128 = arith.constant 0x7F800000 : f32
    %313 = vector.shape_cast %11 : vector<104x1xi1> to vector<104x1xi1>
    %314 = vector.broadcast %313 : vector<104x1xi1> to vector<104x128xi1>
    %315 = vector.broadcast %cst_128 : f32 to vector<104x128xf32>
    %316 = arith.select %314, %300, %315 : vector<104x128xi1>, vector<104x128xf32>
    %cst_129 = arith.constant dense<0x7F800000> : vector<128xf32>
    %317 = vector.multi_reduction <minimumf>, %316, %cst_129 [0] : vector<104x128xf32> to vector<128xf32>
    %318 = vector.shape_cast %317 : vector<128xf32> to vector<1x128xf32>
    %319 = math.sqrt %318 : vector<1x128xf32>
    %cst_130 = arith.constant 0.000000e+00 : f32
    %320 = vector.broadcast %cst_130 : f32 to vector<1x128xf32>
    %321 = arith.select %8, %319, %320 : vector<1x128xi1>, vector<1x128xf32>
    %c5_131 = arith.constant 5 : index
    %c0_132 = arith.constant 0 : index
    %c0_133 = arith.constant 0 : index
    %322 = vector.load %arg6[%c5_131, %c0_132, %c0_133] : memref<8x1x1xf32, #tpu.memory_space<vmem>>, vector<1x1x1xf32>
    %323 = vector.shape_cast %322 : vector<1x1x1xf32> to vector<1x1xf32>
    %cst_134 = arith.constant dense<0.000000e+00> : vector<1xf32>
    %324 = vector.multi_reduction <add>, %321, %cst_134 [1] : vector<1x128xf32> to vector<1xf32>
    %325 = vector.shape_cast %324 : vector<1xf32> to vector<1x1xf32>
    %326 = arith.addf %323, %325 : vector<1x1xf32>
    %c5_135 = arith.constant 5 : index
    %c0_136 = arith.constant 0 : index
    %c0_137 = arith.constant 0 : index
    %327 = vector.load %arg6[%c5_135, %c0_136, %c0_137] : memref<8x1x1xf32, #tpu.memory_space<vmem>>, vector<1x1x1xf32>
    %328 = vector.shape_cast %327 : vector<1x1x1xf32> to vector<1x1xf32>
    %329 = vector.shape_cast %326 : vector<1x1xf32> to vector<1x1x1xf32>
    tpu.vector_store %arg6[%c5_135, %c0_136, %c0_137], %329 {strides = array<i32>} : memref<8x1x1xf32, #tpu.memory_space<vmem>>, vector<1x1x1xf32>,
    %c6 = arith.constant 6 : index
    %c0_138 = arith.constant 0 : index
    %c0_139 = arith.constant 0 : index
    %330 = vector.load %arg2[%c6, %c0_138, %c0_139] : memref<8x104x3xf32, #tpu.memory_space<vmem>>, vector<1x104x3xf32>
    %331 = vector.shape_cast %330 : vector<1x104x3xf32> to vector<104x3xf32>
    %c6_140 = arith.constant 6 : index
    %c0_141 = arith.constant 0 : index
    %c0_142 = arith.constant 0 : index
    %332 = vector.load %arg3[%c6_140, %c0_141, %c0_142] : memref<8x3x128xf32, #tpu.memory_space<vmem>>, vector<1x3x128xf32>
    %333 = vector.shape_cast %332 : vector<1x3x128xf32> to vector<3x128xf32>
    %334 = vector.extract_strided_slice %331 {offsets = [0, 0], sizes = [104, 1], strides = [1, 1]} : vector<104x3xf32> to vector<104x1xf32>
    %335 = vector.extract_strided_slice %333 {offsets = [0, 0], sizes = [1, 128], strides = [1, 1]} : vector<3x128xf32> to vector<1x128xf32>
    %336 = vector.broadcast %334 : vector<104x1xf32> to vector<104x128xf32>
    %337 = vector.broadcast %335 : vector<1x128xf32> to vector<104x128xf32>
    %338 = arith.subf %336, %337 : vector<104x128xf32>
    %339 = arith.mulf %338, %338 : vector<104x128xf32>
    %340 = vector.extract_strided_slice %331 {offsets = [0, 1], sizes = [104, 1], strides = [1, 1]} : vector<104x3xf32> to vector<104x1xf32>
    %341 = vector.extract_strided_slice %333 {offsets = [1, 0], sizes = [1, 128], strides = [1, 1]} : vector<3x128xf32> to vector<1x128xf32>
    %342 = vector.broadcast %340 : vector<104x1xf32> to vector<104x128xf32>
    %343 = vector.broadcast %341 : vector<1x128xf32> to vector<104x128xf32>
    %344 = arith.subf %342, %343 : vector<104x128xf32>
    %345 = arith.mulf %344, %344 : vector<104x128xf32>
    %346 = arith.addf %339, %345 : vector<104x128xf32>
    %347 = vector.extract_strided_slice %331 {offsets = [0, 2], sizes = [104, 1], strides = [1, 1]} : vector<104x3xf32> to vector<104x1xf32>
    %348 = vector.extract_strided_slice %333 {offsets = [2, 0], sizes = [1, 128], strides = [1, 1]} : vector<3x128xf32> to vector<1x128xf32>
    %349 = vector.broadcast %347 : vector<104x1xf32> to vector<104x128xf32>
    %350 = vector.broadcast %348 : vector<1x128xf32> to vector<104x128xf32>
    %351 = arith.subf %349, %350 : vector<104x128xf32>
    %352 = arith.mulf %351, %351 : vector<104x128xf32>
    %353 = arith.addf %346, %352 : vector<104x128xf32>
    %cst_143 = arith.constant 0x7F800000 : f32
    %354 = vector.shape_cast %8 : vector<1x128xi1> to vector<1x128xi1>
    %355 = vector.broadcast %354 : vector<1x128xi1> to vector<104x128xi1>
    %356 = vector.broadcast %cst_143 : f32 to vector<104x128xf32>
    %357 = arith.select %355, %353, %356 : vector<104x128xi1>, vector<104x128xf32>
    %cst_144 = arith.constant dense<0x7F800000> : vector<104xf32>
    %358 = vector.multi_reduction <minimumf>, %357, %cst_144 [1] : vector<104x128xf32> to vector<104xf32>
    %359 = vector.shape_cast %358 : vector<104xf32> to vector<104x1xf32>
    %c6_145 = arith.constant 6 : index
    %c0_146 = arith.constant 0 : index
    %c0_147 = arith.constant 0 : index
    %360 = vector.load %arg5[%c6_145, %c0_146, %c0_147] : memref<8x104x1xf32, #tpu.memory_space<vmem>>, vector<1x104x1xf32>
    %361 = vector.shape_cast %360 : vector<1x104x1xf32> to vector<104x1xf32>
    %362 = arith.minimumf %361, %359 : vector<104x1xf32>
    %c6_148 = arith.constant 6 : index
    %c0_149 = arith.constant 0 : index
    %c0_150 = arith.constant 0 : index
    %363 = vector.load %arg5[%c6_148, %c0_149, %c0_150] : memref<8x104x1xf32, #tpu.memory_space<vmem>>, vector<1x104x1xf32>
    %364 = vector.shape_cast %363 : vector<1x104x1xf32> to vector<104x1xf32>
    %365 = vector.shape_cast %362 : vector<104x1xf32> to vector<1x104x1xf32>
    tpu.vector_store %arg5[%c6_148, %c0_149, %c0_150], %365 {strides = array<i32>} : memref<8x104x1xf32, #tpu.memory_space<vmem>>, vector<1x104x1xf32>,
    %cst_151 = arith.constant 0x7F800000 : f32
    %366 = vector.shape_cast %11 : vector<104x1xi1> to vector<104x1xi1>
    %367 = vector.broadcast %366 : vector<104x1xi1> to vector<104x128xi1>
    %368 = vector.broadcast %cst_151 : f32 to vector<104x128xf32>
    %369 = arith.select %367, %353, %368 : vector<104x128xi1>, vector<104x128xf32>
    %cst_152 = arith.constant dense<0x7F800000> : vector<128xf32>
    %370 = vector.multi_reduction <minimumf>, %369, %cst_152 [0] : vector<104x128xf32> to vector<128xf32>
    %371 = vector.shape_cast %370 : vector<128xf32> to vector<1x128xf32>
    %372 = math.sqrt %371 : vector<1x128xf32>
    %cst_153 = arith.constant 0.000000e+00 : f32
    %373 = vector.broadcast %cst_153 : f32 to vector<1x128xf32>
    %374 = arith.select %8, %372, %373 : vector<1x128xi1>, vector<1x128xf32>
    %c6_154 = arith.constant 6 : index
    %c0_155 = arith.constant 0 : index
    %c0_156 = arith.constant 0 : index
    %375 = vector.load %arg6[%c6_154, %c0_155, %c0_156] : memref<8x1x1xf32, #tpu.memory_space<vmem>>, vector<1x1x1xf32>
    %376 = vector.shape_cast %375 : vector<1x1x1xf32> to vector<1x1xf32>
    %cst_157 = arith.constant dense<0.000000e+00> : vector<1xf32>
    %377 = vector.multi_reduction <add>, %374, %cst_157 [1] : vector<1x128xf32> to vector<1xf32>
    %378 = vector.shape_cast %377 : vector<1xf32> to vector<1x1xf32>
    %379 = arith.addf %376, %378 : vector<1x1xf32>
    %c6_158 = arith.constant 6 : index
    %c0_159 = arith.constant 0 : index
    %c0_160 = arith.constant 0 : index
    %380 = vector.load %arg6[%c6_158, %c0_159, %c0_160] : memref<8x1x1xf32, #tpu.memory_space<vmem>>, vector<1x1x1xf32>
    %381 = vector.shape_cast %380 : vector<1x1x1xf32> to vector<1x1xf32>
    %382 = vector.shape_cast %379 : vector<1x1xf32> to vector<1x1x1xf32>
    tpu.vector_store %arg6[%c6_158, %c0_159, %c0_160], %382 {strides = array<i32>} : memref<8x1x1xf32, #tpu.memory_space<vmem>>, vector<1x1x1xf32>,
    %c7 = arith.constant 7 : index
    %c0_161 = arith.constant 0 : index
    %c0_162 = arith.constant 0 : index
    %383 = vector.load %arg2[%c7, %c0_161, %c0_162] : memref<8x104x3xf32, #tpu.memory_space<vmem>>, vector<1x104x3xf32>
    %384 = vector.shape_cast %383 : vector<1x104x3xf32> to vector<104x3xf32>
    %c7_163 = arith.constant 7 : index
    %c0_164 = arith.constant 0 : index
    %c0_165 = arith.constant 0 : index
    %385 = vector.load %arg3[%c7_163, %c0_164, %c0_165] : memref<8x3x128xf32, #tpu.memory_space<vmem>>, vector<1x3x128xf32>
    %386 = vector.shape_cast %385 : vector<1x3x128xf32> to vector<3x128xf32>
    %387 = vector.extract_strided_slice %384 {offsets = [0, 0], sizes = [104, 1], strides = [1, 1]} : vector<104x3xf32> to vector<104x1xf32>
    %388 = vector.extract_strided_slice %386 {offsets = [0, 0], sizes = [1, 128], strides = [1, 1]} : vector<3x128xf32> to vector<1x128xf32>
    %389 = vector.broadcast %387 : vector<104x1xf32> to vector<104x128xf32>
    %390 = vector.broadcast %388 : vector<1x128xf32> to vector<104x128xf32>
    %391 = arith.subf %389, %390 : vector<104x128xf32>
    %392 = arith.mulf %391, %391 : vector<104x128xf32>
    %393 = vector.extract_strided_slice %384 {offsets = [0, 1], sizes = [104, 1], strides = [1, 1]} : vector<104x3xf32> to vector<104x1xf32>
    %394 = vector.extract_strided_slice %386 {offsets = [1, 0], sizes = [1, 128], strides = [1, 1]} : vector<3x128xf32> to vector<1x128xf32>
    %395 = vector.broadcast %393 : vector<104x1xf32> to vector<104x128xf32>
    %396 = vector.broadcast %394 : vector<1x128xf32> to vector<104x128xf32>
    %397 = arith.subf %395, %396 : vector<104x128xf32>
    %398 = arith.mulf %397, %397 : vector<104x128xf32>
    %399 = arith.addf %392, %398 : vector<104x128xf32>
    %400 = vector.extract_strided_slice %384 {offsets = [0, 2], sizes = [104, 1], strides = [1, 1]} : vector<104x3xf32> to vector<104x1xf32>
    %401 = vector.extract_strided_slice %386 {offsets = [2, 0], sizes = [1, 128], strides = [1, 1]} : vector<3x128xf32> to vector<1x128xf32>
    %402 = vector.broadcast %400 : vector<104x1xf32> to vector<104x128xf32>
    %403 = vector.broadcast %401 : vector<1x128xf32> to vector<104x128xf32>
    %404 = arith.subf %402, %403 : vector<104x128xf32>
    %405 = arith.mulf %404, %404 : vector<104x128xf32>
    %406 = arith.addf %399, %405 : vector<104x128xf32>
    %cst_166 = arith.constant 0x7F800000 : f32
    %407 = vector.shape_cast %8 : vector<1x128xi1> to vector<1x128xi1>
    %408 = vector.broadcast %407 : vector<1x128xi1> to vector<104x128xi1>
    %409 = vector.broadcast %cst_166 : f32 to vector<104x128xf32>
    %410 = arith.select %408, %406, %409 : vector<104x128xi1>, vector<104x128xf32>
    %cst_167 = arith.constant dense<0x7F800000> : vector<104xf32>
    %411 = vector.multi_reduction <minimumf>, %410, %cst_167 [1] : vector<104x128xf32> to vector<104xf32>
    %412 = vector.shape_cast %411 : vector<104xf32> to vector<104x1xf32>
    %c7_168 = arith.constant 7 : index
    %c0_169 = arith.constant 0 : index
    %c0_170 = arith.constant 0 : index
    %413 = vector.load %arg5[%c7_168, %c0_169, %c0_170] : memref<8x104x1xf32, #tpu.memory_space<vmem>>, vector<1x104x1xf32>
    %414 = vector.shape_cast %413 : vector<1x104x1xf32> to vector<104x1xf32>
    %415 = arith.minimumf %414, %412 : vector<104x1xf32>
    %c7_171 = arith.constant 7 : index
    %c0_172 = arith.constant 0 : index
    %c0_173 = arith.constant 0 : index
    %416 = vector.load %arg5[%c7_171, %c0_172, %c0_173] : memref<8x104x1xf32, #tpu.memory_space<vmem>>, vector<1x104x1xf32>
    %417 = vector.shape_cast %416 : vector<1x104x1xf32> to vector<104x1xf32>
    %418 = vector.shape_cast %415 : vector<104x1xf32> to vector<1x104x1xf32>
    tpu.vector_store %arg5[%c7_171, %c0_172, %c0_173], %418 {strides = array<i32>} : memref<8x104x1xf32, #tpu.memory_space<vmem>>, vector<1x104x1xf32>,
    %cst_174 = arith.constant 0x7F800000 : f32
    %419 = vector.shape_cast %11 : vector<104x1xi1> to vector<104x1xi1>
    %420 = vector.broadcast %419 : vector<104x1xi1> to vector<104x128xi1>
    %421 = vector.broadcast %cst_174 : f32 to vector<104x128xf32>
    %422 = arith.select %420, %406, %421 : vector<104x128xi1>, vector<104x128xf32>
    %cst_175 = arith.constant dense<0x7F800000> : vector<128xf32>
    %423 = vector.multi_reduction <minimumf>, %422, %cst_175 [0] : vector<104x128xf32> to vector<128xf32>
    %424 = vector.shape_cast %423 : vector<128xf32> to vector<1x128xf32>
    %425 = math.sqrt %424 : vector<1x128xf32>
    %cst_176 = arith.constant 0.000000e+00 : f32
    %426 = vector.broadcast %cst_176 : f32 to vector<1x128xf32>
    %427 = arith.select %8, %425, %426 : vector<1x128xi1>, vector<1x128xf32>
    %c7_177 = arith.constant 7 : index
    %c0_178 = arith.constant 0 : index
    %c0_179 = arith.constant 0 : index
    %428 = vector.load %arg6[%c7_177, %c0_178, %c0_179] : memref<8x1x1xf32, #tpu.memory_space<vmem>>, vector<1x1x1xf32>
    %429 = vector.shape_cast %428 : vector<1x1x1xf32> to vector<1x1xf32>
    %cst_180 = arith.constant dense<0.000000e+00> : vector<1xf32>
    %430 = vector.multi_reduction <add>, %427, %cst_180 [1] : vector<1x128xf32> to vector<1xf32>
    %431 = vector.shape_cast %430 : vector<1xf32> to vector<1x1xf32>
    %432 = arith.addf %429, %431 : vector<1x1xf32>
    %c7_181 = arith.constant 7 : index
    %c0_182 = arith.constant 0 : index
    %c0_183 = arith.constant 0 : index
    %433 = vector.load %arg6[%c7_181, %c0_182, %c0_183] : memref<8x1x1xf32, #tpu.memory_space<vmem>>, vector<1x1x1xf32>
    %434 = vector.shape_cast %433 : vector<1x1x1xf32> to vector<1x1xf32>
    %435 = vector.shape_cast %432 : vector<1x1xf32> to vector<1x1x1xf32>
    tpu.vector_store %arg6[%c7_181, %c0_182, %c0_183], %435 {strides = array<i32>} : memref<8x1x1xf32, #tpu.memory_space<vmem>>, vector<1x1x1xf32>,
    %c1_i32 = arith.constant 1 : i32
    %436 = arith.cmpi eq, %arg1, %c1_i32 : i32
    %437 = arith.extui %436 : i1 to i32
    %c0_i32_184 = arith.constant 0 : i32
    %438 = arith.cmpi ne, %437, %c0_i32_184 : i32
    scf.if %438 {
      %c0_185 = arith.constant 0 : index
      %c0_186 = arith.constant 0 : index
      %c0_187 = arith.constant 0 : index
      %439 = vector.load %arg5[%c0_185, %c0_186, %c0_187] : memref<8x104x1xf32, #tpu.memory_space<vmem>>, vector<1x104x1xf32>
      %440 = vector.shape_cast %439 : vector<1x104x1xf32> to vector<104x1xf32>
      %441 = math.sqrt %440 : vector<104x1xf32>
      %cst_188 = arith.constant 0.000000e+00 : f32
      %442 = vector.broadcast %cst_188 : f32 to vector<104x1xf32>
      %443 = arith.select %11, %441, %442 : vector<104x1xi1>, vector<104x1xf32>
      %cst_189 = arith.constant dense<0.000000e+00> : vector<1xf32>
      %444 = vector.multi_reduction <add>, %443, %cst_189 [0] : vector<104x1xf32> to vector<1xf32>
      %445 = vector.shape_cast %444 : vector<1xf32> to vector<1x1xf32>
      %cst_190 = arith.constant 0.00999999977 : f32
      %446 = vector.broadcast %cst_190 : f32 to vector<1x1xf32>
      %447 = arith.mulf %445, %446 : vector<1x1xf32>
      %c0_191 = arith.constant 0 : index
      %c0_192 = arith.constant 0 : index
      %c0_193 = arith.constant 0 : index
      %448 = vector.load %arg6[%c0_191, %c0_192, %c0_193] : memref<8x1x1xf32, #tpu.memory_space<vmem>>, vector<1x1x1xf32>
      %449 = vector.shape_cast %448 : vector<1x1x1xf32> to vector<1x1xf32>
      %cst_194 = arith.constant 5.000000e-03 : f32
      %450 = vector.broadcast %cst_194 : f32 to vector<1x1xf32>
      %451 = arith.mulf %449, %450 : vector<1x1xf32>
      %452 = arith.addf %447, %451 : vector<1x1xf32>
      %cst_195 = arith.constant 5.000000e-01 : f32
      %453 = vector.broadcast %cst_195 : f32 to vector<1x1xf32>
      %454 = arith.mulf %453, %452 : vector<1x1xf32>
      %455 = vector.shape_cast %454 : vector<1x1xf32> to vector<1x1xf32>
      %456 = vector.broadcast %455 : vector<1x1xf32> to vector<1x128xf32>
      %c0_196 = arith.constant 0 : index
      %c0_197 = arith.constant 0 : index
      %457 = vector.load %arg4[%c0_196, %c0_197] : memref<8x128xf32, #tpu.memory_space<vmem>>, vector<1x128xf32>
      tpu.vector_store %arg4[%c0_196, %c0_197], %456 {strides = array<i32>} : memref<8x128xf32, #tpu.memory_space<vmem>>, vector<1x128xf32>,
      %c1_198 = arith.constant 1 : index
      %c0_199 = arith.constant 0 : index
      %c0_200 = arith.constant 0 : index
      %458 = vector.load %arg5[%c1_198, %c0_199, %c0_200] : memref<8x104x1xf32, #tpu.memory_space<vmem>>, vector<1x104x1xf32>
      %459 = vector.shape_cast %458 : vector<1x104x1xf32> to vector<104x1xf32>
      %460 = math.sqrt %459 : vector<104x1xf32>
      %cst_201 = arith.constant 0.000000e+00 : f32
      %461 = vector.broadcast %cst_201 : f32 to vector<104x1xf32>
      %462 = arith.select %11, %460, %461 : vector<104x1xi1>, vector<104x1xf32>
      %cst_202 = arith.constant dense<0.000000e+00> : vector<1xf32>
      %463 = vector.multi_reduction <add>, %462, %cst_202 [0] : vector<104x1xf32> to vector<1xf32>
      %464 = vector.shape_cast %463 : vector<1xf32> to vector<1x1xf32>
      %cst_203 = arith.constant 0.00999999977 : f32
      %465 = vector.broadcast %cst_203 : f32 to vector<1x1xf32>
      %466 = arith.mulf %464, %465 : vector<1x1xf32>
      %c1_204 = arith.constant 1 : index
      %c0_205 = arith.constant 0 : index
      %c0_206 = arith.constant 0 : index
      %467 = vector.load %arg6[%c1_204, %c0_205, %c0_206] : memref<8x1x1xf32, #tpu.memory_space<vmem>>, vector<1x1x1xf32>
      %468 = vector.shape_cast %467 : vector<1x1x1xf32> to vector<1x1xf32>
      %cst_207 = arith.constant 5.000000e-03 : f32
      %469 = vector.broadcast %cst_207 : f32 to vector<1x1xf32>
      %470 = arith.mulf %468, %469 : vector<1x1xf32>
      %471 = arith.addf %466, %470 : vector<1x1xf32>
      %cst_208 = arith.constant 5.000000e-01 : f32
      %472 = vector.broadcast %cst_208 : f32 to vector<1x1xf32>
      %473 = arith.mulf %472, %471 : vector<1x1xf32>
      %474 = vector.shape_cast %473 : vector<1x1xf32> to vector<1x1xf32>
      %475 = vector.broadcast %474 : vector<1x1xf32> to vector<1x128xf32>
      %c1_209 = arith.constant 1 : index
      %c0_210 = arith.constant 0 : index
      %476 = vector.load %arg4[%c1_209, %c0_210] : memref<8x128xf32, #tpu.memory_space<vmem>>, vector<1x128xf32>
      tpu.vector_store %arg4[%c1_209, %c0_210], %475 {strides = array<i32>} : memref<8x128xf32, #tpu.memory_space<vmem>>, vector<1x128xf32>,
      %c2_211 = arith.constant 2 : index
      %c0_212 = arith.constant 0 : index
      %c0_213 = arith.constant 0 : index
      %477 = vector.load %arg5[%c2_211, %c0_212, %c0_213] : memref<8x104x1xf32, #tpu.memory_space<vmem>>, vector<1x104x1xf32>
      %478 = vector.shape_cast %477 : vector<1x104x1xf32> to vector<104x1xf32>
      %479 = math.sqrt %478 : vector<104x1xf32>
      %cst_214 = arith.constant 0.000000e+00 : f32
      %480 = vector.broadcast %cst_214 : f32 to vector<104x1xf32>
      %481 = arith.select %11, %479, %480 : vector<104x1xi1>, vector<104x1xf32>
      %cst_215 = arith.constant dense<0.000000e+00> : vector<1xf32>
      %482 = vector.multi_reduction <add>, %481, %cst_215 [0] : vector<104x1xf32> to vector<1xf32>
      %483 = vector.shape_cast %482 : vector<1xf32> to vector<1x1xf32>
      %cst_216 = arith.constant 0.00999999977 : f32
      %484 = vector.broadcast %cst_216 : f32 to vector<1x1xf32>
      %485 = arith.mulf %483, %484 : vector<1x1xf32>
      %c2_217 = arith.constant 2 : index
      %c0_218 = arith.constant 0 : index
      %c0_219 = arith.constant 0 : index
      %486 = vector.load %arg6[%c2_217, %c0_218, %c0_219] : memref<8x1x1xf32, #tpu.memory_space<vmem>>, vector<1x1x1xf32>
      %487 = vector.shape_cast %486 : vector<1x1x1xf32> to vector<1x1xf32>
      %cst_220 = arith.constant 5.000000e-03 : f32
      %488 = vector.broadcast %cst_220 : f32 to vector<1x1xf32>
      %489 = arith.mulf %487, %488 : vector<1x1xf32>
      %490 = arith.addf %485, %489 : vector<1x1xf32>
      %cst_221 = arith.constant 5.000000e-01 : f32
      %491 = vector.broadcast %cst_221 : f32 to vector<1x1xf32>
      %492 = arith.mulf %491, %490 : vector<1x1xf32>
      %493 = vector.shape_cast %492 : vector<1x1xf32> to vector<1x1xf32>
      %494 = vector.broadcast %493 : vector<1x1xf32> to vector<1x128xf32>
      %c2_222 = arith.constant 2 : index
      %c0_223 = arith.constant 0 : index
      %495 = vector.load %arg4[%c2_222, %c0_223] : memref<8x128xf32, #tpu.memory_space<vmem>>, vector<1x128xf32>
      tpu.vector_store %arg4[%c2_222, %c0_223], %494 {strides = array<i32>} : memref<8x128xf32, #tpu.memory_space<vmem>>, vector<1x128xf32>,
      %c3_224 = arith.constant 3 : index
      %c0_225 = arith.constant 0 : index
      %c0_226 = arith.constant 0 : index
      %496 = vector.load %arg5[%c3_224, %c0_225, %c0_226] : memref<8x104x1xf32, #tpu.memory_space<vmem>>, vector<1x104x1xf32>
      %497 = vector.shape_cast %496 : vector<1x104x1xf32> to vector<104x1xf32>
      %498 = math.sqrt %497 : vector<104x1xf32>
      %cst_227 = arith.constant 0.000000e+00 : f32
      %499 = vector.broadcast %cst_227 : f32 to vector<104x1xf32>
      %500 = arith.select %11, %498, %499 : vector<104x1xi1>, vector<104x1xf32>
      %cst_228 = arith.constant dense<0.000000e+00> : vector<1xf32>
      %501 = vector.multi_reduction <add>, %500, %cst_228 [0] : vector<104x1xf32> to vector<1xf32>
      %502 = vector.shape_cast %501 : vector<1xf32> to vector<1x1xf32>
      %cst_229 = arith.constant 0.00999999977 : f32
      %503 = vector.broadcast %cst_229 : f32 to vector<1x1xf32>
      %504 = arith.mulf %502, %503 : vector<1x1xf32>
      %c3_230 = arith.constant 3 : index
      %c0_231 = arith.constant 0 : index
      %c0_232 = arith.constant 0 : index
      %505 = vector.load %arg6[%c3_230, %c0_231, %c0_232] : memref<8x1x1xf32, #tpu.memory_space<vmem>>, vector<1x1x1xf32>
      %506 = vector.shape_cast %505 : vector<1x1x1xf32> to vector<1x1xf32>
      %cst_233 = arith.constant 5.000000e-03 : f32
      %507 = vector.broadcast %cst_233 : f32 to vector<1x1xf32>
      %508 = arith.mulf %506, %507 : vector<1x1xf32>
      %509 = arith.addf %504, %508 : vector<1x1xf32>
      %cst_234 = arith.constant 5.000000e-01 : f32
      %510 = vector.broadcast %cst_234 : f32 to vector<1x1xf32>
      %511 = arith.mulf %510, %509 : vector<1x1xf32>
      %512 = vector.shape_cast %511 : vector<1x1xf32> to vector<1x1xf32>
      %513 = vector.broadcast %512 : vector<1x1xf32> to vector<1x128xf32>
      %c3_235 = arith.constant 3 : index
      %c0_236 = arith.constant 0 : index
      %514 = vector.load %arg4[%c3_235, %c0_236] : memref<8x128xf32, #tpu.memory_space<vmem>>, vector<1x128xf32>
      tpu.vector_store %arg4[%c3_235, %c0_236], %513 {strides = array<i32>} : memref<8x128xf32, #tpu.memory_space<vmem>>, vector<1x128xf32>,
      %c4_237 = arith.constant 4 : index
      %c0_238 = arith.constant 0 : index
      %c0_239 = arith.constant 0 : index
      %515 = vector.load %arg5[%c4_237, %c0_238, %c0_239] : memref<8x104x1xf32, #tpu.memory_space<vmem>>, vector<1x104x1xf32>
      %516 = vector.shape_cast %515 : vector<1x104x1xf32> to vector<104x1xf32>
      %517 = math.sqrt %516 : vector<104x1xf32>
      %cst_240 = arith.constant 0.000000e+00 : f32
      %518 = vector.broadcast %cst_240 : f32 to vector<104x1xf32>
      %519 = arith.select %11, %517, %518 : vector<104x1xi1>, vector<104x1xf32>
      %cst_241 = arith.constant dense<0.000000e+00> : vector<1xf32>
      %520 = vector.multi_reduction <add>, %519, %cst_241 [0] : vector<104x1xf32> to vector<1xf32>
      %521 = vector.shape_cast %520 : vector<1xf32> to vector<1x1xf32>
      %cst_242 = arith.constant 0.00999999977 : f32
      %522 = vector.broadcast %cst_242 : f32 to vector<1x1xf32>
      %523 = arith.mulf %521, %522 : vector<1x1xf32>
      %c4_243 = arith.constant 4 : index
      %c0_244 = arith.constant 0 : index
      %c0_245 = arith.constant 0 : index
      %524 = vector.load %arg6[%c4_243, %c0_244, %c0_245] : memref<8x1x1xf32, #tpu.memory_space<vmem>>, vector<1x1x1xf32>
      %525 = vector.shape_cast %524 : vector<1x1x1xf32> to vector<1x1xf32>
      %cst_246 = arith.constant 5.000000e-03 : f32
      %526 = vector.broadcast %cst_246 : f32 to vector<1x1xf32>
      %527 = arith.mulf %525, %526 : vector<1x1xf32>
      %528 = arith.addf %523, %527 : vector<1x1xf32>
      %cst_247 = arith.constant 5.000000e-01 : f32
      %529 = vector.broadcast %cst_247 : f32 to vector<1x1xf32>
      %530 = arith.mulf %529, %528 : vector<1x1xf32>
      %531 = vector.shape_cast %530 : vector<1x1xf32> to vector<1x1xf32>
      %532 = vector.broadcast %531 : vector<1x1xf32> to vector<1x128xf32>
      %c4_248 = arith.constant 4 : index
      %c0_249 = arith.constant 0 : index
      %533 = vector.load %arg4[%c4_248, %c0_249] : memref<8x128xf32, #tpu.memory_space<vmem>>, vector<1x128xf32>
      tpu.vector_store %arg4[%c4_248, %c0_249], %532 {strides = array<i32>} : memref<8x128xf32, #tpu.memory_space<vmem>>, vector<1x128xf32>,
      %c5_250 = arith.constant 5 : index
      %c0_251 = arith.constant 0 : index
      %c0_252 = arith.constant 0 : index
      %534 = vector.load %arg5[%c5_250, %c0_251, %c0_252] : memref<8x104x1xf32, #tpu.memory_space<vmem>>, vector<1x104x1xf32>
      %535 = vector.shape_cast %534 : vector<1x104x1xf32> to vector<104x1xf32>
      %536 = math.sqrt %535 : vector<104x1xf32>
      %cst_253 = arith.constant 0.000000e+00 : f32
      %537 = vector.broadcast %cst_253 : f32 to vector<104x1xf32>
      %538 = arith.select %11, %536, %537 : vector<104x1xi1>, vector<104x1xf32>
      %cst_254 = arith.constant dense<0.000000e+00> : vector<1xf32>
      %539 = vector.multi_reduction <add>, %538, %cst_254 [0] : vector<104x1xf32> to vector<1xf32>
      %540 = vector.shape_cast %539 : vector<1xf32> to vector<1x1xf32>
      %cst_255 = arith.constant 0.00999999977 : f32
      %541 = vector.broadcast %cst_255 : f32 to vector<1x1xf32>
      %542 = arith.mulf %540, %541 : vector<1x1xf32>
      %c5_256 = arith.constant 5 : index
      %c0_257 = arith.constant 0 : index
      %c0_258 = arith.constant 0 : index
      %543 = vector.load %arg6[%c5_256, %c0_257, %c0_258] : memref<8x1x1xf32, #tpu.memory_space<vmem>>, vector<1x1x1xf32>
      %544 = vector.shape_cast %543 : vector<1x1x1xf32> to vector<1x1xf32>
      %cst_259 = arith.constant 5.000000e-03 : f32
      %545 = vector.broadcast %cst_259 : f32 to vector<1x1xf32>
      %546 = arith.mulf %544, %545 : vector<1x1xf32>
      %547 = arith.addf %542, %546 : vector<1x1xf32>
      %cst_260 = arith.constant 5.000000e-01 : f32
      %548 = vector.broadcast %cst_260 : f32 to vector<1x1xf32>
      %549 = arith.mulf %548, %547 : vector<1x1xf32>
      %550 = vector.shape_cast %549 : vector<1x1xf32> to vector<1x1xf32>
      %551 = vector.broadcast %550 : vector<1x1xf32> to vector<1x128xf32>
      %c5_261 = arith.constant 5 : index
      %c0_262 = arith.constant 0 : index
      %552 = vector.load %arg4[%c5_261, %c0_262] : memref<8x128xf32, #tpu.memory_space<vmem>>, vector<1x128xf32>
      tpu.vector_store %arg4[%c5_261, %c0_262], %551 {strides = array<i32>} : memref<8x128xf32, #tpu.memory_space<vmem>>, vector<1x128xf32>,
      %c6_263 = arith.constant 6 : index
      %c0_264 = arith.constant 0 : index
      %c0_265 = arith.constant 0 : index
      %553 = vector.load %arg5[%c6_263, %c0_264, %c0_265] : memref<8x104x1xf32, #tpu.memory_space<vmem>>, vector<1x104x1xf32>
      %554 = vector.shape_cast %553 : vector<1x104x1xf32> to vector<104x1xf32>
      %555 = math.sqrt %554 : vector<104x1xf32>
      %cst_266 = arith.constant 0.000000e+00 : f32
      %556 = vector.broadcast %cst_266 : f32 to vector<104x1xf32>
      %557 = arith.select %11, %555, %556 : vector<104x1xi1>, vector<104x1xf32>
      %cst_267 = arith.constant dense<0.000000e+00> : vector<1xf32>
      %558 = vector.multi_reduction <add>, %557, %cst_267 [0] : vector<104x1xf32> to vector<1xf32>
      %559 = vector.shape_cast %558 : vector<1xf32> to vector<1x1xf32>
      %cst_268 = arith.constant 0.00999999977 : f32
      %560 = vector.broadcast %cst_268 : f32 to vector<1x1xf32>
      %561 = arith.mulf %559, %560 : vector<1x1xf32>
      %c6_269 = arith.constant 6 : index
      %c0_270 = arith.constant 0 : index
      %c0_271 = arith.constant 0 : index
      %562 = vector.load %arg6[%c6_269, %c0_270, %c0_271] : memref<8x1x1xf32, #tpu.memory_space<vmem>>, vector<1x1x1xf32>
      %563 = vector.shape_cast %562 : vector<1x1x1xf32> to vector<1x1xf32>
      %cst_272 = arith.constant 5.000000e-03 : f32
      %564 = vector.broadcast %cst_272 : f32 to vector<1x1xf32>
      %565 = arith.mulf %563, %564 : vector<1x1xf32>
      %566 = arith.addf %561, %565 : vector<1x1xf32>
      %cst_273 = arith.constant 5.000000e-01 : f32
      %567 = vector.broadcast %cst_273 : f32 to vector<1x1xf32>
      %568 = arith.mulf %567, %566 : vector<1x1xf32>
      %569 = vector.shape_cast %568 : vector<1x1xf32> to vector<1x1xf32>
      %570 = vector.broadcast %569 : vector<1x1xf32> to vector<1x128xf32>
      %c6_274 = arith.constant 6 : index
      %c0_275 = arith.constant 0 : index
      %571 = vector.load %arg4[%c6_274, %c0_275] : memref<8x128xf32, #tpu.memory_space<vmem>>, vector<1x128xf32>
      tpu.vector_store %arg4[%c6_274, %c0_275], %570 {strides = array<i32>} : memref<8x128xf32, #tpu.memory_space<vmem>>, vector<1x128xf32>,
      %c7_276 = arith.constant 7 : index
      %c0_277 = arith.constant 0 : index
      %c0_278 = arith.constant 0 : index
      %572 = vector.load %arg5[%c7_276, %c0_277, %c0_278] : memref<8x104x1xf32, #tpu.memory_space<vmem>>, vector<1x104x1xf32>
      %573 = vector.shape_cast %572 : vector<1x104x1xf32> to vector<104x1xf32>
      %574 = math.sqrt %573 : vector<104x1xf32>
      %cst_279 = arith.constant 0.000000e+00 : f32
      %575 = vector.broadcast %cst_279 : f32 to vector<104x1xf32>
      %576 = arith.select %11, %574, %575 : vector<104x1xi1>, vector<104x1xf32>
      %cst_280 = arith.constant dense<0.000000e+00> : vector<1xf32>
      %577 = vector.multi_reduction <add>, %576, %cst_280 [0] : vector<104x1xf32> to vector<1xf32>
      %578 = vector.shape_cast %577 : vector<1xf32> to vector<1x1xf32>
      %cst_281 = arith.constant 0.00999999977 : f32
      %579 = vector.broadcast %cst_281 : f32 to vector<1x1xf32>
      %580 = arith.mulf %578, %579 : vector<1x1xf32>
      %c7_282 = arith.constant 7 : index
      %c0_283 = arith.constant 0 : index
      %c0_284 = arith.constant 0 : index
      %581 = vector.load %arg6[%c7_282, %c0_283, %c0_284] : memref<8x1x1xf32, #tpu.memory_space<vmem>>, vector<1x1x1xf32>
      %582 = vector.shape_cast %581 : vector<1x1x1xf32> to vector<1x1xf32>
      %cst_285 = arith.constant 5.000000e-03 : f32
      %583 = vector.broadcast %cst_285 : f32 to vector<1x1xf32>
      %584 = arith.mulf %582, %583 : vector<1x1xf32>
      %585 = arith.addf %580, %584 : vector<1x1xf32>
      %cst_286 = arith.constant 5.000000e-01 : f32
      %586 = vector.broadcast %cst_286 : f32 to vector<1x1xf32>
      %587 = arith.mulf %586, %585 : vector<1x1xf32>
      %588 = vector.shape_cast %587 : vector<1x1xf32> to vector<1x1xf32>
      %589 = vector.broadcast %588 : vector<1x1xf32> to vector<1x128xf32>
      %c7_287 = arith.constant 7 : index
      %c0_288 = arith.constant 0 : index
      %590 = vector.load %arg4[%c7_287, %c0_288] : memref<8x128xf32, #tpu.memory_space<vmem>>, vector<1x128xf32>
      tpu.vector_store %arg4[%c7_287, %c0_288], %589 {strides = array<i32>} : memref<8x128xf32, #tpu.memory_space<vmem>>, vector<1x128xf32>,
    } else {
    }
    return
  }
  func.func @transform_0(%arg0: i32, %arg1: i32) -> (i32, i32, i32) {
    %c0_i32 = arith.constant 0 : i32
    %c0_i32_0 = arith.constant 0 : i32
    %c0_i32_1 = arith.constant 0 : i32
    return %arg0, %c0_i32, %c0_i32_0 : i32, i32, i32
  }
  func.func @transform_1(%arg0: i32, %arg1: i32) -> (i32, i32, i32) {
    %c0_i32 = arith.constant 0 : i32
    %c0_i32_0 = arith.constant 0 : i32
    return %arg0, %c0_i32, %arg1 : i32, i32, i32
  }
  func.func @transform_2(%arg0: i32, %arg1: i32) -> (i32, i32) {
    %c0_i32 = arith.constant 0 : i32
    %c0_i32_0 = arith.constant 0 : i32
    return %arg0, %c0_i32 : i32, i32
  }
}

</mosaic_0001>

<bundles_post_ra>
// kernel: tpu_custom_call.1
= control target key start
LH: loop header
LB: loop body
LE: loop exit
PB: predicated region body
PF: predicated region fallthrough
CT: control target
= control target key end

     0   :  { %7 = vsyncpa [#allocation6], 0  ;;  %s5714_s9 = smov 0   ;;  %s5716_s10 = smov 0   ;;  %s9065_s0 = inlined_call_operand.vmem [shape: f32[8,104,3], index: 0, kind: input, shape index: {}]   ;;  %s9066_s1 = inlined_call_operand.vmem [shape: f32[8,3,256], index: 1, kind: input, shape index: {}]   ;;  %s9067_s2 = inlined_call_operand.hbm [shape: f32[8,128], index: 2, kind: output, shape index: {}]  }
   0x1   :  { %s5718_s11 = smov 0   ;;  %s5720_s12 = smov 0  }
   0x2   :  { %s5722_s13 = smov 0  }
   0x3 LB: > { %s5184_s14 = sadd.s32 4294967295, %s5690_s13   ;;  %s22_s15 = sadd.s32 1, %s5686_s12  ;;  %s5690_s13 = sphi %s5722_s13, %s13_s13   ;;  %s5686_s12 = sphi %s5720_s12, %s9100_s12   ;;  %s5682_s11 = sphi %s5718_s11, %s9099_s11   ;;  %s5678_s10 = sphi %s5716_s10, %s9098_s10   ;;  %s5674_s9 = sphi %s5714_s9, %s9097_s9  }
   0x4   : > { %p23_p0 = scmp.ge.s32.totalorder %s22_s15, 2  ;;  %p67_p1 = scmp.ne.s32.totalorder %s5678_s10, %s5674_s9 }
   0x5   : > { %p68_p2 = scmp.eq.s32.totalorder %s5690_s13, 0  ;;  %s60_s17 = sadd.s32 1, %s5678_s10 }
   0x6   : > { %s9102_s15 = smov (%p23_p0, %s22_s15), 0  ;;  %p5187_p5 = scmp.ge.s32.totalorder %s5690_s13, 2 }
   0x7   : > { %p69_p3 = por %p68_p2, %p67_p1  ;;  %s56_s16 = ssub.s32 %s5686_s12, %s9102_s15 }
   0x8   : > { %p58_p4 = scmp.eq.s32.totalorder %s56_s16, 0  ;;  %129 = sbr.rel (%p5187_p5) target bundleno = 22 (0x16), region = 20 }
   0xa   : > { %s5750_s18 = scalar_select %p58_p4, %s5678_s10, %s60_s17  }
   0xd   : > { %132 = sbr.rel (!%p69_p3) target bundleno = 22 (0x16), region = 24  ;;  %s134_s19 = sand.u32 (%p69_p3), 1, %s5678_s10  }
   0xe   : > { %s5189_s20 = sshll.u32 (%p69_p3), %s5686_s12, 2  ;;  %s5188_s21 = sshll.u32 (%p69_p3), %s134_s19, 5 }
   0xf   : > { %s141_s24 = scalar_lea.vmem (%p69_p3), %s9066_s1, %s5189_s20  ;;  %s136_s25 = scalar_lea.vmem (%p69_p3), [#allocation4], %s5188_s21 }
  0x10   : > { %v158_v0 = vld [vmem:[%s141_s24] sm:$0xf] (%p69_p3)  ;;  %v160_v1 = vld [vmem:[%s141_s24 + $0x8] sm:$0xf] (%p69_p3)  ;;  %v162_v2 = vld [vmem:[%s141_s24 + $0x10] sm:$0xf] (%p69_p3) }
  0x11   : > { %159 = vst [vmem:[%s136_s25] sm:$0xf] (%p69_p3), %v158_v0  ;;  %161 = vst [vmem:[%s136_s25 + $0x4] sm:$0xf] (%p69_p3), %v160_v1  ;;  %v164_v3 = vld [vmem:[%s141_s24 + $0x18] sm:$0xf] (%p69_p3) }
  0x12   : > { %v166_v4 = vld [vmem:[%s141_s24 + $0x20] sm:$0xf]  ;;  %163 = vst [vmem:[%s136_s25 + $0x8] sm:$0xf] %v162_v2  ;;  %165 = vst [vmem:[%s136_s25 + $0xc] sm:$0xf] %v164_v3 }
  0x13   : > { %167 = vst [vmem:[%s136_s25 + $0x10] sm:$0xf] %v166_v4  ;;  %v168_v5 = vld [vmem:[%s141_s24 + $0x28] sm:$0xf]  ;;  %v170_v6 = vld [vmem:[%s141_s24 + $0x30] sm:$0xf] }
  0x14   : > { %v172_v7 = vld [vmem:[%s141_s24 + $0x38] sm:$0xf]  ;;  %169 = vst [vmem:[%s136_s25 + $0x14] sm:$0xf] %v168_v5  ;;  %171 = vst [vmem:[%s136_s25 + $0x18] sm:$0xf] %v170_v6 }
  0x15   : > { %173 = vst [vmem:[%s136_s25 + $0x1c] sm:$0xf] %v172_v7 }
  0x16 PF: > { %p5190_p6 = scmp.ge.s32.totalorder %s5690_s13, 1  ;;  %p212_p7 = scmp.lt.s32.totalorder %s5690_s13, 3 }
  0x18   : > { %p213_p8 = pnand %p5190_p6, %p212_p7 }
  0x19   : > { %s219_s26 = sand.u32 (!%p213_p8), 1, %s5674_s9   ;;  %p5192_p9 = scmp.ne.s32.totalorder (!%p213_p8), %s5682_s11, 0 }
  0x1a   : > { %216 = sbr.rel (%p213_p8) target bundleno = 2773 (0xad5), region = 65  ;;  %s5191_s27 = sshll.u32 (!%p213_p8), %s219_s26, 5 }
  0x1b   : > { %s5761_s28 = scalar_lea.vmem (!%p213_p8), [#allocation4], %s5191_s27 }
  0x1f   : > { %252 = sbr.rel (%p5192_p9) target bundleno = 93 (0x5d), region = 73 }
  0x24   : > { %vm253_vm0 = vcmask 7168   ;;  %vm358_vm1 = vcmask 0   ;;  %v5692_v8 = vmov inf   ;;  %v5693_v9 = vmov 0.0  }
  0x25   : > { %254 = vst.msk [vmem:[#allocation2] sm:$0xff] %vm253_vm0, %v5692_v8  ;;  %255 = vst.msk [vmem:[#allocation2 + $0x8] sm:$0xff] %vm253_vm0, %v5692_v8 }
  0x26   : > { %256 = vst.msk [vmem:[#allocation2 + $0x10] sm:$0xff] %vm253_vm0, %v5692_v8  ;;  %257 = vst.msk [vmem:[#allocation2 + $0x18] sm:$0xff] %vm253_vm0, %v5692_v8 }
  0x27   : > { %258 = vst.msk [vmem:[#allocation2 + $0x20] sm:$0xff] %vm253_vm0, %v5692_v8  ;;  %259 = vst.msk [vmem:[#allocation2 + $0x28] sm:$0xff] %vm253_vm0, %v5692_v8 }
  0x28   : > { %260 = vst.msk [vmem:[#allocation2 + $0x30] sm:$0xff] %vm253_vm0, %v5692_v8  ;;  %261 = vst.msk [vmem:[#allocation2 + $0x38] sm:$0xff] %vm253_vm0, %v5692_v8 }
  0x29   : > { %262 = vst.msk [vmem:[#allocation2 + $0x40] sm:$0xff] %vm253_vm0, %v5692_v8  ;;  %263 = vst.msk [vmem:[#allocation2 + $0x48] sm:$0xff] %vm253_vm0, %v5692_v8 }
  0x2a   : > { %264 = vst.msk [vmem:[#allocation2 + $0x50] sm:$0xff] %vm253_vm0, %v5692_v8  ;;  %265 = vst.msk [vmem:[#allocation2 + $0x58] sm:$0xff] %vm253_vm0, %v5692_v8 }
  0x2b   : > { %266 = vst.msk [vmem:[#allocation2 + $0x60] sm:$0xff] %vm253_vm0, %v5692_v8  ;;  %267 = vst.msk [vmem:[#allocation2 + $0x68] sm:$0xff] %vm253_vm0, %v5692_v8 }
  0x2c   : > { %268 = vst.msk [vmem:[#allocation2 + $0x70] sm:$0xff] %vm253_vm0, %v5692_v8  ;;  %269 = vst.msk [vmem:[#allocation2 + $0x78] sm:$0xff] %vm253_vm0, %v5692_v8 }
  0x2d   : > { %270 = vst.msk [vmem:[#allocation2 + $0x80] sm:$0xff] %vm253_vm0, %v5692_v8  ;;  %271 = vst.msk [vmem:[#allocation2 + $0x88] sm:$0xff] %vm253_vm0, %v5692_v8 }
  0x2e   : > { %272 = vst.msk [vmem:[#allocation2 + $0x90] sm:$0xff] %vm253_vm0, %v5692_v8  ;;  %273 = vst.msk [vmem:[#allocation2 + $0x98] sm:$0xff] %vm253_vm0, %v5692_v8 }
  0x2f   : > { %274 = vst.msk [vmem:[#allocation2 + $0xa0] sm:$0xff] %vm253_vm0, %v5692_v8  ;;  %275 = vst.msk [vmem:[#allocation2 + $0xa8] sm:$0xff] %vm253_vm0, %v5692_v8 }
  0x30   : > { %276 = vst.msk [vmem:[#allocation2 + $0xb0] sm:$0xff] %vm253_vm0, %v5692_v8  ;;  %277 = vst.msk [vmem:[#allocation2 + $0xb8] sm:$0xff] %vm253_vm0, %v5692_v8 }
  0x31   : > { %278 = vst.msk [vmem:[#allocation2 + $0xc0] sm:$0xff] %vm253_vm0, %v5692_v8  ;;  %279 = vst.msk [vmem:[#allocation2 + $0xc8] sm:$0xff] %vm253_vm0, %v5692_v8 }
  0x32   : > { %280 = vst.msk [vmem:[#allocation2 + $0xd0] sm:$0xff] %vm253_vm0, %v5692_v8  ;;  %281 = vst.msk [vmem:[#allocation2 + $0xd8] sm:$0xff] %vm253_vm0, %v5692_v8 }
  0x33   : > { %282 = vst.msk [vmem:[#allocation2 + $0xe0] sm:$0xff] %vm253_vm0, %v5692_v8  ;;  %283 = vst.msk [vmem:[#allocation2 + $0xe8] sm:$0xff] %vm253_vm0, %v5692_v8 }
  0x34   : > { %284 = vst.msk [vmem:[#allocation2 + $0xf0] sm:$0xff] %vm253_vm0, %v5692_v8  ;;  %285 = vst.msk [vmem:[#allocation2 + $0xf8] sm:$0xff] %vm253_vm0, %v5692_v8 }
  0x35   : > { %286 = vst.msk [vmem:[#allocation2 + $0x100] sm:$0xff] %vm253_vm0, %v5692_v8  ;;  %287 = vst.msk [vmem:[#allocation2 + $0x108] sm:$0xff] %vm253_vm0, %v5692_v8 }
  0x36   : > { %288 = vst.msk [vmem:[#allocation2 + $0x110] sm:$0xff] %vm253_vm0, %v5692_v8  ;;  %289 = vst.msk [vmem:[#allocation2 + $0x118] sm:$0xff] %vm253_vm0, %v5692_v8 }
  0x37   : > { %290 = vst.msk [vmem:[#allocation2 + $0x120] sm:$0xff] %vm253_vm0, %v5692_v8  ;;  %291 = vst.msk [vmem:[#allocation2 + $0x128] sm:$0xff] %vm253_vm0, %v5692_v8 }
  0x38   : > { %292 = vst.msk [vmem:[#allocation2 + $0x130] sm:$0xff] %vm253_vm0, %v5692_v8  ;;  %293 = vst.msk [vmem:[#allocation2 + $0x138] sm:$0xff] %vm253_vm0, %v5692_v8 }
  0x39   : > { %294 = vst.msk [vmem:[#allocation2 + $0x140] sm:$0xff] %vm253_vm0, %v5692_v8  ;;  %295 = vst.msk [vmem:[#allocation2 + $0x148] sm:$0xff] %vm253_vm0, %v5692_v8 }
  0x3a   : > { %296 = vst.msk [vmem:[#allocation2 + $0x150] sm:$0xff] %vm253_vm0, %v5692_v8  ;;  %297 = vst.msk [vmem:[#allocation2 + $0x158] sm:$0xff] %vm253_vm0, %v5692_v8 }
  0x3b   : > { %298 = vst.msk [vmem:[#allocation2 + $0x160] sm:$0xff] %vm253_vm0, %v5692_v8  ;;  %299 = vst.msk [vmem:[#allocation2 + $0x168] sm:$0xff] %vm253_vm0, %v5692_v8 }
  0x3c   : > { %300 = vst.msk [vmem:[#allocation2 + $0x170] sm:$0xff] %vm253_vm0, %v5692_v8  ;;  %301 = vst.msk [vmem:[#allocation2 + $0x178] sm:$0xff] %vm253_vm0, %v5692_v8 }
  0x3d   : > { %302 = vst.msk [vmem:[#allocation2 + $0x180] sm:$0xff] %vm253_vm0, %v5692_v8  ;;  %303 = vst.msk [vmem:[#allocation2 + $0x188] sm:$0xff] %vm253_vm0, %v5692_v8 }
  0x3e   : > { %304 = vst.msk [vmem:[#allocation2 + $0x190] sm:$0xff] %vm253_vm0, %v5692_v8  ;;  %305 = vst.msk [vmem:[#allocation2 + $0x198] sm:$0xff] %vm253_vm0, %v5692_v8 }
  0x3f   : > { %306 = vst.msk [vmem:[#allocation2 + $0x1a0] sm:$0xff] %vm253_vm0, %v5692_v8  ;;  %307 = vst.msk [vmem:[#allocation2 + $0x1a8] sm:$0xff] %vm253_vm0, %v5692_v8 }
  0x40   : > { %308 = vst.msk [vmem:[#allocation2 + $0x1b0] sm:$0xff] %vm253_vm0, %v5692_v8  ;;  %309 = vst.msk [vmem:[#allocation2 + $0x1b8] sm:$0xff] %vm253_vm0, %v5692_v8 }
  0x41   : > { %310 = vst.msk [vmem:[#allocation2 + $0x1c0] sm:$0xff] %vm253_vm0, %v5692_v8  ;;  %311 = vst.msk [vmem:[#allocation2 + $0x1c8] sm:$0xff] %vm253_vm0, %v5692_v8 }
  0x42   : > { %312 = vst.msk [vmem:[#allocation2 + $0x1d0] sm:$0xff] %vm253_vm0, %v5692_v8  ;;  %313 = vst.msk [vmem:[#allocation2 + $0x1d8] sm:$0xff] %vm253_vm0, %v5692_v8 }
  0x43   : > { %314 = vst.msk [vmem:[#allocation2 + $0x1e0] sm:$0xff] %vm253_vm0, %v5692_v8  ;;  %315 = vst.msk [vmem:[#allocation2 + $0x1e8] sm:$0xff] %vm253_vm0, %v5692_v8 }
  0x44   : > { %316 = vst.msk [vmem:[#allocation2 + $0x1f0] sm:$0xff] %vm253_vm0, %v5692_v8  ;;  %317 = vst.msk [vmem:[#allocation2 + $0x1f8] sm:$0xff] %vm253_vm0, %v5692_v8 }
  0x45   : > { %318 = vst.msk [vmem:[#allocation2 + $0x200] sm:$0xff] %vm253_vm0, %v5692_v8  ;;  %319 = vst.msk [vmem:[#allocation2 + $0x208] sm:$0xff] %vm253_vm0, %v5692_v8 }
  0x46   : > { %320 = vst.msk [vmem:[#allocation2 + $0x210] sm:$0xff] %vm253_vm0, %v5692_v8  ;;  %321 = vst.msk [vmem:[#allocation2 + $0x218] sm:$0xff] %vm253_vm0, %v5692_v8 }
  0x47   : > { %322 = vst.msk [vmem:[#allocation2 + $0x220] sm:$0xff] %vm253_vm0, %v5692_v8  ;;  %323 = vst.msk [vmem:[#allocation2 + $0x228] sm:$0xff] %vm253_vm0, %v5692_v8 }
  0x48   : > { %324 = vst.msk [vmem:[#allocation2 + $0x230] sm:$0xff] %vm253_vm0, %v5692_v8  ;;  %325 = vst.msk [vmem:[#allocation2 + $0x238] sm:$0xff] %vm253_vm0, %v5692_v8 }
  0x49   : > { %326 = vst.msk [vmem:[#allocation2 + $0x240] sm:$0xff] %vm253_vm0, %v5692_v8  ;;  %327 = vst.msk [vmem:[#allocation2 + $0x248] sm:$0xff] %vm253_vm0, %v5692_v8 }
  0x4a   : > { %328 = vst.msk [vmem:[#allocation2 + $0x250] sm:$0xff] %vm253_vm0, %v5692_v8  ;;  %329 = vst.msk [vmem:[#allocation2 + $0x258] sm:$0xff] %vm253_vm0, %v5692_v8 }
  0x4b   : > { %330 = vst.msk [vmem:[#allocation2 + $0x260] sm:$0xff] %vm253_vm0, %v5692_v8  ;;  %331 = vst.msk [vmem:[#allocation2 + $0x268] sm:$0xff] %vm253_vm0, %v5692_v8 }
  0x4c   : > { %332 = vst.msk [vmem:[#allocation2 + $0x270] sm:$0xff] %vm253_vm0, %v5692_v8  ;;  %333 = vst.msk [vmem:[#allocation2 + $0x278] sm:$0xff] %vm253_vm0, %v5692_v8 }
  0x4d   : > { %334 = vst.msk [vmem:[#allocation2 + $0x280] sm:$0xff] %vm253_vm0, %v5692_v8  ;;  %335 = vst.msk [vmem:[#allocation2 + $0x288] sm:$0xff] %vm253_vm0, %v5692_v8 }
  0x4e   : > { %336 = vst.msk [vmem:[#allocation2 + $0x290] sm:$0xff] %vm253_vm0, %v5692_v8  ;;  %337 = vst.msk [vmem:[#allocation2 + $0x298] sm:$0xff] %vm253_vm0, %v5692_v8 }
  0x4f   : > { %338 = vst.msk [vmem:[#allocation2 + $0x2a0] sm:$0xff] %vm253_vm0, %v5692_v8  ;;  %339 = vst.msk [vmem:[#allocation2 + $0x2a8] sm:$0xff] %vm253_vm0, %v5692_v8 }
  0x50   : > { %340 = vst.msk [vmem:[#allocation2 + $0x2b0] sm:$0xff] %vm253_vm0, %v5692_v8  ;;  %341 = vst.msk [vmem:[#allocation2 + $0x2b8] sm:$0xff] %vm253_vm0, %v5692_v8 }
  0x51   : > { %342 = vst.msk [vmem:[#allocation2 + $0x2c0] sm:$0xff] %vm253_vm0, %v5692_v8  ;;  %343 = vst.msk [vmem:[#allocation2 + $0x2c8] sm:$0xff] %vm253_vm0, %v5692_v8 }
  0x52   : > { %344 = vst.msk [vmem:[#allocation2 + $0x2d0] sm:$0xff] %vm253_vm0, %v5692_v8  ;;  %345 = vst.msk [vmem:[#allocation2 + $0x2d8] sm:$0xff] %vm253_vm0, %v5692_v8 }
  0x53   : > { %346 = vst.msk [vmem:[#allocation2 + $0x2e0] sm:$0xff] %vm253_vm0, %v5692_v8  ;;  %347 = vst.msk [vmem:[#allocation2 + $0x2e8] sm:$0xff] %vm253_vm0, %v5692_v8 }
  0x54   : > { %348 = vst.msk [vmem:[#allocation2 + $0x2f0] sm:$0xff] %vm253_vm0, %v5692_v8  ;;  %349 = vst.msk [vmem:[#allocation2 + $0x2f8] sm:$0xff] %vm253_vm0, %v5692_v8 }
  0x55   : > { %350 = vst.msk [vmem:[#allocation2 + $0x300] sm:$0xff] %vm253_vm0, %v5692_v8  ;;  %351 = vst.msk [vmem:[#allocation2 + $0x308] sm:$0xff] %vm253_vm0, %v5692_v8 }
  0x56   : > { %352 = vst.msk [vmem:[#allocation2 + $0x310] sm:$0xff] %vm253_vm0, %v5692_v8  ;;  %353 = vst.msk [vmem:[#allocation2 + $0x318] sm:$0xff] %vm253_vm0, %v5692_v8 }
  0x57   : > { %354 = vst.msk [vmem:[#allocation2 + $0x320] sm:$0xff] %vm253_vm0, %v5692_v8  ;;  %355 = vst.msk [vmem:[#allocation2 + $0x328] sm:$0xff] %vm253_vm0, %v5692_v8 }
  0x58   : > { %356 = vst.msk [vmem:[#allocation2 + $0x330] sm:$0xff] %vm253_vm0, %v5692_v8  ;;  %357 = vst.msk [vmem:[#allocation2 + $0x338] sm:$0xff] %vm253_vm0, %v5692_v8 }
  0x59   : > { %359 = vst.msk [vmem:[#allocation3] sm:$0x1] %vm358_vm1, %v5693_v9  ;;  %360 = vst.msk [vmem:[#allocation3 + $0x1] sm:$0x1] %vm358_vm1, %v5693_v9 }
  0x5a   : > { %361 = vst.msk [vmem:[#allocation3 + $0x2] sm:$0x1] %vm358_vm1, %v5693_v9  ;;  %362 = vst.msk [vmem:[#allocation3 + $0x3] sm:$0x1] %vm358_vm1, %v5693_v9 }
  0x5b   : > { %363 = vst.msk [vmem:[#allocation3 + $0x4] sm:$0x1] %vm358_vm1, %v5693_v9  ;;  %364 = vst.msk [vmem:[#allocation3 + $0x5] sm:$0x1] %vm358_vm1, %v5693_v9 }
  0x5c   : > { %365 = vst.msk [vmem:[#allocation3 + $0x6] sm:$0x1] %vm358_vm1, %v5693_v9  ;;  %366 = vst.msk [vmem:[#allocation3 + $0x7] sm:$0x1] %vm358_vm1, %v5693_v9 }
  0x5d PF: > { %v402_v10 = vld [vmem:[%s9065_s0 + $0x10] sm:$0xff]  ;;  %v401_v11 = vld [vmem:[%s9065_s0 + $0x8] sm:$0xff]  ;;  %v5694_v12 = vmov 1   ;;  %v5695_v13 = vmov 0   ;;  %v403_v14 = vld [vmem:[%s9065_s0 + $0x18] sm:$0xff]  ;;  %v5696_v25 = vmov 2   ;;  %v368_v44 = vlaneseq }
  0x5e   : > { %5352 = vset.pattern.permute.xlu0 %v5694_v12  ;;  %5350 = vset.pattern.permute.xlu1 %v5695_v13  ;;  %v404_v15 = vld [vmem:[%s9065_s0 + $0x20] sm:$0xff]  ;;  %v405_v16 = vld [vmem:[%s9065_s0 + $0x28] sm:$0xff]  ;;  %v406_v17 = vld [vmem:[%s9065_s0 + $0x30] sm:$0xff]  ;;  %s5193_s7 = sshll.u32 %s5682_s11, 7  ;;  %vm766_vm6 = vcmask 7168   ;;  %vm849_vm7 = vcmask 0  }
  0x5f   : > { %426 = vperm.xlu1 %5350, %v402_v10   ;;  %514 = vperm.xlu0 %5352, %v401_v11   ;;  %v407_v18 = vld [vmem:[%s9065_s0 + $0x38] sm:$0xff]  ;;  %v408_v19 = vld [vmem:[%s9065_s0 + $0x40] sm:$0xff]  ;;  %v409_v20 = vld [vmem:[%s9065_s0 + $0x48] sm:$0xff]  ;;  %v6038_v47 = vshrl.u32 %v368_v44, 7  ;;  %v369_v57 = vand.u32 127, %v368_v44  ;;  %v370_v59 = vstv %s5193_s7  ;;  %p5292_p10 = scmp.ne.s32.totalorder %s5682_s11, 1 }
  0x60   : > { %v410_v21 = vld [vmem:[%s9065_s0 + $0x50] sm:$0xff]  ;;  %v411_v22 = vld [vmem:[%s9065_s0 + $0x58] sm:$0xff]  ;;  %v412_v23 = vld [vmem:[%s9065_s0 + $0x60] sm:$0xff] }
  0x61   : > { %v400_v24 = vld [vmem:[%s9065_s0] sm:$0xff]  ;;  %v6045_v50 = vsub.s32 0, %v6038_v47  ;;  %v413_v51 = vld [vmem:[%s5761_s28] sm:$0x7]  ;;  %v6049_v52 = vsub.s32 1, %v6038_v47  ;;  %v6060_v56 = vsub.s32 2, %v6038_v47  ;;  %v6071_v0 = vadd.s32 %v370_v59, %v369_v57 }
  0x63   : > { %431 = vperm.xlu1 %5350, %v403_v14   ;;  %526 = vperm.xlu0 %5352, %v404_v15   ;;  %v6057_v55 = vrot.slane %v413_v51, %v6045_v50  ;;  %v6063_v58 = vrot.slane %v413_v51, %v6049_v52  ;;  %v6069_v62 = vrot.slane %v413_v51, %v6060_v56  ;;  %vm372_vm2 = vcmp.lt.s32.totalorder %v6071_v0, 200 }
  0x67   : > { %441 = vperm.xlu1 %5350, %v405_v16   ;;  %534 = vperm.xlu0 %5352, %v406_v17  }
  0x6b   : > { %451 = vperm.xlu1 %5350, %v407_v18   ;;  %542 = vperm.xlu0 %5352, %v408_v19  }
  0x6f   : > { %461 = vperm.xlu1 %5350, %v409_v20   ;;  %550 = vperm.xlu0 %5352, %v410_v21  }
  0x73   : > { %471 = vperm.xlu1 %5350, %v411_v22   ;;  %558 = vperm.xlu0 %5352, %v412_v23  }
  0x77   : > { %5351 = vset.pattern.permute.xlu1 %v5694_v12  ;;  %5354 = vset.pattern.permute.xlu0 %v5696_v25 }
  0x78   : > { %609 = vperm.xlu0 %5354, %v401_v11   ;;  %510 = vperm.xlu1 %5351, %v400_v24  }
  0x7c   : > { %621 = vperm.xlu0 %5354, %v404_v15   ;;  %518 = vperm.xlu1 %5351, %v402_v10  }
  0x80   : > { %629 = vperm.xlu0 %5354, %v406_v17   ;;  %522 = vperm.xlu1 %5351, %v403_v14  }
  0x84   : > { %637 = vperm.xlu0 %5354, %v408_v19   ;;  %530 = vperm.xlu1 %5351, %v405_v16  }
  0x88   : > { %645 = vperm.xlu0 %5354, %v410_v21   ;;  %538 = vperm.xlu1 %5351, %v407_v18  }
  0x8c   : > { %653 = vperm.xlu0 %5354, %v412_v23   ;;  %546 = vperm.xlu1 %5351, %v409_v20  }
  0x90   : > { %5355 = vset.pattern.permute.xlu0 %v5695_v13  ;;  %554 = vperm.xlu1 %5351, %v411_v22  }
  0x91   : > { %416 = vperm.xlu0 %5355, %v400_v24  }
  0x94   : > { %5353 = vset.pattern.permute.xlu1 %v5696_v25 }
  0x95   : > { %421 = vperm.xlu0 %5355, %v401_v11   ;;  %605 = vperm.xlu1 %5353, %v400_v24  }
  0x99   : > { %436 = vperm.xlu0 %5355, %v404_v15   ;;  %613 = vperm.xlu1 %5353, %v402_v10  }
  0x9d   : > { %446 = vperm.xlu0 %5355, %v406_v17   ;;  %617 = vperm.xlu1 %5353, %v403_v14  }
  0xa1   : > { %456 = vperm.xlu0 %5355, %v408_v19   ;;  %625 = vperm.xlu1 %5353, %v405_v16  }
  0xa5   : > { %466 = vperm.xlu0 %5355, %v410_v21   ;;  %633 = vperm.xlu1 %5353, %v407_v18  }
  0xa9   : > { %476 = vperm.xlu0 %5355, %v412_v23   ;;  %641 = vperm.xlu1 %5353, %v409_v20  }
  0xad   : > { %649 = vperm.xlu1 %5353, %v411_v22  }
  0xb1   : > { %5356 = vset.pattern.permute.xlu1 %v5695_v13 }
  0xda   : > { %v427_v26 = vpop.permute.xlu1 %426  ;;  %v515_v27 = vpop.permute.xlu0 %514 }
  0xdb   : > { %v485_v61 = vsub.f32 %v427_v26, %v6057_v55  ;;  %v566_v1 = vsub.f32 %v515_v27, %v6063_v58 }
  0xdd   : > { %v498_v7 = vmul.f32 %v485_v61, %v485_v61  ;;  %v579_v14 = vmul.f32 %v566_v1, %v566_v1 }
  0xde   : > { %v432_v28 = vpop.permute.xlu1 %431  ;;  %v527_v29 = vpop.permute.xlu0 %526 }
  0xdf   : > { %v486_v4 = vsub.f32 %v432_v28, %v6057_v55  ;;  %v569_v5 = vsub.f32 %v527_v29, %v6063_v58 }
  0xe1   : > { %v499_v18 = vmul.f32 %v486_v4, %v486_v4  ;;  %v582_v19 = vmul.f32 %v569_v5, %v569_v5 }
  0xe2   : > { %v442_v30 = vpop.permute.xlu1 %441  ;;  %v535_v31 = vpop.permute.xlu0 %534 }
  0xe3   : > { %v488_v20 = vsub.f32 %v442_v30, %v6057_v55  ;;  %v571_v22 = vsub.f32 %v535_v31, %v6063_v58 }
  0xe6   : > { %v452_v32 = vpop.permute.xlu1 %451  ;;  %v543_v33 = vpop.permute.xlu0 %542 }
  0xe7   : > { %v490_v27 = vsub.f32 %v452_v32, %v6057_v55  ;;  %v573_v28 = vsub.f32 %v543_v33, %v6063_v58 }
  0xe9   : > { %v586_v4 = vmul.f32 %v573_v28, %v573_v28 }
  0xea   : > { %v6026_v34 = vpop.permute.xlu1 %461  ;;  %v6028_v35 = vpop.permute.xlu0 %550 }
  0xee   : > { %v6030_v36 = vpop.permute.xlu1 %471  ;;  %v6032_v37 = vpop.permute.xlu0 %558 }
  0xf3   : > { %v610_v38 = vpop.permute.xlu0 %609  ;;  %v511_v39 = vpop.permute.xlu1 %510 }
  0xf4   : > { %v565_v2 = vsub.f32 %v511_v39, %v6063_v58  ;;  %v661_v8 = vsub.f32 %v610_v38, %v6069_v62 }
  0xf6   : > { %v578_v15 = vmul.f32 %v565_v2, %v565_v2  ;;  %v674_v29 = vmul.f32 %v661_v8, %v661_v8  ;;  %v584_v2 = vmul.f32 %v571_v22, %v571_v22  ;;  %v575_v22 = vsub.f32 %v6028_v35, %v6063_v58 }
  0xf7   : > { %v622_v40 = vpop.permute.xlu0 %621  ;;  %v519_v41 = vpop.permute.xlu1 %518 }
  0xf8   : > { %v567_v9 = vsub.f32 %v519_v41, %v6063_v58  ;;  %v664_v31 = vsub.f32 %v622_v40, %v6069_v62 }
  0xfa   : > { %v580_v38 = vmul.f32 %v567_v9, %v567_v9 }
  0xfb   : > { %v6034_v42 = vpop.permute.xlu0 %629  ;;  %v523_v43 = vpop.permute.xlu1 %522 }
  0xfc   : > { %v568_v21 = vsub.f32 %v523_v43, %v6063_v58  ;;  %v501_v43 = vmul.f32 %v488_v20, %v488_v20  ;;  %v593_v5 = vadd.f32 %v580_v38, %v498_v7 }
  0xfe   : > { %v581_v59 = vmul.f32 %v568_v21, %v568_v21  ;;  %v492_v21 = vsub.f32 %v6026_v34, %v6057_v55 }
  0xff   : > { %v6036_v45 = vpop.permute.xlu0 %637  ;;  %v531_v46 = vpop.permute.xlu1 %530 }
 0x100   : > { %v570_v61 = vsub.f32 %v531_v46, %v6063_v58  ;;  %v668_v34 = vsub.f32 %v6036_v45, %v6069_v62 }
 0x103   : > { %v6040_v48 = vpop.permute.xlu0 %645  ;;  %v6042_v49 = vpop.permute.xlu1 %538 }
 0x107   : > { %v6052_v53 = vpop.permute.xlu0 %653  ;;  %v6054_v54 = vpop.permute.xlu1 %546 }
 0x108   : > { %v574_v38 = vsub.f32 %v6054_v54, %v6063_v58 }
 0x10b   : > { %v6065_v60 = vpop.permute.xlu1 %554 }
 0x10c   : > { %v417_v63 = vpop.permute.xlu0 %416 }
 0x10d   : > { %v483_v3 = vsub.f32 %v417_v63, %v6057_v55 }
 0x10f   : > { %v496_v6 = vmul.f32 %v483_v3, %v483_v3  ;;  %v503_v3 = vmul.f32 %v490_v27, %v490_v27 }
 0x110   : > { %v422_v10 = vpop.permute.xlu0 %421  ;;  %v606_v11 = vpop.permute.xlu1 %605 }
 0x111   : > { %v484_v16 = vsub.f32 %v422_v10, %v6057_v55  ;;  %v660_v17 = vsub.f32 %v606_v11, %v6069_v62  ;;  %v591_v23 = vadd.f32 %v578_v15, %v496_v6  ;;  %v677_v11 = vmul.f32 %v664_v31, %v664_v31 }
 0x112   : > { %v572_v15 = vsub.f32 %v6042_v49, %v6063_v58  ;;  %v577_v31 = vsub.f32 %v6032_v37, %v6063_v58  ;;  %v670_v37 = vsub.f32 %v6040_v48, %v6069_v62 }
 0x113   : > { %v497_v24 = vmul.f32 %v484_v16, %v484_v16  ;;  %v673_v26 = vmul.f32 %v660_v17, %v660_v17  ;;  %v594_v16 = vadd.f32 %v581_v59, %v499_v18  ;;  %v583_v17 = vmul.f32 %v570_v61, %v570_v61 }
 0x114   : > { %v437_v39 = vpop.permute.xlu0 %436  ;;  %v614_v41 = vpop.permute.xlu1 %613  ;;  %v585_v35 = vmul.f32 %v572_v15, %v572_v15 }
 0x115   : > { %v592_v44 = vadd.f32 %v579_v14, %v497_v24  ;;  %v487_v51 = vsub.f32 %v437_v39, %v6057_v55  ;;  %v662_v30 = vsub.f32 %v614_v41, %v6069_v62  ;;  %v6090_v57 = vadd.f32 %v673_v26, %v591_v23 }
 0x116   : > { %v666_v14 = vsub.f32 %v6034_v42, %v6069_v62  ;;  %v596_v39 = vadd.f32 %v583_v17, %v501_v43  ;;  %v590_v17 = vmul.f32 %v577_v31, %v577_v31 }
 0x117   : > { %v500_v32 = vmul.f32 %v487_v51, %v487_v51  ;;  %v675_v63 = vmul.f32 %v662_v30, %v662_v30  ;;  %v701_v33 = vsel %vm372_vm2, %v6090_v57, inf  ;;  %v6097_v1 = vadd.f32 %v674_v29, %v592_v44 }
 0x118   : > { %v447_v6 = vpop.permute.xlu0 %446  ;;  %v618_v8 = vpop.permute.xlu1 %617  ;;  %714 = vmin.xlane.f32.xlu1 %v701_v33  ;;  %v679_v29 = vmul.f32 %v666_v14, %v666_v14  ;;  %v588_v30 = vmul.f32 %v575_v22, %v575_v22 }
 0x119   : > { %v595_v9 = vadd.f32 %v582_v19, %v500_v32  ;;  %v489_v40 = vsub.f32 %v447_v6, %v6057_v55  ;;  %v663_v46 = vsub.f32 %v618_v8, %v6069_v62  ;;  %v702_v10 = vsel %vm372_vm2, %v6097_v1, inf }
 0x11a   : > { %716 = vmin.xlane.f32.xlu0 %v702_v10  ;;  %v6108_v7 = vadd.f32 %v675_v63, %v593_v5  ;;  %v598_v5 = vadd.f32 %v585_v35, %v503_v3  ;;  %v587_v6 = vmul.f32 %v574_v38, %v574_v38  ;;  %v576_v8 = vsub.f32 %v6065_v60, %v6063_v58 }
 0x11b   : > { %v502_v19 = vmul.f32 %v489_v40, %v489_v40  ;;  %v676_v20 = vmul.f32 %v663_v46, %v663_v46  ;;  %v6117_v49 = vadd.f32 %v677_v11, %v595_v9  ;;  %v505_v46 = vmul.f32 %v492_v21, %v492_v21 }
 0x11c   : > { %v457_v23 = vpop.permute.xlu0 %456  ;;  %v626_v24 = vpop.permute.xlu1 %625  ;;  %v703_v42 = vsel %vm372_vm2, %v6108_v7, inf  ;;  %v494_v10 = vsub.f32 %v6030_v36, %v6057_v55  ;;  %v589_v21 = vmul.f32 %v576_v8, %v576_v8 }
 0x11d   : > { %v597_v26 = vadd.f32 %v584_v2, %v502_v19  ;;  %v491_v18 = vsub.f32 %v457_v23, %v6057_v55  ;;  %v665_v27 = vsub.f32 %v626_v24, %v6069_v62  ;;  %v6121_v28 = vadd.f32 %v676_v20, %v594_v16 }
 0x11e   : > { %718 = vmin.xlane.f32.xlu0 %v703_v42  ;;  %v705_v45 = vsel %vm372_vm2, %v6117_v49, inf  ;;  %v681_v2 = vmul.f32 %v668_v34, %v668_v34  ;;  %v683_v19 = vmul.f32 %v670_v37, %v670_v37  ;;  %v672_v20 = vsub.f32 %v6052_v53, %v6069_v62 }
 0x11f   : > { %v504_v41 = vmul.f32 %v491_v18, %v491_v18  ;;  %v678_v44 = vmul.f32 %v665_v27, %v665_v27  ;;  %v704_v51 = vsel %vm372_vm2, %v6121_v28, inf  ;;  %v6135_v54 = vadd.f32 %v679_v29, %v597_v26 }
 0x120   : > { %v467_v59 = vpop.permute.xlu0 %466  ;;  %v634_v61 = vpop.permute.xlu1 %633  ;;  %720 = vmin.xlane.f32.xlu1 %v704_v51  ;;  %v600_v36 = vadd.f32 %v587_v6, %v505_v46  ;;  %v507_v42 = vmul.f32 %v494_v10, %v494_v10  ;;  %v685_v53 = vmul.f32 %v672_v20, %v672_v20  ;;  %v5199_v10 = vld [vmem:[%s9065_s0 + $0x90] sm:$0xff] }
 0x121   : > { %v599_v43 = vadd.f32 %v586_v4, %v504_v41  ;;  %v493_v32 = vsub.f32 %v467_v59, %v6057_v55  ;;  %v667_v63 = vsub.f32 %v634_v61, %v6069_v62  ;;  %v6139_v33 = vadd.f32 %v678_v44, %v596_v39 }
 0x122   : > { %722 = vmin.xlane.f32.xlu0 %v705_v45  ;;  %v707_v48 = vsel %vm372_vm2, %v6135_v54, inf  ;;  %v602_v35 = vadd.f32 %v589_v21, %v507_v42  ;;  %v819_v59 = vmin.f32 %v6090_v57, %v6117_v49  ;;  %v6186_v57 = vld [vmem:[%s9065_s0 + $0x70] sm:$0xff]  ;;  %v6238_v21 = vld [vmem:[%s9065_s0 + $0xb8] sm:$0xff]  ;;  %v741_v42 = vld [vmem:[#allocation2 + $0x8] sm:$0xff] }
 0x123   : > { %v506_v9 = vmul.f32 %v493_v32, %v493_v32  ;;  %v680_v40 = vmul.f32 %v667_v63, %v667_v63  ;;  %v706_v4 = vsel %vm372_vm2, %v6139_v33, inf  ;;  %v694_v3 = vadd.f32 %v681_v2, %v599_v43 }
 0x124   : > { %v477_v11 = vpop.permute.xlu0 %476  ;;  %v642_v14 = vpop.permute.xlu1 %641  ;;  %724 = vmin.xlane.f32.xlu1 %v706_v4  ;;  %v820_v32 = vmin.f32 %v6097_v1, %v6139_v33  ;;  %v6192_v1 = vld [vmem:[%s9065_s0 + $0x78] sm:$0xff]  ;;  %v5203_v33 = vld [vmem:[%s9065_s0 + $0xb0] sm:$0xff]  ;;  %v5205_v4 = vld [vmem:[%s9065_s0 + $0xc0] sm:$0xff] }
 0x125   : > { %v601_v15 = vadd.f32 %v588_v30, %v506_v9  ;;  %v495_v58 = vsub.f32 %v477_v11, %v6057_v55  ;;  %v669_v60 = vsub.f32 %v642_v14, %v6069_v62  ;;  %v693_v16 = vadd.f32 %v680_v40, %v598_v5  ;;  %v6207_v40 = vld [vmem:[%s9065_s0 + $0x88] sm:$0xff]  ;;  %v6219_v14 = vld [vmem:[%s9065_s0 + $0x98] sm:$0xff] }
 0x126   : > { %726 = vmin.xlane.f32.xlu0 %v707_v48  ;;  %v709_v55 = vsel %vm372_vm2, %v694_v3, inf  ;;  %v823_v43 = vmin.f32 %v819_v59, %v694_v3 }
 0x127   : > { %v508_v22 = vmul.f32 %v495_v58, %v495_v58  ;;  %v682_v23 = vmul.f32 %v669_v60, %v669_v60  ;;  %v708_v24 = vsel %vm372_vm2, %v693_v16, inf  ;;  %v696_v34 = vadd.f32 %v683_v19, %v601_v15  ;;  %v5201_v15 = vld [vmem:[%s9065_s0 + $0xa0] sm:$0xff] }
 0x128   : > { %v650_v26 = vpop.permute.xlu1 %649  ;;  %728 = vmin.xlane.f32.xlu1 %v708_v24  ;;  %v822_v45 = vmin.f32 %v6121_v28, %v693_v16 }
 0x129   : > { %v603_v18 = vadd.f32 %v590_v17, %v508_v22  ;;  %v671_v27 = vsub.f32 %v650_v26, %v6069_v62  ;;  %v695_v29 = vadd.f32 %v682_v23, %v600_v36  ;;  %v711_v41 = vsel %vm372_vm2, %v696_v34, inf  ;;  %v6232_v36 = vld [vmem:[%s9065_s0 + $0xa8] sm:$0xff]  ;;  %v740_v23 = vld [vmem:[#allocation2] sm:$0xff] }
 0x12a   : > { %730 = vmin.xlane.f32.xlu0 %v709_v55  ;;  %v6169_v62 = vadd.s32 96, %v6038_v47  ;;  %v821_v47 = vmin.f32 %v6108_v7, %v6135_v54  ;;  %v5194_v7 = vld [vmem:[%s9065_s0 + $0x68] sm:$0xff]  ;;  %v5197_v54 = vld [vmem:[%s9065_s0 + $0x80] sm:$0xff] }
 0x12b   : > { %v684_v38 = vmul.f32 %v671_v27, %v671_v27  ;;  %v710_v39 = vsel %vm372_vm2, %v695_v29, inf  ;;  %v698_v51 = vadd.f32 %v685_v53, %v603_v18  ;;  %v824_v37 = vmin.f32 %v820_v32, %v695_v29  ;;  %v6244_v22 = vld [vmem:[%s9065_s0 + $0xc8] sm:$0xff]  ;;  %v742_v27 = vld [vmem:[#allocation2 + $0x10] sm:$0xff] }
 0x12c   : > { %732 = vmin.xlane.f32.xlu1 %v710_v39  ;;  %vm9068_vm3 = vcmp.lt.s32.totalorder %v6169_v62, 100  ;;  %v825_v5 = vmin.f32 %v821_v47, %v696_v34  ;;  %v743_v34 = vld [vmem:[#allocation2 + $0x18] sm:$0xff]  ;;  %v748_v47 = vld [vmem:[#allocation2 + $0x40] sm:$0xff] }
 0x12d   : > { %v697_v44 = vadd.f32 %v684_v38, %v602_v35  ;;  %v713_v31 = vsel %vm372_vm2, %v698_v51, inf  ;;  %v818_v61 = vsel %vm9068_vm3, %v698_v51, inf  ;;  %v744_v38 = vld [vmem:[#allocation2 + $0x20] sm:$0xff] }
 0x12e   : > { %734 = vmin.xlane.f32.xlu0 %v711_v41  ;;  %v827_v2 = vmin.f32 %v823_v43, %v818_v61 }
 0x12f   : > { %v712_v30 = vsel %vm372_vm2, %v697_v44, inf  ;;  %v826_v63 = vmin.f32 %v822_v45, %v697_v44  ;;  %v745_v44 = vld [vmem:[#allocation2 + $0x28] sm:$0xff]  ;;  %v747_v45 = vld [vmem:[#allocation2 + $0x38] sm:$0xff] }
 0x130   : > { %736 = vmin.xlane.f32.xlu1 %v712_v30  ;;  %v828_v8 = vmin.f32 %v827_v2, %v824_v37  ;;  %v749_v37 = vld [vmem:[#allocation2 + $0x48] sm:$0xff] }
 0x131   : > { %v829_v6 = vmin.f32 %v825_v5, %v826_v63 }
 0x132   : > { %738 = vmin.xlane.f32.xlu0 %v713_v31  ;;  %v746_v31 = vld [vmem:[#allocation2 + $0x30] sm:$0xff] }
 0x133   : > { %v830_v49 = vmin.f32 %v828_v8, %v829_v6  ;;  %v750_v8 = vld [vmem:[#allocation2 + $0x50] sm:$0xff] }
 0x135   : > { %v831_v28 = vrot.slane %v830_v49, 4 }
 0x137   : > { %v832_v9 = vmin.f32 %v830_v49, %v831_v28  ;;  %v751_v28 = vld [vmem:[#allocation2 + $0x58] sm:$0xff] }
 0x139   : > { %v833_v46 = vrot.slane %v832_v9, 2 }
 0x13b   : > { %v834_v11 = vmin.f32 %v832_v9, %v833_v46  ;;  %v752_v9 = vld [vmem:[#allocation2 + $0x60] sm:$0xff] }
 0x13d   : > { %v835_v48 = vrot.slane %v834_v11, 1 }
 0x13f   : > { %v836_v3 = vmin.f32 %v834_v11, %v835_v48 }
 0x141   : > { %874 = vperm.xlu1 %5356, %v6186_v57   ;;  %5398 = vrsqrt.f32 %v836_v3  ;;  %vm839_vm4 = vcmp.eq.f32.partialorder %v836_v3, inf  ;;  %v842_v17 = vand.u32 2147483648, %v836_v3  ;;  %vm841_vm5 = vcmp.eq.f32.partialorder %v836_v3, 0.0 }
 0x145   : > { %879 = vperm.xlu1 %5356, %v6192_v1  }
 0x148   : > { %869 = vperm.xlu0 %5355, %v5194_v7  }
 0x149   : > { %884 = vperm.xlu1 %5356, %v5197_v54  }
 0x14c   : > { %914 = vperm.xlu0 %5355, %v5203_v33  }
 0x14d   : > { %889 = vperm.xlu1 %5356, %v6207_v40  }
 0x14e   : > { %v5399_v58 = vpop.eup %5398 }
 0x14f   : > { %v838_v60 = vmul.f32 %v5399_v58, %v836_v3 }
 0x150   : > { %924 = vperm.xlu0 %5355, %v5205_v4  }
 0x151   : > { %894 = vperm.xlu1 %5356, %v5199_v10   ;;  %v840_v16 = vsel %vm839_vm4, %v836_v3, %v838_v60 }
 0x152   : > { %v843_v19 = vsel %vm841_vm5, %v842_v17, %v840_v16 }
 0x153   : > { %v844_v20 = vsel %vm372_vm2, %v843_v19, 0.0 }
 0x154   : > { %5358 = vset.pattern.permute.xlu0 %v5696_v25 }
 0x155   : > { %1058 = vperm.xlu0 %5358, %v5194_v7   ;;  %899 = vperm.xlu1 %5356, %v6219_v14  }
 0x159   : > { %1070 = vperm.xlu0 %5358, %v5197_v54  }
 0x15d   : > { %1078 = vperm.xlu0 %5358, %v5199_v10  }
 0x161   : > { %1086 = vperm.xlu0 %5358, %v5201_v15  }
 0x165   : > { %1094 = vperm.xlu0 %5358, %v5203_v33  }
 0x169   : > { %1102 = vperm.xlu0 %5358, %v5205_v4  }
 0x16d   : > { %5360 = vset.pattern.permute.xlu0 %v5694_v12 }
 0x16e   : > { %963 = vperm.xlu0 %5360, %v5194_v7  }
 0x172   : > { %975 = vperm.xlu0 %5360, %v5197_v54  }
 0x176   : > { %983 = vperm.xlu0 %5360, %v5199_v10  }
 0x179   : > { %846 = vadd.xlane.f32.xlu1 %v844_v20 }
 0x17a   : > { %991 = vperm.xlu0 %5360, %v5201_v15  }
 0x17e   : > { %999 = vperm.xlu0 %5360, %v5203_v33  }
 0x182   : > { %1007 = vperm.xlu0 %5360, %v5205_v4  }
 0x18a   : > { %904 = vperm.xlu1 %5356, %v5201_v15  }
 0x18e   : > { %909 = vperm.xlu1 %5356, %v6232_v36  }
 0x192   : > { %919 = vperm.xlu1 %5356, %v6238_v21  }
 0x196   : > { %929 = vperm.xlu1 %5356, %v6244_v22  }
 0x19a   : > { %5357 = vset.pattern.permute.xlu1 %v5694_v12 }
 0x19b   : > { %967 = vperm.xlu1 %5357, %v6186_v57  }
 0x19f   : > { %971 = vperm.xlu1 %5357, %v6192_v1  }
 0x1a1   : > { %v715_v24 = vpop.xlane.xlu1 %714 }
 0x1a2   : > { %v753_v26 = vmin.f32 %v740_v23, %v715_v24 }
 0x1a3   : > { %v717_v55 = vpop.xlane.xlu0 %716  ;;  %979 = vperm.xlu1 %5357, %v6207_v40  }
 0x1a4   : > { %767 = vst.msk [vmem:[#allocation2] sm:$0xff] %vm766_vm6, %v753_v26  ;;  %v754_v18 = vmin.f32 %v741_v42, %v717_v55 }
 0x1a6   : > { %768 = vst.msk [vmem:[#allocation2 + $0x8] sm:$0xff] %vm766_vm6, %v754_v18 }
 0x1a7   : > { %v719_v29 = vpop.xlane.xlu0 %718  ;;  %987 = vperm.xlu1 %5357, %v6219_v14  }
 0x1a8   : > { %v755_v53 = vmin.f32 %v742_v27, %v719_v29 }
 0x1a9   : > { %v721_v35 = vpop.xlane.xlu1 %720 }
 0x1aa   : > { %769 = vst.msk [vmem:[#allocation2 + $0x10] sm:$0xff] %vm766_vm6, %v755_v53  ;;  %v756_v39 = vmin.f32 %v743_v34, %v721_v35 }
 0x1ab   : > { %v723_v41 = vpop.xlane.xlu0 %722  ;;  %995 = vperm.xlu1 %5357, %v6232_v36  }
 0x1ac   : > { %770 = vst.msk [vmem:[#allocation2 + $0x18] sm:$0xff] %vm766_vm6, %v756_v39  ;;  %v757_v51 = vmin.f32 %v744_v38, %v723_v41  ;;  %v845_v39 = vld [vmem:[#allocation3] sm:$0x1] }
 0x1ad   : > { %v725_v30 = vpop.xlane.xlu1 %724 }
 0x1ae   : > { %771 = vst.msk [vmem:[#allocation2 + $0x20] sm:$0xff] %vm766_vm6, %v757_v51  ;;  %v758_v59 = vmin.f32 %v745_v44, %v725_v30 }
 0x1af   : > { %v727_v61 = vpop.xlane.xlu0 %726  ;;  %1003 = vperm.xlu1 %5357, %v6238_v21  }
 0x1b0   : > { %772 = vst.msk [vmem:[#allocation2 + $0x28] sm:$0xff] %vm766_vm6, %v758_v59  ;;  %v759_v43 = vmin.f32 %v746_v31, %v727_v61 }
 0x1b1   : > { %v729_v32 = vpop.xlane.xlu1 %728 }
 0x1b2   : > { %773 = vst.msk [vmem:[#allocation2 + $0x30] sm:$0xff] %vm766_vm6, %v759_v43  ;;  %v760_v63 = vmin.f32 %v747_v45, %v729_v32 }
 0x1b3   : > { %v731_v2 = vpop.xlane.xlu0 %730  ;;  %1011 = vperm.xlu1 %5357, %v6244_v22  }
 0x1b4   : > { %774 = vst.msk [vmem:[#allocation2 + $0x38] sm:$0xff] %vm766_vm6, %v760_v63  ;;  %v761_v5 = vmin.f32 %v748_v47, %v731_v2 }
 0x1b5   : > { %v733_v6 = vpop.xlane.xlu1 %732 }
 0x1b6   : > { %775 = vst.msk [vmem:[#allocation2 + $0x40] sm:$0xff] %vm766_vm6, %v761_v5  ;;  %v762_v49 = vmin.f32 %v749_v37, %v733_v6 }
 0x1b7   : > { %v735_v7 = vpop.xlane.xlu0 %734  ;;  %5359 = vset.pattern.permute.xlu1 %v5696_v25 }
 0x1b8   : > { %776 = vst.msk [vmem:[#allocation2 + $0x48] sm:$0xff] %vm766_vm6, %v762_v49  ;;  %v763_v54 = vmin.f32 %v750_v8, %v735_v7  ;;  %1062 = vperm.xlu1 %5359, %v6186_v57  }
 0x1b9   : > { %v737_v33 = vpop.xlane.xlu1 %736 }
 0x1ba   : > { %777 = vst.msk [vmem:[#allocation2 + $0x50] sm:$0xff] %vm766_vm6, %v763_v54  ;;  %v764_v4 = vmin.f32 %v751_v28, %v737_v33 }
 0x1bb   : > { %v739_v46 = vpop.xlane.xlu0 %738 }
 0x1bc   : > { %778 = vst.msk [vmem:[#allocation2 + $0x58] sm:$0xff] %vm766_vm6, %v764_v4  ;;  %v765_v10 = vmin.f32 %v752_v9, %v739_v46  ;;  %1066 = vperm.xlu1 %5359, %v6192_v1  }
 0x1be   : > { %779 = vst.msk [vmem:[#allocation2 + $0x60] sm:$0xff] %vm766_vm6, %v765_v10 }
 0x1c0   : > { %1074 = vperm.xlu1 %5359, %v6207_v40   ;;  %v875_v40 = vpop.permute.xlu1 %874 }
 0x1c3   : > { %v870_v11 = vpop.permute.xlu0 %869 }
 0x1c4   : > { %1082 = vperm.xlu1 %5359, %v6219_v14   ;;  %v5207_v14 = vld [vmem:[%s5761_s28 + $0x4] sm:$0x7]  ;;  %v880_v20 = vpop.permute.xlu1 %879 }
 0x1c5   : > { %v6287_v16 = vrot.slane %v5207_v14, %v6060_v56  ;;  %v6292_v19 = vrot.slane %v5207_v14, %v6045_v50 }
 0x1c7   : > { %v915_v57 = vpop.permute.xlu0 %914  ;;  %v937_v8 = vsub.f32 %v875_v40, %v6292_v19  ;;  %v938_v7 = vsub.f32 %v880_v20, %v6292_v19 }
 0x1c8   : > { %1090 = vperm.xlu1 %5359, %v6232_v36   ;;  %v6295_v36 = vrot.slane %v5207_v14, %v6049_v52  ;;  %v885_v26 = vpop.permute.xlu1 %884  ;;  %v945_v4 = vsub.f32 %v915_v57, %v6292_v19 }
 0x1c9   : > { %v939_v54 = vsub.f32 %v885_v26, %v6292_v19  ;;  %v951_v20 = vmul.f32 %v938_v7, %v938_v7 }
 0x1cb   : > { %v6274_v48 = vpop.permute.xlu0 %924 }
 0x1cc   : > { %1098 = vperm.xlu1 %5359, %v6238_v21   ;;  %v936_v21 = vsub.f32 %v870_v11, %v6292_v19  ;;  %v890_v34 = vpop.permute.xlu1 %889 }
 0x1cd   : > { %v940_v46 = vsub.f32 %v890_v34, %v6292_v19 }
 0x1ce   : > { %v949_v42 = vmul.f32 %v936_v21, %v936_v21 }
 0x1d0   : > { %1106 = vperm.xlu1 %5359, %v6244_v22   ;;  %v1059_v3 = vpop.permute.xlu0 %1058  ;;  %v895_v35 = vpop.permute.xlu1 %894 }
 0x1d1   : > { %v1113_v22 = vsub.f32 %v1059_v3, %v6287_v16  ;;  %v950_v3 = vmul.f32 %v937_v8, %v937_v8 }
 0x1d3   : > { %v1126_v55 = vmul.f32 %v1113_v22, %v1113_v22  ;;  %v941_v22 = vsub.f32 %v895_v35, %v6292_v19 }
 0x1d4   : > { %v1071_v15 = vpop.permute.xlu0 %1070  ;;  %5361 = vset.pattern.permute.xlu1 %v5695_v13  ;;  %v900_v38 = vpop.permute.xlu1 %899 }
 0x1d5   : > { %v1116_v10 = vsub.f32 %v1071_v15, %v6287_v16  ;;  %v942_v7 = vsub.f32 %v900_v38, %v6292_v19 }
 0x1d7   : > { %v1129_v15 = vmul.f32 %v1116_v10, %v1116_v10 }
 0x1d8   : > { %v6279_v1 = vpop.permute.xlu0 %1078 }
 0x1dc   : > { %v6281_v58 = vpop.permute.xlu0 %1086 }
 0x1e0   : > { %v6283_v60 = vpop.permute.xlu0 %1094 }
 0x1e4   : > { %v6289_v17 = vpop.permute.xlu0 %1102 }
 0x1e9   : > { %v964_v23 = vpop.permute.xlu0 %963 }
 0x1ea   : > { %v1018_v24 = vsub.f32 %v964_v23, %v6295_v36 }
 0x1ec   : > { %v1031_v18 = vmul.f32 %v1018_v24, %v1018_v24  ;;  %v952_v24 = vmul.f32 %v939_v54, %v939_v54  ;;  %v1120_v54 = vsub.f32 %v6281_v58, %v6287_v16 }
 0x1ed   : > { %v976_v47 = vpop.permute.xlu0 %975 }
 0x1ee   : > { %v1044_v27 = vadd.f32 %v1031_v18, %v949_v42  ;;  %v1021_v49 = vsub.f32 %v976_v47, %v6295_v36  ;;  %v953_v18 = vmul.f32 %v940_v46, %v940_v46 }
 0x1f0   : > { %v6300_v29 = vadd.f32 %v1126_v55, %v1044_v27  ;;  %v1034_v14 = vmul.f32 %v1021_v49, %v1021_v49  ;;  %v6329_v55 = vmul.f32 %v945_v4, %v945_v4  ;;  %v1118_v27 = vsub.f32 %v6279_v1, %v6287_v16 }
 0x1f1   : > { %v984_v37 = vpop.permute.xlu0 %983  ;;  %v947_v49 = vsub.f32 %v6274_v48, %v6292_v19 }
 0x1f2   : > { %v1152_v53 = vsel %vm372_vm2, %v6300_v29, inf  ;;  %v1023_v40 = vsub.f32 %v984_v37, %v6295_v36 }
 0x1f3   : > { %1165 = vmin.xlane.f32.xlu0 %v1152_v53  ;;  %v1047_v53 = vadd.f32 %v1034_v14, %v952_v24 }
 0x1f5   : > { %v992_v33 = vpop.permute.xlu0 %991  ;;  %v6350_v4 = vadd.f32 %v1129_v15, %v1047_v53 }
 0x202   : > { %v847_v41 = vpop.xlane.xlu1 %846 }
 0x203   : > { %v848_v44 = vadd.f32 %v847_v41, %v845_v39  ;;  %v1036_v39 = vmul.f32 %v1023_v40, %v1023_v40  ;;  %v1000_v41 = vpop.permute.xlu0 %999 }
 0x204   : > { %v1027_v10 = vsub.f32 %v1000_v41, %v6295_v36 }
 0x205   : > { %850 = vst.msk [vmem:[#allocation3] sm:$0x1] %vm849_vm7, %v848_v44 }
 0x206   : > { %v905_v51 = vpop.permute.xlu1 %904 }
 0x207   : > { %v1008_v38 = vpop.permute.xlu0 %1007 }
 0x208   : > { %v1029_v15 = vsub.f32 %v1008_v38, %v6295_v36 }
 0x20a   : > { %v6306_v30 = vpop.permute.xlu1 %909 }
 0x20e   : > { %v6308_v31 = vpop.permute.xlu1 %919 }
 0x212   : > { %v6310_v59 = vpop.permute.xlu1 %929 }
 0x216   : > { %v968_v61 = vpop.permute.xlu1 %967 }
 0x217   : > { %v1019_v5 = vsub.f32 %v968_v61, %v6295_v36  ;;  %v954_v61 = vmul.f32 %v941_v22, %v941_v22  ;;  %v1122_v22 = vsub.f32 %v6283_v60, %v6287_v16 }
 0x219   : > { %v1032_v9 = vmul.f32 %v1019_v5, %v1019_v5  ;;  %v1135_v41 = vmul.f32 %v1122_v22, %v1122_v22 }
 0x21a   : > { %v972_v45 = vpop.permute.xlu1 %971 }
 0x21b   : > { %v1020_v28 = vsub.f32 %v972_v45, %v6295_v36  ;;  %v1045_v42 = vadd.f32 %v1032_v9, %v950_v3  ;;  %v1025_v45 = vsub.f32 %v992_v33, %v6295_v36  ;;  %v1049_v33 = vadd.f32 %v1036_v39, %v954_v61 }
 0x21d   : > { %v1033_v23 = vmul.f32 %v1020_v28, %v1020_v28  ;;  %v1131_v28 = vmul.f32 %v1118_v27, %v1118_v27  ;;  %v1038_v46 = vmul.f32 %v1025_v45, %v1025_v45 }
 0x21e   : > { %v980_v43 = vpop.permute.xlu1 %979 }
 0x21f   : > { %v1022_v26 = vsub.f32 %v980_v43, %v6295_v36  ;;  %v943_v43 = vsub.f32 %v905_v51, %v6292_v19  ;;  %v1046_v47 = vadd.f32 %v1033_v23, %v951_v20  ;;  %v1133_v20 = vmul.f32 %v1120_v54, %v1120_v54 }
 0x220   : > { %v944_v23 = vsub.f32 %v6306_v30, %v6292_v19 }
 0x221   : > { %v1035_v37 = vmul.f32 %v1022_v26, %v1022_v26 }
 0x222   : > { %v988_v32 = vpop.permute.xlu1 %987  ;;  %v957_v61 = vmul.f32 %v944_v23, %v944_v23 }
 0x223   : > { %v1024_v5 = vsub.f32 %v988_v32, %v6295_v36  ;;  %v1048_v3 = vadd.f32 %v1035_v37, %v953_v18  ;;  %v1040_v18 = vmul.f32 %v1027_v10, %v1027_v10 }
 0x225   : > { %v1037_v14 = vmul.f32 %v1024_v5, %v1024_v5  ;;  %v1053_v5 = vadd.f32 %v1040_v18, %v6329_v55 }
 0x226   : > { %v996_v63 = vpop.permute.xlu1 %995 }
 0x227   : > { %v1026_v48 = vsub.f32 %v996_v63, %v6295_v36 }
 0x229   : > { %v1039_v60 = vmul.f32 %v1026_v48, %v1026_v48 }
 0x22a   : > { %v6312_v2 = vpop.permute.xlu1 %1003 }
 0x22b   : > { %v1028_v30 = vsub.f32 %v6312_v2, %v6295_v36 }
 0x22e   : > { %v6315_v6 = vpop.permute.xlu1 %1011 }
 0x233   : > { %v1063_v11 = vpop.permute.xlu1 %1062 }
 0x234   : > { %v1114_v21 = vsub.f32 %v1063_v11, %v6287_v16  ;;  %v956_v11 = vmul.f32 %v943_v43, %v943_v43  ;;  %v946_v43 = vsub.f32 %v6308_v31, %v6292_v19 }
 0x236   : > { %v1127_v57 = vmul.f32 %v1114_v21, %v1114_v21  ;;  %v955_v21 = vmul.f32 %v942_v7, %v942_v7  ;;  %v1051_v27 = vadd.f32 %v1038_v46, %v956_v11  ;;  %v948_v46 = vsub.f32 %v6310_v59, %v6292_v19 }
 0x237   : > { %v1067_v34 = vpop.permute.xlu1 %1066 }
 0x238   : > { %v1115_v44 = vsub.f32 %v1067_v34, %v6287_v16  ;;  %v6334_v35 = vadd.f32 %v1127_v57, %v1045_v42  ;;  %v1155_v42 = vsel %vm372_vm2, %v6350_v4, inf  ;;  %v6367_v57 = vadd.f32 %v1131_v28, %v1049_v33 }
 0x239   : > { %v1050_v34 = vadd.f32 %v1037_v14, %v955_v21  ;;  %v1146_v7 = vadd.f32 %v1133_v20, %v1051_v27  ;;  %v1030_v28 = vsub.f32 %v6315_v6, %v6295_v36  ;;  %v1148_v6 = vadd.f32 %v1135_v41, %v1053_v5  ;;  %v5212_v5 = vld [vmem:[%s9065_s0 + $0xf0] sm:$0xff] }
 0x23a   : > { %v1128_v8 = vmul.f32 %v1115_v44, %v1115_v44  ;;  %v1153_v1 = vsel %vm372_vm2, %v6334_v35, inf  ;;  %v1124_v44 = vsub.f32 %v6289_v17, %v6287_v16  ;;  %v1157_v2 = vsel %vm372_vm2, %v6367_v57, inf }
 0x23b   : > { %1167 = vmin.xlane.f32.xlu1 %v1153_v1  ;;  %v1075_v51 = vpop.permute.xlu1 %1074  ;;  %v1052_v1 = vadd.f32 %v1039_v60, %v957_v61  ;;  %v1041_v17 = vmul.f32 %v1028_v30, %v1028_v30  ;;  %v1159_v36 = vsel %vm372_vm2, %v1146_v7, inf  ;;  %v1161_v21 = vsel %vm372_vm2, %v1148_v6, inf }
 0x23c   : > { %v1117_v9 = vsub.f32 %v1075_v51, %v6287_v16  ;;  %v6348_v32 = vadd.f32 %v1128_v8, %v1046_v47  ;;  %v1042_v8 = vmul.f32 %v1029_v15, %v1029_v15  ;;  %v960_v51 = vmul.f32 %v947_v49, %v947_v49 }
 0x23d   : > { %v1137_v11 = vmul.f32 %v1124_v44, %v1124_v44  ;;  %v1247_v23 = vmin.f32 %v6350_v4, %v1146_v7  ;;  %v1245_v18 = vmin.f32 %v6334_v35, %v6367_v57 }
 0x23e   : > { %v1130_v40 = vmul.f32 %v1117_v9, %v1117_v9  ;;  %v1154_v58 = vsel %vm372_vm2, %v6348_v32, inf  ;;  %v959_v9 = vmul.f32 %v946_v43, %v946_v43  ;;  %v1055_v48 = vadd.f32 %v1042_v8, %v960_v51  ;;  %v5208_v43 = vld [vmem:[%s9065_s0 + $0xd0] sm:$0xff]  ;;  %v5213_v8 = vld [vmem:[%s9065_s0 + $0xf8] sm:$0xff] }
 0x23f   : > { %1169 = vmin.xlane.f32.xlu0 %v1154_v58  ;;  %v1083_v24 = vpop.permute.xlu1 %1082  ;;  %v961_v58 = vmul.f32 %v948_v46, %v948_v46 }
 0x240   : > { %v1119_v63 = vsub.f32 %v1083_v24, %v6287_v16  ;;  %v6365_v26 = vadd.f32 %v1130_v40, %v1048_v3  ;;  %v1054_v38 = vadd.f32 %v1041_v17, %v959_v9  ;;  %v1043_v3 = vmul.f32 %v1030_v28, %v1030_v28  ;;  %v1192_v9 = vld [vmem:[#allocation2 + $0x68] sm:$0xff] }
 0x241   : > { %v1150_v20 = vadd.f32 %v1137_v11, %v1055_v48  ;;  %v5218_v11 = vld [vmem:[%s9065_s0 + $0x120] sm:$0xff]  ;;  %v5220_v48 = vld [vmem:[%s9065_s0 + $0x130] sm:$0xff] }
 0x242   : > { %v1132_v53 = vmul.f32 %v1119_v63, %v1119_v63  ;;  %v1156_v39 = vsel %vm372_vm2, %v6365_v26, inf  ;;  %v1056_v22 = vadd.f32 %v1043_v3, %v961_v58  ;;  %v1193_v3 = vld [vmem:[#allocation2 + $0x70] sm:$0xff] }
 0x243   : > { %1171 = vmin.xlane.f32.xlu0 %v1155_v42  ;;  %1173 = vmin.xlane.f32.xlu1 %v1156_v39  ;;  %v1091_v45 = vpop.permute.xlu1 %1090  ;;  %v1244_v42 = vmin.f32 %v6300_v29, %v6365_v26  ;;  %v1163_v4 = vsel %vm372_vm2, %v1150_v20, inf  ;;  %v1249_v29 = vmin.f32 %v1245_v18, %v1148_v6  ;;  %v1251_v26 = vmin.f32 %v1247_v23, %v1150_v20  ;;  %v5217_v6 = vld [vmem:[%s9065_s0 + $0x118] sm:$0xff] }
 0x244   : > { %v1121_v47 = vsub.f32 %v1091_v45, %v6287_v16  ;;  %v1145_v37 = vadd.f32 %v1132_v53, %v1050_v34 }
 0x246   : > { %v1134_v54 = vmul.f32 %v1121_v47, %v1121_v47  ;;  %v1158_v31 = vsel %vm372_vm2, %v1145_v37, inf }
 0x247   : > { %1175 = vmin.xlane.f32.xlu0 %v1157_v2  ;;  %1177 = vmin.xlane.f32.xlu1 %v1158_v31  ;;  %v1099_v33 = vpop.permute.xlu1 %1098  ;;  %v5210_v2 = vld [vmem:[%s9065_s0 + $0xe0] sm:$0xff] }
 0x248   : > { %v1123_v55 = vsub.f32 %v1099_v33, %v6287_v16  ;;  %v1147_v10 = vadd.f32 %v1134_v54, %v1052_v1  ;;  %v5214_v54 = vld [vmem:[%s9065_s0 + $0x100] sm:$0xff]  ;;  %v5215_v33 = vld [vmem:[%s9065_s0 + $0x108] sm:$0xff] }
 0x24a   : > { %v1136_v14 = vmul.f32 %v1123_v55, %v1123_v55  ;;  %v1160_v49 = vsel %vm372_vm2, %v1147_v10, inf  ;;  %v1248_v27 = vmin.f32 %v1244_v42, %v1147_v10  ;;  %v5216_v10 = vld [vmem:[%s9065_s0 + $0x110] sm:$0xff]  ;;  %v1198_v42 = vld [vmem:[#allocation2 + $0x98] sm:$0xff] }
 0x24b   : > { %1179 = vmin.xlane.f32.xlu0 %v1159_v36  ;;  %1181 = vmin.xlane.f32.xlu1 %v1160_v49  ;;  %v1107_v40 = vpop.permute.xlu1 %1106  ;;  %v5209_v36 = vld [vmem:[%s9065_s0 + $0xd8] sm:$0xff] }
 0x24c   : > { %v1125_v19 = vsub.f32 %v1107_v40, %v6287_v16  ;;  %v1149_v59 = vadd.f32 %v1136_v14, %v1054_v38  ;;  %v1246_v16 = vmin.f32 %v6348_v32, %v1145_v37  ;;  %v5211_v37 = vld [vmem:[%s9065_s0 + $0xe8] sm:$0xff]  ;;  %v1194_v40 = vld [vmem:[#allocation2 + $0x78] sm:$0xff] }
 0x24d   : > { %v5219_v38 = vld [vmem:[%s9065_s0 + $0x128] sm:$0xff] }
 0x24e   : > { %v1138_v24 = vmul.f32 %v1125_v19, %v1125_v19  ;;  %v1162_v63 = vsel %vm372_vm2, %v1149_v59, inf  ;;  %v1250_v60 = vmin.f32 %v1246_v16, %v1149_v59  ;;  %v1195_v59 = vld [vmem:[#allocation2 + $0x80] sm:$0xff] }
 0x24f   : > { %1183 = vmin.xlane.f32.xlu0 %v1161_v21  ;;  %1185 = vmin.xlane.f32.xlu1 %v1162_v63  ;;  %v1196_v21 = vld [vmem:[#allocation2 + $0x88] sm:$0xff]  ;;  %v1197_v63 = vld [vmem:[#allocation2 + $0x90] sm:$0xff] }
 0x250   : > { %v1151_v15 = vadd.f32 %v1138_v24, %v1056_v22  ;;  %v1254_v32 = vmin.f32 %v1250_v60, %v1251_v26  ;;  %v1199_v60 = vld [vmem:[#allocation2 + $0xa0] sm:$0xff] }
 0x252   : > { %v1164_v34 = vsel %vm372_vm2, %v1151_v15, inf  ;;  %v1243_v30 = vsel %vm9068_vm3, %v1151_v15, inf }
 0x253   : > { %1187 = vmin.xlane.f32.xlu0 %v1163_v4  ;;  %v1252_v35 = vmin.f32 %v1248_v27, %v1243_v30  ;;  %1189 = vmin.xlane.f32.xlu1 %v1164_v34  ;;  %v1200_v4 = vld [vmem:[#allocation2 + $0xa8] sm:$0xff] }
 0x255   : > { %v1253_v57 = vmin.f32 %v1252_v35, %v1249_v29  ;;  %v1201_v35 = vld [vmem:[#allocation2 + $0xb0] sm:$0xff] }
 0x257   : > { %v1255_v53 = vmin.f32 %v1253_v57, %v1254_v32  ;;  %v1202_v32 = vld [vmem:[#allocation2 + $0xb8] sm:$0xff] }
 0x259   : > { %v1256_v39 = vrot.slane %v1255_v53, 4 }
 0x25b   : > { %v1257_v41 = vmin.f32 %v1255_v53, %v1256_v39 }
 0x25d   : > { %v1258_v44 = vrot.slane %v1257_v41, 2 }
 0x25f   : > { %v1259_v61 = vmin.f32 %v1257_v41, %v1258_v44  ;;  %v1203_v44 = vld [vmem:[#allocation2 + $0xc0] sm:$0xff] }
 0x261   : > { %v1260_v45 = vrot.slane %v1259_v61, 1 }
 0x263   : > { %v1261_v47 = vmin.f32 %v1259_v61, %v1260_v45  ;;  %v1204_v61 = vld [vmem:[#allocation2 + $0xc8] sm:$0xff] }
 0x264   : > { %1294 = vperm.xlu1 %5361, %v5208_v43  }
 0x265   : > { %5400 = vrsqrt.f32 %v1261_v47  ;;  %vm1264_vm8 = vcmp.eq.f32.partialorder %v1261_v47, inf  ;;  %v1267_v17 = vand.u32 2147483648, %v1261_v47  ;;  %vm1266_vm9 = vcmp.eq.f32.partialorder %v1261_v47, 0.0 }
 0x268   : > { %1304 = vperm.xlu1 %5361, %v5210_v2  }
 0x26c   : > { %1309 = vperm.xlu1 %5361, %v5211_v37  }
 0x270   : > { %1314 = vperm.xlu1 %5361, %v5212_v5  }
 0x272   : > { %v5401_v1 = vpop.eup %5400 }
 0x273   : > { %v1263_v7 = vmul.f32 %v5401_v1, %v1261_v47 }
 0x274   : > { %1319 = vperm.xlu1 %5361, %v5213_v8  }
 0x275   : > { %v1265_v28 = vsel %vm1264_vm8, %v1261_v47, %v1263_v7 }
 0x276   : > { %v1268_v31 = vsel %vm1266_vm9, %v1267_v17, %v1265_v28 }
 0x277   : > { %v1269_v51 = vsel %vm372_vm2, %v1268_v31, 0.0  ;;  %v1271_v31 = vld [vmem:[#allocation3 + $0x1] sm:$0x1] }
 0x278   : > { %1272 = vadd.xlane.f32.xlu0 %v1269_v51  ;;  %1324 = vperm.xlu1 %5361, %v5214_v54  }
 0x27c   : > { %v1166_v46 = vpop.xlane.xlu0 %1165  ;;  %1329 = vperm.xlu1 %5361, %v5215_v33  }
 0x27d   : > { %v1205_v55 = vmin.f32 %v1192_v9, %v1166_v46 }
 0x27f   : > { %1218 = vst.msk [vmem:[#allocation2 + $0x68] sm:$0xff] %vm766_vm6, %v1205_v55 }
 0x280   : > { %1334 = vperm.xlu1 %5361, %v5216_v10  }
 0x284   : > { %1344 = vperm.xlu1 %5361, %v5218_v11  }
 0x288   : > { %1354 = vperm.xlu1 %5361, %v5220_v48  }
 0x28c   : > { %5362 = vset.pattern.permute.xlu1 %v5694_v12 }
 0x28d   : > { %1392 = vperm.xlu1 %5362, %v5209_v36  }
 0x28e   : > { %1388 = vperm.xlu0 %5360, %v5208_v43  }
 0x291   : > { %1396 = vperm.xlu1 %5362, %v5210_v2  }
 0x292   : > { %1400 = vperm.xlu0 %5360, %v5211_v37  }
 0x295   : > { %1404 = vperm.xlu1 %5362, %v5212_v5  }
 0x296   : > { %1408 = vperm.xlu0 %5360, %v5213_v8  }
 0x299   : > { %1412 = vperm.xlu1 %5362, %v5214_v54  }
 0x29a   : > { %1416 = vperm.xlu0 %5360, %v5215_v33  }
 0x29d   : > { %1420 = vperm.xlu1 %5362, %v5216_v10  }
 0x29e   : > { %1424 = vperm.xlu0 %5360, %v5217_v6  }
 0x2a1   : > { %1428 = vperm.xlu1 %5362, %v5218_v11  }
 0x2a2   : > { %1432 = vperm.xlu0 %5360, %v5219_v38  }
 0x2a5   : > { %1436 = vperm.xlu1 %5362, %v5220_v48  }
 0x2a6   : > { %5363 = vset.pattern.permute.xlu0 %v5696_v25 }
 0x2a7   : > { %1483 = vperm.xlu0 %5363, %v5208_v43  }
 0x2a9   : > { %5364 = vset.pattern.permute.xlu1 %v5696_v25 }
 0x2aa   : > { %1487 = vperm.xlu1 %5364, %v5209_v36  }
 0x2ab   : > { %1495 = vperm.xlu0 %5363, %v5211_v37  }
 0x2ae   : > { %1491 = vperm.xlu1 %5364, %v5210_v2  }
 0x2af   : > { %1503 = vperm.xlu0 %5363, %v5213_v8  }
 0x2b2   : > { %1499 = vperm.xlu1 %5364, %v5212_v5  }
 0x2b3   : > { %1511 = vperm.xlu0 %5363, %v5215_v33  }
 0x2b6   : > { %1507 = vperm.xlu1 %5364, %v5214_v54  }
 0x2b7   : > { %1519 = vperm.xlu0 %5363, %v5217_v6  }
 0x2ba   : > { %1515 = vperm.xlu1 %5364, %v5216_v10  }
 0x2bb   : > { %1527 = vperm.xlu0 %5363, %v5219_v38  }
 0x2be   : > { %1523 = vperm.xlu1 %5364, %v5218_v11  }
 0x2bf   : > { %5365 = vset.pattern.permute.xlu0 %v5695_v13 }
 0x2c0   : > { %1299 = vperm.xlu0 %5365, %v5209_v36  }
 0x2c2   : > { %1531 = vperm.xlu1 %5364, %v5220_v48  }
 0x2c4   : > { %1339 = vperm.xlu0 %5365, %v5217_v6   ;;  %v1168_v14 = vpop.xlane.xlu1 %1167 }
 0x2c5   : > { %v1206_v49 = vmin.f32 %v1193_v3, %v1168_v14  ;;  %v5221_v14 = vld [vmem:[%s5761_s28 + $0x8] sm:$0x7] }
 0x2c6   : > { %5366 = vset.pattern.permute.xlu1 %v5695_v13 }
 0x2c7   : > { %1219 = vst.msk [vmem:[#allocation2 + $0x70] sm:$0xff] %vm766_vm6, %v1206_v49 }
 0x2c8   : > { %v1170_v58 = vpop.xlane.xlu0 %1169  ;;  %1349 = vperm.xlu0 %5365, %v5219_v38  }
 0x2c9   : > { %v1207_v19 = vmin.f32 %v1194_v40, %v1170_v58  ;;  %v6494_v40 = vrot.slane %v5221_v14, %v6049_v52 }
 0x2cb   : > { %1220 = vst.msk [vmem:[#allocation2 + $0x78] sm:$0xff] %vm766_vm6, %v1207_v19  ;;  %v6499_v19 = vrot.slane %v5221_v14, %v6045_v50 }
 0x2cc   : > { %v1172_v20 = vpop.xlane.xlu0 %1171  ;;  %v1174_v22 = vpop.xlane.xlu1 %1173 }
 0x2cd   : > { %v1208_v23 = vmin.f32 %v1195_v59, %v1172_v20  ;;  %v1209_v24 = vmin.f32 %v1196_v21, %v1174_v22 }
 0x2cf   : > { %1221 = vst.msk [vmem:[#allocation2 + $0x80] sm:$0xff] %vm766_vm6, %v1208_v23  ;;  %1222 = vst.msk [vmem:[#allocation2 + $0x88] sm:$0xff] %vm766_vm6, %v1209_v24  ;;  %v6508_v23 = vrot.slane %v5221_v14, %v6060_v56 }
 0x2d0   : > { %v1176_v18 = vpop.xlane.xlu0 %1175  ;;  %v1178_v16 = vpop.xlane.xlu1 %1177 }
 0x2d1   : > { %v1210_v15 = vmin.f32 %v1197_v63, %v1176_v18  ;;  %v1211_v27 = vmin.f32 %v1198_v42, %v1178_v16 }
 0x2d3   : > { %1223 = vst.msk [vmem:[#allocation2 + $0x90] sm:$0xff] %vm766_vm6, %v1210_v15  ;;  %1224 = vst.msk [vmem:[#allocation2 + $0x98] sm:$0xff] %vm766_vm6, %v1211_v27 }
 0x2d4   : > { %v1180_v34 = vpop.xlane.xlu0 %1179  ;;  %v1182_v30 = vpop.xlane.xlu1 %1181 }
 0x2d5   : > { %v1212_v29 = vmin.f32 %v1199_v60, %v1180_v34  ;;  %v1213_v26 = vmin.f32 %v1200_v4, %v1182_v30 }
 0x2d7   : > { %1225 = vst.msk [vmem:[#allocation2 + $0xa0] sm:$0xff] %vm766_vm6, %v1212_v29  ;;  %1226 = vst.msk [vmem:[#allocation2 + $0xa8] sm:$0xff] %vm766_vm6, %v1213_v26 }
 0x2d8   : > { %v1184_v57 = vpop.xlane.xlu0 %1183  ;;  %v1186_v53 = vpop.xlane.xlu1 %1185 }
 0x2d9   : > { %v1214_v39 = vmin.f32 %v1201_v35, %v1184_v57  ;;  %v1215_v41 = vmin.f32 %v1202_v32, %v1186_v53 }
 0x2db   : > { %1227 = vst.msk [vmem:[#allocation2 + $0xb0] sm:$0xff] %vm766_vm6, %v1214_v39  ;;  %1228 = vst.msk [vmem:[#allocation2 + $0xb8] sm:$0xff] %vm766_vm6, %v1215_v41 }
 0x2dc   : > { %v1188_v45 = vpop.xlane.xlu0 %1187  ;;  %v1190_v43 = vpop.xlane.xlu1 %1189 }
 0x2dd   : > { %v1216_v47 = vmin.f32 %v1203_v44, %v1188_v45  ;;  %v1217_v2 = vmin.f32 %v1204_v61, %v1190_v43 }
 0x2df   : > { %1229 = vst.msk [vmem:[#allocation2 + $0xc0] sm:$0xff] %vm766_vm6, %v1216_v47  ;;  %1230 = vst.msk [vmem:[#allocation2 + $0xc8] sm:$0xff] %vm766_vm6, %v1217_v2 }
 0x2e0   : > { %v1295_v37 = vpop.permute.xlu1 %1294 }
 0x2e1   : > { %v1361_v22 = vsub.f32 %v1295_v37, %v6499_v19 }
 0x2e3   : > { %v1374_v18 = vmul.f32 %v1361_v22, %v1361_v22 }
 0x2e4   : > { %v1305_v5 = vpop.permute.xlu1 %1304 }
 0x2e5   : > { %v1363_v34 = vsub.f32 %v1305_v5, %v6499_v19 }
 0x2e7   : > { %v1376_v41 = vmul.f32 %v1363_v34, %v1363_v34 }
 0x2e8   : > { %v1310_v8 = vpop.permute.xlu1 %1309 }
 0x2e9   : > { %v1364_v26 = vsub.f32 %v1310_v8, %v6499_v19 }
 0x2eb   : > { %v1377_v47 = vmul.f32 %v1364_v26, %v1364_v26 }
 0x2ec   : > { %v6471_v1 = vpop.permute.xlu1 %1314 }
 0x2f0   : > { %v1320_v7 = vpop.permute.xlu1 %1319 }
 0x2f1   : > { %v1366_v2 = vsub.f32 %v1320_v7, %v6499_v19 }
 0x2f4   : > { %v6473_v17 = vpop.permute.xlu1 %1324 }
 0x2f8   : > { %v6475_v28 = vpop.permute.xlu1 %1329 }
 0x2fc   : > { %v6477_v54 = vpop.permute.xlu1 %1334 }
 0x300   : > { %v6479_v51 = vpop.permute.xlu1 %1344 }
 0x301   : > { %v1273_v33 = vpop.xlane.xlu0 %1272 }
 0x302   : > { %v1274_v9 = vadd.f32 %v1273_v33, %v1271_v31 }
 0x304   : > { %1275 = vst.msk [vmem:[#allocation3 + $0x1] sm:$0x1] %vm849_vm7, %v1274_v9  ;;  %v6482_v46 = vpop.permute.xlu1 %1354 }
 0x308   : > { %v6484_v55 = vpop.permute.xlu1 %1392 }
 0x309   : > { %v1389_v10 = vpop.permute.xlu0 %1388 }
 0x30a   : > { %v1443_v21 = vsub.f32 %v1389_v10, %v6494_v40 }
 0x30c   : > { %v1397_v11 = vpop.permute.xlu1 %1396  ;;  %v1456_v63 = vmul.f32 %v1443_v21, %v1443_v21  ;;  %v1368_v21 = vsub.f32 %v6475_v28, %v6499_v19 }
 0x30d   : > { %v1401_v48 = vpop.permute.xlu0 %1400  ;;  %v1445_v15 = vsub.f32 %v1397_v11, %v6494_v40 }
 0x30e   : > { %v1469_v27 = vadd.f32 %v1456_v63, %v1374_v18  ;;  %v1446_v30 = vsub.f32 %v1401_v48, %v6494_v40 }
 0x30f   : > { %v1458_v32 = vmul.f32 %v1445_v15, %v1445_v15 }
 0x310   : > { %v6486_v36 = vpop.permute.xlu1 %1404  ;;  %v1459_v44 = vmul.f32 %v1446_v30, %v1446_v30  ;;  %v1365_v30 = vsub.f32 %v6471_v1, %v6499_v19  ;;  %v1373_v1 = vsub.f32 %v6482_v46, %v6499_v19 }
 0x311   : > { %v1409_v6 = vpop.permute.xlu0 %1408  ;;  %v1471_v37 = vadd.f32 %v1458_v32, %v1376_v41 }
 0x312   : > { %v1448_v61 = vsub.f32 %v1409_v6, %v6494_v40  ;;  %v1472_v9 = vadd.f32 %v1459_v44, %v1377_v47  ;;  %v1379_v6 = vmul.f32 %v1366_v2, %v1366_v2 }
 0x314   : > { %v6488_v38 = vpop.permute.xlu1 %1412  ;;  %v1461_v10 = vmul.f32 %v1448_v61, %v1448_v61 }
 0x315   : > { %v1417_v3 = vpop.permute.xlu0 %1416  ;;  %v1449_v26 = vsub.f32 %v6488_v38, %v6494_v40 }
 0x316   : > { %v1450_v11 = vsub.f32 %v1417_v3, %v6494_v40 }
 0x318   : > { %v6491_v49 = vpop.permute.xlu1 %1420  ;;  %v1463_v3 = vmul.f32 %v1450_v11, %v1450_v11 }
 0x319   : > { %v6496_v58 = vpop.permute.xlu0 %1424 }
 0x31c   : > { %v6501_v59 = vpop.permute.xlu1 %1428 }
 0x31d   : > { %v6504_v20 = vpop.permute.xlu0 %1432 }
 0x320   : > { %v6510_v24 = vpop.permute.xlu1 %1436 }
 0x322   : > { %v1484_v42 = vpop.permute.xlu0 %1483 }
 0x323   : > { %v1538_v16 = vsub.f32 %v1484_v42, %v6508_v23 }
 0x325   : > { %v1551_v60 = vmul.f32 %v1538_v16, %v1538_v16  ;;  %v6514_v4 = vpop.permute.xlu1 %1487  ;;  %v1474_v16 = vadd.f32 %v1461_v10, %v1379_v6 }
 0x326   : > { %v1496_v29 = vpop.permute.xlu0 %1495 }
 0x327   : > { %v6519_v35 = vadd.f32 %v1551_v60, %v1469_v27  ;;  %v1541_v57 = vsub.f32 %v1496_v29, %v6508_v23  ;;  %v1381_v27 = vmul.f32 %v1368_v21, %v1368_v21  ;;  %v1447_v29 = vsub.f32 %v6486_v36, %v6494_v40 }
 0x328   : > { %v1444_v36 = vsub.f32 %v6484_v55, %v6494_v40  ;;  %v1452_v55 = vsub.f32 %v6496_v58, %v6494_v40  ;;  %v1453_v58 = vsub.f32 %v6501_v59, %v6494_v40 }
 0x329   : > { %v1492_v53 = vpop.permute.xlu1 %1491  ;;  %v1577_v39 = vsel %vm372_vm2, %v6519_v35, inf  ;;  %v1554_v5 = vmul.f32 %v1541_v57, %v1541_v57  ;;  %v1367_v57 = vsub.f32 %v6473_v17, %v6499_v19  ;;  %v1476_v41 = vadd.f32 %v1463_v3, %v1381_v27 }
 0x32a   : > { %v1540_v45 = vsub.f32 %v1492_v53, %v6508_v23  ;;  %v1504_v43 = vpop.permute.xlu0 %1503  ;;  %1590 = vmin.xlane.f32.xlu0 %v1577_v39  ;;  %v1369_v53 = vsub.f32 %v6477_v54, %v6499_v19  ;;  %v1371_v39 = vsub.f32 %v6479_v51, %v6499_v19  ;;  %v1460_v17 = vmul.f32 %v1447_v29, %v1447_v29 }
 0x32b   : > { %v1543_v31 = vsub.f32 %v1504_v43, %v6508_v23  ;;  %v6538_v42 = vadd.f32 %v1554_v5, %v1472_v9  ;;  %v1451_v54 = vsub.f32 %v6491_v49, %v6494_v40  ;;  %v1378_v43 = vmul.f32 %v1365_v30, %v1365_v30 }
 0x32c   : > { %v1553_v8 = vmul.f32 %v1540_v45, %v1540_v45  ;;  %v1462_v45 = vmul.f32 %v1449_v26, %v1449_v26  ;;  %v1380_v47 = vmul.f32 %v1367_v57, %v1367_v57  ;;  %v1382_v2 = vmul.f32 %v1369_v53, %v1369_v53 }
 0x32d   : > { %v1500_v33 = vpop.permute.xlu1 %1499  ;;  %v1556_v22 = vmul.f32 %v1543_v31, %v1543_v31  ;;  %v1580_v28 = vsel %vm372_vm2, %v6538_v42, inf  ;;  %v1384_v46 = vmul.f32 %v1371_v39, %v1371_v39  ;;  %v1455_v5 = vsub.f32 %v6510_v24, %v6494_v40 }
 0x32e   : > { %v1512_v48 = vpop.permute.xlu0 %1511  ;;  %v6530_v14 = vadd.f32 %v1553_v8, %v1471_v37  ;;  %v1386_v37 = vmul.f32 %v1373_v1, %v1373_v1  ;;  %v1542_v8 = vsub.f32 %v1500_v33, %v6508_v23  ;;  %v1457_v9 = vmul.f32 %v1444_v36, %v1444_v36 }
 0x32f   : > { %v1545_v7 = vsub.f32 %v1512_v48, %v6508_v23  ;;  %v6543_v34 = vadd.f32 %v1556_v22, %v1474_v16  ;;  %v1539_v49 = vsub.f32 %v6514_v4, %v6508_v23  ;;  %v1473_v48 = vadd.f32 %v1460_v17, %v1378_v43 }
 0x330   : > { %v1579_v63 = vsel %vm372_vm2, %v6530_v14, inf  ;;  %v1475_v6 = vadd.f32 %v1462_v45, %v1380_v47  ;;  %v1464_v21 = vmul.f32 %v1451_v54, %v1451_v54  ;;  %v1468_v16 = vmul.f32 %v1455_v5, %v1455_v5 }
 0x331   : > { %1594 = vmin.xlane.f32.xlu0 %v1579_v63  ;;  %v1508_v18 = vpop.permute.xlu1 %1507  ;;  %v1558_v60 = vmul.f32 %v1545_v7, %v1545_v7  ;;  %v1582_v38 = vsel %vm372_vm2, %v6543_v34, inf  ;;  %v1465_v63 = vmul.f32 %v1452_v55, %v1452_v55  ;;  %v1555_v3 = vmul.f32 %v1542_v8, %v1542_v8 }
 0x332   : > { %v1520_v15 = vpop.permute.xlu0 %1519  ;;  %v1544_v33 = vsub.f32 %v1508_v18, %v6508_v23  ;;  %v1477_v26 = vadd.f32 %v1464_v21, %v1382_v2  ;;  %v1466_v57 = vmul.f32 %v1453_v58, %v1453_v58  ;;  %v1454_v18 = vsub.f32 %v6504_v20, %v6494_v40 }
 0x333   : > { %v6564_v61 = vadd.f32 %v1558_v60, %v1476_v41  ;;  %v1547_v27 = vsub.f32 %v1520_v15, %v6508_v23  ;;  %v1481_v36 = vadd.f32 %v1468_v16, %v1386_v37  ;;  %v1568_v45 = vadd.f32 %v1555_v3, %v1473_v48 }
 0x334   : > { %v1557_v53 = vmul.f32 %v1544_v33, %v1544_v33  ;;  %v1479_v2 = vadd.f32 %v1466_v57, %v1384_v46  ;;  %v1467_v40 = vmul.f32 %v1454_v18, %v1454_v18 }
 0x335   : > { %1596 = vmin.xlane.f32.xlu0 %v1580_v28  ;;  %v1516_v32 = vpop.permute.xlu1 %1515  ;;  %v1584_v11 = vsel %vm372_vm2, %v6564_v61, inf  ;;  %v1552_v28 = vmul.f32 %v1539_v49, %v1539_v49 }
 0x336   : > { %v1528_v44 = vpop.permute.xlu0 %1527  ;;  %v1546_v22 = vsub.f32 %v1516_v32, %v6508_v23  ;;  %v1570_v8 = vadd.f32 %v1557_v53, %v1475_v6 }
 0x337   : > { %v1549_v15 = vsub.f32 %v1528_v44, %v6508_v23  ;;  %v1669_v44 = vmin.f32 %v6519_v35, %v1568_v45 }
 0x338   : > { %v1559_v39 = vmul.f32 %v1546_v22, %v1546_v22  ;;  %v1671_v21 = vmin.f32 %v6530_v14, %v1570_v8 }
 0x339   : > { %1600 = vmin.xlane.f32.xlu0 %v1582_v38  ;;  %v1524_v51 = vpop.permute.xlu1 %1523  ;;  %v1560_v38 = vmul.f32 %v1547_v27, %v1547_v27 }
 0x33a   : > { %v1548_v30 = vsub.f32 %v1524_v51, %v6508_v23  ;;  %v1572_v37 = vadd.f32 %v1559_v39, %v1477_v26  ;;  %v5224_v26 = vld [vmem:[%s9065_s0 + $0x148] sm:$0xff]  ;;  %v5225_v39 = vld [vmem:[%s9065_s0 + $0x150] sm:$0xff] }
 0x33b   : > { %v1300_v31 = vpop.permute.xlu0 %1299 }
 0x33c   : > { %v1362_v10 = vsub.f32 %v1300_v31, %v6499_v19  ;;  %v1561_v54 = vmul.f32 %v1548_v30, %v1548_v30  ;;  %v1562_v31 = vmul.f32 %v1549_v15, %v1549_v15  ;;  %v1673_v35 = vmin.f32 %v1669_v44, %v1572_v37  ;;  %v5229_v15 = vld [vmem:[%s9065_s0 + $0x170] sm:$0xff]  ;;  %v1622_v44 = vld [vmem:[#allocation2 + $0xf8] sm:$0xff] }
 0x33d   : > { %1604 = vmin.xlane.f32.xlu0 %v1584_v11  ;;  %v1532_v24 = vpop.permute.xlu1 %1531 }
 0x33e   : > { %v1375_v7 = vmul.f32 %v1362_v10, %v1362_v10  ;;  %v1550_v4 = vsub.f32 %v1532_v24, %v6508_v23  ;;  %v1581_v23 = vsel %vm372_vm2, %v1568_v45, inf  ;;  %v1574_v46 = vadd.f32 %v1561_v54, %v1479_v2  ;;  %v5223_v45 = vld [vmem:[%s9065_s0 + $0x140] sm:$0xff]  ;;  %v1617_v2 = vld [vmem:[#allocation2 + $0xd0] sm:$0xff] }
 0x33f   : > { %v1340_v60 = vpop.permute.xlu0 %1339  ;;  %v1672_v10 = vmin.f32 %v6538_v42, %v6564_v61  ;;  %v5231_v54 = vld [vmem:[%s9065_s0 + $0x180] sm:$0xff] }
 0x340   : > { %v1470_v29 = vadd.f32 %v1457_v9, %v1375_v7  ;;  %v1370_v59 = vsub.f32 %v1340_v60, %v6499_v19  ;;  %v1563_v32 = vmul.f32 %v1550_v4, %v1550_v4  ;;  %v1675_v33 = vmin.f32 %v1671_v21, %v1574_v46  ;;  %v1626_v21 = vld [vmem:[#allocation2 + $0x118] sm:$0xff] }
 0x341   : > { %v1585_v7 = vsel %vm372_vm2, %v1572_v37, inf  ;;  %v1620_v37 = vld [vmem:[#allocation2 + $0xe8] sm:$0xff] }
 0x342   : > { %v1383_v41 = vmul.f32 %v1370_v59, %v1370_v59  ;;  %v1565_v1 = vadd.f32 %v1552_v28, %v1470_v29  ;;  %v1576_v20 = vadd.f32 %v1563_v32, %v1481_v36  ;;  %v5222_v29 = vld [vmem:[%s9065_s0 + $0x138] sm:$0xff]  ;;  %v5227_v36 = vld [vmem:[%s9065_s0 + $0x160] sm:$0xff] }
 0x343   : > { %v1350_v17 = vpop.permute.xlu0 %1349 }
 0x344   : > { %v1478_v51 = vadd.f32 %v1465_v63, %v1383_v41  ;;  %v1372_v43 = vsub.f32 %v1350_v17, %v6499_v19  ;;  %v1578_v47 = vsel %vm372_vm2, %v1565_v1, inf  ;;  %v1670_v19 = vmin.f32 %v1565_v1, %v6543_v34  ;;  %v5226_v1 = vld [vmem:[%s9065_s0 + $0x158] sm:$0xff] }
 0x345   : > { %1592 = vmin.xlane.f32.xlu1 %v1578_v47  ;;  %v1668_v11 = vsel %vm9068_vm3, %v1576_v20, inf  ;;  %v1583_v34 = vsel %vm372_vm2, %v1570_v8, inf  ;;  %v1587_v63 = vsel %vm372_vm2, %v1574_v46, inf  ;;  %v1589_v27 = vsel %vm372_vm2, %v1576_v20, inf  ;;  %v5230_v17 = vld [vmem:[%s9065_s0 + $0x178] sm:$0xff] }
 0x346   : > { %v1385_v55 = vmul.f32 %v1372_v43, %v1372_v43  ;;  %v1573_v5 = vadd.f32 %v1560_v38, %v1478_v51  ;;  %v1677_v22 = vmin.f32 %v1673_v35, %v1668_v11  ;;  %v5228_v38 = vld [vmem:[%s9065_s0 + $0x168] sm:$0xff]  ;;  %v5233_v43 = vld [vmem:[%s9065_s0 + $0x190] sm:$0xff]  ;;  %v5234_v47 = vld [vmem:[%s9065_s0 + $0x198] sm:$0xff] }
 0x347   : > { %v5232_v51 = vld [vmem:[%s9065_s0 + $0x188] sm:$0xff]  ;;  %v1618_v11 = vld [vmem:[#allocation2 + $0xd8] sm:$0xff]  ;;  %v1621_v35 = vld [vmem:[#allocation2 + $0xf0] sm:$0xff] }
 0x348   : > { %v1480_v9 = vadd.f32 %v1467_v40, %v1385_v55  ;;  %v1586_v49 = vsel %vm372_vm2, %v1573_v5, inf  ;;  %v1674_v48 = vmin.f32 %v1670_v19, %v1573_v5  ;;  %v1619_v55 = vld [vmem:[#allocation2 + $0xe0] sm:$0xff] }
 0x349   : > { %1608 = vmin.xlane.f32.xlu0 %v1586_v49  ;;  %1598 = vmin.xlane.f32.xlu1 %v1581_v23  ;;  %v1624_v49 = vld [vmem:[#allocation2 + $0x108] sm:$0xff] }
 0x34a   : > { %v1575_v6 = vadd.f32 %v1562_v31, %v1480_v9  ;;  %v1678_v61 = vmin.f32 %v1677_v22, %v1674_v48  ;;  %v1628_v22 = vld [vmem:[#allocation2 + $0x128] sm:$0xff] }
 0x34c   : > { %v1588_v58 = vsel %vm372_vm2, %v1575_v6, inf  ;;  %v1676_v24 = vmin.f32 %v1672_v10, %v1575_v6 }
 0x34d   : > { %1612 = vmin.xlane.f32.xlu0 %v1588_v58  ;;  %1602 = vmin.xlane.f32.xlu1 %v1583_v34 }
 0x34e   : > { %v1679_v42 = vmin.f32 %v1675_v33, %v1676_v24 }
 0x350   : > { %v1680_v4 = vmin.f32 %v1678_v61, %v1679_v42  ;;  %v1623_v42 = vld [vmem:[#allocation2 + $0x100] sm:$0xff] }
 0x351   : > { %1606 = vmin.xlane.f32.xlu1 %v1585_v7 }
 0x352   : > { %v1681_v14 = vrot.slane %v1680_v4, 4 }
 0x354   : > { %v1682_v16 = vmin.f32 %v1680_v4, %v1681_v14 }
 0x355   : > { %1610 = vmin.xlane.f32.xlu1 %v1587_v63  ;;  %v1625_v63 = vld [vmem:[#allocation2 + $0x110] sm:$0xff] }
 0x356   : > { %v1683_v3 = vrot.slane %v1682_v16, 2 }
 0x358   : > { %v1684_v60 = vmin.f32 %v1682_v16, %v1683_v3 }
 0x359   : > { %1614 = vmin.xlane.f32.xlu1 %v1589_v27  ;;  %v1627_v27 = vld [vmem:[#allocation2 + $0x120] sm:$0xff] }
 0x35a   : > { %v1685_v28 = vrot.slane %v1684_v60, 1 }
 0x35c   : > { %v1686_v30 = vmin.f32 %v1684_v60, %v1685_v28 }
 0x35e   : > { %5402 = vrsqrt.f32 %v1686_v30  ;;  %vm1689_vm10 = vcmp.eq.f32.partialorder %v1686_v30, inf  ;;  %v1692_v18 = vand.u32 2147483648, %v1686_v30  ;;  %vm1691_vm11 = vcmp.eq.f32.partialorder %v1686_v30, 0.0 }
 0x36a   : > { %1719 = vperm.xlu1 %5366, %v5222_v29  }
 0x36b   : > { %v5403_v59 = vpop.eup %5402 }
 0x36c   : > { %v1688_v57 = vmul.f32 %v5403_v59, %v1686_v30 }
 0x36e   : > { %1729 = vperm.xlu1 %5366, %v5224_v26   ;;  %v1690_v32 = vsel %vm1689_vm10, %v1686_v30, %v1688_v57  ;;  %v1629_v30 = vld [vmem:[#allocation2 + $0x130] sm:$0xff] }
 0x36f   : > { %v1693_v53 = vsel %vm1691_vm11, %v1692_v18, %v1690_v32 }
 0x370   : > { %v1694_v41 = vsel %vm372_vm2, %v1693_v53, 0.0 }
 0x371   : > { %1697 = vadd.xlane.f32.xlu0 %v1694_v41 }
 0x372   : > { %1734 = vperm.xlu1 %5366, %v5225_v39  }
 0x376   : > { %1739 = vperm.xlu1 %5366, %v5226_v1  }
 0x37a   : > { %1744 = vperm.xlu1 %5366, %v5227_v36  }
 0x37e   : > { %1749 = vperm.xlu1 %5366, %v5228_v38  }
 0x382   : > { %1754 = vperm.xlu1 %5366, %v5229_v15  }
 0x386   : > { %1759 = vperm.xlu1 %5366, %v5230_v17  }
 0x387   : > { %1724 = vperm.xlu0 %5365, %v5223_v45  }
 0x38a   : > { %1764 = vperm.xlu1 %5366, %v5231_v54  }
 0x38b   : > { %1769 = vperm.xlu0 %5365, %v5232_v51  }
 0x38e   : > { %1774 = vperm.xlu1 %5366, %v5233_v43  }
 0x38f   : > { %1779 = vperm.xlu0 %5365, %v5234_v47  }
 0x392   : > { %5367 = vset.pattern.permute.xlu1 %v5694_v12 }
 0x393   : > { %5369 = vset.pattern.permute.xlu0 %v5696_v25  ;;  %1813 = vperm.xlu1 %5367, %v5222_v29  }
 0x394   : > { %1912 = vperm.xlu0 %5369, %v5223_v45  }
 0x397   : > { %1821 = vperm.xlu1 %5367, %v5224_v26  }
 0x398   : > { %1924 = vperm.xlu0 %5369, %v5226_v1  }
 0x39b   : > { %1825 = vperm.xlu1 %5367, %v5225_v39  }
 0x39c   : > { %1932 = vperm.xlu0 %5369, %v5228_v38  }
 0x39f   : > { %1833 = vperm.xlu1 %5367, %v5227_v36  }
 0x3a0   : > { %1940 = vperm.xlu0 %5369, %v5230_v17  }
 0x3a3   : > { %1841 = vperm.xlu1 %5367, %v5229_v15  }
 0x3a4   : > { %1948 = vperm.xlu0 %5369, %v5232_v51  }
 0x3a7   : > { %1849 = vperm.xlu1 %5367, %v5231_v54  }
 0x3a8   : > { %1956 = vperm.xlu0 %5369, %v5234_v47  }
 0x3ab   : > { %1857 = vperm.xlu1 %5367, %v5233_v43  }
 0x3ac   : > { %5370 = vset.pattern.permute.xlu0 %v5694_v12 }
 0x3ad   : > { %1817 = vperm.xlu0 %5370, %v5223_v45  }
 0x3af   : > { %5368 = vset.pattern.permute.xlu1 %v5696_v25 }
 0x3b0   : > { %1908 = vperm.xlu1 %5368, %v5222_v29  }
 0x3b1   : > { %1829 = vperm.xlu0 %5370, %v5226_v1  }
 0x3b3   : > { %v1591_v40 = vpop.xlane.xlu0 %1590 }
 0x3b4   : > { %v1630_v20 = vmin.f32 %v1617_v2, %v1591_v40  ;;  %1916 = vperm.xlu1 %5368, %v5224_v26  }
 0x3b5   : > { %1837 = vperm.xlu0 %5370, %v5228_v38  }
 0x3b6   : > { %1643 = vst.msk [vmem:[#allocation2 + $0xd0] sm:$0xff] %vm766_vm6, %v1630_v20 }
 0x3b8   : > { %1920 = vperm.xlu1 %5368, %v5225_v39   ;;  %v1696_v39 = vld [vmem:[#allocation3 + $0x2] sm:$0x1] }
 0x3b9   : > { %1845 = vperm.xlu0 %5370, %v5230_v17  }
 0x3ba   : > { %v1595_v5 = vpop.xlane.xlu0 %1594 }
 0x3bb   : > { %v1632_v8 = vmin.f32 %v1619_v55, %v1595_v5 }
 0x3bc   : > { %1928 = vperm.xlu1 %5368, %v5227_v36  }
 0x3bd   : > { %1645 = vst.msk [vmem:[#allocation2 + $0xe0] sm:$0xff] %vm766_vm6, %v1632_v8  ;;  %1853 = vperm.xlu0 %5370, %v5232_v51  }
 0x3be   : > { %v1597_v31 = vpop.xlane.xlu0 %1596 }
 0x3bf   : > { %v1633_v23 = vmin.f32 %v1620_v37, %v1597_v31 }
 0x3c0   : > { %1936 = vperm.xlu1 %5368, %v5229_v15  }
 0x3c1   : > { %1646 = vst.msk [vmem:[#allocation2 + $0xe8] sm:$0xff] %vm766_vm6, %v1633_v23  ;;  %1861 = vperm.xlu0 %5370, %v5234_v47   ;;  %v5235_v23 = vld [vmem:[%s5761_s28 + $0xc] sm:$0x7] }
 0x3c2   : > { %v1601_v9 = vpop.xlane.xlu0 %1600 }
 0x3c3   : > { %v1635_v19 = vmin.f32 %v1622_v44, %v1601_v9  ;;  %v6690_v9 = vrot.slane %v5235_v23, %v6045_v50 }
 0x3c4   : > { %1944 = vperm.xlu1 %5368, %v5231_v54  }
 0x3c5   : > { %1648 = vst.msk [vmem:[#allocation2 + $0xf8] sm:$0xff] %vm766_vm6, %v1635_v19  ;;  %v6693_v19 = vrot.slane %v5235_v23, %v6049_v52 }
 0x3c6   : > { %v1605_v46 = vpop.xlane.xlu0 %1604 }
 0x3c7   : > { %v1637_v10 = vmin.f32 %v1624_v49, %v1605_v46 }
 0x3c8   : > { %1952 = vperm.xlu1 %5368, %v5233_v43  }
 0x3c9   : > { %1650 = vst.msk [vmem:[#allocation2 + $0x108] sm:$0xff] %vm766_vm6, %v1637_v10  ;;  %v6700_v10 = vrot.slane %v5235_v23, %v6060_v56 }
 0x3cc   : > { %5371 = vset.pattern.permute.xlu1 %v5695_v13 }
 0x3ce   : > { %v1593_v48 = vpop.xlane.xlu1 %1592 }
 0x3cf   : > { %v1631_v6 = vmin.f32 %v1618_v11, %v1593_v48 }
 0x3d1   : > { %1644 = vst.msk [vmem:[#allocation2 + $0xd8] sm:$0xff] %vm766_vm6, %v1631_v6 }
 0x3d2   : > { %v1609_v34 = vpop.xlane.xlu0 %1608  ;;  %v1599_v58 = vpop.xlane.xlu1 %1598 }
 0x3d3   : > { %v1639_v24 = vmin.f32 %v1626_v21, %v1609_v34  ;;  %v1634_v33 = vmin.f32 %v1621_v35, %v1599_v58 }
 0x3d5   : > { %1652 = vst.msk [vmem:[#allocation2 + $0x118] sm:$0xff] %vm766_vm6, %v1639_v24  ;;  %1647 = vst.msk [vmem:[#allocation2 + $0xf0] sm:$0xff] %vm766_vm6, %v1634_v33 }
 0x3d6   : > { %v1613_v61 = vpop.xlane.xlu0 %1612  ;;  %v1603_v7 = vpop.xlane.xlu1 %1602 }
 0x3d7   : > { %v1641_v4 = vmin.f32 %v1628_v22, %v1613_v61  ;;  %v1636_v14 = vmin.f32 %v1623_v42, %v1603_v7 }
 0x3d9   : > { %1654 = vst.msk [vmem:[#allocation2 + $0x128] sm:$0xff] %vm766_vm6, %v1641_v4  ;;  %1649 = vst.msk [vmem:[#allocation2 + $0x100] sm:$0xff] %vm766_vm6, %v1636_v14 }
 0x3da   : > { %v1607_v16 = vpop.xlane.xlu1 %1606 }
 0x3db   : > { %v1638_v3 = vmin.f32 %v1625_v63, %v1607_v16 }
 0x3dd   : > { %1651 = vst.msk [vmem:[#allocation2 + $0x110] sm:$0xff] %vm766_vm6, %v1638_v3 }
 0x3de   : > { %v1611_v60 = vpop.xlane.xlu1 %1610 }
 0x3df   : > { %v1640_v28 = vmin.f32 %v1627_v27, %v1611_v60 }
 0x3e1   : > { %1653 = vst.msk [vmem:[#allocation2 + $0x120] sm:$0xff] %vm766_vm6, %v1640_v28 }
 0x3e2   : > { %v1615_v29 = vpop.xlane.xlu1 %1614 }
 0x3e3   : > { %v1642_v59 = vmin.f32 %v1629_v30, %v1615_v29 }
 0x3e5   : > { %1655 = vst.msk [vmem:[#allocation2 + $0x130] sm:$0xff] %vm766_vm6, %v1642_v59 }
 0x3e6   : > { %v1720_v26 = vpop.permute.xlu1 %1719 }
 0x3e7   : > { %v1786_v11 = vsub.f32 %v1720_v26, %v6690_v9 }
 0x3e9   : > { %v1799_v7 = vmul.f32 %v1786_v11, %v1786_v11 }
 0x3ea   : > { %v1730_v57 = vpop.permute.xlu1 %1729 }
 0x3eb   : > { %v1788_v21 = vsub.f32 %v1730_v57, %v6690_v9 }
 0x3ed   : > { %v1801_v63 = vmul.f32 %v1788_v21, %v1788_v21 }
 0x3ee   : > { %v1735_v18 = vpop.permute.xlu1 %1734 }
 0x3ef   : > { %v1789_v34 = vsub.f32 %v1735_v18, %v6690_v9 }
 0x3f1   : > { %v1802_v28 = vmul.f32 %v1789_v34, %v1789_v34 }
 0x3f2   : > { %v1740_v32 = vpop.permute.xlu1 %1739 }
 0x3f3   : > { %v1790_v58 = vsub.f32 %v1740_v32, %v6690_v9 }
 0x3f5   : > { %v1803_v30 = vmul.f32 %v1790_v58, %v1790_v58 }
 0x3f6   : > { %v1745_v53 = vpop.permute.xlu1 %1744 }
 0x3f7   : > { %v1791_v24 = vsub.f32 %v1745_v53, %v6690_v9 }
 0x3f9   : > { %v1804_v29 = vmul.f32 %v1791_v24, %v1791_v24 }
 0x3fa   : > { %v1698_v41 = vpop.xlane.xlu0 %1697  ;;  %v1750_v1 = vpop.permute.xlu1 %1749 }
 0x3fb   : > { %v1699_v36 = vadd.f32 %v1698_v41, %v1696_v39  ;;  %v1792_v4 = vsub.f32 %v1750_v1, %v6690_v9 }
 0x3fd   : > { %1700 = vst.msk [vmem:[#allocation3 + $0x2] sm:$0x1] %vm849_vm7, %v1699_v36  ;;  %v1805_v39 = vmul.f32 %v1792_v4, %v1792_v4 }
 0x3fe   : > { %v1755_v38 = vpop.permute.xlu1 %1754 }
 0x3ff   : > { %v1793_v16 = vsub.f32 %v1755_v38, %v6690_v9 }
 0x401   : > { %v6719_v38 = vmul.f32 %v1793_v16, %v1793_v16 }
 0x402   : > { %v1725_v15 = vpop.permute.xlu0 %1724  ;;  %v1760_v17 = vpop.permute.xlu1 %1759 }
 0x403   : > { %v1787_v35 = vsub.f32 %v1725_v15, %v6690_v9  ;;  %v1794_v15 = vsub.f32 %v1760_v17, %v6690_v9 }
 0x405   : > { %v1800_v3 = vmul.f32 %v1787_v35, %v1787_v35 }
 0x406   : > { %v1770_v45 = vpop.permute.xlu0 %1769  ;;  %v6674_v54 = vpop.permute.xlu1 %1764 }
 0x407   : > { %v1796_v23 = vsub.f32 %v1770_v45, %v6690_v9 }
 0x40a   : > { %v6676_v51 = vpop.permute.xlu0 %1779  ;;  %v6678_v43 = vpop.permute.xlu1 %1774 }
 0x40e   : > { %v1814_v47 = vpop.permute.xlu1 %1813 }
 0x40f   : > { %v1913_v2 = vpop.permute.xlu0 %1912  ;;  %v1868_v48 = vsub.f32 %v1814_v47, %v6693_v19 }
 0x410   : > { %v1964_v22 = vsub.f32 %v1913_v2, %v6700_v10 }
 0x411   : > { %v1881_v14 = vmul.f32 %v1868_v48, %v1868_v48 }
 0x412   : > { %v1822_v40 = vpop.permute.xlu1 %1821  ;;  %v1977_v57 = vmul.f32 %v1964_v22, %v1964_v22 }
 0x413   : > { %v1925_v20 = vpop.permute.xlu0 %1924  ;;  %v1870_v42 = vsub.f32 %v1822_v40, %v6693_v19  ;;  %v1894_v41 = vadd.f32 %v1881_v14, %v1799_v7 }
 0x414   : > { %v1967_v11 = vsub.f32 %v1925_v20, %v6700_v10  ;;  %v1807_v20 = vmul.f32 %v1794_v15, %v1794_v15 }
 0x415   : > { %v1883_v18 = vmul.f32 %v1870_v42, %v1870_v42  ;;  %v1795_v42 = vsub.f32 %v6674_v54, %v6690_v9 }
 0x416   : > { %v1826_v55 = vpop.permute.xlu1 %1825  ;;  %v1980_v4 = vmul.f32 %v1967_v11, %v1967_v11 }
 0x417   : > { %v6680_v5 = vpop.permute.xlu0 %1932  ;;  %v1871_v1 = vsub.f32 %v1826_v55, %v6693_v19  ;;  %v1896_v34 = vadd.f32 %v1883_v18, %v1801_v63  ;;  %v1808_v18 = vmul.f32 %v1795_v42, %v1795_v42 }
 0x419   : > { %v1884_v24 = vmul.f32 %v1871_v1, %v1871_v1 }
 0x41a   : > { %v1834_v8 = vpop.permute.xlu1 %1833 }
 0x41b   : > { %v6682_v37 = vpop.permute.xlu0 %1940  ;;  %v1873_v55 = vsub.f32 %v1834_v8, %v6693_v19  ;;  %v1969_v8 = vsub.f32 %v6680_v5, %v6700_v10 }
 0x41e   : > { %v6684_v31 = vpop.permute.xlu1 %1841 }
 0x41f   : > { %v6687_v44 = vpop.permute.xlu0 %1948  ;;  %v1875_v14 = vsub.f32 %v6684_v31, %v6693_v19  ;;  %v1982_v31 = vmul.f32 %v1969_v8, %v1969_v8 }
 0x421   : > { %v1888_v1 = vmul.f32 %v1875_v14, %v1875_v14 }
 0x422   : > { %v6695_v49 = vpop.permute.xlu1 %1849 }
 0x423   : > { %v6697_v46 = vpop.permute.xlu0 %1956 }
 0x426   : > { %v6704_v6 = vpop.permute.xlu1 %1857 }
 0x428   : > { %v1818_v33 = vpop.permute.xlu0 %1817 }
 0x429   : > { %v1869_v61 = vsub.f32 %v1818_v33, %v6693_v19 }
 0x42b   : > { %v1882_v27 = vmul.f32 %v1869_v61, %v1869_v61  ;;  %v1909_v60 = vpop.permute.xlu1 %1908 }
 0x42c   : > { %v1963_v59 = vsub.f32 %v1909_v60, %v6700_v10  ;;  %v1830_v26 = vpop.permute.xlu0 %1829  ;;  %v1886_v60 = vmul.f32 %v1873_v55, %v1873_v55 }
 0x42d   : > { %v1895_v32 = vadd.f32 %v1882_v27, %v1800_v3  ;;  %v1872_v53 = vsub.f32 %v1830_v26, %v6693_v19  ;;  %v1809_v27 = vmul.f32 %v1796_v23, %v1796_v23 }
 0x42e   : > { %v1976_v36 = vmul.f32 %v1963_v59, %v1963_v59  ;;  %v1897_v59 = vadd.f32 %v1884_v24, %v1802_v28 }
 0x42f   : > { %v1885_v47 = vmul.f32 %v1872_v53, %v1872_v53  ;;  %v1917_v2 = vpop.permute.xlu1 %1916  ;;  %v6722_v40 = vadd.f32 %v1977_v57, %v1895_v32  ;;  %v1971_v32 = vsub.f32 %v6682_v37, %v6700_v10 }
 0x430   : > { %v1965_v48 = vsub.f32 %v1917_v2, %v6700_v10  ;;  %v1838_v21 = vpop.permute.xlu0 %1837  ;;  %v6727_v35 = vadd.f32 %v1976_v36, %v1894_v41  ;;  %v1877_v2 = vsub.f32 %v6695_v49, %v6693_v19 }
 0x431   : > { %v1874_v58 = vsub.f32 %v1838_v21, %v6693_v19  ;;  %v2003_v17 = vsel %vm372_vm2, %v6722_v40, inf  ;;  %v1898_v33 = vadd.f32 %v1885_v47, %v1803_v30  ;;  %v1899_v47 = vadd.f32 %v1886_v60, %v1804_v29 }
 0x432   : > { %v1978_v22 = vmul.f32 %v1965_v48, %v1965_v48  ;;  %2017 = vmin.xlane.f32.xlu0 %v2003_v17  ;;  %v2002_v45 = vsel %vm372_vm2, %v6727_v35, inf  ;;  %v1973_v29 = vsub.f32 %v6687_v44, %v6700_v10  ;;  %v1975_v17 = vsub.f32 %v6697_v46, %v6700_v10 }
 0x433   : > { %v1887_v61 = vmul.f32 %v1874_v58, %v1874_v58  ;;  %2015 = vmin.xlane.f32.xlu1 %v2002_v45  ;;  %v1921_v7 = vpop.permute.xlu1 %1920  ;;  %v6750_v57 = vadd.f32 %v1980_v4, %v1898_v33  ;;  %v1901_v58 = vadd.f32 %v1888_v1, %v6719_v38  ;;  %v1890_v45 = vmul.f32 %v1877_v2, %v1877_v2 }
 0x434   : > { %v1966_v63 = vsub.f32 %v1921_v7, %v6700_v10  ;;  %v1846_v16 = vpop.permute.xlu0 %1845  ;;  %v6744_v3 = vadd.f32 %v1978_v22, %v1896_v34  ;;  %v1984_v34 = vmul.f32 %v1971_v32, %v1971_v32  ;;  %v1797_v4 = vsub.f32 %v6678_v43, %v6690_v9 }
 0x435   : > { %v1900_v30 = vadd.f32 %v1887_v61, %v1805_v39  ;;  %v1876_v54 = vsub.f32 %v1846_v16, %v6693_v19  ;;  %v1798_v39 = vsub.f32 %v6676_v51, %v6690_v9  ;;  %v2006_v51 = vsel %vm372_vm2, %v6750_v57, inf }
 0x436   : > { %v1979_v26 = vmul.f32 %v1966_v63, %v1966_v63  ;;  %v2004_v5 = vsel %vm372_vm2, %v6744_v3, inf  ;;  %v1986_v63 = vmul.f32 %v1973_v29, %v1973_v29  ;;  %v1903_v60 = vadd.f32 %v1890_v45, %v1808_v18  ;;  %v5242_v45 = vld [vmem:[%s9065_s0 + $0x1d0] sm:$0xff] }
 0x437   : > { %v1889_v53 = vmul.f32 %v1876_v54, %v1876_v54  ;;  %2019 = vmin.xlane.f32.xlu0 %v2004_v5  ;;  %v1929_v41 = vpop.permute.xlu1 %1928  ;;  %v6762_v11 = vadd.f32 %v1982_v31, %v1900_v30  ;;  %v1811_v7 = vmul.f32 %v1798_v39, %v1798_v39  ;;  %v1988_v30 = vmul.f32 %v1975_v17, %v1975_v17 }
 0x438   : > { %v1968_v28 = vsub.f32 %v1929_v41, %v6700_v10  ;;  %v1854_v36 = vpop.permute.xlu0 %1853  ;;  %v6757_v15 = vadd.f32 %v1979_v26, %v1897_v59  ;;  %v1810_v9 = vmul.f32 %v1797_v4, %v1797_v4  ;;  %v2094_v31 = vmin.f32 %v6727_v35, %v6750_v57  ;;  %v5248_v4 = vld [vmem:[%s9065_s0 + $0x200] sm:$0xff] }
 0x439   : > { %v1878_v23 = vsub.f32 %v1854_v36, %v6693_v19  ;;  %v1902_v37 = vadd.f32 %v1889_v53, %v1807_v20  ;;  %v1879_v20 = vsub.f32 %v6704_v6, %v6693_v19  ;;  %v2008_v44 = vsel %vm372_vm2, %v6762_v11, inf }
 0x43a   : > { %v1981_v48 = vmul.f32 %v1968_v28, %v1968_v28  ;;  %v2005_v21 = vsel %vm372_vm2, %v6757_v15, inf  ;;  %v2096_v57 = vmin.f32 %v6744_v3, %v6762_v11 }
 0x43b   : > { %v1891_v55 = vmul.f32 %v1878_v23, %v1878_v23  ;;  %2023 = vmin.xlane.f32.xlu0 %v2006_v51  ;;  %2021 = vmin.xlane.f32.xlu1 %v2005_v21  ;;  %v1937_v49 = vpop.permute.xlu1 %1936  ;;  %v1997_v46 = vadd.f32 %v1984_v34, %v1902_v37 }
 0x43c   : > { %v1970_v24 = vsub.f32 %v1937_v49, %v6700_v10  ;;  %v1862_v33 = vpop.permute.xlu0 %1861  ;;  %v1994_v22 = vadd.f32 %v1981_v48, %v1899_v47 }
 0x43d   : > { %v1880_v42 = vsub.f32 %v1862_v33, %v6693_v19  ;;  %v1904_v8 = vadd.f32 %v1891_v55, %v1809_v27  ;;  %v1892_v27 = vmul.f32 %v1879_v20, %v1879_v20  ;;  %v2010_v26 = vsel %vm372_vm2, %v1997_v46, inf  ;;  %v5237_v33 = vld [vmem:[%s9065_s0 + $0x1a8] sm:$0xff] }
 0x43e   : > { %v1983_v61 = vmul.f32 %v1970_v24, %v1970_v24  ;;  %v2007_v38 = vsel %vm372_vm2, %v1994_v22, inf  ;;  %v2098_v1 = vmin.f32 %v2094_v31, %v1997_v46  ;;  %v2095_v36 = vmin.f32 %v6722_v40, %v1994_v22  ;;  %v5240_v22 = vld [vmem:[%s9065_s0 + $0x1c0] sm:$0xff] }
 0x43f   : > { %v1893_v14 = vmul.f32 %v1880_v42, %v1880_v42  ;;  %2027 = vmin.xlane.f32.xlu0 %v2008_v44  ;;  %2025 = vmin.xlane.f32.xlu1 %v2007_v38  ;;  %v1945_v6 = vpop.permute.xlu1 %1944  ;;  %v1999_v43 = vadd.f32 %v1986_v63, %v1904_v8  ;;  %v1905_v39 = vadd.f32 %v1892_v27, %v1810_v9  ;;  %v5244_v42 = vld [vmem:[%s9065_s0 + $0x1e0] sm:$0xff]  ;;  %v5241_v63 = vld [vmem:[%s9065_s0 + $0x1c8] sm:$0xff] }
 0x440   : > { %v1972_v19 = vsub.f32 %v1945_v6, %v6700_v10  ;;  %v1996_v16 = vadd.f32 %v1983_v61, %v1901_v58  ;;  %v5239_v6 = vld [vmem:[%s9065_s0 + $0x1b8] sm:$0xff]  ;;  %v2043_v27 = vld [vmem:[#allocation2 + $0x140] sm:$0xff]  ;;  %v2044_v9 = vld [vmem:[#allocation2 + $0x148] sm:$0xff] }
 0x441   : > { %v1906_v54 = vadd.f32 %v1893_v14, %v1811_v7  ;;  %v2012_v2 = vsel %vm372_vm2, %v1999_v43, inf  ;;  %v2100_v51 = vmin.f32 %v2096_v57, %v1999_v43  ;;  %v5246_v7 = vld [vmem:[%s9065_s0 + $0x1f0] sm:$0xff] }
 0x442   : > { %v1985_v59 = vmul.f32 %v1972_v19, %v1972_v19  ;;  %v2009_v5 = vsel %vm372_vm2, %v1996_v16, inf  ;;  %v5238_v14 = vld [vmem:[%s9065_s0 + $0x1b0] sm:$0xff]  ;;  %v5236_v19 = vld [vmem:[%s9065_s0 + $0x1a0] sm:$0xff] }
 0x443   : > { %2031 = vmin.xlane.f32.xlu0 %v2010_v26  ;;  %2029 = vmin.xlane.f32.xlu1 %v2009_v5  ;;  %v1953_v32 = vpop.permute.xlu1 %1952  ;;  %v2001_v53 = vadd.f32 %v1988_v30, %v1906_v54  ;;  %v6857_v30 = vld [vmem:[%s9065_s0 + $0x1f8] sm:$0xff] }
 0x444   : > { %v1974_v18 = vsub.f32 %v1953_v32, %v6700_v10  ;;  %v1998_v41 = vadd.f32 %v1985_v59, %v1903_v60  ;;  %v2097_v10 = vmin.f32 %v6757_v15, %v1996_v16  ;;  %v6845_v16 = vld [vmem:[%s9065_s0 + $0x1d8] sm:$0xff]  ;;  %v6851_v60 = vld [vmem:[%s9065_s0 + $0x1e8] sm:$0xff] }
 0x445   : > { %v2093_v28 = vsel %vm9068_vm3, %v2001_v53, inf  ;;  %v2014_v40 = vsel %vm372_vm2, %v2001_v53, inf  ;;  %v2042_v54 = vld [vmem:[#allocation2 + $0x138] sm:$0xff] }
 0x446   : > { %v1987_v47 = vmul.f32 %v1974_v18, %v1974_v18  ;;  %v2011_v35 = vsel %vm372_vm2, %v1998_v41, inf  ;;  %v2099_v23 = vmin.f32 %v2095_v36, %v1998_v41  ;;  %v2102_v37 = vmin.f32 %v2098_v1, %v2093_v28  ;;  %v2046_v53 = vld [vmem:[#allocation2 + $0x158] sm:$0xff]  ;;  %v2045_v18 = vld [vmem:[#allocation2 + $0x150] sm:$0xff]  ;;  %v2048_v36 = vld [vmem:[#allocation2 + $0x168] sm:$0xff] }
 0x447   : > { %2035 = vmin.xlane.f32.xlu0 %v2012_v2  ;;  %2033 = vmin.xlane.f32.xlu1 %v2011_v35 }
 0x448   : > { %v2000_v48 = vadd.f32 %v1987_v47, %v1905_v39  ;;  %v2103_v29 = vmin.f32 %v2102_v37, %v2099_v23  ;;  %v2047_v47 = vld [vmem:[#allocation2 + $0x160] sm:$0xff]  ;;  %v2050_v23 = vld [vmem:[#allocation2 + $0x178] sm:$0xff]  ;;  %v2049_v37 = vld [vmem:[#allocation2 + $0x170] sm:$0xff] }
 0x44a   : > { %v2013_v21 = vsel %vm372_vm2, %v2000_v48, inf  ;;  %v2101_v34 = vmin.f32 %v2097_v10, %v2000_v48 }
 0x44b   : > { %2039 = vmin.xlane.f32.xlu0 %v2014_v40  ;;  %2037 = vmin.xlane.f32.xlu1 %v2013_v21 }
 0x44c   : > { %v2104_v55 = vmin.f32 %v2100_v51, %v2101_v34  ;;  %v2052_v34 = vld [vmem:[#allocation2 + $0x188] sm:$0xff] }
 0x44e   : > { %v2105_v3 = vmin.f32 %v2103_v29, %v2104_v55  ;;  %v2051_v29 = vld [vmem:[#allocation2 + $0x180] sm:$0xff] }
 0x450   : > { %v2106_v11 = vrot.slane %v2105_v3, 4 }
 0x452   : > { %v2107_v49 = vmin.f32 %v2105_v3, %v2106_v11 }
 0x454   : > { %v2108_v58 = vrot.slane %v2107_v49, 2 }
 0x456   : > { %v2109_v15 = vmin.f32 %v2107_v49, %v2108_v58  ;;  %v2054_v58 = vld [vmem:[#allocation2 + $0x198] sm:$0xff] }
 0x458   : > { %v2110_v17 = vrot.slane %v2109_v15, 1 }
 0x45a   : > { %v2111_v24 = vmin.f32 %v2109_v15, %v2110_v17  ;;  %v2053_v15 = vld [vmem:[#allocation2 + $0x190] sm:$0xff] }
 0x45c   : > { %5404 = vrsqrt.f32 %v2111_v24  ;;  %vm2114_vm12 = vcmp.eq.f32.partialorder %v2111_v24, inf  ;;  %v2117_v8 = vand.u32 2147483648, %v2111_v24  ;;  %vm2116_vm13 = vcmp.eq.f32.partialorder %v2111_v24, 0.0 }
 0x461   : > { %2242 = vperm.xlu0 %5370, %v5237_v33  }
 0x465   : > { %2254 = vperm.xlu0 %5370, %v5240_v22  }
 0x469   : > { %v5405_v20 = vpop.eup %5404  ;;  %2262 = vperm.xlu0 %5370, %v5242_v45  }
 0x46a   : > { %v2113_v44 = vmul.f32 %v5405_v20, %v2111_v24 }
 0x46c   : > { %v2115_v61 = vsel %vm2114_vm12, %v2111_v24, %v2113_v44 }
 0x46d   : > { %2270 = vperm.xlu0 %5370, %v5244_v42   ;;  %v2118_v38 = vsel %vm2116_vm13, %v2117_v8, %v2115_v61  ;;  %v5249_v61 = vld [vmem:[%s5761_s28 + $0x10] sm:$0x7] }
 0x46e   : > { %v2119_v46 = vsel %vm372_vm2, %v2118_v38, 0.0 }
 0x46f   : > { %2122 = vadd.xlane.f32.xlu1 %v2119_v46  ;;  %v2121_v46 = vld [vmem:[#allocation3 + $0x3] sm:$0x1] }
 0x471   : > { %2278 = vperm.xlu0 %5370, %v5246_v7  }
 0x475   : > { %2286 = vperm.xlu0 %5370, %v5248_v4  }
 0x479   : > { %5374 = vset.pattern.permute.xlu0 %v5696_v25 }
 0x47a   : > { %2337 = vperm.xlu0 %5374, %v5237_v33  }
 0x47e   : > { %2349 = vperm.xlu0 %5374, %v5240_v22  }
 0x480   : > { %2149 = vperm.xlu1 %5371, %v5237_v33  }
 0x482   : > { %2357 = vperm.xlu0 %5374, %v5242_v45  }
 0x484   : > { %2154 = vperm.xlu1 %5371, %v5238_v14  }
 0x486   : > { %2365 = vperm.xlu0 %5374, %v5244_v42  }
 0x488   : > { %2159 = vperm.xlu1 %5371, %v5239_v6  }
 0x48a   : > { %2373 = vperm.xlu0 %5374, %v5246_v7  }
 0x48c   : > { %2164 = vperm.xlu1 %5371, %v5240_v22  }
 0x48e   : > { %2381 = vperm.xlu0 %5374, %v5248_v4  }
 0x490   : > { %2169 = vperm.xlu1 %5371, %v5241_v63  }
 0x492   : > { %5375 = vset.pattern.permute.xlu0 %v5695_v13 }
 0x493   : > { %2144 = vperm.xlu0 %5375, %v5236_v19  }
 0x494   : > { %2174 = vperm.xlu1 %5371, %v5242_v45  }
 0x497   : > { %2184 = vperm.xlu0 %5375, %v5244_v42  }
 0x498   : > { %2179 = vperm.xlu1 %5371, %v6845_v16  }
 0x49b   : > { %2194 = vperm.xlu0 %5375, %v5246_v7   ;;  %v6886_v7 = vrot.slane %v5249_v61, %v6049_v52 }
 0x49c   : > { %2189 = vperm.xlu1 %5371, %v6851_v60  }
 0x49f   : > { %2204 = vperm.xlu0 %5375, %v5248_v4   ;;  %v6889_v4 = vrot.slane %v5249_v61, %v6060_v56 }
 0x4a0   : > { %2199 = vperm.xlu1 %5371, %v6857_v30  }
 0x4a4   : > { %5372 = vset.pattern.permute.xlu1 %v5694_v12 }
 0x4a5   : > { %2238 = vperm.xlu1 %5372, %v5236_v19  }
 0x4a9   : > { %2246 = vperm.xlu1 %5372, %v5238_v14  }
 0x4ad   : > { %2250 = vperm.xlu1 %5372, %v5239_v6  }
 0x4b1   : > { %2258 = vperm.xlu1 %5372, %v5241_v63  }
 0x4b5   : > { %2266 = vperm.xlu1 %5372, %v6845_v16  }
 0x4b9   : > { %2274 = vperm.xlu1 %5372, %v6851_v60  }
 0x4bb   : > { %v2018_v59 = vpop.xlane.xlu0 %2017 }
 0x4bc   : > { %v2056_v26 = vmin.f32 %v2043_v27, %v2018_v59  ;;  %v2016_v5 = vpop.xlane.xlu1 %2015 }
 0x4bd   : > { %v2055_v43 = vmin.f32 %v2042_v54, %v2016_v5  ;;  %2282 = vperm.xlu1 %5372, %v6857_v30  }
 0x4be   : > { %2069 = vst.msk [vmem:[#allocation2 + $0x140] sm:$0xff] %vm766_vm6, %v2056_v26 }
 0x4bf   : > { %2068 = vst.msk [vmem:[#allocation2 + $0x138] sm:$0xff] %vm766_vm6, %v2055_v43 }
 0x4c0   : > { %v2020_v31 = vpop.xlane.xlu0 %2019 }
 0x4c1   : > { %v2057_v32 = vmin.f32 %v2044_v9, %v2020_v31  ;;  %5373 = vset.pattern.permute.xlu1 %v5696_v25 }
 0x4c2   : > { %2333 = vperm.xlu1 %5373, %v5236_v19  }
 0x4c3   : > { %2070 = vst.msk [vmem:[#allocation2 + $0x148] sm:$0xff] %vm766_vm6, %v2057_v32 }
 0x4c4   : > { %v2024_v41 = vpop.xlane.xlu0 %2023  ;;  %v2022_v39 = vpop.xlane.xlu1 %2021 }
 0x4c5   : > { %v2059_v1 = vmin.f32 %v2046_v53, %v2024_v41  ;;  %v2058_v28 = vmin.f32 %v2045_v18, %v2022_v39 }
 0x4c6   : > { %2341 = vperm.xlu1 %5373, %v5238_v14  }
 0x4c7   : > { %2072 = vst.msk [vmem:[#allocation2 + $0x158] sm:$0xff] %vm766_vm6, %v2059_v1  ;;  %2071 = vst.msk [vmem:[#allocation2 + $0x150] sm:$0xff] %vm766_vm6, %v2058_v28 }
 0x4c8   : > { %v2028_v2 = vpop.xlane.xlu0 %2027  ;;  %v2026_v35 = vpop.xlane.xlu1 %2025 }
 0x4c9   : > { %v2061_v57 = vmin.f32 %v2048_v36, %v2028_v2  ;;  %v2060_v10 = vmin.f32 %v2047_v47, %v2026_v35 }
 0x4ca   : > { %2345 = vperm.xlu1 %5373, %v5239_v6  }
 0x4cb   : > { %2074 = vst.msk [vmem:[#allocation2 + $0x168] sm:$0xff] %vm766_vm6, %v2061_v57  ;;  %2073 = vst.msk [vmem:[#allocation2 + $0x160] sm:$0xff] %vm766_vm6, %v2060_v10 }
 0x4cc   : > { %v2032_v48 = vpop.xlane.xlu0 %2031  ;;  %v2030_v51 = vpop.xlane.xlu1 %2029 }
 0x4cd   : > { %v2063_v40 = vmin.f32 %v2050_v23, %v2032_v48  ;;  %v2062_v21 = vmin.f32 %v2049_v37, %v2030_v51 }
 0x4ce   : > { %2353 = vperm.xlu1 %5373, %v5241_v63   ;;  %v6892_v63 = vrot.slane %v5249_v61, %v6045_v50 }
 0x4cf   : > { %2076 = vst.msk [vmem:[#allocation2 + $0x178] sm:$0xff] %vm766_vm6, %v2063_v40  ;;  %2075 = vst.msk [vmem:[#allocation2 + $0x170] sm:$0xff] %vm766_vm6, %v2062_v21 }
 0x4d0   : > { %v2036_v55 = vpop.xlane.xlu0 %2035  ;;  %v2034_v3 = vpop.xlane.xlu1 %2033 }
 0x4d1   : > { %v2065_v11 = vmin.f32 %v2052_v34, %v2036_v55  ;;  %v2064_v49 = vmin.f32 %v2051_v29, %v2034_v3 }
 0x4d2   : > { %2361 = vperm.xlu1 %5373, %v6845_v16  }
 0x4d3   : > { %2078 = vst.msk [vmem:[#allocation2 + $0x188] sm:$0xff] %vm766_vm6, %v2065_v11  ;;  %2077 = vst.msk [vmem:[#allocation2 + $0x180] sm:$0xff] %vm766_vm6, %v2064_v49 }
 0x4d4   : > { %v2040_v17 = vpop.xlane.xlu0 %2039  ;;  %v2038_v24 = vpop.xlane.xlu1 %2037 }
 0x4d5   : > { %v2067_v33 = vmin.f32 %v2054_v58, %v2040_v17  ;;  %v2066_v22 = vmin.f32 %v2053_v15, %v2038_v24 }
 0x4d6   : > { %2369 = vperm.xlu1 %5373, %v6851_v60  }
 0x4d7   : > { %2080 = vst.msk [vmem:[#allocation2 + $0x198] sm:$0xff] %vm766_vm6, %v2067_v33  ;;  %2079 = vst.msk [vmem:[#allocation2 + $0x190] sm:$0xff] %vm766_vm6, %v2066_v22 }
 0x4da   : > { %2377 = vperm.xlu1 %5373, %v6857_v30  }
 0x4dc   : > { %v2243_v45 = vpop.permute.xlu0 %2242 }
 0x4dd   : > { %v2294_v16 = vsub.f32 %v2243_v45, %v6886_v7 }
 0x4de   : > { %5376 = vset.pattern.permute.xlu1 %v5695_v13 }
 0x4df   : > { %v2307_v54 = vmul.f32 %v2294_v16, %v2294_v16 }
 0x4e0   : > { %v2255_v20 = vpop.permute.xlu0 %2254 }
 0x4e1   : > { %v2297_v11 = vsub.f32 %v2255_v20, %v6886_v7 }
 0x4e4   : > { %v2263_v42 = vpop.permute.xlu0 %2262 }
 0x4e5   : > { %v2299_v49 = vsub.f32 %v2263_v42, %v6886_v7 }
 0x4e8   : > { %v2271_v44 = vpop.permute.xlu0 %2270 }
 0x4e9   : > { %v2301_v20 = vsub.f32 %v2271_v44, %v6886_v7 }
 0x4ec   : > { %v2279_v8 = vpop.permute.xlu0 %2278 }
 0x4ed   : > { %v2303_v42 = vsub.f32 %v2279_v8, %v6886_v7  ;;  %v2314_v8 = vmul.f32 %v2301_v20, %v2301_v20 }
 0x4f0   : > { %v6883_v38 = vpop.permute.xlu0 %2286 }
 0x4f5   : > { %v2338_v19 = vpop.permute.xlu0 %2337 }
 0x4f6   : > { %v2389_v60 = vsub.f32 %v2338_v19, %v6889_v4  ;;  %v2312_v19 = vmul.f32 %v2299_v49, %v2299_v49 }
 0x4f8   : > { %v2123_v14 = vpop.xlane.xlu1 %2122  ;;  %v2402_v59 = vmul.f32 %v2389_v60, %v2389_v60 }
 0x4f9   : > { %v2124_v6 = vadd.f32 %v2123_v14, %v2121_v46  ;;  %v2350_v1 = vpop.permute.xlu0 %2349 }
 0x4fa   : > { %v2392_v33 = vsub.f32 %v2350_v1, %v6889_v4 }
 0x4fb   : > { %2125 = vst.msk [vmem:[#allocation3 + $0x3] sm:$0x1] %vm849_vm7, %v2124_v6  ;;  %v2310_v6 = vmul.f32 %v2297_v11, %v2297_v11 }
 0x4fc   : > { %v2150_v30 = vpop.permute.xlu1 %2149 }
 0x4fd   : > { %v2212_v27 = vsub.f32 %v2150_v30, %v6892_v63  ;;  %v2358_v47 = vpop.permute.xlu0 %2357 }
 0x4ff   : > { %v2225_v26 = vmul.f32 %v2212_v27, %v2212_v27 }
 0x500   : > { %v2155_v5 = vpop.permute.xlu1 %2154 }
 0x501   : > { %v2320_v43 = vadd.f32 %v2307_v54, %v2225_v26  ;;  %v2366_v35 = vpop.permute.xlu0 %2365  ;;  %v2213_v22 = vsub.f32 %v2155_v5, %v6892_v63  ;;  %v2405_v54 = vmul.f32 %v2392_v33, %v2392_v33  ;;  %v2305_v33 = vsub.f32 %v6883_v38, %v6886_v7 }
 0x503   : > { %v6898_v9 = vadd.f32 %v2402_v59, %v2320_v43  ;;  %v2394_v59 = vsub.f32 %v2358_v47, %v6889_v4  ;;  %v2226_v26 = vmul.f32 %v2213_v22, %v2213_v22 }
 0x504   : > { %v2160_v31 = vpop.permute.xlu1 %2159 }
 0x505   : > { %v2428_v32 = vsel %vm372_vm2, %v6898_v9, inf  ;;  %v6909_v23 = vpop.permute.xlu0 %2373  ;;  %v2214_v5 = vsub.f32 %v2160_v31, %v6892_v63 }
 0x506   : > { %2442 = vmin.xlane.f32.xlu0 %v2428_v32  ;;  %v2398_v20 = vsub.f32 %v6909_v23, %v6889_v4 }
 0x507   : > { %v2227_v11 = vmul.f32 %v2214_v5, %v2214_v5 }
 0x508   : > { %v2165_v53 = vpop.permute.xlu1 %2164 }
 0x509   : > { %v6911_v48 = vpop.permute.xlu0 %2381  ;;  %v2215_v3 = vsub.f32 %v2165_v53, %v6892_v63 }
 0x50b   : > { %v2228_v61 = vmul.f32 %v2215_v3, %v2215_v3  ;;  %v2396_v3 = vsub.f32 %v2366_v35, %v6889_v4 }
 0x50c   : > { %v2170_v18 = vpop.permute.xlu1 %2169 }
 0x50d   : > { %v2323_v32 = vadd.f32 %v2310_v6, %v2228_v61  ;;  %v2216_v49 = vsub.f32 %v2170_v18, %v6892_v63 }
 0x50e   : > { %v2145_v21 = vpop.permute.xlu0 %2144 }
 0x50f   : > { %v2211_v34 = vsub.f32 %v2145_v21, %v6892_v63 }
 0x510   : > { %v2175_v41 = vpop.permute.xlu1 %2174 }
 0x511   : > { %v2224_v58 = vmul.f32 %v2211_v34, %v2211_v34  ;;  %v2217_v46 = vsub.f32 %v2175_v41, %v6892_v63 }
 0x512   : > { %v2185_v15 = vpop.permute.xlu0 %2184 }
 0x513   : > { %v2230_v53 = vmul.f32 %v2217_v46, %v2217_v46 }
 0x514   : > { %v6903_v39 = vpop.permute.xlu1 %2179 }
 0x515   : > { %v2218_v38 = vsub.f32 %v6903_v39, %v6892_v63 }
 0x516   : > { %v2195_v41 = vpop.permute.xlu0 %2194 }
 0x518   : > { %v6905_v28 = vpop.permute.xlu1 %2189 }
 0x51a   : > { %v2205_v35 = vpop.permute.xlu0 %2204 }
 0x51b   : > { %v2223_v23 = vsub.f32 %v2205_v35, %v6892_v63 }
 0x51c   : > { %v6907_v36 = vpop.permute.xlu1 %2199 }
 0x520   : > { %v2239_v2 = vpop.permute.xlu1 %2238 }
 0x521   : > { %v2293_v29 = vsub.f32 %v2239_v2, %v6886_v7  ;;  %v2316_v2 = vmul.f32 %v2303_v42, %v2303_v42  ;;  %v2229_v42 = vmul.f32 %v2216_v49, %v2216_v49 }
 0x523   : > { %v2306_v17 = vmul.f32 %v2293_v29, %v2293_v29  ;;  %v2407_v29 = vmul.f32 %v2394_v59, %v2394_v59 }
 0x524   : > { %v2247_v57 = vpop.permute.xlu1 %2246 }
 0x525   : > { %v2295_v24 = vsub.f32 %v2247_v57, %v6886_v7  ;;  %v2319_v16 = vadd.f32 %v2306_v17, %v2224_v58  ;;  %v2219_v57 = vsub.f32 %v2185_v15, %v6892_v63  ;;  %v2325_v17 = vadd.f32 %v2312_v19, %v2230_v53 }
 0x526   : > { %v2409_v19 = vmul.f32 %v2396_v3, %v2396_v3  ;;  %v2411_v53 = vmul.f32 %v2398_v20, %v2398_v20 }
 0x527   : > { %v2308_v60 = vmul.f32 %v2295_v24, %v2295_v24  ;;  %v2232_v22 = vmul.f32 %v2219_v57, %v2219_v57  ;;  %v2220_v57 = vsub.f32 %v6905_v28, %v6892_v63  ;;  %v2318_v28 = vmul.f32 %v2305_v33, %v2305_v33 }
 0x528   : > { %v2251_v10 = vpop.permute.xlu1 %2250 }
 0x529   : > { %v2296_v30 = vsub.f32 %v2251_v10, %v6886_v7  ;;  %v2321_v21 = vadd.f32 %v2308_v60, %v2226_v26 }
 0x52b   : > { %v2309_v34 = vmul.f32 %v2296_v30, %v2296_v30 }
 0x52c   : > { %v2259_v37 = vpop.permute.xlu1 %2258 }
 0x52d   : > { %v2298_v10 = vsub.f32 %v2259_v37, %v6886_v7  ;;  %v6945_v37 = vadd.f32 %v2405_v54, %v2323_v32  ;;  %v2322_v46 = vadd.f32 %v2309_v34, %v2227_v11  ;;  %v2327_v54 = vadd.f32 %v2314_v8, %v2232_v22 }
 0x52f   : > { %v2311_v61 = vmul.f32 %v2298_v10, %v2298_v10 }
 0x530   : > { %v2267_v51 = vpop.permute.xlu1 %2266 }
 0x531   : > { %v2300_v18 = vsub.f32 %v2267_v51, %v6886_v7  ;;  %v2431_v51 = vsel %vm372_vm2, %v6945_v37, inf  ;;  %v2324_v26 = vadd.f32 %v2311_v61, %v2229_v42 }
 0x533   : > { %v2313_v5 = vmul.f32 %v2300_v18, %v2300_v18 }
 0x534   : > { %v6913_v40 = vpop.permute.xlu1 %2274 }
 0x535   : > { %v2302_v39 = vsub.f32 %v6913_v40, %v6886_v7 }
 0x537   : > { %v2315_v3 = vmul.f32 %v2302_v39, %v2302_v39 }
 0x538   : > { %v6917_v55 = vpop.permute.xlu1 %2282 }
 0x53d   : > { %v2334_v45 = vpop.permute.xlu1 %2333 }
 0x53e   : > { %v2388_v14 = vsub.f32 %v2334_v45, %v6889_v4  ;;  %v2221_v45 = vsub.f32 %v2195_v41, %v6892_v63  ;;  %v2400_v41 = vsub.f32 %v6911_v48, %v6889_v4  ;;  %v2422_v48 = vadd.f32 %v2409_v19, %v2327_v54 }
 0x540   : > { %v2401_v27 = vmul.f32 %v2388_v14, %v2388_v14  ;;  %v2234_v59 = vmul.f32 %v2221_v45, %v2221_v45  ;;  %v2435_v33 = vsel %vm372_vm2, %v2422_v48, inf }
 0x541   : > { %v2342_v43 = vpop.permute.xlu1 %2341 }
 0x542   : > { %v2390_v1 = vsub.f32 %v2342_v43, %v6889_v4  ;;  %v6933_v44 = vadd.f32 %v2401_v27, %v2319_v16  ;;  %v6964_v27 = vadd.f32 %v2407_v29, %v2325_v17  ;;  %v2329_v34 = vadd.f32 %v2316_v2, %v2234_v59 }
 0x543   : > { %v2233_v2 = vmul.f32 %v2220_v57, %v2220_v57 }
 0x544   : > { %v2403_v47 = vmul.f32 %v2390_v1, %v2390_v1  ;;  %v2427_v31 = vsel %vm372_vm2, %v6933_v44, inf  ;;  %v2231_v1 = vmul.f32 %v2218_v38, %v2218_v38  ;;  %v2433_v40 = vsel %vm372_vm2, %v6964_v27, inf }
 0x545   : > { %2440 = vmin.xlane.f32.xlu1 %v2427_v31  ;;  %v2346_v58 = vpop.permute.xlu1 %2345  ;;  %v2304_v31 = vsub.f32 %v6917_v55, %v6886_v7  ;;  %v2519_v61 = vmin.f32 %v6933_v44, %v6945_v37  ;;  %v2424_v35 = vadd.f32 %v2411_v53, %v2329_v34 }
 0x546   : > { %v2391_v15 = vsub.f32 %v2346_v58, %v6889_v4  ;;  %v6943_v24 = vadd.f32 %v2403_v47, %v2321_v21  ;;  %v2236_v47 = vmul.f32 %v2223_v23, %v2223_v23  ;;  %v2326_v29 = vadd.f32 %v2313_v5, %v2231_v1 }
 0x547   : > { %v2222_v58 = vsub.f32 %v6907_v36, %v6892_v63  ;;  %v2317_v55 = vmul.f32 %v2304_v31, %v2304_v31  ;;  %v2523_v42 = vmin.f32 %v2519_v61, %v2422_v48  ;;  %v2437_v44 = vsel %vm372_vm2, %v2424_v35, inf  ;;  %v7052_v61 = vld [vmem:[%s9065_s0 + $0x258] sm:$0xff] }
 0x548   : > { %v2404_v14 = vmul.f32 %v2391_v15, %v2391_v15  ;;  %v2429_v6 = vsel %vm372_vm2, %v6943_v24, inf  ;;  %v2413_v15 = vmul.f32 %v2400_v41, %v2400_v41  ;;  %v2331_v7 = vadd.f32 %v2318_v28, %v2236_v47  ;;  %v5257_v28 = vld [vmem:[%s9065_s0 + $0x240] sm:$0xff] }
 0x549   : > { %2444 = vmin.xlane.f32.xlu0 %v2429_v6  ;;  %v2354_v16 = vpop.permute.xlu1 %2353  ;;  %v2235_v36 = vmul.f32 %v2222_v58, %v2222_v58  ;;  %v2521_v38 = vmin.f32 %v6943_v24, %v6964_v27  ;;  %v2468_v58 = vld [vmem:[#allocation2 + $0x1a8] sm:$0xff] }
 0x54a   : > { %v2393_v60 = vsub.f32 %v2354_v16, %v6889_v4  ;;  %v6962_v30 = vadd.f32 %v2404_v14, %v2322_v46  ;;  %v2328_v46 = vadd.f32 %v2315_v3, %v2233_v2  ;;  %v2426_v37 = vadd.f32 %v2413_v15, %v2331_v7  ;;  %v5251_v15 = vld [vmem:[%s9065_s0 + $0x210] sm:$0xff]  ;;  %v5256_v7 = vld [vmem:[%s9065_s0 + $0x238] sm:$0xff] }
 0x54b   : > { %v2330_v20 = vadd.f32 %v2317_v55, %v2235_v36  ;;  %v2525_v5 = vmin.f32 %v2521_v38, %v2424_v35  ;;  %v7046_v55 = vld [vmem:[%s9065_s0 + $0x248] sm:$0xff]  ;;  %v2473_v38 = vld [vmem:[#allocation2 + $0x1d0] sm:$0xff] }
 0x54c   : > { %v2406_v43 = vmul.f32 %v2393_v60, %v2393_v60  ;;  %v2430_v32 = vsel %vm372_vm2, %v6962_v30, inf  ;;  %v2439_v23 = vsel %vm372_vm2, %v2426_v37, inf  ;;  %v7058_v35 = vld [vmem:[%s9065_s0 + $0x268] sm:$0xff] }
 0x54d   : > { %2448 = vmin.xlane.f32.xlu0 %v2431_v51  ;;  %2446 = vmin.xlane.f32.xlu1 %v2430_v32  ;;  %v2362_v8 = vpop.permute.xlu1 %2361 }
 0x54e   : > { %v2395_v10 = vsub.f32 %v2362_v8, %v6889_v4  ;;  %v2419_v21 = vadd.f32 %v2406_v43, %v2324_v26  ;;  %v2518_v26 = vsel %vm9068_vm3, %v2426_v37, inf }
 0x54f   : > { %v2527_v24 = vmin.f32 %v2523_v42, %v2518_v26 }
 0x550   : > { %v2408_v11 = vmul.f32 %v2395_v10, %v2395_v10  ;;  %v2432_v49 = vsel %vm372_vm2, %v2419_v21, inf  ;;  %v2520_v16 = vmin.f32 %v6898_v9, %v2419_v21  ;;  %v5250_v10 = vld [vmem:[%s9065_s0 + $0x208] sm:$0xff]  ;;  %v5261_v21 = vld [vmem:[%s9065_s0 + $0x260] sm:$0xff] }
 0x551   : > { %2452 = vmin.xlane.f32.xlu0 %v2433_v40  ;;  %2450 = vmin.xlane.f32.xlu1 %v2432_v49  ;;  %v2370_v17 = vpop.permute.xlu1 %2369  ;;  %v5259_v40 = vld [vmem:[%s9065_s0 + $0x250] sm:$0xff] }
 0x552   : > { %v2397_v22 = vsub.f32 %v2370_v17, %v6889_v4  ;;  %v2421_v45 = vadd.f32 %v2408_v11, %v2326_v29  ;;  %v5253_v11 = vld [vmem:[%s9065_s0 + $0x220] sm:$0xff]  ;;  %v5255_v49 = vld [vmem:[%s9065_s0 + $0x230] sm:$0xff] }
 0x554   : > { %v2410_v18 = vmul.f32 %v2397_v22, %v2397_v22  ;;  %v2434_v63 = vsel %vm372_vm2, %v2421_v45, inf  ;;  %v5252_v22 = vld [vmem:[%s9065_s0 + $0x218] sm:$0xff] }
 0x555   : > { %2456 = vmin.xlane.f32.xlu0 %v2435_v33  ;;  %2454 = vmin.xlane.f32.xlu1 %v2434_v63  ;;  %v2378_v14 = vpop.permute.xlu1 %2377  ;;  %v2469_v63 = vld [vmem:[#allocation2 + $0x1b0] sm:$0xff] }
 0x556   : > { %v2399_v6 = vsub.f32 %v2378_v14, %v6889_v4  ;;  %v2423_v19 = vadd.f32 %v2410_v18, %v2328_v46  ;;  %v2522_v4 = vmin.f32 %v6962_v30, %v2421_v45  ;;  %v5254_v45 = vld [vmem:[%s9065_s0 + $0x228] sm:$0xff]  ;;  %v2467_v46 = vld [vmem:[#allocation2 + $0x1a0] sm:$0xff] }
 0x558   : > { %v2412_v60 = vmul.f32 %v2399_v6, %v2399_v6  ;;  %v2436_v51 = vsel %vm372_vm2, %v2423_v19, inf  ;;  %v2524_v54 = vmin.f32 %v2520_v16, %v2423_v19  ;;  %v2471_v6 = vld [vmem:[#allocation2 + $0x1c0] sm:$0xff]  ;;  %v2470_v19 = vld [vmem:[#allocation2 + $0x1b8] sm:$0xff]  ;;  %v2472_v16 = vld [vmem:[#allocation2 + $0x1c8] sm:$0xff] }
 0x559   : > { %2460 = vmin.xlane.f32.xlu0 %v2437_v44  ;;  %2458 = vmin.xlane.f32.xlu1 %v2436_v51 }
 0x55a   : > { %v2425_v59 = vadd.f32 %v2412_v60, %v2330_v20  ;;  %v2528_v39 = vmin.f32 %v2527_v24, %v2524_v54 }
 0x55c   : > { %v2438_v9 = vsel %vm372_vm2, %v2425_v59, inf  ;;  %v2526_v27 = vmin.f32 %v2522_v4, %v2425_v59  ;;  %v2475_v59 = vld [vmem:[#allocation2 + $0x1e0] sm:$0xff] }
 0x55d   : > { %2464 = vmin.xlane.f32.xlu0 %v2439_v23  ;;  %2462 = vmin.xlane.f32.xlu1 %v2438_v9  ;;  %v2474_v23 = vld [vmem:[#allocation2 + $0x1d8] sm:$0xff] }
 0x55e   : > { %v2529_v43 = vmin.f32 %v2525_v5, %v2526_v27  ;;  %v2477_v27 = vld [vmem:[#allocation2 + $0x1f0] sm:$0xff] }
 0x560   : > { %v2530_v32 = vmin.f32 %v2528_v39, %v2529_v43  ;;  %v2476_v39 = vld [vmem:[#allocation2 + $0x1e8] sm:$0xff] }
 0x562   : > { %v2531_v30 = vrot.slane %v2530_v32, 4 }
 0x564   : > { %v2532_v53 = vmin.f32 %v2530_v32, %v2531_v30 }
 0x566   : > { %v2533_v41 = vrot.slane %v2532_v53, 2 }
 0x568   : > { %v2534_v1 = vmin.f32 %v2532_v53, %v2533_v41  ;;  %v2479_v41 = vld [vmem:[#allocation2 + $0x200] sm:$0xff] }
 0x56a   : > { %v2535_v8 = vrot.slane %v2534_v1, 1 }
 0x56c   : > { %v2536_v57 = vmin.f32 %v2534_v1, %v2535_v8  ;;  %v2478_v1 = vld [vmem:[#allocation2 + $0x1f8] sm:$0xff] }
 0x56e   : > { %5406 = vrsqrt.f32 %v2536_v57  ;;  %vm2539_vm14 = vcmp.eq.f32.partialorder %v2536_v57, inf  ;;  %v2542_v31 = vand.u32 2147483648, %v2536_v57  ;;  %vm2541_vm15 = vcmp.eq.f32.partialorder %v2536_v57, 0.0 }
 0x573   : > { %2569 = vperm.xlu0 %5375, %v5250_v10  }
 0x577   : > { %2614 = vperm.xlu0 %5375, %v5259_v40  }
 0x57b   : > { %v5407_v34 = vpop.eup %5406  ;;  %2624 = vperm.xlu0 %5375, %v5261_v21  }
 0x57c   : > { %v2538_v47 = vmul.f32 %v5407_v34, %v2536_v57 }
 0x57e   : > { %v2540_v48 = vsel %vm2539_vm14, %v2536_v57, %v2538_v47 }
 0x57f   : > { %5378 = vset.pattern.permute.xlu0 %v5696_v25  ;;  %v2543_v29 = vsel %vm2541_vm15, %v2542_v31, %v2540_v48 }
 0x580   : > { %2758 = vperm.xlu0 %5378, %v5250_v10   ;;  %v2544_v3 = vsel %vm372_vm2, %v2543_v29, 0.0 }
 0x581   : > { %2547 = vadd.xlane.f32.xlu1 %v2544_v3 }
 0x584   : > { %2770 = vperm.xlu0 %5378, %v5253_v11  }
 0x588   : > { %2778 = vperm.xlu0 %5378, %v5255_v49  }
 0x58c   : > { %2786 = vperm.xlu0 %5378, %v5257_v28  }
 0x58f   : > { %v2443_v17 = vpop.xlane.xlu0 %2442 }
 0x590   : > { %v2481_v2 = vmin.f32 %v2468_v58, %v2443_v17  ;;  %2794 = vperm.xlu0 %5378, %v5259_v40   ;;  %v5263_v17 = vld [vmem:[%s5761_s28 + $0x14] sm:$0x7] }
 0x592   : > { %2494 = vst.msk [vmem:[#allocation2 + $0x1a8] sm:$0xff] %vm766_vm6, %v2481_v2  ;;  %2574 = vperm.xlu1 %5376, %v5251_v15   ;;  %v7093_v2 = vrot.slane %v5263_v17, %v6045_v50 }
 0x594   : > { %2802 = vperm.xlu0 %5378, %v5261_v21  }
 0x596   : > { %2579 = vperm.xlu1 %5376, %v5252_v22  }
 0x598   : > { %5380 = vset.pattern.permute.xlu0 %v5694_v12 }
 0x599   : > { %2663 = vperm.xlu0 %5380, %v5250_v10  }
 0x59a   : > { %2584 = vperm.xlu1 %5376, %v5253_v11  }
 0x59d   : > { %2675 = vperm.xlu0 %5380, %v5253_v11   ;;  %v2546_v11 = vld [vmem:[#allocation3 + $0x4] sm:$0x1] }
 0x59e   : > { %2589 = vperm.xlu1 %5376, %v5254_v45  }
 0x5a1   : > { %2683 = vperm.xlu0 %5380, %v5255_v49  }
 0x5a2   : > { %2594 = vperm.xlu1 %5376, %v5255_v49  }
 0x5a5   : > { %2691 = vperm.xlu0 %5380, %v5257_v28  }
 0x5a6   : > { %2599 = vperm.xlu1 %5376, %v5256_v7  }
 0x5a9   : > { %2699 = vperm.xlu0 %5380, %v5259_v40  }
 0x5aa   : > { %2604 = vperm.xlu1 %5376, %v5257_v28  }
 0x5ad   : > { %2707 = vperm.xlu0 %5380, %v5261_v21  }
 0x5ae   : > { %2609 = vperm.xlu1 %5376, %v7046_v55  }
 0x5b2   : > { %2619 = vperm.xlu1 %5376, %v7052_v61  }
 0x5b6   : > { %2629 = vperm.xlu1 %5376, %v7058_v35  }
 0x5ba   : > { %5377 = vset.pattern.permute.xlu1 %v5694_v12 }
 0x5bb   : > { %2667 = vperm.xlu1 %5377, %v5251_v15  }
 0x5bf   : > { %2671 = vperm.xlu1 %5377, %v5252_v22  }
 0x5c3   : > { %2679 = vperm.xlu1 %5377, %v5254_v45  }
 0x5c7   : > { %2687 = vperm.xlu1 %5377, %v5256_v7  }
 0x5cb   : > { %2695 = vperm.xlu1 %5377, %v7046_v55  }
 0x5ce   : > { %v2441_v18 = vpop.xlane.xlu1 %2440 }
 0x5cf   : > { %v2480_v33 = vmin.f32 %v2467_v46, %v2441_v18  ;;  %2703 = vperm.xlu1 %5377, %v7052_v61  }
 0x5d1   : > { %2493 = vst.msk [vmem:[#allocation2 + $0x1a0] sm:$0xff] %vm766_vm6, %v2480_v33 }
 0x5d2   : > { %v2445_v36 = vpop.xlane.xlu0 %2444 }
 0x5d3   : > { %v2482_v14 = vmin.f32 %v2469_v63, %v2445_v36  ;;  %2711 = vperm.xlu1 %5377, %v7058_v35  }
 0x5d5   : > { %2495 = vst.msk [vmem:[#allocation2 + $0x1b0] sm:$0xff] %vm766_vm6, %v2482_v14 }
 0x5d6   : > { %v2449_v20 = vpop.xlane.xlu0 %2448  ;;  %v2447_v42 = vpop.xlane.xlu1 %2446 }
 0x5d7   : > { %v2484_v44 = vmin.f32 %v2471_v6, %v2449_v20  ;;  %v2483_v37 = vmin.f32 %v2470_v19, %v2447_v42  ;;  %5379 = vset.pattern.permute.xlu1 %v5696_v25 }
 0x5d8   : > { %2762 = vperm.xlu1 %5379, %v5251_v15  }
 0x5d9   : > { %2497 = vst.msk [vmem:[#allocation2 + $0x1c0] sm:$0xff] %vm766_vm6, %v2484_v44  ;;  %2496 = vst.msk [vmem:[#allocation2 + $0x1b8] sm:$0xff] %vm766_vm6, %v2483_v37 }
 0x5da   : > { %v2453_v60 = vpop.xlane.xlu0 %2452  ;;  %v2451_v51 = vpop.xlane.xlu1 %2450 }
 0x5db   : > { %v2486_v4 = vmin.f32 %v2473_v38, %v2453_v60  ;;  %v2485_v54 = vmin.f32 %v2472_v16, %v2451_v51 }
 0x5dc   : > { %2766 = vperm.xlu1 %5379, %v5252_v22   ;;  %v7096_v22 = vrot.slane %v5263_v17, %v6060_v56 }
 0x5dd   : > { %2499 = vst.msk [vmem:[#allocation2 + $0x1d0] sm:$0xff] %vm766_vm6, %v2486_v4  ;;  %2498 = vst.msk [vmem:[#allocation2 + $0x1c8] sm:$0xff] %vm766_vm6, %v2485_v54 }
 0x5de   : > { %v2457_v26 = vpop.xlane.xlu0 %2456  ;;  %v2455_v5 = vpop.xlane.xlu1 %2454 }
 0x5df   : > { %v2488_v24 = vmin.f32 %v2475_v59, %v2457_v26  ;;  %v2487_v9 = vmin.f32 %v2474_v23, %v2455_v5 }
 0x5e0   : > { %2774 = vperm.xlu1 %5379, %v5254_v45  }
 0x5e1   : > { %2501 = vst.msk [vmem:[#allocation2 + $0x1e0] sm:$0xff] %vm766_vm6, %v2488_v24  ;;  %2500 = vst.msk [vmem:[#allocation2 + $0x1d8] sm:$0xff] %vm766_vm6, %v2487_v9 }
 0x5e2   : > { %v2461_v43 = vpop.xlane.xlu0 %2460  ;;  %v2459_v32 = vpop.xlane.xlu1 %2458 }
 0x5e3   : > { %v2490_v30 = vmin.f32 %v2477_v27, %v2461_v43  ;;  %v2489_v53 = vmin.f32 %v2476_v39, %v2459_v32 }
 0x5e4   : > { %2782 = vperm.xlu1 %5379, %v5256_v7   ;;  %v7101_v7 = vrot.slane %v5263_v17, %v6049_v52 }
 0x5e5   : > { %2503 = vst.msk [vmem:[#allocation2 + $0x1f0] sm:$0xff] %vm766_vm6, %v2490_v30  ;;  %2502 = vst.msk [vmem:[#allocation2 + $0x1e8] sm:$0xff] %vm766_vm6, %v2489_v53 }
 0x5e6   : > { %v2465_v8 = vpop.xlane.xlu0 %2464  ;;  %v2463_v57 = vpop.xlane.xlu1 %2462 }
 0x5e7   : > { %v2492_v10 = vmin.f32 %v2479_v41, %v2465_v8  ;;  %v2491_v40 = vmin.f32 %v2478_v1, %v2463_v57 }
 0x5e8   : > { %2790 = vperm.xlu1 %5379, %v7046_v55  }
 0x5e9   : > { %2505 = vst.msk [vmem:[#allocation2 + $0x200] sm:$0xff] %vm766_vm6, %v2492_v10  ;;  %2504 = vst.msk [vmem:[#allocation2 + $0x1f8] sm:$0xff] %vm766_vm6, %v2491_v40 }
 0x5ec   : > { %2798 = vperm.xlu1 %5379, %v7052_v61  }
 0x5ee   : > { %v2570_v21 = vpop.permute.xlu0 %2569 }
 0x5ef   : > { %v2636_v61 = vsub.f32 %v2570_v21, %v7093_v2 }
 0x5f0   : > { %2806 = vperm.xlu1 %5379, %v7058_v35  }
 0x5f1   : > { %v2649_v63 = vmul.f32 %v2636_v61, %v2636_v61 }
 0x5f2   : > { %v2615_v34 = vpop.permute.xlu0 %2614 }
 0x5f3   : > { %v2645_v30 = vsub.f32 %v2615_v34, %v7093_v2 }
 0x5f4   : > { %5381 = vset.pattern.permute.xlu1 %v5695_v13 }
 0x5f5   : > { %v7132_v34 = vmul.f32 %v2645_v30, %v2645_v30 }
 0x5f6   : > { %v7082_v47 = vpop.permute.xlu0 %2624 }
 0x5fb   : > { %v2759_v31 = vpop.permute.xlu0 %2758 }
 0x5fc   : > { %v2813_v35 = vsub.f32 %v2759_v31, %v7096_v22 }
 0x5fe   : > { %v2826_v36 = vmul.f32 %v2813_v35, %v2813_v35 }
 0x5ff   : > { %v2771_v48 = vpop.permute.xlu0 %2770 }
 0x600   : > { %v2816_v1 = vsub.f32 %v2771_v48, %v7096_v22 }
 0x602   : > { %v2829_v61 = vmul.f32 %v2816_v1, %v2816_v1 }
 0x603   : > { %v7084_v29 = vpop.permute.xlu0 %2778 }
 0x607   : > { %v7086_v3 = vpop.permute.xlu0 %2786 }
 0x608   : > { %v2820_v30 = vsub.f32 %v7086_v3, %v7096_v22 }
 0x60a   : > { %v2548_v49 = vpop.xlane.xlu1 %2547 }
 0x60b   : > { %v2549_v28 = vadd.f32 %v2548_v49, %v2546_v11  ;;  %v7088_v58 = vpop.permute.xlu0 %2794 }
 0x60d   : > { %2550 = vst.msk [vmem:[#allocation3 + $0x4] sm:$0x1] %vm849_vm7, %v2549_v28 }
 0x60e   : > { %v2575_v15 = vpop.permute.xlu1 %2574 }
 0x60f   : > { %v7098_v45 = vpop.permute.xlu0 %2802  ;;  %v2637_v32 = vsub.f32 %v2575_v15, %v7093_v2 }
 0x611   : > { %v2650_v31 = vmul.f32 %v2637_v32, %v2637_v32 }
 0x612   : > { %v2580_v55 = vpop.permute.xlu1 %2579 }
 0x613   : > { %v2638_v10 = vsub.f32 %v2580_v55, %v7093_v2  ;;  %v2818_v55 = vsub.f32 %v7084_v29, %v7096_v22 }
 0x614   : > { %v2664_v46 = vpop.permute.xlu0 %2663 }
 0x615   : > { %v2718_v18 = vsub.f32 %v2664_v46, %v7101_v7  ;;  %v2831_v32 = vmul.f32 %v2818_v55, %v2818_v55 }
 0x616   : > { %v2585_v33 = vpop.permute.xlu1 %2584 }
 0x617   : > { %v2731_v14 = vmul.f32 %v2718_v18, %v2718_v18  ;;  %v2639_v53 = vsub.f32 %v2585_v33, %v7093_v2  ;;  %v2651_v18 = vmul.f32 %v2638_v10, %v2638_v10 }
 0x618   : > { %v2676_v26 = vpop.permute.xlu0 %2675 }
 0x619   : > { %v2744_v6 = vadd.f32 %v2731_v14, %v2649_v63  ;;  %v2721_v43 = vsub.f32 %v2676_v26, %v7101_v7  ;;  %v2652_v17 = vmul.f32 %v2639_v53, %v2639_v53 }
 0x61a   : > { %v2590_v19 = vpop.permute.xlu1 %2589 }
 0x61b   : > { %v7106_v20 = vadd.f32 %v2826_v36, %v2744_v6  ;;  %v2734_v40 = vmul.f32 %v2721_v43, %v2721_v43  ;;  %v2640_v63 = vsub.f32 %v2590_v19, %v7093_v2 }
 0x61c   : > { %v2684_v9 = vpop.permute.xlu0 %2683 }
 0x61d   : > { %v2852_v42 = vsel %vm372_vm2, %v7106_v20, inf  ;;  %v2723_v11 = vsub.f32 %v2684_v9, %v7101_v7  ;;  %v2747_v33 = vadd.f32 %v2734_v40, %v2652_v17  ;;  %v2653_v53 = vmul.f32 %v2640_v63, %v2640_v63 }
 0x61e   : > { %2865 = vmin.xlane.f32.xlu0 %v2852_v42  ;;  %v2595_v44 = vpop.permute.xlu1 %2594  ;;  %v2833_v17 = vmul.f32 %v2820_v30, %v2820_v30 }
 0x61f   : > { %v2641_v49 = vsub.f32 %v2595_v44, %v7093_v2  ;;  %v2736_v14 = vmul.f32 %v2723_v11, %v2723_v11 }
 0x620   : > { %v2692_v8 = vpop.permute.xlu0 %2691 }
 0x621   : > { %v2654_v6 = vmul.f32 %v2641_v49, %v2641_v49 }
 0x622   : > { %v2600_v37 = vpop.permute.xlu1 %2599 }
 0x623   : > { %v2749_v1 = vadd.f32 %v2736_v14, %v2654_v6 }
 0x624   : > { %v2700_v42 = vpop.permute.xlu0 %2699 }
 0x625   : > { %v2727_v10 = vsub.f32 %v2700_v42, %v7101_v7  ;;  %v7174_v55 = vadd.f32 %v2831_v32, %v2749_v1 }
 0x626   : > { %v2605_v38 = vpop.permute.xlu1 %2604 }
 0x627   : > { %v2643_v29 = vsub.f32 %v2605_v38, %v7093_v2  ;;  %v2642_v38 = vsub.f32 %v2600_v37, %v7093_v2  ;;  %v2822_v37 = vsub.f32 %v7088_v58, %v7096_v22 }
 0x629   : > { %v2656_v40 = vmul.f32 %v2643_v29, %v2643_v29  ;;  %v2835_v42 = vmul.f32 %v2822_v37, %v2822_v37 }
 0x62a   : > { %v7111_v16 = vpop.permute.xlu1 %2609 }
 0x62e   : > { %v7113_v60 = vpop.permute.xlu1 %2619 }
 0x632   : > { %v7115_v51 = vpop.permute.xlu1 %2629 }
 0x636   : > { %v2668_v4 = vpop.permute.xlu1 %2667 }
 0x637   : > { %v2719_v27 = vsub.f32 %v2668_v4, %v7101_v7 }
 0x639   : > { %v2732_v57 = vmul.f32 %v2719_v27, %v2719_v27 }
 0x63a   : > { %v2672_v54 = vpop.permute.xlu1 %2671 }
 0x63b   : > { %v2720_v41 = vsub.f32 %v2672_v54, %v7101_v7  ;;  %v2745_v35 = vadd.f32 %v2732_v57, %v2650_v31  ;;  %v7143_v54 = vsub.f32 %v7082_v47, %v7093_v2  ;;  %v2708_v31 = vpop.permute.xlu0 %2707 }
 0x63c   : > { %v2729_v58 = vsub.f32 %v2708_v31, %v7101_v7 }
 0x63d   : > { %v2733_v15 = vmul.f32 %v2720_v41, %v2720_v41  ;;  %v7153_v41 = vadd.f32 %v2829_v61, %v2747_v33  ;;  %v2660_v1 = vmul.f32 %v7143_v54, %v7143_v54 }
 0x63e   : > { %v2680_v59 = vpop.permute.xlu1 %2679 }
 0x63f   : > { %v2722_v48 = vsub.f32 %v2680_v59, %v7101_v7  ;;  %v2725_v59 = vsub.f32 %v2692_v8, %v7101_v7  ;;  %v2746_v26 = vadd.f32 %v2733_v15, %v2651_v18  ;;  %v2644_v15 = vsub.f32 %v7111_v16, %v7093_v2 }
 0x640   : > { %v2740_v18 = vmul.f32 %v2727_v10, %v2727_v10 }
 0x641   : > { %v2735_v9 = vmul.f32 %v2722_v48, %v2722_v48  ;;  %v2738_v57 = vmul.f32 %v2725_v59, %v2725_v59  ;;  %v2657_v59 = vmul.f32 %v2644_v15, %v2644_v15 }
 0x642   : > { %v2688_v23 = vpop.permute.xlu1 %2687 }
 0x643   : > { %v2724_v19 = vsub.f32 %v2688_v23, %v7101_v7  ;;  %v2748_v3 = vadd.f32 %v2735_v9, %v2653_v53  ;;  %v2751_v33 = vadd.f32 %v2738_v57, %v2656_v40 }
 0x645   : > { %v2737_v11 = vmul.f32 %v2724_v19, %v2724_v19  ;;  %v2846_v30 = vadd.f32 %v2833_v17, %v2751_v33 }
 0x646   : > { %v2696_v5 = vpop.permute.xlu1 %2695 }
 0x647   : > { %v2947_v17 = vmin.f32 %v7153_v41, %v2846_v30 }
 0x64a   : > { %v7117_v24 = vpop.permute.xlu1 %2703 }
 0x64b   : > { %v2728_v16 = vsub.f32 %v7117_v24, %v7101_v7  ;;  %v2857_v24 = vsel %vm372_vm2, %v7174_v55, inf }
 0x64e   : > { %v7120_v39 = vpop.permute.xlu1 %2711 }
 0x64f   : > { %v2730_v53 = vsub.f32 %v7120_v39, %v7101_v7 }
 0x653   : > { %v2763_v21 = vpop.permute.xlu1 %2762 }
 0x654   : > { %v2814_v28 = vsub.f32 %v2763_v21, %v7096_v22  ;;  %v2726_v21 = vsub.f32 %v2696_v5, %v7101_v7  ;;  %v2855_v5 = vsel %vm372_vm2, %v7153_v41, inf  ;;  %v2859_v7 = vsel %vm372_vm2, %v2846_v30, inf }
 0x656   : > { %v2827_v46 = vmul.f32 %v2814_v28, %v2814_v28  ;;  %v2739_v63 = vmul.f32 %v2726_v21, %v2726_v21 }
 0x657   : > { %v2767_v36 = vpop.permute.xlu1 %2766 }
 0x658   : > { %v2815_v44 = vsub.f32 %v2767_v36, %v7096_v22  ;;  %v7139_v4 = vadd.f32 %v2827_v46, %v2745_v35  ;;  %v2655_v35 = vmul.f32 %v2642_v38, %v2642_v38  ;;  %v2752_v32 = vadd.f32 %v2739_v63, %v2657_v59 }
 0x65a   : > { %v2828_v27 = vmul.f32 %v2815_v44, %v2815_v44  ;;  %v2853_v43 = vsel %vm372_vm2, %v7139_v4, inf  ;;  %v2750_v36 = vadd.f32 %v2737_v11, %v2655_v35  ;;  %v2824_v44 = vsub.f32 %v7098_v45, %v7096_v22 }
 0x65b   : > { %2867 = vmin.xlane.f32.xlu1 %v2853_v43  ;;  %v2775_v47 = vpop.permute.xlu1 %2774  ;;  %v2742_v43 = vmul.f32 %v2729_v58, %v2729_v58  ;;  %v2741_v45 = vmul.f32 %v2728_v16, %v2728_v16 }
 0x65c   : > { %v2817_v8 = vsub.f32 %v2775_v47, %v7096_v22  ;;  %v7157_v23 = vadd.f32 %v2828_v27, %v2746_v26  ;;  %v2646_v26 = vsub.f32 %v7113_v60, %v7093_v2  ;;  %v2753_v27 = vadd.f32 %v2740_v18, %v7132_v34 }
 0x65d   : > { %v2648_v34 = vsub.f32 %v7115_v51, %v7093_v2  ;;  %v2837_v40 = vmul.f32 %v2824_v44, %v2824_v44  ;;  %v2755_v21 = vadd.f32 %v2742_v43, %v2660_v1  ;;  %v2945_v18 = vmin.f32 %v7139_v4, %v7174_v55  ;;  %v5269_v43 = vld [vmem:[%s9065_s0 + $0x298] sm:$0xff] }
 0x65e   : > { %v2830_v49 = vmul.f32 %v2817_v8, %v2817_v8  ;;  %v2854_v28 = vsel %vm372_vm2, %v7157_v23, inf  ;;  %v2659_v8 = vmul.f32 %v2646_v26, %v2646_v26  ;;  %v2848_v39 = vadd.f32 %v2835_v42, %v2753_v27  ;;  %v5264_v26 = vld [vmem:[%s9065_s0 + $0x270] sm:$0xff] }
 0x65f   : > { %2869 = vmin.xlane.f32.xlu0 %v2854_v28  ;;  %v2783_v61 = vpop.permute.xlu1 %2782  ;;  %v2661_v28 = vmul.f32 %v2648_v34, %v2648_v34  ;;  %v2850_v35 = vadd.f32 %v2837_v40, %v2755_v21  ;;  %v5268_v27 = vld [vmem:[%s9065_s0 + $0x290] sm:$0xff]  ;;  %v5274_v34 = vld [vmem:[%s9065_s0 + $0x2c0] sm:$0xff] }
 0x660   : > { %v2819_v48 = vsub.f32 %v2783_v61, %v7096_v22  ;;  %v7172_v46 = vadd.f32 %v2830_v49, %v2748_v3  ;;  %v2754_v31 = vadd.f32 %v2741_v45, %v2659_v8  ;;  %v2743_v3 = vmul.f32 %v2730_v53, %v2730_v53  ;;  %v5272_v8 = vld [vmem:[%s9065_s0 + $0x2b0] sm:$0xff] }
 0x661   : > { %v2861_v37 = vsel %vm372_vm2, %v2848_v39, inf  ;;  %v2863_v63 = vsel %vm372_vm2, %v2850_v35, inf }
 0x662   : > { %v2832_v14 = vmul.f32 %v2819_v48, %v2819_v48  ;;  %v2856_v6 = vsel %vm372_vm2, %v7172_v46, inf  ;;  %v2756_v15 = vadd.f32 %v2743_v3, %v2661_v28  ;;  %v2944_v48 = vmin.f32 %v7106_v20, %v7172_v46  ;;  %v2893_v3 = vld [vmem:[#allocation2 + $0x210] sm:$0xff] }
 0x663   : > { %2871 = vmin.xlane.f32.xlu0 %v2855_v5  ;;  %2873 = vmin.xlane.f32.xlu1 %v2856_v6  ;;  %v2791_v29 = vpop.permute.xlu1 %2790  ;;  %v2949_v20 = vmin.f32 %v2945_v18, %v2848_v39  ;;  %v2951_v46 = vmin.f32 %v2947_v17, %v2850_v35  ;;  %v5273_v39 = vld [vmem:[%s9065_s0 + $0x2b8] sm:$0xff]  ;;  %v2896_v17 = vld [vmem:[#allocation2 + $0x228] sm:$0xff]  ;;  %v2897_v35 = vld [vmem:[#allocation2 + $0x230] sm:$0xff] }
 0x664   : > { %v2821_v9 = vsub.f32 %v2791_v29, %v7096_v22  ;;  %v2845_v19 = vadd.f32 %v2832_v14, %v2750_v36 }
 0x666   : > { %v2834_v47 = vmul.f32 %v2821_v9, %v2821_v9  ;;  %v2858_v60 = vsel %vm372_vm2, %v2845_v19, inf }
 0x667   : > { %2875 = vmin.xlane.f32.xlu0 %v2857_v24  ;;  %2877 = vmin.xlane.f32.xlu1 %v2858_v60  ;;  %v2799_v38 = vpop.permute.xlu1 %2798  ;;  %v5266_v24 = vld [vmem:[%s9065_s0 + $0x280] sm:$0xff] }
 0x668   : > { %v2823_v57 = vsub.f32 %v2799_v38, %v7096_v22  ;;  %v2847_v10 = vadd.f32 %v2834_v47, %v2752_v32  ;;  %v5270_v47 = vld [vmem:[%s9065_s0 + $0x2a0] sm:$0xff]  ;;  %v5271_v38 = vld [vmem:[%s9065_s0 + $0x2a8] sm:$0xff] }
 0x66a   : > { %v2836_v11 = vmul.f32 %v2823_v57, %v2823_v57  ;;  %v2860_v54 = vsel %vm372_vm2, %v2847_v10, inf  ;;  %v2948_v33 = vmin.f32 %v2944_v48, %v2847_v10  ;;  %v2892_v57 = vld [vmem:[#allocation2 + $0x208] sm:$0xff]  ;;  %v5276_v10 = vld [vmem:[%s9065_s0 + $0x2d0] sm:$0xff]  ;;  %v2898_v48 = vld [vmem:[#allocation2 + $0x238] sm:$0xff] }
 0x66b   : > { %2879 = vmin.xlane.f32.xlu0 %v2859_v7  ;;  %2881 = vmin.xlane.f32.xlu1 %v2860_v54  ;;  %v2807_v49 = vpop.permute.xlu1 %2806  ;;  %v5265_v7 = vld [vmem:[%s9065_s0 + $0x278] sm:$0xff] }
 0x66c   : > { %v2825_v2 = vsub.f32 %v2807_v49, %v7096_v22  ;;  %v2849_v51 = vadd.f32 %v2836_v11, %v2754_v31  ;;  %v2946_v22 = vmin.f32 %v7157_v23, %v2845_v19  ;;  %v5267_v19 = vld [vmem:[%s9065_s0 + $0x288] sm:$0xff]  ;;  %v2894_v49 = vld [vmem:[#allocation2 + $0x218] sm:$0xff] }
 0x66d   : > { %v5275_v31 = vld [vmem:[%s9065_s0 + $0x2c8] sm:$0xff] }
 0x66e   : > { %v2838_v61 = vmul.f32 %v2825_v2, %v2825_v2  ;;  %v2862_v5 = vsel %vm372_vm2, %v2849_v51, inf  ;;  %v2950_v58 = vmin.f32 %v2946_v22, %v2849_v51  ;;  %v2895_v51 = vld [vmem:[#allocation2 + $0x220] sm:$0xff] }
 0x66f   : > { %2883 = vmin.xlane.f32.xlu0 %v2861_v37  ;;  %2885 = vmin.xlane.f32.xlu1 %v2862_v5 }
 0x670   : > { %v2851_v41 = vadd.f32 %v2838_v61, %v2756_v15  ;;  %v2954_v23 = vmin.f32 %v2950_v58, %v2951_v46  ;;  %v2899_v58 = vld [vmem:[#allocation2 + $0x240] sm:$0xff] }
 0x672   : > { %v2864_v36 = vsel %vm372_vm2, %v2851_v41, inf  ;;  %v2943_v16 = vsel %vm9068_vm3, %v2851_v41, inf }
 0x673   : > { %2887 = vmin.xlane.f32.xlu0 %v2863_v63  ;;  %v2952_v4 = vmin.f32 %v2948_v33, %v2943_v16  ;;  %2889 = vmin.xlane.f32.xlu1 %v2864_v36  ;;  %v2900_v63 = vld [vmem:[#allocation2 + $0x248] sm:$0xff] }
 0x675   : > { %v2953_v55 = vmin.f32 %v2952_v4, %v2949_v20  ;;  %v2901_v4 = vld [vmem:[#allocation2 + $0x250] sm:$0xff] }
 0x677   : > { %v2955_v14 = vmin.f32 %v2953_v55, %v2954_v23  ;;  %v2902_v23 = vld [vmem:[#allocation2 + $0x258] sm:$0xff] }
 0x679   : > { %v2956_v6 = vrot.slane %v2955_v14, 4 }
 0x67b   : > { %v2957_v42 = vmin.f32 %v2955_v14, %v2956_v6 }
 0x67d   : > { %v2958_v44 = vrot.slane %v2957_v42, 2 }
 0x67f   : > { %v2959_v59 = vmin.f32 %v2957_v42, %v2958_v44  ;;  %v2903_v44 = vld [vmem:[#allocation2 + $0x260] sm:$0xff] }
 0x681   : > { %v2960_v29 = vrot.slane %v2959_v59, 1 }
 0x683   : > { %v2961_v9 = vmin.f32 %v2959_v59, %v2960_v29  ;;  %v2904_v59 = vld [vmem:[#allocation2 + $0x268] sm:$0xff] }
 0x684   : > { %2994 = vperm.xlu1 %5381, %v5264_v26  }
 0x685   : > { %5408 = vrsqrt.f32 %v2961_v9  ;;  %vm2964_vm0 = vcmp.eq.f32.partialorder %v2961_v9, inf  ;;  %v2967_v45 = vand.u32 2147483648, %v2961_v9  ;;  %vm2966_vm1 = vcmp.eq.f32.partialorder %v2961_v9, 0.0 }
 0x688   : > { %3004 = vperm.xlu1 %5381, %v5266_v24  }
 0x68c   : > { %3009 = vperm.xlu1 %5381, %v5267_v19  }
 0x690   : > { %3014 = vperm.xlu1 %5381, %v5268_v27  }
 0x692   : > { %v5409_v32 = vpop.eup %5408 }
 0x693   : > { %v2963_v30 = vmul.f32 %v5409_v32, %v2961_v9 }
 0x694   : > { %3019 = vperm.xlu1 %5381, %v5269_v43  }
 0x695   : > { %v2965_v53 = vsel %vm2964_vm0, %v2961_v9, %v2963_v30 }
 0x696   : > { %v2968_v60 = vsel %vm2966_vm1, %v2967_v45, %v2965_v53 }
 0x697   : > { %v2969_v1 = vsel %vm372_vm2, %v2968_v60, 0.0  ;;  %v2971_v60 = vld [vmem:[#allocation3 + $0x5] sm:$0x1] }
 0x698   : > { %2972 = vadd.xlane.f32.xlu0 %v2969_v1  ;;  %3024 = vperm.xlu1 %5381, %v5270_v47  }
 0x69c   : > { %3029 = vperm.xlu1 %5381, %v5271_v38  }
 0x6a0   : > { %3034 = vperm.xlu1 %5381, %v5272_v8  }
 0x6a4   : > { %3044 = vperm.xlu1 %5381, %v5274_v34  }
 0x6a7   : > { %v2866_v40 = vpop.xlane.xlu0 %2865 }
 0x6a8   : > { %v2905_v21 = vmin.f32 %v2892_v57, %v2866_v40  ;;  %3054 = vperm.xlu1 %5381, %v5276_v10  }
 0x6aa   : > { %2918 = vst.msk [vmem:[#allocation2 + $0x208] sm:$0xff] %vm766_vm6, %v2905_v21 }
 0x6ac   : > { %5382 = vset.pattern.permute.xlu1 %v5694_v12 }
 0x6ad   : > { %3092 = vperm.xlu1 %5382, %v5265_v7  }
 0x6ae   : > { %3088 = vperm.xlu0 %5380, %v5264_v26  }
 0x6b1   : > { %3096 = vperm.xlu1 %5382, %v5266_v24  }
 0x6b2   : > { %3100 = vperm.xlu0 %5380, %v5267_v19  }
 0x6b5   : > { %3104 = vperm.xlu1 %5382, %v5268_v27  }
 0x6b6   : > { %3108 = vperm.xlu0 %5380, %v5269_v43  }
 0x6b9   : > { %3112 = vperm.xlu1 %5382, %v5270_v47  }
 0x6ba   : > { %3116 = vperm.xlu0 %5380, %v5271_v38  }
 0x6bd   : > { %3120 = vperm.xlu1 %5382, %v5272_v8  }
 0x6be   : > { %3124 = vperm.xlu0 %5380, %v5273_v39  }
 0x6c1   : > { %3128 = vperm.xlu1 %5382, %v5274_v34  }
 0x6c2   : > { %3132 = vperm.xlu0 %5380, %v5275_v31  }
 0x6c5   : > { %3136 = vperm.xlu1 %5382, %v5276_v10  }
 0x6c6   : > { %5383 = vset.pattern.permute.xlu0 %v5696_v25 }
 0x6c7   : > { %3183 = vperm.xlu0 %5383, %v5264_v26  }
 0x6c9   : > { %5384 = vset.pattern.permute.xlu1 %v5696_v25 }
 0x6ca   : > { %3187 = vperm.xlu1 %5384, %v5265_v7  }
 0x6cb   : > { %3195 = vperm.xlu0 %5383, %v5267_v19  }
 0x6ce   : > { %3191 = vperm.xlu1 %5384, %v5266_v24  }
 0x6cf   : > { %3203 = vperm.xlu0 %5383, %v5269_v43  }
 0x6d2   : > { %3199 = vperm.xlu1 %5384, %v5268_v27  }
 0x6d3   : > { %3211 = vperm.xlu0 %5383, %v5271_v38  }
 0x6d6   : > { %3207 = vperm.xlu1 %5384, %v5270_v47  }
 0x6d7   : > { %3219 = vperm.xlu0 %5383, %v5273_v39  }
 0x6da   : > { %3215 = vperm.xlu1 %5384, %v5272_v8  }
 0x6db   : > { %3227 = vperm.xlu0 %5383, %v5275_v31  }
 0x6de   : > { %3223 = vperm.xlu1 %5384, %v5274_v34  }
 0x6df   : > { %5385 = vset.pattern.permute.xlu0 %v5695_v13 }
 0x6e0   : > { %2999 = vperm.xlu0 %5385, %v5265_v7  }
 0x6e2   : > { %3231 = vperm.xlu1 %5384, %v5276_v10  }
 0x6e4   : > { %3039 = vperm.xlu0 %5385, %v5273_v39   ;;  %v2868_v11 = vpop.xlane.xlu1 %2867 }
 0x6e5   : > { %v2906_v54 = vmin.f32 %v2893_v3, %v2868_v11  ;;  %v5277_v11 = vld [vmem:[%s5761_s28 + $0x18] sm:$0x7] }
 0x6e6   : > { %5386 = vset.pattern.permute.xlu1 %v5695_v13 }
 0x6e7   : > { %2919 = vst.msk [vmem:[#allocation2 + $0x210] sm:$0xff] %vm766_vm6, %v2906_v54 }
 0x6e8   : > { %v2870_v28 = vpop.xlane.xlu0 %2869  ;;  %3049 = vperm.xlu0 %5385, %v5275_v31  }
 0x6e9   : > { %v2907_v2 = vmin.f32 %v2894_v49, %v2870_v28  ;;  %v7303_v49 = vrot.slane %v5277_v11, %v6049_v52 }
 0x6eb   : > { %2920 = vst.msk [vmem:[#allocation2 + $0x218] sm:$0xff] %vm766_vm6, %v2907_v2  ;;  %v7308_v2 = vrot.slane %v5277_v11, %v6045_v50 }
 0x6ec   : > { %v2872_v37 = vpop.xlane.xlu0 %2871  ;;  %v2874_v15 = vpop.xlane.xlu1 %2873 }
 0x6ed   : > { %v2908_v61 = vmin.f32 %v2895_v51, %v2872_v37  ;;  %v2909_v5 = vmin.f32 %v2896_v17, %v2874_v15 }
 0x6ef   : > { %2921 = vst.msk [vmem:[#allocation2 + $0x220] sm:$0xff] %vm766_vm6, %v2908_v61  ;;  %2922 = vst.msk [vmem:[#allocation2 + $0x228] sm:$0xff] %vm766_vm6, %v2909_v5  ;;  %v7317_v61 = vrot.slane %v5277_v11, %v6060_v56 }
 0x6f0   : > { %v2876_v18 = vpop.xlane.xlu0 %2875  ;;  %v2878_v22 = vpop.xlane.xlu1 %2877 }
 0x6f1   : > { %v2910_v41 = vmin.f32 %v2897_v35, %v2876_v18  ;;  %v2911_v33 = vmin.f32 %v2898_v48, %v2878_v22 }
 0x6f3   : > { %2923 = vst.msk [vmem:[#allocation2 + $0x230] sm:$0xff] %vm766_vm6, %v2910_v41  ;;  %2924 = vst.msk [vmem:[#allocation2 + $0x238] sm:$0xff] %vm766_vm6, %v2911_v33 }
 0x6f4   : > { %v2880_v36 = vpop.xlane.xlu0 %2879  ;;  %v2882_v16 = vpop.xlane.xlu1 %2881 }
 0x6f5   : > { %v2912_v20 = vmin.f32 %v2899_v58, %v2880_v36  ;;  %v2913_v46 = vmin.f32 %v2900_v63, %v2882_v16 }
 0x6f7   : > { %2925 = vst.msk [vmem:[#allocation2 + $0x240] sm:$0xff] %vm766_vm6, %v2912_v20  ;;  %2926 = vst.msk [vmem:[#allocation2 + $0x248] sm:$0xff] %vm766_vm6, %v2913_v46 }
 0x6f8   : > { %v2884_v55 = vpop.xlane.xlu0 %2883  ;;  %v2886_v14 = vpop.xlane.xlu1 %2885 }
 0x6f9   : > { %v2914_v6 = vmin.f32 %v2901_v4, %v2884_v55  ;;  %v2915_v42 = vmin.f32 %v2902_v23, %v2886_v14 }
 0x6fb   : > { %2927 = vst.msk [vmem:[#allocation2 + $0x250] sm:$0xff] %vm766_vm6, %v2914_v6  ;;  %2928 = vst.msk [vmem:[#allocation2 + $0x258] sm:$0xff] %vm766_vm6, %v2915_v42 }
 0x6fc   : > { %v2888_v29 = vpop.xlane.xlu0 %2887  ;;  %v2890_v26 = vpop.xlane.xlu1 %2889 }
 0x6fd   : > { %v2916_v9 = vmin.f32 %v2903_v44, %v2888_v29  ;;  %v2917_v24 = vmin.f32 %v2904_v59, %v2890_v26 }
 0x6ff   : > { %2929 = vst.msk [vmem:[#allocation2 + $0x260] sm:$0xff] %vm766_vm6, %v2916_v9  ;;  %2930 = vst.msk [vmem:[#allocation2 + $0x268] sm:$0xff] %vm766_vm6, %v2917_v24 }
 0x700   : > { %v2995_v19 = vpop.permute.xlu1 %2994 }
 0x701   : > { %v3061_v15 = vsub.f32 %v2995_v19, %v7308_v2 }
 0x703   : > { %v3074_v18 = vmul.f32 %v3061_v15, %v3061_v15 }
 0x704   : > { %v3005_v27 = vpop.permute.xlu1 %3004 }
 0x705   : > { %v3063_v36 = vsub.f32 %v3005_v27, %v7308_v2 }
 0x707   : > { %v3076_v42 = vmul.f32 %v3063_v36, %v3063_v36 }
 0x708   : > { %v3010_v43 = vpop.permute.xlu1 %3009 }
 0x709   : > { %v3064_v46 = vsub.f32 %v3010_v43, %v7308_v2 }
 0x70b   : > { %v3077_v9 = vmul.f32 %v3064_v46, %v3064_v46 }
 0x70c   : > { %v7280_v32 = vpop.permute.xlu1 %3014 }
 0x710   : > { %v3020_v30 = vpop.permute.xlu1 %3019 }
 0x711   : > { %v3066_v24 = vsub.f32 %v3020_v30, %v7308_v2 }
 0x713   : > { %v3079_v11 = vmul.f32 %v3066_v24, %v3066_v24 }
 0x714   : > { %v7282_v45 = vpop.permute.xlu1 %3024 }
 0x718   : > { %v7284_v53 = vpop.permute.xlu1 %3029 }
 0x71c   : > { %v7286_v47 = vpop.permute.xlu1 %3034 }
 0x720   : > { %v7288_v1 = vpop.permute.xlu1 %3044 }
 0x721   : > { %v2973_v38 = vpop.xlane.xlu0 %2972 }
 0x722   : > { %v2974_v8 = vadd.f32 %v2973_v38, %v2971_v60 }
 0x724   : > { %2975 = vst.msk [vmem:[#allocation3 + $0x5] sm:$0x1] %vm849_vm7, %v2974_v8  ;;  %v7291_v34 = vpop.permute.xlu1 %3054 }
 0x728   : > { %v7293_v57 = vpop.permute.xlu1 %3092 }
 0x729   : > { %v3089_v10 = vpop.permute.xlu0 %3088 }
 0x72a   : > { %v3143_v17 = vsub.f32 %v3089_v10, %v7303_v49 }
 0x72c   : > { %v3097_v40 = vpop.permute.xlu1 %3096  ;;  %v3156_v35 = vmul.f32 %v3143_v17, %v3143_v17  ;;  %v3068_v17 = vsub.f32 %v7284_v53, %v7308_v2 }
 0x72d   : > { %v3101_v21 = vpop.permute.xlu0 %3100  ;;  %v3145_v41 = vsub.f32 %v3097_v40, %v7303_v49 }
 0x72e   : > { %v3169_v33 = vadd.f32 %v3156_v35, %v3074_v18  ;;  %v3146_v16 = vsub.f32 %v3101_v21, %v7303_v49 }
 0x72f   : > { %v3158_v23 = vmul.f32 %v3145_v41, %v3145_v41 }
 0x730   : > { %v7295_v7 = vpop.permute.xlu1 %3104  ;;  %v3159_v44 = vmul.f32 %v3146_v16, %v3146_v16  ;;  %v3065_v16 = vsub.f32 %v7280_v32, %v7308_v2  ;;  %v3073_v32 = vsub.f32 %v7291_v34, %v7308_v2 }
 0x731   : > { %v3109_v39 = vpop.permute.xlu0 %3108  ;;  %v3171_v19 = vadd.f32 %v3158_v23, %v3076_v42 }
 0x732   : > { %v3148_v59 = vsub.f32 %v3109_v39, %v7303_v49  ;;  %v3172_v8 = vadd.f32 %v3159_v44, %v3077_v9 }
 0x734   : > { %v7297_v31 = vpop.permute.xlu1 %3112  ;;  %v3161_v10 = vmul.f32 %v3148_v59, %v3148_v59 }
 0x735   : > { %v3117_v3 = vpop.permute.xlu0 %3116  ;;  %v3149_v46 = vsub.f32 %v7297_v31, %v7303_v49 }
 0x736   : > { %v3150_v40 = vsub.f32 %v3117_v3, %v7303_v49 }
 0x738   : > { %v7300_v54 = vpop.permute.xlu1 %3120  ;;  %v3163_v3 = vmul.f32 %v3150_v40, %v3150_v40 }
 0x739   : > { %v7305_v28 = vpop.permute.xlu0 %3124 }
 0x73c   : > { %v7310_v51 = vpop.permute.xlu1 %3128 }
 0x73d   : > { %v7313_v37 = vpop.permute.xlu0 %3132 }
 0x740   : > { %v7319_v5 = vpop.permute.xlu1 %3136 }
 0x742   : > { %v3184_v48 = vpop.permute.xlu0 %3183 }
 0x743   : > { %v3238_v22 = vsub.f32 %v3184_v48, %v7317_v61 }
 0x745   : > { %v3251_v58 = vmul.f32 %v3238_v22, %v3238_v22  ;;  %v7323_v63 = vpop.permute.xlu1 %3187  ;;  %v3174_v22 = vadd.f32 %v3161_v10, %v3079_v11 }
 0x746   : > { %v3196_v20 = vpop.permute.xlu0 %3195 }
 0x747   : > { %v7328_v4 = vadd.f32 %v3251_v58, %v3169_v33  ;;  %v3241_v55 = vsub.f32 %v3196_v20, %v7317_v61  ;;  %v3081_v33 = vmul.f32 %v3068_v17, %v3068_v17  ;;  %v3147_v20 = vsub.f32 %v7295_v7, %v7303_v49 }
 0x748   : > { %v3144_v7 = vsub.f32 %v7293_v57, %v7303_v49  ;;  %v3152_v57 = vsub.f32 %v7305_v28, %v7303_v49  ;;  %v3153_v28 = vsub.f32 %v7310_v51, %v7303_v49 }
 0x749   : > { %v3192_v14 = vpop.permute.xlu1 %3191  ;;  %v3277_v6 = vsel %vm372_vm2, %v7328_v4, inf  ;;  %v3254_v27 = vmul.f32 %v3241_v55, %v3241_v55  ;;  %v3067_v55 = vsub.f32 %v7282_v45, %v7308_v2  ;;  %v3176_v42 = vadd.f32 %v3163_v3, %v3081_v33 }
 0x74a   : > { %v3240_v29 = vsub.f32 %v3192_v14, %v7317_v61  ;;  %v3204_v26 = vpop.permute.xlu0 %3203  ;;  %3290 = vmin.xlane.f32.xlu0 %v3277_v6  ;;  %v3069_v14 = vsub.f32 %v7286_v47, %v7308_v2  ;;  %v3071_v6 = vsub.f32 %v7288_v1, %v7308_v2  ;;  %v3160_v59 = vmul.f32 %v3147_v20, %v3147_v20 }
 0x74b   : > { %v3243_v60 = vsub.f32 %v3204_v26, %v7317_v61  ;;  %v7343_v15 = vadd.f32 %v3254_v27, %v3172_v8  ;;  %v3151_v47 = vsub.f32 %v7300_v54, %v7303_v49  ;;  %v3078_v26 = vmul.f32 %v3065_v16, %v3065_v16 }
 0x74c   : > { %v3253_v43 = vmul.f32 %v3240_v29, %v3240_v29  ;;  %v3162_v29 = vmul.f32 %v3149_v46, %v3149_v46  ;;  %v3080_v9 = vmul.f32 %v3067_v55, %v3067_v55  ;;  %v3082_v24 = vmul.f32 %v3069_v14, %v3069_v14 }
 0x74d   : > { %v3200_v38 = vpop.permute.xlu1 %3199  ;;  %v3256_v30 = vmul.f32 %v3243_v60, %v3243_v60  ;;  %v3280_v53 = vsel %vm372_vm2, %v7343_v15, inf  ;;  %v3084_v34 = vmul.f32 %v3071_v6, %v3071_v6  ;;  %v3155_v27 = vsub.f32 %v7319_v5, %v7303_v49 }
 0x74e   : > { %v7339_v21 = vadd.f32 %v3253_v43, %v3171_v19  ;;  %v3212_v39 = vpop.permute.xlu0 %3211  ;;  %v3086_v19 = vmul.f32 %v3073_v32, %v3073_v32  ;;  %v3242_v43 = vsub.f32 %v3200_v38, %v7317_v61  ;;  %v3157_v8 = vmul.f32 %v3144_v7, %v3144_v7 }
 0x74f   : > { %v3245_v35 = vsub.f32 %v3212_v39, %v7317_v61  ;;  %v7349_v58 = vadd.f32 %v3256_v30, %v3174_v22  ;;  %v3239_v54 = vsub.f32 %v7323_v63, %v7317_v61  ;;  %v3173_v39 = vadd.f32 %v3160_v59, %v3078_v26 }
 0x750   : > { %v3279_v48 = vsel %vm372_vm2, %v7339_v21, inf  ;;  %v3175_v11 = vadd.f32 %v3162_v29, %v3080_v9  ;;  %v3164_v17 = vmul.f32 %v3151_v47, %v3151_v47  ;;  %v3168_v22 = vmul.f32 %v3155_v27, %v3155_v27 }
 0x751   : > { %3294 = vmin.xlane.f32.xlu0 %v3279_v48  ;;  %v3208_v18 = vpop.permute.xlu1 %3207  ;;  %v3258_v36 = vmul.f32 %v3245_v35, %v3245_v35  ;;  %v3282_v45 = vsel %vm372_vm2, %v7349_v58, inf  ;;  %v3165_v48 = vmul.f32 %v3152_v57, %v3152_v57  ;;  %v3255_v3 = vmul.f32 %v3242_v43, %v3242_v43 }
 0x752   : > { %v3220_v41 = vpop.permute.xlu0 %3219  ;;  %v3244_v38 = vsub.f32 %v3208_v18, %v7317_v61  ;;  %v3177_v46 = vadd.f32 %v3164_v17, %v3082_v24  ;;  %v3166_v55 = vmul.f32 %v3153_v28, %v3153_v28  ;;  %v3154_v18 = vsub.f32 %v7313_v37, %v7303_v49 }
 0x753   : > { %v7370_v31 = vadd.f32 %v3258_v36, %v3176_v42  ;;  %v3247_v33 = vsub.f32 %v3220_v41, %v7317_v61  ;;  %v3181_v7 = vadd.f32 %v3168_v22, %v3086_v19 }
 0x754   : > { %v3257_v14 = vmul.f32 %v3244_v38, %v3244_v38  ;;  %v3179_v24 = vadd.f32 %v3166_v55, %v3084_v34  ;;  %v3167_v49 = vmul.f32 %v3154_v18, %v3154_v18 }
 0x755   : > { %3296 = vmin.xlane.f32.xlu0 %v3280_v53  ;;  %v3216_v23 = vpop.permute.xlu1 %3215  ;;  %v3284_v40 = vsel %vm372_vm2, %v7370_v31, inf  ;;  %v3252_v53 = vmul.f32 %v3239_v54, %v3239_v54  ;;  %v3260_v41 = vmul.f32 %v3247_v33, %v3247_v33 }
 0x756   : > { %v3228_v44 = vpop.permute.xlu0 %3227  ;;  %v3246_v30 = vsub.f32 %v3216_v23, %v7317_v61  ;;  %v3270_v57 = vadd.f32 %v3257_v14, %v3175_v11 }
 0x757   : > { %v3249_v59 = vsub.f32 %v3228_v44, %v7317_v61 }
 0x758   : > { %v3259_v6 = vmul.f32 %v3246_v30, %v3246_v30  ;;  %v3283_v28 = vsel %vm372_vm2, %v3270_v57, inf }
 0x759   : > { %3300 = vmin.xlane.f32.xlu0 %v3282_v45  ;;  %v3224_v1 = vpop.permute.xlu1 %3223  ;;  %v3268_v45 = vadd.f32 %v3255_v3, %v3173_v39 }
 0x75a   : > { %v3248_v16 = vsub.f32 %v3224_v1, %v7317_v61  ;;  %v3272_v27 = vadd.f32 %v3259_v6, %v3177_v46  ;;  %v7429_v46 = vld [vmem:[%s9065_s0 + $0x2e8] sm:$0xff]  ;;  %v7435_v6 = vld [vmem:[%s9065_s0 + $0x2f0] sm:$0xff] }
 0x75b   : > { %v3000_v60 = vpop.permute.xlu0 %2999 }
 0x75c   : > { %v3062_v10 = vsub.f32 %v3000_v60, %v7308_v2  ;;  %v3261_v47 = vmul.f32 %v3248_v16, %v3248_v16  ;;  %v3369_v60 = vmin.f32 %v7328_v4, %v3268_v45  ;;  %v3371_v4 = vmin.f32 %v7339_v21, %v3270_v57  ;;  %v3319_v57 = vld [vmem:[#allocation2 + $0x280] sm:$0xff] }
 0x75d   : > { %3304 = vmin.xlane.f32.xlu0 %v3284_v40  ;;  %v3232_v5 = vpop.permute.xlu1 %3231  ;;  %v3285_v21 = vsel %vm372_vm2, %v3272_v27, inf }
 0x75e   : > { %v3075_v35 = vmul.f32 %v3062_v10, %v3062_v10  ;;  %v3250_v63 = vsub.f32 %v3232_v5, %v7317_v61  ;;  %v3281_v61 = vsel %vm372_vm2, %v3268_v45, inf  ;;  %v3274_v44 = vadd.f32 %v3261_v47, %v3179_v24  ;;  %v5279_v45 = vld [vmem:[%s9065_s0 + $0x2e0] sm:$0xff]  ;;  %v5289_v24 = vld [vmem:[%s9065_s0 + $0x330] sm:$0xff] }
 0x75f   : > { %v3040_v36 = vpop.permute.xlu0 %3039  ;;  %v3372_v10 = vmin.f32 %v7343_v15, %v7370_v31  ;;  %v3373_v39 = vmin.f32 %v3369_v60, %v3272_v27  ;;  %v7469_v47 = vld [vmem:[%s9065_s0 + $0x320] sm:$0xff] }
 0x760   : > { %v3170_v20 = vadd.f32 %v3157_v8, %v3075_v35  ;;  %v3070_v51 = vsub.f32 %v3040_v36, %v7308_v2  ;;  %v3263_v23 = vmul.f32 %v3250_v63, %v3250_v63  ;;  %v3262_v8 = vmul.f32 %v3249_v59, %v3249_v59  ;;  %v7460_v59 = vld [vmem:[%s9065_s0 + $0x318] sm:$0xff] }
 0x761   : > { %v3287_v22 = vsel %vm372_vm2, %v3274_v44, inf }
 0x762   : > { %v3083_v42 = vmul.f32 %v3070_v51, %v3070_v51  ;;  %v3265_v32 = vadd.f32 %v3252_v53, %v3170_v20  ;;  %v3276_v37 = vadd.f32 %v3263_v23, %v3181_v7  ;;  %v5278_v20 = vld [vmem:[%s9065_s0 + $0x2d8] sm:$0xff]  ;;  %v5283_v7 = vld [vmem:[%s9065_s0 + $0x300] sm:$0xff] }
 0x763   : > { %v3050_v29 = vpop.permute.xlu0 %3049 }
 0x764   : > { %v3178_v1 = vadd.f32 %v3165_v48, %v3083_v42  ;;  %v3072_v26 = vsub.f32 %v3050_v29, %v7308_v2  ;;  %v3278_v9 = vsel %vm372_vm2, %v3265_v32, inf  ;;  %v3370_v2 = vmin.f32 %v3265_v32, %v7349_v58  ;;  %v5282_v32 = vld [vmem:[%s9065_s0 + $0x2f8] sm:$0xff]  ;;  %v5285_v29 = vld [vmem:[%s9065_s0 + $0x310] sm:$0xff] }
 0x765   : > { %3292 = vmin.xlane.f32.xlu1 %v3278_v9  ;;  %v3368_v40 = vsel %vm9068_vm3, %v3276_v37, inf  ;;  %v3375_v58 = vmin.f32 %v3371_v4, %v3274_v44  ;;  %v3289_v36 = vsel %vm372_vm2, %v3276_v37, inf  ;;  %v3317_v9 = vld [vmem:[#allocation2 + $0x270] sm:$0xff] }
 0x766   : > { %v3085_v43 = vmul.f32 %v3072_v26, %v3072_v26  ;;  %v3273_v19 = vadd.f32 %v3260_v41, %v3178_v1  ;;  %v3377_v5 = vmin.f32 %v3373_v39, %v3368_v40  ;;  %v7454_v41 = vld [vmem:[%s9065_s0 + $0x308] sm:$0xff]  ;;  %v5290_v1 = vld [vmem:[%s9065_s0 + $0x338] sm:$0xff]  ;;  %v3321_v4 = vld [vmem:[#allocation2 + $0x290] sm:$0xff] }
 0x767   : > { %v5288_v26 = vld [vmem:[%s9065_s0 + $0x328] sm:$0xff] }
 0x768   : > { %v3180_v54 = vadd.f32 %v3167_v49, %v3085_v43  ;;  %v3286_v34 = vsel %vm372_vm2, %v3273_v19, inf  ;;  %v3374_v11 = vmin.f32 %v3370_v2, %v3273_v19  ;;  %v3320_v43 = vld [vmem:[#allocation2 + $0x288] sm:$0xff] }
 0x769   : > { %3308 = vmin.xlane.f32.xlu0 %v3286_v34  ;;  %3298 = vmin.xlane.f32.xlu1 %v3281_v61  ;;  %v3318_v34 = vld [vmem:[#allocation2 + $0x278] sm:$0xff] }
 0x76a   : > { %v3275_v17 = vadd.f32 %v3262_v8, %v3180_v54  ;;  %v3378_v15 = vmin.f32 %v3377_v5, %v3374_v11  ;;  %v3322_v8 = vld [vmem:[#allocation2 + $0x298] sm:$0xff]  ;;  %v3323_v5 = vld [vmem:[#allocation2 + $0x2a0] sm:$0xff] }
 0x76c   : > { %v3288_v38 = vsel %vm372_vm2, %v3275_v17, inf  ;;  %v3376_v30 = vmin.f32 %v3372_v10, %v3275_v17 }
 0x76d   : > { %3312 = vmin.xlane.f32.xlu0 %v3288_v38  ;;  %3302 = vmin.xlane.f32.xlu1 %v3283_v28 }
 0x76e   : > { %v3379_v31 = vmin.f32 %v3375_v58, %v3376_v30  ;;  %v3328_v58 = vld [vmem:[#allocation2 + $0x2c8] sm:$0xff] }
 0x770   : > { %v3380_v35 = vmin.f32 %v3378_v15, %v3379_v31 }
 0x771   : > { %3306 = vmin.xlane.f32.xlu1 %v3285_v21 }
 0x772   : > { %v3381_v63 = vrot.slane %v3380_v35, 4 }
 0x774   : > { %v3382_v48 = vmin.f32 %v3380_v35, %v3381_v63  ;;  %v3325_v35 = vld [vmem:[#allocation2 + $0x2b0] sm:$0xff] }
 0x775   : > { %3310 = vmin.xlane.f32.xlu1 %v3287_v22 }
 0x776   : > { %v3383_v3 = vrot.slane %v3382_v48, 2 }
 0x778   : > { %v3384_v33 = vmin.f32 %v3382_v48, %v3383_v3  ;;  %v3327_v48 = vld [vmem:[#allocation2 + $0x2c0] sm:$0xff] }
 0x779   : > { %3314 = vmin.xlane.f32.xlu1 %v3289_v36 }
 0x77a   : > { %v3385_v53 = vrot.slane %v3384_v33, 1 }
 0x77c   : > { %v3386_v16 = vmin.f32 %v3384_v33, %v3385_v53  ;;  %v3329_v33 = vld [vmem:[#allocation2 + $0x2d0] sm:$0xff] }
 0x77e   : > { %5410 = vrsqrt.f32 %v3386_v16  ;;  %vm3389_vm4 = vcmp.eq.f32.partialorder %v3386_v16, inf  ;;  %v3392_v18 = vand.u32 2147483648, %v3386_v16  ;;  %vm3391_vm5 = vcmp.eq.f32.partialorder %v3386_v16, 0.0 }
 0x78a   : > { %3419 = vperm.xlu1 %5386, %v5278_v20  }
 0x78b   : > { %v5411_v51 = vpop.eup %5410 }
 0x78c   : > { %v3388_v55 = vmul.f32 %v5411_v51, %v3386_v16 }
 0x78e   : > { %3429 = vperm.xlu1 %5386, %v7429_v46   ;;  %v3390_v23 = vsel %vm3389_vm4, %v3386_v16, %v3388_v55 }
 0x78f   : > { %v3393_v14 = vsel %vm3391_vm5, %v3392_v18, %v3390_v23  ;;  %v3396_v18 = vld [vmem:[#allocation3 + $0x6] sm:$0x1] }
 0x790   : > { %v3394_v42 = vsel %vm372_vm2, %v3393_v14, 0.0 }
 0x791   : > { %3397 = vadd.xlane.f32.xlu0 %v3394_v42 }
 0x792   : > { %3434 = vperm.xlu1 %5386, %v7435_v6  }
 0x796   : > { %3439 = vperm.xlu1 %5386, %v5282_v32  }
 0x79a   : > { %5387 = vset.pattern.permute.xlu1 %v5694_v12 }
 0x79b   : > { %3513 = vperm.xlu1 %5387, %v5278_v20  }
 0x79f   : > { %3529 = vperm.xlu1 %5387, %v5282_v32  }
 0x7a3   : > { %5388 = vset.pattern.permute.xlu1 %v5695_v13 }
 0x7a4   : > { %3444 = vperm.xlu1 %5388, %v5283_v7  }
 0x7a7   : > { %3424 = vperm.xlu0 %5385, %v5279_v45  }
 0x7a8   : > { %3449 = vperm.xlu1 %5388, %v7454_v41  }
 0x7ab   : > { %3459 = vperm.xlu0 %5385, %v7460_v59  }
 0x7ac   : > { %3454 = vperm.xlu1 %5388, %v5285_v29  }
 0x7af   : > { %3464 = vperm.xlu0 %5385, %v7469_v47  }
 0x7b0   : > { %5389 = vset.pattern.permute.xlu1 %v5694_v12 }
 0x7b1   : > { %3517 = vperm.xlu1 %5389, %v5279_v45  }
 0x7b3   : > { %5393 = vset.pattern.permute.xlu0 %v5694_v12 }
 0x7b4   : > { %3521 = vperm.xlu0 %5393, %v7429_v46  }
 0x7b5   : > { %3525 = vperm.xlu1 %5389, %v7435_v6  }
 0x7b8   : > { %3537 = vperm.xlu0 %5393, %v7454_v41  }
 0x7b9   : > { %3533 = vperm.xlu1 %5389, %v5283_v7  }
 0x7bc   : > { %3545 = vperm.xlu0 %5393, %v7460_v59  }
 0x7bd   : > { %3541 = vperm.xlu1 %5389, %v5285_v29  }
 0x7c0   : > { %3549 = vperm.xlu0 %5393, %v7469_v47  }
 0x7c1   : > { %5390 = vset.pattern.permute.xlu1 %v5696_v25 }
 0x7c2   : > { %3608 = vperm.xlu1 %5390, %v5278_v20  }
 0x7c4   : > { %5395 = vset.pattern.permute.xlu0 %v5696_v25 }
 0x7c5   : > { %3624 = vperm.xlu0 %5395, %v5282_v32  }
 0x7c6   : > { %5391 = vset.pattern.permute.xlu1 %v5695_v13 }
 0x7c7   : > { %3479 = vperm.xlu1 %5391, %v5290_v1  }
 0x7c9   : > { %3612 = vperm.xlu0 %5395, %v5279_v45  }
 0x7cb   : > { %5392 = vset.pattern.permute.xlu1 %v5694_v12 }
 0x7cc   : > { %3561 = vperm.xlu1 %5392, %v5290_v1  }
 0x7cd   : > { %3628 = vperm.xlu0 %5395, %v5283_v7  }
 0x7d0   : > { %5394 = vset.pattern.permute.xlu1 %v5695_v13 }
 0x7d1   : > { %3636 = vperm.xlu0 %5395, %v5285_v29   ;;  %3469 = vperm.xlu1 %5394, %v5288_v26  }
 0x7d3   : > { %v3291_v49 = vpop.xlane.xlu0 %3290 }
 0x7d4   : > { %v3330_v37 = vmin.f32 %v3317_v9, %v3291_v49 }
 0x7d5   : > { %3656 = vperm.xlu0 %5395, %v5290_v1   ;;  %3474 = vperm.xlu1 %5394, %v5289_v24  }
 0x7d6   : > { %3343 = vst.msk [vmem:[#allocation2 + $0x270] sm:$0xff] %vm766_vm6, %v3330_v37 }
 0x7d9   : > { %5396 = vset.pattern.permute.xlu1 %v5694_v12  ;;  %3648 = vperm.xlu0 %5395, %v5288_v26   ;;  %v3324_v12 = vld [vmem:[#allocation2 + $0x2a8] sm:$0xff] }
 0x7da   : > { %v3295_v27 = vpop.xlane.xlu0 %3294  ;;  %3553 = vperm.xlu1 %5396, %v5288_v26   ;;  %v5291_v26 = vld [vmem:[%s5761_s28 + $0x1c] sm:$0x7] }
 0x7db   : > { %v3332_v13 = vmin.f32 %v3319_v57, %v3295_v27  ;;  %v7535_v37 = vrot.slane %v5291_v26, %v6045_v50 }
 0x7dd   : > { %3345 = vst.msk [vmem:[#allocation2 + $0x280] sm:$0xff] %vm766_vm6, %v3332_v13 }
 0x7de   : > { %v3297_v19 = vpop.xlane.xlu0 %3296  ;;  %3557 = vperm.xlu1 %5396, %v5289_v24  }
 0x7df   : > { %v3333_v60 = vmin.f32 %v3320_v43, %v3297_v19  ;;  %v7544_v19 = vrot.slane %v5291_v26, %v6060_v56 }
 0x7e1   : > { %3346 = vst.msk [vmem:[#allocation2 + $0x288] sm:$0xff] %vm766_vm6, %v3333_v60 }
 0x7e2   : > { %v3301_v61 = vpop.xlane.xlu0 %3300  ;;  %5397 = vset.pattern.permute.xlu1 %v5696_v25  ;;  %v3326_v25 = vld [vmem:[#allocation2 + $0x2b8] sm:$0xff] }
 0x7e3   : > { %v3335_v44 = vmin.f32 %v3322_v8, %v3301_v61  ;;  %3616 = vperm.xlu1 %5397, %v7429_v46  }
 0x7e5   : > { %3348 = vst.msk [vmem:[#allocation2 + $0x298] sm:$0xff] %vm766_vm6, %v3335_v44 }
 0x7e6   : > { %v3305_v54 = vpop.xlane.xlu0 %3304 }
 0x7e7   : > { %v3337_v2 = vmin.f32 %v3324_v12, %v3305_v54  ;;  %3620 = vperm.xlu1 %5397, %v7435_v6  }
 0x7e9   : > { %3350 = vst.msk [vmem:[#allocation2 + $0x2a8] sm:$0xff] %vm766_vm6, %v3337_v2 }
 0x7eb   : > { %3632 = vperm.xlu1 %5397, %v7454_v41  }
 0x7ee   : > { %v3293_v10 = vpop.xlane.xlu1 %3292 }
 0x7ef   : > { %v3331_v40 = vmin.f32 %v3318_v34, %v3293_v10  ;;  %3640 = vperm.xlu1 %5397, %v7460_v59  }
 0x7f1   : > { %3344 = vst.msk [vmem:[#allocation2 + $0x278] sm:$0xff] %vm766_vm6, %v3331_v40 }
 0x7f2   : > { %v3309_v39 = vpop.xlane.xlu0 %3308  ;;  %v3299_v11 = vpop.xlane.xlu1 %3298 }
 0x7f3   : > { %v3339_v17 = vmin.f32 %v3326_v25, %v3309_v39  ;;  %v3334_v28 = vmin.f32 %v3321_v4, %v3299_v11  ;;  %3644 = vperm.xlu1 %5397, %v7469_v47  }
 0x7f5   : > { %3352 = vst.msk [vmem:[#allocation2 + $0x2b8] sm:$0xff] %vm766_vm6, %v3339_v17  ;;  %3347 = vst.msk [vmem:[#allocation2 + $0x290] sm:$0xff] %vm766_vm6, %v3334_v28 }
 0x7f6   : > { %v3313_v38 = vpop.xlane.xlu0 %3312  ;;  %v3303_v30 = vpop.xlane.xlu1 %3302 }
 0x7f7   : > { %v3341_v15 = vmin.f32 %v3328_v58, %v3313_v38  ;;  %v3336_v31 = vmin.f32 %v3323_v5, %v3303_v30  ;;  %3652 = vperm.xlu1 %5397, %v5289_v24   ;;  %v7532_v24 = vrot.slane %v5291_v26, %v6049_v52 }
 0x7f9   : > { %3354 = vst.msk [vmem:[#allocation2 + $0x2c8] sm:$0xff] %vm766_vm6, %v3341_v15  ;;  %3349 = vst.msk [vmem:[#allocation2 + $0x2a0] sm:$0xff] %vm766_vm6, %v3336_v31 }
 0x7fa   : > { %v3307_v21 = vpop.xlane.xlu1 %3306 }
 0x7fb   : > { %v3338_v63 = vmin.f32 %v3325_v35, %v3307_v21 }
 0x7fd   : > { %3351 = vst.msk [vmem:[#allocation2 + $0x2b0] sm:$0xff] %vm766_vm6, %v3338_v63 }
 0x7fe   : > { %v3311_v22 = vpop.xlane.xlu1 %3310 }
 0x7ff   : > { %v3340_v3 = vmin.f32 %v3327_v48, %v3311_v22 }
 0x801   : > { %3353 = vst.msk [vmem:[#allocation2 + $0x2c0] sm:$0xff] %vm766_vm6, %v3340_v3 }
 0x802   : > { %v3315_v36 = vpop.xlane.xlu1 %3314 }
 0x803   : > { %v3342_v53 = vmin.f32 %v3329_v33, %v3315_v36 }
 0x805   : > { %3355 = vst.msk [vmem:[#allocation2 + $0x2d0] sm:$0xff] %vm766_vm6, %v3342_v53 }
 0x806   : > { %v3420_v16 = vpop.permute.xlu1 %3419 }
 0x807   : > { %v3486_v43 = vsub.f32 %v3420_v16, %v7535_v37 }
 0x809   : > { %v3499_v61 = vmul.f32 %v3486_v43, %v3486_v43 }
 0x80a   : > { %v7513_v20 = vpop.permute.xlu1 %3429 }
 0x80e   : > { %v7515_v51 = vpop.permute.xlu1 %3434 }
 0x812   : > { %v3440_v46 = vpop.permute.xlu1 %3439 }
 0x813   : > { %v3490_v25 = vsub.f32 %v3440_v46, %v7535_v37 }
 0x815   : > { %v3503_v38 = vmul.f32 %v3490_v25, %v3490_v25 }
 0x816   : > { %v3514_v55 = vpop.permute.xlu1 %3513 }
 0x817   : > { %v3568_v27 = vsub.f32 %v3514_v55, %v7532_v24 }
 0x819   : > { %v3581_v8 = vmul.f32 %v3568_v27, %v3568_v27 }
 0x81a   : > { %v3398_v23 = vpop.xlane.xlu0 %3397  ;;  %v3530_v14 = vpop.permute.xlu1 %3529 }
 0x81b   : > { %v3399_v6 = vadd.f32 %v3398_v23, %v3396_v18  ;;  %v3594_v12 = vadd.f32 %v3581_v8, %v3499_v61  ;;  %v3572_v34 = vsub.f32 %v3530_v14, %v7532_v24  ;;  %v3488_v18 = vsub.f32 %v7513_v20, %v7535_v37 }
 0x81c   : > { %v3489_v14 = vsub.f32 %v7515_v51, %v7535_v37 }
 0x81d   : > { %3400 = vst.msk [vmem:[#allocation3 + $0x6] sm:$0x1] %vm849_vm7, %v3399_v6  ;;  %v3585_v28 = vmul.f32 %v3572_v34, %v3572_v34  ;;  %v3501_v20 = vmul.f32 %v3488_v18, %v3488_v18 }
 0x81f   : > { %v7518_v42 = vpop.permute.xlu1 %3444  ;;  %v3598_v21 = vadd.f32 %v3585_v28, %v3503_v38 }
 0x822   : > { %v3425_v32 = vpop.permute.xlu0 %3424 }
 0x823   : > { %v7520_v7 = vpop.permute.xlu1 %3449  ;;  %v3487_v10 = vsub.f32 %v3425_v32, %v7535_v37 }
 0x825   : > { %v3500_v58 = vmul.f32 %v3487_v10, %v3487_v10 }
 0x826   : > { %v7522_v45 = vpop.permute.xlu0 %3459 }
 0x827   : > { %v7524_v41 = vpop.permute.xlu1 %3454  ;;  %v3494_v27 = vsub.f32 %v7522_v45, %v7535_v37 }
 0x828   : > { %v3493_v8 = vsub.f32 %v7524_v41, %v7535_v37 }
 0x82a   : > { %v7526_v59 = vpop.permute.xlu0 %3464  ;;  %v3506_v10 = vmul.f32 %v3493_v8, %v3493_v8 }
 0x82c   : > { %v3518_v29 = vpop.permute.xlu1 %3517 }
 0x82d   : > { %v3569_v50 = vsub.f32 %v3518_v29, %v7532_v24  ;;  %v3491_v29 = vsub.f32 %v7518_v42, %v7535_v37 }
 0x82f   : > { %v3522_v47 = vpop.permute.xlu0 %3521  ;;  %v3582_v4 = vmul.f32 %v3569_v50, %v3569_v50  ;;  %v3504_v61 = vmul.f32 %v3491_v29, %v3491_v29 }
 0x830   : > { %v3526_v1 = vpop.permute.xlu1 %3525  ;;  %v3570_v46 = vsub.f32 %v3522_v47, %v7532_v24  ;;  %v3492_v47 = vsub.f32 %v7520_v7, %v7535_v37 }
 0x831   : > { %v3595_v30 = vadd.f32 %v3582_v4, %v3500_v58  ;;  %v3571_v6 = vsub.f32 %v3526_v1, %v7532_v24  ;;  %v3502_v1 = vmul.f32 %v3489_v14, %v3489_v14 }
 0x832   : > { %v3583_v26 = vmul.f32 %v3570_v46, %v3570_v46  ;;  %v3505_v45 = vmul.f32 %v3492_v47, %v3492_v47 }
 0x833   : > { %v7529_v9 = vpop.permute.xlu0 %3537 }
 0x834   : > { %v3534_v49 = vpop.permute.xlu1 %3533 }
 0x835   : > { %v3573_v32 = vsub.f32 %v3534_v49, %v7532_v24  ;;  %v3574_v49 = vsub.f32 %v7529_v9, %v7532_v24  ;;  %v3495_v9 = vsub.f32 %v7526_v59, %v7535_v37 }
 0x837   : > { %v7537_v57 = vpop.permute.xlu0 %3545  ;;  %v3586_v42 = vmul.f32 %v3573_v32, %v3573_v32 }
 0x838   : > { %v7540_v13 = vpop.permute.xlu1 %3541 }
 0x839   : > { %v3575_v41 = vsub.f32 %v7540_v13, %v7532_v24 }
 0x83b   : > { %v7546_v60 = vpop.permute.xlu0 %3549  ;;  %v3588_v59 = vmul.f32 %v3575_v41, %v3575_v41 }
 0x83d   : > { %v3609_v52 = vpop.permute.xlu1 %3608  ;;  %v3601_v29 = vadd.f32 %v3588_v59, %v3506_v10 }
 0x83e   : > { %v3663_v44 = vsub.f32 %v3609_v52, %v7544_v19  ;;  %v3584_v52 = vmul.f32 %v3571_v6, %v3571_v6 }
 0x840   : > { %v3676_v54 = vmul.f32 %v3663_v44, %v3663_v44  ;;  %v3625_v2 = vpop.permute.xlu0 %3624  ;;  %v3596_v44 = vadd.f32 %v3583_v26, %v3501_v20 }
 0x841   : > { %v3667_v39 = vsub.f32 %v3625_v2, %v7544_v19  ;;  %v3576_v2 = vsub.f32 %v7537_v57, %v7532_v24 }
 0x842   : > { %v7552_v40 = vadd.f32 %v3676_v54, %v3594_v12  ;;  %v7554_v56 = vpop.permute.xlu1 %3479  ;;  %v3507_v54 = vmul.f32 %v3494_v27, %v3494_v27 }
 0x843   : > { %v3680_v15 = vmul.f32 %v3667_v39, %v3667_v39  ;;  %v3597_v39 = vadd.f32 %v3584_v52, %v3502_v1 }
 0x844   : > { %v3613_v11 = vpop.permute.xlu0 %3612  ;;  %v3702_v17 = vsel %vm372_vm2, %v7552_v40, inf }
 0x845   : > { %v3664_v5 = vsub.f32 %v3613_v11, %v7544_v19  ;;  %3715 = vmin.xlane.f32.xlu0 %v3702_v17  ;;  %v7564_v48 = vadd.f32 %v3680_v15, %v3598_v21  ;;  %v3587_v11 = vmul.f32 %v3574_v49, %v3574_v49  ;;  %v3599_v17 = vadd.f32 %v3586_v42, %v3504_v61 }
 0x847   : > { %v3677_v31 = vmul.f32 %v3664_v5, %v3664_v5  ;;  %v3562_v35 = vpop.permute.xlu1 %3561  ;;  %v3706_v33 = vsel %vm372_vm2, %v7564_v48, inf  ;;  %v3600_v46 = vadd.f32 %v3587_v11, %v3505_v45 }
 0x848   : > { %v3629_v53 = vpop.permute.xlu0 %3628  ;;  %v3580_v15 = vsub.f32 %v3562_v35, %v7532_v24 }
 0x849   : > { %v7562_v63 = vadd.f32 %v3677_v31, %v3595_v30  ;;  %v3668_v7 = vsub.f32 %v3629_v53, %v7544_v19  ;;  %v3589_v30 = vmul.f32 %v3576_v2, %v3576_v2  ;;  %v3794_v2 = vmin.f32 %v7552_v40, %v7564_v48 }
 0x84b   : > { %v3703_v22 = vsel %vm372_vm2, %v7562_v63, inf  ;;  %v3681_v58 = vmul.f32 %v3668_v7, %v3668_v7  ;;  %v3602_v32 = vadd.f32 %v3589_v30, %v3507_v54 }
 0x84c   : > { %3717 = vmin.xlane.f32.xlu1 %v3703_v22  ;;  %v3470_v3 = vpop.permute.xlu1 %3469  ;;  %v3637_v23 = vpop.permute.xlu0 %3636  ;;  %v3577_v22 = vsub.f32 %v7546_v60, %v7532_v24 }
 0x84d   : > { %v3670_v57 = vsub.f32 %v3637_v23, %v7544_v19  ;;  %v3496_v31 = vsub.f32 %v3470_v3, %v7535_v37  ;;  %v3694_v14 = vadd.f32 %v3681_v58, %v3599_v17 }
 0x84e   : > { %v3590_v27 = vmul.f32 %v3577_v22, %v3577_v22 }
 0x84f   : > { %v3683_v3 = vmul.f32 %v3670_v57, %v3670_v57  ;;  %v3509_v26 = vmul.f32 %v3496_v31, %v3496_v31  ;;  %v3795_v40 = vmin.f32 %v7562_v63, %v3694_v14 }
 0x850   : > { %3723 = vmin.xlane.f32.xlu1 %v3706_v33  ;;  %v7572_v36 = vpop.permute.xlu1 %3474  ;;  %v3657_v50 = vpop.permute.xlu0 %3656  ;;  %v3498_v33 = vsub.f32 %v7554_v56, %v7535_v37  ;;  %v3593_v56 = vmul.f32 %v3580_v15, %v3580_v15 }
 0x851   : > { %v3675_v18 = vsub.f32 %v3657_v50, %v7544_v19  ;;  %v3696_v42 = vadd.f32 %v3683_v3, %v3601_v29  ;;  %v3508_v50 = vmul.f32 %v3495_v9, %v3495_v9  ;;  %v3497_v45 = vsub.f32 %v7572_v36, %v7535_v37 }
 0x853   : > { %v3603_v41 = vadd.f32 %v3590_v27, %v3508_v50  ;;  %v3709_v9 = vsel %vm372_vm2, %v3696_v42, inf  ;;  %v3510_v36 = vmul.f32 %v3497_v45, %v3497_v45  ;;  %v3748_v45 = vld [vmem:[#allocation2 + $0x308] sm:$0xff] }
 0x854   : > { %v3649_v5 = vpop.permute.xlu0 %3648 }
 0x855   : > { %v3554_v16 = vpop.permute.xlu1 %3553  ;;  %v3673_v35 = vsub.f32 %v3649_v5, %v7544_v19 }
 0x856   : > { %v3578_v28 = vsub.f32 %v3554_v16, %v7532_v24 }
 0x857   : > { %v3686_v52 = vmul.f32 %v3673_v35, %v3673_v35 }
 0x858   : > { %v3591_v23 = vmul.f32 %v3578_v28, %v3578_v28 }
 0x859   : > { %v7575_v55 = vpop.permute.xlu1 %3557 }
 0x85a   : > { %v3604_v1 = vadd.f32 %v3591_v23, %v3509_v26  ;;  %v3579_v49 = vsub.f32 %v7575_v55, %v7532_v24 }
 0x85c   : > { %v3699_v10 = vadd.f32 %v3686_v52, %v3604_v1  ;;  %v3746_v1 = vld [vmem:[#allocation2 + $0x2f8] sm:$0xff] }
 0x85e   : > { %v3617_v43 = vpop.permute.xlu1 %3616 }
 0x85f   : > { %v3665_v51 = vsub.f32 %v3617_v43, %v7544_v19  ;;  %v3511_v43 = vmul.f32 %v3498_v33, %v3498_v33 }
 0x861   : > { %v3678_v12 = vmul.f32 %v3665_v51, %v3665_v51  ;;  %v3688_v51 = vmul.f32 %v3675_v18, %v3675_v18 }
 0x862   : > { %v3621_v34 = vpop.permute.xlu1 %3620 }
 0x863   : > { %v7601_v25 = vadd.f32 %v3678_v12, %v3596_v44  ;;  %v3666_v4 = vsub.f32 %v3621_v34, %v7544_v19  ;;  %v3707_v44 = vsel %vm372_vm2, %v3694_v14, inf  ;;  %v3606_v12 = vadd.f32 %v3593_v56, %v3511_v43 }
 0x865   : > { %v3679_v38 = vmul.f32 %v3666_v4, %v3666_v4  ;;  %v3704_v13 = vsel %vm372_vm2, %v7601_v25, inf  ;;  %v3701_v34 = vadd.f32 %v3688_v51, %v3606_v12  ;;  %v3592_v4 = vmul.f32 %v3579_v49, %v3579_v49  ;;  %v3747_v12 = vld [vmem:[#allocation2 + $0x300] sm:$0xff] }
 0x866   : > { %3719 = vmin.xlane.f32.xlu0 %v3704_v13  ;;  %v3633_v21 = vpop.permute.xlu1 %3632 }
 0x867   : > { %v7615_v53 = vadd.f32 %v3679_v38, %v3597_v39  ;;  %v3669_v16 = vsub.f32 %v3633_v21, %v7544_v19  ;;  %v3793_v58 = vsel %vm9068_vm3, %v3701_v34, inf  ;;  %v3605_v57 = vadd.f32 %v3592_v4, %v3510_v36 }
 0x868   : > { %v3712_v38 = vsel %vm372_vm2, %v3699_v10, inf }
 0x869   : > { %v3682_v6 = vmul.f32 %v3669_v16, %v3669_v16  ;;  %v3705_v60 = vsel %vm372_vm2, %v7615_v53, inf  ;;  %v3797_v63 = vmin.f32 %v7615_v53, %v3696_v42  ;;  %v3744_v42 = vld [vmem:[#allocation2 + $0x2e8] sm:$0xff] }
 0x86a   : > { %3721 = vmin.xlane.f32.xlu0 %v3705_v60  ;;  %v3641_v47 = vpop.permute.xlu1 %3640 }
 0x86b   : > { %v3695_v20 = vadd.f32 %v3682_v6, %v3600_v46  ;;  %v3671_v8 = vsub.f32 %v3641_v47, %v7544_v19  ;;  %v3742_v47 = vld [vmem:[#allocation2 + $0x2d8] sm:$0xff] }
 0x86d   : > { %v3684_v61 = vmul.f32 %v3671_v8, %v3671_v8  ;;  %v3708_v7 = vsel %vm372_vm2, %v3695_v20, inf  ;;  %v3796_v5 = vmin.f32 %v7601_v25, %v3695_v20  ;;  %v3714_v25 = vsel %vm372_vm2, %v3701_v34, inf  ;;  %v3743_v20 = vld [vmem:[#allocation2 + $0x2e0] sm:$0xff]  ;;  %v3750_v34 = vld [vmem:[#allocation2 + $0x318] sm:$0xff] }
 0x86e   : > { %3725 = vmin.xlane.f32.xlu0 %v3707_v44  ;;  %3727 = vmin.xlane.f32.xlu1 %v3708_v7  ;;  %v3645_v54 = vpop.permute.xlu1 %3644  ;;  %v3745_v44 = vld [vmem:[#allocation2 + $0x2f0] sm:$0xff] }
 0x86f   : > { %v3697_v24 = vadd.f32 %v3684_v61, %v3602_v32  ;;  %v3672_v55 = vsub.f32 %v3645_v54, %v7544_v19  ;;  %v3800_v21 = vmin.f32 %v3796_v5, %v3699_v10 }
 0x871   : > { %v3798_v39 = vmin.f32 %v3794_v2, %v3697_v24  ;;  %v3685_v11 = vmul.f32 %v3672_v55, %v3672_v55  ;;  %v3710_v37 = vsel %vm372_vm2, %v3697_v24, inf }
 0x872   : > { %3729 = vmin.xlane.f32.xlu0 %v3709_v9  ;;  %3731 = vmin.xlane.f32.xlu1 %v3710_v37  ;;  %v3653_v17 = vpop.permute.xlu1 %3652  ;;  %v3751_v9 = vld [vmem:[#allocation2 + $0x320] sm:$0xff]  ;;  %v3752_v37 = vld [vmem:[#allocation2 + $0x328] sm:$0xff] }
 0x873   : > { %v3698_v48 = vadd.f32 %v3685_v11, %v3603_v41  ;;  %v3674_v28 = vsub.f32 %v3653_v17, %v7544_v19  ;;  %v3802_v13 = vmin.f32 %v3798_v39, %v3793_v58  ;;  %v3749_v41 = vld [vmem:[#allocation2 + $0x310] sm:$0xff]  ;;  %v3754_v58 = vld [vmem:[#allocation2 + $0x338] sm:$0xff] }
 0x875   : > { %v3799_v30 = vmin.f32 %v3795_v40, %v3698_v48  ;;  %v3687_v59 = vmul.f32 %v3674_v28, %v3674_v28  ;;  %v3711_v15 = vsel %vm372_vm2, %v3698_v48, inf  ;;  %v3753_v28 = vld [vmem:[#allocation2 + $0x330] sm:$0xff] }
 0x876   : > { %3735 = vmin.xlane.f32.xlu1 %v3712_v38  ;;  %3733 = vmin.xlane.f32.xlu0 %v3711_v15 }
 0x877   : > { %v3803_v19 = vmin.f32 %v3802_v13, %v3799_v30  ;;  %v3700_v31 = vadd.f32 %v3687_v59, %v3605_v57  ;;  %v3821_v30 = vld [vmem:[#allocation3 + $0x7] sm:$0x1] }
 0x879   : > { %v3801_v22 = vmin.f32 %v3797_v63, %v3700_v31  ;;  %v3713_v33 = vsel %vm372_vm2, %v3700_v31, inf }
 0x87a   : > { %3739 = vmin.xlane.f32.xlu1 %v3714_v25  ;;  %3737 = vmin.xlane.f32.xlu0 %v3713_v33 }
 0x87b   : > { %v3804_v16 = vmin.f32 %v3800_v21, %v3801_v22 }
 0x87d   : > { %v3805_v46 = vmin.f32 %v3803_v19, %v3804_v16 }
 0x87f   : > { %v3806_v18 = vrot.slane %v3805_v46, 4 }
 0x881   : > { %v3807_v23 = vmin.f32 %v3805_v46, %v3806_v18 }
 0x883   : > { %v3808_v35 = vrot.slane %v3807_v23, 2 }
 0x885   : > { %v3809_v14 = vmin.f32 %v3807_v23, %v3808_v35 }
 0x887   : > { %v3810_v3 = vrot.slane %v3809_v14, 1 }
 0x889   : > { %v3811_v53 = vmin.f32 %v3809_v14, %v3810_v3 }
 0x88b   : > { %5412 = vrsqrt.f32 %v3811_v53  ;;  %vm3814_vm8 = vcmp.eq.f32.partialorder %v3811_v53, inf  ;;  %v3817_v32 = vand.u32 2147483648, %v3811_v53  ;;  %vm3816_vm9 = vcmp.eq.f32.partialorder %v3811_v53, 0.0 }
 0x898   : > { %v5413_v6 = vpop.eup %5412 }
 0x899   : > { %v3813_v60 = vmul.f32 %v5413_v6, %v3811_v53 }
 0x89b   : > { %v3815_v29 = vsel %vm3814_vm8, %v3811_v53, %v3813_v60 }
 0x89c   : > { %v3818_v56 = vsel %vm3816_vm9, %v3817_v32, %v3815_v29 }
 0x89d   : > { %v3819_v26 = vsel %vm372_vm2, %v3818_v56, 0.0 }
 0x89e   : > { %3822 = vadd.xlane.f32.xlu0 %v3819_v26 }
 0x8ce   : > { %v3716_v27 = vpop.xlane.xlu0 %3715 }
 0x8cf   : > { %v3755_v43 = vmin.f32 %v3742_v47, %v3716_v27 }
 0x8d1   : > { %3768 = vst.msk [vmem:[#allocation2 + $0x2d8] sm:$0xff] %vm766_vm6, %v3755_v43 }
 0x8d5   : > { %v3718_v8 = vpop.xlane.xlu1 %3717 }
 0x8d6   : > { %v3756_v51 = vmin.f32 %v3743_v20, %v3718_v8 }
 0x8d8   : > { %3769 = vst.msk [vmem:[#allocation2 + $0x2e0] sm:$0xff] %vm766_vm6, %v3756_v51 }
 0x8d9   : > { %v3724_v52 = vpop.xlane.xlu1 %3723 }
 0x8da   : > { %v3759_v49 = vmin.f32 %v3746_v1, %v3724_v52 }
 0x8dc   : > { %3772 = vst.msk [vmem:[#allocation2 + $0x2f8] sm:$0xff] %vm766_vm6, %v3759_v49 }
 0x8ef   : > { %v3720_v61 = vpop.xlane.xlu0 %3719 }
 0x8f0   : > { %v3757_v0 = vmin.f32 %v3744_v42, %v3720_v61 }
 0x8f2   : > { %3770 = vst.msk [vmem:[#allocation2 + $0x2e8] sm:$0xff] %vm766_vm6, %v3757_v0 }
 0x8f3   : > { %v3722_v7 = vpop.xlane.xlu0 %3721 }
 0x8f4   : > { %v3758_v50 = vmin.f32 %v3745_v44, %v3722_v7 }
 0x8f6   : > { %3771 = vst.msk [vmem:[#allocation2 + $0x2f0] sm:$0xff] %vm766_vm6, %v3758_v50 }
 0x8f7   : > { %v3726_v54 = vpop.xlane.xlu0 %3725  ;;  %v3728_v2 = vpop.xlane.xlu1 %3727 }
 0x8f8   : > { %v3760_v24 = vmin.f32 %v3747_v12, %v3726_v54  ;;  %v3761_v55 = vmin.f32 %v3748_v45, %v3728_v2 }
 0x8fa   : > { %3773 = vst.msk [vmem:[#allocation2 + $0x300] sm:$0xff] %vm766_vm6, %v3760_v24  ;;  %3774 = vst.msk [vmem:[#allocation2 + $0x308] sm:$0xff] %vm766_vm6, %v3761_v55 }
 0x8fb   : > { %v3730_v10 = vpop.xlane.xlu0 %3729  ;;  %v3732_v4 = vpop.xlane.xlu1 %3731 }
 0x8fc   : > { %v3762_v39 = vmin.f32 %v3749_v41, %v3730_v10  ;;  %v3763_v11 = vmin.f32 %v3750_v34, %v3732_v4 }
 0x8fe   : > { %3775 = vst.msk [vmem:[#allocation2 + $0x310] sm:$0xff] %vm766_vm6, %v3762_v39  ;;  %3776 = vst.msk [vmem:[#allocation2 + $0x318] sm:$0xff] %vm766_vm6, %v3763_v11 }
 0x8ff   : > { %v3734_v36 = vpop.xlane.xlu0 %3733  ;;  %v3736_v17 = vpop.xlane.xlu1 %3735 }
 0x900   : > { %v3764_v40 = vmin.f32 %v3751_v9, %v3734_v36  ;;  %v3765_v48 = vmin.f32 %v3752_v37, %v3736_v17 }
 0x902   : > { %3777 = vst.msk [vmem:[#allocation2 + $0x320] sm:$0xff] %vm766_vm6, %v3764_v40  ;;  %3778 = vst.msk [vmem:[#allocation2 + $0x328] sm:$0xff] %vm766_vm6, %v3765_v48 }
 0x903   : > { %v3738_v57 = vpop.xlane.xlu0 %3737  ;;  %v3740_v5 = vpop.xlane.xlu1 %3739 }
 0x904   : > { %v3766_v38 = vmin.f32 %v3753_v28, %v3738_v57  ;;  %v3767_v13 = vmin.f32 %v3754_v58, %v3740_v5 }
 0x906   : > { %3779 = vst.msk [vmem:[#allocation2 + $0x330] sm:$0xff] %vm766_vm6, %v3766_v38  ;;  %3780 = vst.msk [vmem:[#allocation2 + $0x338] sm:$0xff] %vm766_vm6, %v3767_v13 }
 0x926   : > { %3829 = sbr.rel (%p5292_p10) target bundleno = 2758 (0xac6), region = 77 }
 0x927   : > { %v3823_v59 = vpop.xlane.xlu0 %3822 }
 0x928   : > { %v3824_v15 = vadd.f32 %v3823_v59, %v3821_v30 }
 0x92a   : > { %3825 = vst.msk [vmem:[#allocation3 + $0x7] sm:$0x1] %vm849_vm7, %v3824_v15 }
 0x92b   : > { %v7670_v63 = vld [vmem:[#allocation2 + $0xd0] sm:$0xff]  ;;  %v7672_v19 = vld [vmem:[#allocation2 + $0xd8] sm:$0xff]  ;;  %v7674_v31 = vld [vmem:[#allocation2 + $0xe0] sm:$0xff]  ;;  %v5697_v21 = vmov 0  }
 0x92c   : > { %5415 = vset.pattern.permute.xlu1 %v5697_v21  ;;  %5414 = vset.pattern.permute.xlu0 %v5697_v21  ;;  %v7676_v22 = vld [vmem:[#allocation2 + $0xe8] sm:$0xff]  ;;  %5416 = vrsqrt.f32 %v7670_v63  ;;  %v7679_v25 = vld [vmem:[#allocation2 + $0xf0] sm:$0xff]  ;;  %v7682_v33 = vld [vmem:[#allocation2 + $0xf8] sm:$0xff]  ;;  %vm4163_vm2 = vcmp.eq.f32.partialorder %v7670_v63, inf  ;;  %vm4165_vm7 = vcmp.eq.f32.partialorder %v7670_v63, 0.0  ;;  %v4166_v3 = vand.u32 2147483648, %v7670_v63 }
 0x92d   : > { %5418 = vrsqrt.f32 %v7672_v19  ;;  %v7685_v16 = vld [vmem:[#allocation2 + $0x100] sm:$0xff]  ;;  %v7688_v46 = vld [vmem:[#allocation2 + $0x108] sm:$0xff]  ;;  %v7691_v18 = vld [vmem:[#allocation2 + $0x110] sm:$0xff]  ;;  %vm4170_vm10 = vcmp.eq.f32.partialorder %v7672_v19, inf  ;;  %vm4172_vm11 = vcmp.eq.f32.partialorder %v7672_v19, 0.0  ;;  %v4173_v6 = vand.u32 2147483648, %v7672_v19 }
 0x92e   : > { %5420 = vrsqrt.f32 %v7674_v31  ;;  %v7694_v23 = vld [vmem:[#allocation2 + $0x118] sm:$0xff]  ;;  %v7697_v35 = vld [vmem:[#allocation2 + $0x120] sm:$0xff]  ;;  %v7701_v14 = vld [vmem:[#allocation2 + $0x128] sm:$0xff]  ;;  %vm4177_vm12 = vcmp.eq.f32.partialorder %v7674_v31, inf  ;;  %vm4179_vm13 = vcmp.eq.f32.partialorder %v7674_v31, 0.0  ;;  %v4180_v60 = vand.u32 2147483648, %v7674_v31 }
 0x92f   : > { %5422 = vrsqrt.f32 %v7676_v22  ;;  %v7707_v53 = vld [vmem:[#allocation2 + $0x130] sm:$0xff]  ;;  %vm4184_vm14 = vcmp.eq.f32.partialorder %v7676_v22, inf  ;;  %vm4186_vm15 = vcmp.eq.f32.partialorder %v7676_v22, 0.0  ;;  %v4187_v32 = vand.u32 2147483648, %v7676_v22  ;;  %v7721_v29 = vld [vmem:[#allocation2] sm:$0xff]  ;;  %v7727_v26 = vld [vmem:[#allocation2 + $0x8] sm:$0xff] }
 0x930   : > { %5424 = vrsqrt.f32 %v7679_v25  ;;  %vm4191_vm0 = vcmp.eq.f32.partialorder %v7679_v25, inf  ;;  %vm4193_vm1 = vcmp.eq.f32.partialorder %v7679_v25, 0.0  ;;  %v4194_v56 = vand.u32 2147483648, %v7679_v25  ;;  %v7734_v20 = vld [vmem:[#allocation2 + $0x10] sm:$0xff] }
 0x931   : > { %5426 = vrsqrt.f32 %v7682_v33  ;;  %vm4198_vm4 = vcmp.eq.f32.partialorder %v7682_v33, inf  ;;  %v4201_v27 = vand.u32 2147483648, %v7682_v33  ;;  %vm4205_vm8 = vcmp.eq.f32.partialorder %v7685_v16, inf }
 0x932   : > { %5428 = vrsqrt.f32 %v7685_v16  ;;  %v4208_v43 = vand.u32 2147483648, %v7685_v16  ;;  %v4215_v1 = vand.u32 2147483648, %v7688_v46  ;;  %vm4214_vm5 = vcmp.eq.f32.partialorder %v7688_v46, 0.0 }
 0x933   : > { %5430 = vrsqrt.f32 %v7688_v46  ;;  %vm4219_vm9 = vcmp.eq.f32.partialorder %v7691_v18, inf  ;;  %v4222_v42 = vand.u32 2147483648, %v7691_v18  ;;  %vm4226_vm3 = vcmp.eq.f32.partialorder %v7694_v23, inf }
 0x934   : > { %5432 = vrsqrt.f32 %v7691_v18  ;;  %v4229_v7 = vand.u32 2147483648, %v7694_v23  ;;  %v4236_v2 = vand.u32 2147483648, %v7697_v35  ;;  %v4243_v38 = vand.u32 2147483648, %v7701_v14 }
 0x935   : > { %5434 = vrsqrt.f32 %v7694_v23 }
 0x936   : > { %5436 = vrsqrt.f32 %v7697_v35 }
 0x937   : > { %5438 = vrsqrt.f32 %v7701_v14 }
 0x938   : > { %5440 = vrsqrt.f32 %v7707_v53 }
 0x939   : > { %v5417_v47 = vpop.eup %5416  ;;  %5442 = vrsqrt.f32 %v7721_v29 }
 0x93a   : > { %v5419_v8 = vpop.eup %5418  ;;  %v4162_v51 = vmul.f32 %v5417_v47, %v7670_v63  ;;  %5444 = vrsqrt.f32 %v7727_v26 }
 0x93b   : > { %v5421_v52 = vpop.eup %5420  ;;  %v4169_v49 = vmul.f32 %v5419_v8, %v7672_v19  ;;  %5446 = vrsqrt.f32 %v7734_v20 }
 0x93c   : > { %v5423_v61 = vpop.eup %5422  ;;  %v4164_v0 = vsel %vm4163_vm2, %v7670_v63, %v4162_v51  ;;  %v4176_v44 = vmul.f32 %v5421_v52, %v7674_v31  ;;  %vm4221_vm2 = vcmp.eq.f32.partialorder %v7691_v18, 0.0  ;;  %v4250_v52 = vand.u32 2147483648, %v7707_v53 }
 0x93d   : > { %v5425_v50 = vpop.eup %5424  ;;  %v4167_v12 = vsel %vm4165_vm7, %v4166_v3, %v4164_v0  ;;  %v4171_v45 = vsel %vm4170_vm10, %v7672_v19, %v4169_v49  ;;  %v4183_v54 = vmul.f32 %v5423_v61, %v7676_v22  ;;  %vm4233_vm7 = vcmp.eq.f32.partialorder %v7697_v35, inf }
 0x93e   : > { %v5427_v24 = vpop.eup %5426  ;;  %v4174_v55 = vsel %vm4172_vm11, %v4173_v6, %v4171_v45  ;;  %v4178_v41 = vsel %vm4177_vm12, %v7674_v31, %v4176_v44  ;;  %v4190_v34 = vmul.f32 %v5425_v50, %v7679_v25  ;;  %v4265_v10 = vsel %vm766_vm6, %v4167_v12, 0.0 }
 0x93f   : > { %v5429_v4 = vpop.eup %5428  ;;  %v4181_v39 = vsel %vm4179_vm13, %v4180_v60, %v4178_v41  ;;  %v4185_v11 = vsel %vm4184_vm14, %v7676_v22, %v4183_v54  ;;  %v4197_v9 = vmul.f32 %v5427_v24, %v7682_v33  ;;  %vm4228_vm10 = vcmp.eq.f32.partialorder %v7694_v23, 0.0  ;;  %v7838_v24 = vld [vmem:[#allocation2 + $0x18] sm:$0xff] }
 0x940   : > { %vm4240_vm11 = vcmp.eq.f32.partialorder %v7701_v14, inf  ;;  %v4266_v37 = vsel %vm766_vm6, %v4174_v55, 0.0  ;;  %v5431_v36 = vpop.eup %5430  ;;  %v4188_v17 = vsel %vm4186_vm15, %v4187_v32, %v4185_v11  ;;  %v4192_v40 = vsel %vm4191_vm0, %v7679_v25, %v4190_v34 }
 0x941   : > { %v4204_v48 = vmul.f32 %v5429_v4, %v7685_v16  ;;  %v4267_v28 = vadd.f32 %v4266_v37, %v4265_v10  ;;  %v5433_v58 = vpop.eup %5432  ;;  %v4199_v57 = vsel %vm4198_vm4, %v7682_v33, %v4197_v9  ;;  %v4211_v5 = vmul.f32 %v5431_v36, %v7688_v46  ;;  %v7858_v9 = vld [vmem:[#allocation2 + $0x20] sm:$0xff]  ;;  %v7866_v36 = vld [vmem:[#allocation2 + $0x28] sm:$0xff] }
 0x942   : > { %vm4235_vm12 = vcmp.eq.f32.partialorder %v7697_v35, 0.0  ;;  %v4268_v13 = vsel %vm766_vm6, %v4181_v39, 0.0  ;;  %v5435_v30 = vpop.eup %5434  ;;  %v4195_v59 = vsel %vm4193_vm1, %v4194_v56, %v4192_v40  ;;  %v4218_v63 = vmul.f32 %v5433_v58, %v7691_v18  ;;  %v4297_v56 = vld [vmem:[#allocation3 + $0x2] sm:$0x1]  ;;  %v7880_v58 = vld [vmem:[#allocation2 + $0x30] sm:$0xff] }
 0x943   : > { %v4206_v15 = vsel %vm4205_vm8, %v7685_v16, %v4204_v48  ;;  %v4269_v19 = vadd.f32 %v4268_v13, %v4267_v28  ;;  %v5437_v31 = vpop.eup %5436  ;;  %vm9069_vm13 = vcmp.eq.f32.partialorder %v7688_v46, inf  ;;  %v4225_v22 = vmul.f32 %v5435_v30, %v7694_v23 }
 0x944   : > { %v4213_v21 = vsel %vm9069_vm13, %v7688_v46, %v4211_v5  ;;  %vm4242_vm14 = vcmp.eq.f32.partialorder %v7701_v14, 0.0  ;;  %vm4247_vm15 = vcmp.eq.f32.partialorder %v7707_v53, inf  ;;  %v4270_v25 = vsel %vm766_vm6, %v4188_v17, 0.0  ;;  %v5439_v3 = vpop.eup %5438  ;;  %v7884_v5 = vld [vmem:[#allocation2 + $0x38] sm:$0xff] }
 0x945   : > { %vm9070_vm0 = vcmp.eq.f32.partialorder %v7682_v33, 0.0  ;;  %vm9071_vm1 = vcmp.eq.f32.partialorder %v7685_v16, 0.0  ;;  %vm4249_vm4 = vcmp.eq.f32.partialorder %v7707_v53, 0.0  ;;  %v4271_v32 = vadd.f32 %v4270_v25, %v4269_v19  ;;  %v5441_v47 = vpop.eup %5440 }
 0x946   : > { %v4202_v6 = vsel %vm9070_vm0, %v4201_v27, %v4199_v57  ;;  %v4209_v60 = vsel %vm9071_vm1, %v4208_v43, %v4206_v15  ;;  %v4220_v8 = vsel %vm4219_vm9, %v7691_v18, %v4218_v63  ;;  %v4232_v51 = vmul.f32 %v5437_v31, %v7697_v35  ;;  %v5443_v61 = vpop.eup %5442  ;;  %v7900_v31 = vld [vmem:[#allocation2 + $0x48] sm:$0xff] }
 0x947   : > { %v4272_v33 = vsel %vm766_vm6, %v4195_v59, 0.0  ;;  %v4216_v16 = vsel %vm4214_vm5, %v4215_v1, %v4213_v21  ;;  %v4239_v27 = vmul.f32 %v5439_v3, %v7701_v14  ;;  %v4246_v43 = vmul.f32 %v5441_v47, %v7707_v53  ;;  %v5445_v45 = vpop.eup %5444 }
 0x948   : > { %v4273_v49 = vadd.f32 %v4272_v33, %v4271_v32  ;;  %v4227_v0 = vsel %vm4226_vm3, %v7694_v23, %v4225_v22  ;;  %v4274_v44 = vsel %vm766_vm6, %v4202_v6, 0.0  ;;  %v4276_v50 = vsel %vm766_vm6, %v4209_v60, 0.0  ;;  %v5447_v55 = vpop.eup %5446  ;;  %v7904_v22 = vld [vmem:[#allocation2 + $0x50] sm:$0xff] }
 0x949   : > { %v7829_v12 = vmul.f32 0.005, %v4297_v56  ;;  %v4223_v46 = vsel %vm4221_vm2, %v4222_v42, %v4220_v8  ;;  %v4248_v1 = vsel %vm4247_vm15, %v7707_v53, %v4246_v43  ;;  %vm3845_vm3 = vcmp.eq.f32.partialorder %v7721_v29, inf  ;;  %v7916_v56 = vld [vmem:[#allocation2 + $0x60] sm:$0xff] }
 0x94a   : > { %v4275_v54 = vadd.f32 %v4274_v44, %v4273_v49  ;;  %v4234_v41 = vsel %vm4233_vm7, %v7697_v35, %v4232_v51  ;;  %v4278_v34 = vsel %vm766_vm6, %v4216_v16, 0.0  ;;  %vm3847_vm5 = vcmp.eq.f32.partialorder %v7721_v29, 0.0  ;;  %v7932_v51 = vld [vmem:[#allocation2 + $0x138] sm:$0xff] }
 0x94b   : > { %v3848_v18 = vand.u32 2147483648, %v7721_v29  ;;  %v4230_v42 = vsel %vm4228_vm10, %v4229_v7, %v4227_v0  ;;  %v4241_v10 = vsel %vm4240_vm11, %v7701_v14, %v4239_v27  ;;  %vm3852_vm8 = vcmp.eq.f32.partialorder %v7727_v26, inf }
 0x94c   : > { %v4277_v4 = vadd.f32 %v4276_v50, %v4275_v54  ;;  %v4251_v39 = vsel %vm4249_vm4, %v4250_v52, %v4248_v1  ;;  %v4280_v11 = vsel %vm766_vm6, %v4223_v46, 0.0  ;;  %v3844_v37 = vmul.f32 %v5443_v61, %v7721_v29 }
 0x94d   : > { %5448 = vrsqrt.f32 %v7838_v24  ;;  %v4237_v23 = vsel %vm4235_vm12, %v4236_v2, %v4234_v41  ;;  %v3851_v17 = vmul.f32 %v5445_v45, %v7727_v26  ;;  %v3858_v53 = vmul.f32 %v5447_v55, %v7734_v20  ;;  %v7944_v45 = vld [vmem:[#allocation2 + $0x140] sm:$0xff] }
 0x94e   : > { %v4279_v7 = vadd.f32 %v4278_v34, %v4277_v4  ;;  %v4282_v40 = vsel %vm766_vm6, %v4230_v42, 0.0  ;;  %vm3854_vm9 = vcmp.eq.f32.partialorder %v7727_v26, 0.0  ;;  %v3855_v48 = vand.u32 2147483648, %v7727_v26 }
 0x94f   : > { %vm3859_vm2 = vcmp.eq.f32.partialorder %v7734_v20, inf  ;;  %v4244_v35 = vsel %vm4242_vm14, %v4243_v38, %v4241_v10  ;;  %vm9072_vm7 = vcmp.lt.s32.totalorder %v6169_v62, 100  ;;  %5450 = vrsqrt.f32 %v7858_v9  ;;  %v7891_v38 = vld [vmem:[#allocation2 + $0x40] sm:$0xff] }
 0x950   : > { %v4264_v2 = vsel %vm9072_vm7, %v4251_v39, 0.0  ;;  %v4281_v28 = vadd.f32 %v4280_v11, %v4279_v7  ;;  %v4284_v57 = vsel %vm766_vm6, %v4237_v23, 0.0  ;;  %v3846_v13 = vsel %vm3845_vm3, %v7721_v29, %v3844_v37 }
 0x951   : > { %v3862_v30 = vand.u32 2147483648, %v7734_v20  ;;  %5452 = vrsqrt.f32 %v7866_v36  ;;  %v3853_v59 = vsel %vm3852_vm8, %v7727_v26, %v3851_v17  ;;  %v3860_v15 = vsel %vm3859_vm2, %v7734_v20, %v3858_v53 }
 0x952   : > { %v4283_v14 = vadd.f32 %v4282_v40, %v4281_v28  ;;  %vm3861_vm10 = vcmp.eq.f32.partialorder %v7734_v20, 0.0  ;;  %v4286_v63 = vsel %vm766_vm6, %v4244_v35, 0.0  ;;  %v4288_v19 = vsel %vm766_vm6, %v4264_v2, 0.0  ;;  %v7910_v20 = vld [vmem:[#allocation2 + $0x58] sm:$0xff] }
 0x953   : > { %vm3866_vm11 = vcmp.eq.f32.partialorder %v7838_v24, inf  ;;  %5454 = vrsqrt.f32 %v7880_v58  ;;  %v3849_v25 = vsel %vm3847_vm5, %v3848_v18, %v3846_v13  ;;  %vm3868_vm12 = vcmp.eq.f32.partialorder %v7838_v24, 0.0 }
 0x954   : > { %v4285_v21 = vadd.f32 %v4284_v57, %v4283_v14  ;;  %5456 = vrsqrt.f32 %v7884_v5  ;;  %v3856_v3 = vsel %vm3854_vm9, %v3855_v48, %v3853_v59  ;;  %v3863_v6 = vsel %vm3861_vm10, %v3862_v30, %v3860_v15 }
 0x955   : > { %v3869_v60 = vand.u32 2147483648, %v7838_v24  ;;  %5458 = vrsqrt.f32 %v7891_v38  ;;  %vm3873_vm13 = vcmp.eq.f32.partialorder %v7858_v9, inf  ;;  %vm3875_vm14 = vcmp.eq.f32.partialorder %v7858_v9, 0.0 }
 0x956   : > { %v4287_v32 = vadd.f32 %v4286_v63, %v4285_v21  ;;  %5460 = vrsqrt.f32 %v7900_v31  ;;  %v3876_v29 = vand.u32 2147483648, %v7858_v9  ;;  %vm3880_vm15 = vcmp.eq.f32.partialorder %v7866_v36, inf }
 0x957   : > { %vm3882_vm0 = vcmp.eq.f32.partialorder %v7866_v36, 0.0  ;;  %5462 = vrsqrt.f32 %v7904_v22  ;;  %v3883_v47 = vand.u32 2147483648, %v7866_v36  ;;  %vm3887_vm1 = vcmp.eq.f32.partialorder %v7880_v58, inf }
 0x958   : > { %v4289_v26 = vadd.f32 %v4288_v19, %v4287_v32  ;;  %5464 = vrsqrt.f32 %v7910_v20  ;;  %vm3889_vm4 = vcmp.eq.f32.partialorder %v7880_v58, 0.0  ;;  %v3890_v8 = vand.u32 2147483648, %v7880_v58 }
 0x959   : > { %vm3894_vm3 = vcmp.eq.f32.partialorder %v7884_v5, inf  ;;  %5466 = vrsqrt.f32 %v7916_v56  ;;  %vm3896_vm5 = vcmp.eq.f32.partialorder %v7884_v5, 0.0  ;;  %v3897_v16 = vand.u32 2147483648, %v7884_v5 }
 0x95a   : > { %v5449_v52 = vpop.eup %5448  ;;  %v4290_v33 = vrot.slane %v4289_v26, 4  ;;  %vm3901_vm8 = vcmp.eq.f32.partialorder %v7891_v38, inf  ;;  %v3904_v27 = vand.u32 2147483648, %v7891_v38  ;;  %vm3903_vm9 = vcmp.eq.f32.partialorder %v7891_v38, 0.0 }
 0x95b   : > { %v3865_v43 = vmul.f32 %v5449_v52, %v7838_v24  ;;  %v3947_v49 = vsel %vm766_vm6, %v3849_v25, 0.0  ;;  %v3948_v61 = vsel %vm766_vm6, %v3856_v3, 0.0  ;;  %v3950_v0 = vsel %vm766_vm6, %v3863_v6, 0.0 }
 0x95c   : > { %v4291_v44 = vadd.f32 %v4290_v33, %v4289_v26  ;;  %vm3908_vm2 = vcmp.eq.f32.partialorder %v7900_v31, inf  ;;  %v3949_v50 = vadd.f32 %v3948_v61, %v3947_v49  ;;  %5468 = vrsqrt.f32 %v7932_v51  ;;  %v5451_v46 = vpop.eup %5450 }
 0x95d   : > { %v3867_v1 = vsel %vm3866_vm11, %v7838_v24, %v3865_v43  ;;  %v3911_v54 = vand.u32 2147483648, %v7900_v31  ;;  %vm3915_vm10 = vcmp.eq.f32.partialorder %v7904_v22, inf  ;;  %v3918_v55 = vand.u32 2147483648, %v7904_v22 }
 0x95e   : > { %v5453_v41 = vpop.eup %5452  ;;  %v4292_v34 = vrot.slane %v4291_v44, 2  ;;  %v3870_v18 = vsel %vm3868_vm12, %v3869_v60, %v3867_v1  ;;  %v3872_v42 = vmul.f32 %v5451_v46, %v7858_v9  ;;  %v3951_v10 = vadd.f32 %v3950_v0, %v3949_v50 }
 0x95f   : > { %v3879_v4 = vmul.f32 %v5453_v41, %v7866_v36  ;;  %vm3922_vm7 = vcmp.eq.f32.partialorder %v7910_v20, inf  ;;  %v3952_v39 = vsel %vm766_vm6, %v3870_v18, 0.0  ;;  %5470 = vrsqrt.f32 %v7944_v45  ;;  %v8026_v18 = vld [vmem:[#allocation2 + $0x150] sm:$0xff] }
 0x960   : > { %v5455_v11 = vpop.eup %5454  ;;  %v4293_v37 = vadd.f32 %v4292_v34, %v4291_v44  ;;  %v3874_v24 = vsel %vm3873_vm13, %v7858_v9, %v3872_v42  ;;  %v3925_v23 = vand.u32 2147483648, %v7910_v20  ;;  %v3953_v7 = vadd.f32 %v3952_v39, %v3951_v10 }
 0x961   : > { %v5457_v17 = vpop.eup %5456  ;;  %v3877_v53 = vsel %vm3875_vm14, %v3876_v29, %v3874_v24  ;;  %v3881_v40 = vsel %vm3880_vm15, %v7866_v36, %v3879_v4  ;;  %v3886_v48 = vmul.f32 %v5455_v11, %v7880_v58  ;;  %vm3924_vm12 = vcmp.eq.f32.partialorder %v7910_v20, 0.0  ;;  %v8030_v4 = vld [vmem:[#allocation2 + $0x158] sm:$0xff]  ;;  %v8038_v24 = vld [vmem:[#allocation2 + $0x160] sm:$0xff] }
 0x962   : > { %vm3929_vm11 = vcmp.eq.f32.partialorder %v7916_v56, inf  ;;  %v5459_v35 = vpop.eup %5458  ;;  %v4294_v2 = vrot.slane %v4293_v37, 1  ;;  %v3884_v28 = vsel %vm3882_vm0, %v3883_v47, %v3881_v40  ;;  %v3893_v57 = vmul.f32 %v5457_v17, %v7884_v5 }
 0x963   : > { %v3954_v9 = vsel %vm766_vm6, %v3877_v53, 0.0  ;;  %v5461_v13 = vpop.eup %5460  ;;  %v3888_v30 = vsel %vm3887_vm1, %v7880_v58, %v3886_v48  ;;  %v3900_v14 = vmul.f32 %v5459_v35, %v7891_v38  ;;  %v3956_v15 = vsel %vm766_vm6, %v3884_v28, 0.0  ;;  %v8050_v48 = vld [vmem:[#allocation2 + $0x170] sm:$0xff]  ;;  %v8055_v28 = vld [vmem:[#allocation2 + $0x178] sm:$0xff] }
 0x964   : > { %v3955_v59 = vadd.f32 %v3954_v9, %v3953_v7  ;;  %v5463_v63 = vpop.eup %5462  ;;  %v4295_v19 = vadd.f32 %v4294_v2, %v4293_v37  ;;  %v3891_v36 = vsel %vm3889_vm4, %v3890_v8, %v3888_v30  ;;  %v3895_v21 = vsel %vm3894_vm3, %v7884_v5, %v3893_v57  ;;  %v8043_v7 = vld [vmem:[#allocation2 + $0x168] sm:$0xff] }
 0x965   : > { %v3907_v25 = vmul.f32 %v5461_v13, %v7900_v31  ;;  %v5465_v3 = vpop.eup %5464  ;;  %v3898_v6 = vsel %vm3896_vm5, %v3897_v16, %v3895_v21  ;;  %v3902_v60 = vsel %vm3901_vm8, %v7891_v38, %v3900_v14  ;;  %v3914_v32 = vmul.f32 %v5463_v63, %v7904_v22  ;;  %v8060_v13 = vld [vmem:[#allocation2 + $0x180] sm:$0xff]  ;;  %v8073_v63 = vld [vmem:[#allocation2 + $0x190] sm:$0xff] }
 0x966   : > { %v3957_v29 = vadd.f32 %v3956_v15, %v3955_v59  ;;  %v5467_v26 = vpop.eup %5466  ;;  %v4296_v58 = vmul.f32 0.01, %v4295_v19  ;;  %v3905_v47 = vsel %vm3903_vm9, %v3904_v27, %v3902_v60  ;;  %v3921_v52 = vmul.f32 %v5465_v3, %v7910_v20  ;;  %v8068_v15 = vld [vmem:[#allocation2 + $0x188] sm:$0xff] }
 0x967   : > { %v3909_v8 = vsel %vm3908_vm2, %v7900_v31, %v3907_v25  ;;  %v3916_v5 = vsel %vm3915_vm10, %v7904_v22, %v3914_v32  ;;  %v3928_v33 = vmul.f32 %v5467_v26, %v7916_v56  ;;  %v3932_v16 = vand.u32 2147483648, %v7916_v56  ;;  %v8080_v25 = vld [vmem:[#allocation2 + $0x198] sm:$0xff]  ;;  %v8093_v32 = vld [vmem:[#allocation2 + $0x68] sm:$0xff] }
 0x968   : > { %v3958_v43 = vsel %vm766_vm6, %v3891_v36, 0.0  ;;  %v4299_v49 = vadd.f32 %v7829_v12, %v4296_v58  ;;  %vm9073_vm13 = vcmp.eq.f32.partialorder %v7900_v31, 0.0  ;;  %vm3931_vm14 = vcmp.eq.f32.partialorder %v7916_v56, 0.0  ;;  %v8019_v12 = vld [vmem:[#allocation2 + $0x148] sm:$0xff] }
 0x969   : > { %v3912_v38 = vsel %vm9073_vm13, %v3911_v54, %v3909_v8  ;;  %v3959_v27 = vadd.f32 %v3958_v43, %v3957_v29  ;;  %v5469_v61 = vpop.eup %5468  ;;  %v3923_v0 = vsel %vm3922_vm7, %v7910_v20, %v3921_v52  ;;  %v3930_v44 = vsel %vm3929_vm11, %v7916_v56, %v3928_v33 }
 0x96a   : > { %v3960_v50 = vsel %vm766_vm6, %v3898_v6, 0.0  ;;  %v3962_v46 = vsel %vm766_vm6, %v3905_v47, 0.0  ;;  %v4300_v31 = vmul.f32 0.5, %v4299_v49  ;;  %vm9074_vm15 = vcmp.eq.f32.partialorder %v7904_v22, 0.0  ;;  %v8108_v49 = vld [vmem:[#allocation2 + $0x70] sm:$0xff] }
 0x96b   : > { %v3919_v1 = vsel %vm9074_vm15, %v3918_v55, %v3916_v5  ;;  %v3961_v54 = vadd.f32 %v3960_v50, %v3959_v27  ;;  %v3933_v41 = vsel %vm3931_vm14, %v3932_v16, %v3930_v44  ;;  %v3964_v34 = vsel %vm766_vm6, %v3912_v38, 0.0  ;;  %v3979_v55 = vld [vmem:[#allocation3] sm:$0x1] }
 0x96c   : > { %v5471_v42 = vpop.eup %5470  ;;  %4303 = vperm.xlu1 %5415, %v4300_v31   ;;  %v3926_v56 = vsel %vm3924_vm12, %v3925_v23, %v3923_v0  ;;  %v4321_v39 = vmul.f32 %v5469_v61, %v7932_v51  ;;  %5472 = vrsqrt.f32 %v8019_v12  ;;  %v3966_v22 = vsel %vm766_vm6, %v3919_v1, 0.0 }
 0x96d   : > { %v3963_v10 = vadd.f32 %v3962_v46, %v3961_v54  ;;  %vm4322_vm0 = vcmp.eq.f32.partialorder %v7932_v51, inf  ;;  %vm9075_vm1 = vcmp.lt.s32.totalorder %v6169_v62, 100  ;;  %v4328_v20 = vmul.f32 %v5471_v42, %v7944_v45 }
 0x96e   : > { %v3946_v11 = vsel %vm9075_vm1, %v3933_v41, 0.0  ;;  %5474 = vrsqrt.f32 %v8026_v18  ;;  %v3968_v23 = vsel %vm766_vm6, %v3926_v56, 0.0  ;;  %v4325_v17 = vand.u32 2147483648, %v7932_v51 }
 0x96f   : > { %v3965_v37 = vadd.f32 %v3964_v34, %v3963_v10  ;;  %vm4329_vm4 = vcmp.eq.f32.partialorder %v7944_v45, inf  ;;  %5476 = vrsqrt.f32 %v8030_v4  ;;  %v8048_v40 = vmul.f32 0.005, %v3979_v55 }
 0x970   : > { %v4323_v35 = vsel %vm4322_vm0, %v7932_v51, %v4321_v39  ;;  %vm4324_vm3 = vcmp.eq.f32.partialorder %v7932_v51, 0.0  ;;  %v3970_v2 = vsel %vm766_vm6, %v3946_v11, 0.0  ;;  %vm4331_vm5 = vcmp.eq.f32.partialorder %v7944_v45, 0.0 }
 0x971   : > { %v3967_v53 = vadd.f32 %v3966_v22, %v3965_v37  ;;  %v4332_v57 = vand.u32 2147483648, %v7944_v45  ;;  %5478 = vrsqrt.f32 %v8038_v24  ;;  %v4330_v30 = vsel %vm4329_vm4, %v7944_v45, %v4328_v20 }
 0x972   : > { %vm4336_vm8 = vcmp.eq.f32.partialorder %v8019_v12, inf  ;;  %5480 = vrsqrt.f32 %v8043_v7  ;;  %v4326_v51 = vsel %vm4324_vm3, %v4325_v17, %v4323_v35  ;;  %vm4338_vm9 = vcmp.eq.f32.partialorder %v8019_v12, 0.0 }
 0x973   : > { %v3969_v9 = vadd.f32 %v3968_v23, %v3967_v53  ;;  %v4339_v14 = vand.u32 2147483648, %v8019_v12  ;;  %5482 = vrsqrt.f32 %v8050_v48  ;;  %vm4343_vm2 = vcmp.eq.f32.partialorder %v8026_v18, inf }
 0x974   : > { %vm4345_vm7 = vcmp.eq.f32.partialorder %v8026_v18, 0.0  ;;  %5484 = vrsqrt.f32 %v8055_v28  ;;  %v4333_v19 = vsel %vm4331_vm5, %v4332_v57, %v4330_v30  ;;  %v4346_v36 = vand.u32 2147483648, %v8026_v18 }
 0x975   : > { %v3971_v59 = vadd.f32 %v3970_v2, %v3969_v9  ;;  %vm4350_vm10 = vcmp.eq.f32.partialorder %v8030_v4, inf  ;;  %5486 = vrsqrt.f32 %v8060_v13  ;;  %vm4352_vm11 = vcmp.eq.f32.partialorder %v8030_v4, 0.0 }
 0x976   : > { %v4353_v3 = vand.u32 2147483648, %v8030_v4  ;;  %vm4357_vm12 = vcmp.eq.f32.partialorder %v8038_v24, inf  ;;  %vm4359_vm13 = vcmp.eq.f32.partialorder %v8038_v24, 0.0  ;;  %v4360_v45 = vand.u32 2147483648, %v8038_v24 }
 0x977   : > { %v3972_v21 = vrot.slane %v3971_v59, 4  ;;  %vm4364_vm14 = vcmp.eq.f32.partialorder %v8043_v7, inf  ;;  %5488 = vrsqrt.f32 %v8068_v15  ;;  %vm4366_vm15 = vcmp.eq.f32.partialorder %v8043_v7, 0.0 }
 0x978   : > { %v4367_v60 = vand.u32 2147483648, %v8043_v7  ;;  %vm4371_vm0 = vcmp.eq.f32.partialorder %v8050_v48, inf  ;;  %5490 = vrsqrt.f32 %v8073_v63  ;;  %v4374_v26 = vand.u32 2147483648, %v8050_v48 }
 0x979   : > { %v3973_v6 = vadd.f32 %v3972_v21, %v3971_v59  ;;  %v5473_v29 = vpop.eup %5472  ;;  %vm4378_vm4 = vcmp.eq.f32.partialorder %v8055_v28, inf  ;;  %v4381_v58 = vand.u32 2147483648, %v8055_v28  ;;  %5492 = vrsqrt.f32 %v8080_v25 }
 0x97a   : > { %v4335_v8 = vmul.f32 %v5473_v29, %v8019_v12  ;;  %vm4380_vm3 = vcmp.eq.f32.partialorder %v8055_v28, 0.0  ;;  %v4424_v52 = vsel %vm766_vm6, %v4326_v51, 0.0  ;;  %v4388_v33 = vand.u32 2147483648, %v8060_v13 }
 0x97b   : > { %v3974_v47 = vrot.slane %v3973_v6, 2  ;;  %v5475_v5 = vpop.eup %5474  ;;  %v4395_v16 = vand.u32 2147483648, %v8068_v15  ;;  %v4425_v43 = vsel %vm766_vm6, %v4333_v19, 0.0  ;;  %5494 = vrsqrt.f32 %v8093_v32 }
 0x97c   : > { %v5477_v38 = vpop.eup %5476  ;;  %v4337_v61 = vsel %vm4336_vm8, %v8019_v12, %v4335_v8  ;;  %v4342_v0 = vmul.f32 %v5475_v5, %v8026_v18  ;;  %v4426_v44 = vadd.f32 %v4425_v43, %v4424_v52  ;;  %vm4399_vm5 = vcmp.eq.f32.partialorder %v8073_v63, inf }
 0x97d   : > { %v3975_v27 = vadd.f32 %v3974_v47, %v3973_v6  ;;  %v4340_v50 = vsel %vm4338_vm9, %v4339_v14, %v4337_v61  ;;  %v4349_v46 = vmul.f32 %v5477_v38, %v8030_v4  ;;  %v4402_v31 = vand.u32 2147483648, %v8073_v63 }
 0x97e   : > { %v4409_v1 = vand.u32 2147483648, %v8080_v25  ;;  %v5479_v54 = vpop.eup %5478  ;;  %v4344_v34 = vsel %vm4343_vm2, %v8026_v18, %v4342_v0  ;;  %vm4394_vm8 = vcmp.eq.f32.partialorder %v8068_v15, 0.0  ;;  %vm4406_vm1 = vcmp.eq.f32.partialorder %v8080_v25, inf }
 0x97f   : > { %v3976_v41 = vrot.slane %v3975_v27, 1  ;;  %v4427_v12 = vsel %vm766_vm6, %v4340_v50, 0.0  ;;  %5496 = vrsqrt.f32 %v8108_v49  ;;  %v5481_v42 = vpop.eup %5480  ;;  %v4347_v56 = vsel %vm4345_vm7, %v4346_v36, %v4344_v34  ;;  %v8195_v50 = vld [vmem:[#allocation2 + $0x78] sm:$0xff] }
 0x980   : > { %v4351_v10 = vsel %vm4350_vm10, %v8030_v4, %v4349_v46  ;;  %v4356_v39 = vmul.f32 %v5479_v54, %v8038_v24  ;;  %vm4408_vm9 = vcmp.eq.f32.partialorder %v8080_v25, 0.0  ;;  %v4428_v22 = vadd.f32 %v4427_v12, %v4426_v44  ;;  %v5483_v55 = vpop.eup %5482 }
 0x981   : > { %v3977_v11 = vadd.f32 %v3976_v41, %v3975_v27  ;;  %v4354_v37 = vsel %vm4352_vm11, %v4353_v3, %v4351_v10  ;;  %v4363_v20 = vmul.f32 %v5481_v42, %v8043_v7  ;;  %v4429_v23 = vsel %vm766_vm6, %v4347_v56, 0.0  ;;  %v5485_v18 = vpop.eup %5484  ;;  %v8202_v42 = vld [vmem:[#allocation2 + $0x80] sm:$0xff] }
 0x982   : > { %v4358_v17 = vsel %vm4357_vm12, %v8038_v24, %v4356_v39  ;;  %v4370_v53 = vmul.f32 %v5483_v55, %v8050_v48  ;;  %v4430_v35 = vadd.f32 %v4429_v23, %v4428_v22  ;;  %v4431_v2 = vsel %vm766_vm6, %v4354_v37, 0.0  ;;  %v5487_v57 = vpop.eup %5486  ;;  %v8217_v22 = vld [vmem:[#allocation2 + $0x98] sm:$0xff]  ;;  %v4456_v37 = vld [vmem:[#allocation3 + $0x3] sm:$0x1] }
 0x983   : > { %v3978_v9 = vmul.f32 0.01, %v3977_v11  ;;  %v4361_v4 = vsel %vm4359_vm13, %v4360_v45, %v4358_v17  ;;  %v4365_v30 = vsel %vm4364_vm14, %v8043_v7, %v4363_v20  ;;  %v4377_v51 = vmul.f32 %v5485_v18, %v8055_v28  ;;  %v8222_v20 = vld [vmem:[#allocation2 + $0xa0] sm:$0xff]  ;;  %v8227_v17 = vld [vmem:[#allocation2 + $0xa8] sm:$0xff] }
 0x984   : > { %v4368_v14 = vsel %vm4366_vm15, %v4367_v60, %v4365_v30  ;;  %v4372_v59 = vsel %vm4371_vm0, %v8050_v48, %v4370_v53  ;;  %v4384_v19 = vmul.f32 %v5487_v57, %v8060_v13  ;;  %v4432_v36 = vadd.f32 %v4431_v2, %v4430_v35  ;;  %v5489_v21 = vpop.eup %5488  ;;  %v8231_v35 = vld [vmem:[#allocation2 + $0xb0] sm:$0xff] }
 0x985   : > { %v3981_v24 = vadd.f32 %v8048_v40, %v3978_v9  ;;  %vm9076_vm2 = vcmp.eq.f32.partialorder %v8050_v48, 0.0  ;;  %v4379_v45 = vsel %vm4378_vm4, %v8055_v28, %v4377_v51  ;;  %v4433_v7 = vsel %vm766_vm6, %v4361_v4, 0.0  ;;  %v5491_v6 = vpop.eup %5490 }
 0x986   : > { %v4375_v3 = vsel %vm9076_vm2, %v4374_v26, %v4372_v59  ;;  %v4382_v60 = vsel %vm4380_vm3, %v4381_v58, %v4379_v45  ;;  %vm9077_vm7 = vcmp.eq.f32.partialorder %v8060_v13, inf  ;;  %v4391_v40 = vmul.f32 %v5489_v21, %v8068_v15  ;;  %v5493_v26 = vpop.eup %5492  ;;  %v8249_v59 = vld [vmem:[#allocation2 + $0xc8] sm:$0xff] }
 0x987   : > { %v4386_v29 = vsel %vm9077_vm7, %v8060_v13, %v4384_v19  ;;  %v4434_v48 = vadd.f32 %v4433_v7, %v4432_v36  ;;  %v3982_v47 = vmul.f32 0.5, %v3981_v24  ;;  %vm9078_vm10 = vcmp.eq.f32.partialorder %v8060_v13, 0.0  ;;  %v8263_v45 = vld [vmem:[#allocation2 + $0x208] sm:$0xff] }
 0x988   : > { %v4389_v8 = vsel %vm9078_vm10, %v4388_v33, %v4386_v29  ;;  %v4398_v52 = vmul.f32 %v5491_v6, %v8073_v63  ;;  %v4435_v5 = vsel %vm766_vm6, %v4368_v14, 0.0  ;;  %vm9079_vm11 = vcmp.eq.f32.partialorder %v8068_v15, inf  ;;  %v5495_v27 = vpop.eup %5494 }
 0x989   : > { %v4393_v28 = vsel %vm9079_vm11, %v8068_v15, %v4391_v40  ;;  %v4405_v58 = vmul.f32 %v5493_v26, %v8080_v25  ;;  %v4436_v43 = vadd.f32 %v4435_v5, %v4434_v48  ;;  %v4437_v38 = vsel %vm766_vm6, %v4375_v3, 0.0  ;;  %3985 = vperm.xlu0 %5414, %v3982_v47   ;;  %v8274_v26 = vld [vmem:[#allocation2 + $0x210] sm:$0xff] }
 0x98a   : > { %v4400_v13 = vsel %vm4399_vm5, %v8073_v63, %v4398_v52  ;;  %vm4401_vm12 = vcmp.eq.f32.partialorder %v8073_v63, 0.0  ;;  %v4439_v33 = vsel %vm766_vm6, %v4382_v60, 0.0  ;;  %v4396_v61 = vsel %vm4394_vm8, %v4395_v16, %v4393_v28 }
 0x98b   : > { %v4407_v0 = vsel %vm4406_vm1, %v8080_v25, %v4405_v58  ;;  %v4438_v44 = vadd.f32 %v4437_v38, %v4436_v43  ;;  %v4441_v54 = vsel %vm766_vm6, %v4389_v8, 0.0  ;;  %v4403_v34 = vsel %vm4401_vm12, %v4402_v31, %v4400_v13  ;;  %v8213_v31 = vld [vmem:[#allocation2 + $0x90] sm:$0xff] }
 0x98c   : > { %v4410_v46 = vsel %vm4408_vm9, %v4409_v1, %v4407_v0  ;;  %v5497_v41 = vpop.eup %5496  ;;  %v4443_v15 = vsel %vm766_vm6, %v4396_v61, 0.0  ;;  %v4003_v16 = vmul.f32 %v5495_v27, %v8093_v32  ;;  %5498 = vrsqrt.f32 %v8195_v50  ;;  %v8209_v1 = vld [vmem:[#allocation2 + $0x88] sm:$0xff] }
 0x98d   : > { %v4440_v12 = vadd.f32 %v4439_v33, %v4438_v44  ;;  %vm9080_vm13 = vcmp.lt.s32.totalorder %v6169_v62, 100  ;;  %vm4004_vm14 = vcmp.eq.f32.partialorder %v8093_v32, inf  ;;  %v4445_v63 = vsel %vm766_vm6, %v4403_v34, 0.0 }
 0x98e   : > { %v4423_v56 = vsel %vm9080_vm13, %v4410_v46, 0.0  ;;  %v4010_v10 = vmul.f32 %v5497_v41, %v8108_v49  ;;  %5500 = vrsqrt.f32 %v8202_v42  ;;  %v4007_v55 = vand.u32 2147483648, %v8093_v32 }
 0x98f   : > { %v4442_v25 = vadd.f32 %v4441_v54, %v4440_v12  ;;  %vm4011_vm15 = vcmp.eq.f32.partialorder %v8108_v49, inf  ;;  %v4447_v11 = vsel %vm766_vm6, %v4423_v56, 0.0  ;;  %v4005_v23 = vsel %vm4004_vm14, %v8093_v32, %v4003_v16 }
 0x990   : > { %vm4006_vm0 = vcmp.eq.f32.partialorder %v8093_v32, 0.0  ;;  %5502 = vrsqrt.f32 %v8209_v1  ;;  %v4014_v53 = vand.u32 2147483648, %v8108_v49  ;;  %v4012_v2 = vsel %vm4011_vm15, %v8108_v49, %v4010_v10  ;;  %v8238_v32 = vld [vmem:[#allocation2 + $0xb8] sm:$0xff] }
 0x991   : > { %v4444_v39 = vadd.f32 %v4443_v15, %v4442_v25  ;;  %5504 = vrsqrt.f32 %v8213_v31  ;;  %vm4013_vm1 = vcmp.eq.f32.partialorder %v8108_v49, 0.0  ;;  %v8236_v9 = vmul.f32 0.005, %v4456_v37  ;;  %v8245_v49 = vld [vmem:[#allocation2 + $0xc0] sm:$0xff] }
 0x992   : > { %5506 = vrsqrt.f32 %v8217_v22  ;;  %v4008_v4 = vsel %vm4006_vm0, %v4007_v55, %v4005_v23  ;;  %vm4018_vm4 = vcmp.eq.f32.partialorder %v8195_v50, inf  ;;  %vm4020_vm3 = vcmp.eq.f32.partialorder %v8195_v50, 0.0 }
 0x993   : > { %v4446_v18 = vadd.f32 %v4445_v63, %v4444_v39  ;;  %5508 = vrsqrt.f32 %v8222_v20  ;;  %v4021_v30 = vand.u32 2147483648, %v8195_v50  ;;  %v4015_v14 = vsel %vm4013_vm1, %v4014_v53, %v4012_v2 }
 0x994   : > { %5510 = vrsqrt.f32 %v8227_v17  ;;  %vm4025_vm5 = vcmp.eq.f32.partialorder %v8202_v42, inf  ;;  %vm4027_vm8 = vcmp.eq.f32.partialorder %v8202_v42, 0.0  ;;  %v4028_v19 = vand.u32 2147483648, %v8202_v42 }
 0x995   : > { %v4448_v57 = vadd.f32 %v4447_v11, %v4446_v18  ;;  %5512 = vrsqrt.f32 %v8231_v35  ;;  %vm4032_vm9 = vcmp.eq.f32.partialorder %v8209_v1, inf  ;;  %vm4034_vm2 = vcmp.eq.f32.partialorder %v8209_v1, 0.0 }
 0x996   : > { %5514 = vrsqrt.f32 %v8238_v32  ;;  %v4035_v21 = vand.u32 2147483648, %v8209_v1  ;;  %vm4039_vm7 = vcmp.eq.f32.partialorder %v8213_v31, inf  ;;  %vm4041_vm10 = vcmp.eq.f32.partialorder %v8213_v31, 0.0 }
 0x997   : > { %v4449_v51 = vrot.slane %v4448_v57, 4  ;;  %v4042_v24 = vand.u32 2147483648, %v8213_v31  ;;  %vm4046_vm11 = vcmp.eq.f32.partialorder %v8217_v22, inf  ;;  %v4049_v3 = vand.u32 2147483648, %v8217_v22 }
 0x998   : > { %5516 = vrsqrt.f32 %v8245_v49  ;;  %vm4048_vm12 = vcmp.eq.f32.partialorder %v8217_v22, 0.0  ;;  %vm4053_vm13 = vcmp.eq.f32.partialorder %v8222_v20, inf  ;;  %v4056_v60 = vand.u32 2147483648, %v8222_v20 }
 0x999   : > { %v4450_v36 = vadd.f32 %v4449_v51, %v4448_v57  ;;  %v5499_v7 = vpop.eup %5498  ;;  %5518 = vrsqrt.f32 %v8249_v59  ;;  %vm4055_vm14 = vcmp.eq.f32.partialorder %v8222_v20, 0.0  ;;  %vm4060_vm15 = vcmp.eq.f32.partialorder %v8227_v17, inf }
 0x99a   : > { %v4017_v29 = vmul.f32 %v5499_v7, %v8195_v50  ;;  %v4106_v40 = vsel %vm766_vm6, %v4008_v4, 0.0  ;;  %v4107_v48 = vsel %vm766_vm6, %v4015_v14, 0.0  ;;  %v4063_v52 = vand.u32 2147483648, %v8227_v17 }
 0x99b   : > { %v4451_v6 = vrot.slane %v4450_v36, 2  ;;  %v5501_v47 = vpop.eup %5500  ;;  %v4108_v5 = vadd.f32 %v4107_v48, %v4106_v40  ;;  %5520 = vrsqrt.f32 %v8263_v45  ;;  %vm4067_vm1 = vcmp.eq.f32.partialorder %v8231_v35, inf }
 0x99c   : > { %v4019_v28 = vsel %vm4018_vm4, %v8195_v50, %v4017_v29  ;;  %v4024_v58 = vmul.f32 %v5501_v47, %v8202_v42  ;;  %v4070_v43 = vand.u32 2147483648, %v8231_v35  ;;  %vm4074_vm0 = vcmp.eq.f32.partialorder %v8238_v32, inf }
 0x99d   : > { %v4452_v8 = vadd.f32 %v4451_v6, %v4450_v36  ;;  %v5503_v38 = vpop.eup %5502  ;;  %v4022_v13 = vsel %vm4020_vm3, %v4021_v30, %v4019_v28  ;;  %5522 = vrsqrt.f32 %v8274_v26  ;;  %vm4069_vm4 = vcmp.eq.f32.partialorder %v8231_v35, 0.0 }
 0x99e   : > { %v5505_v33 = vpop.eup %5504  ;;  %v4026_v61 = vsel %vm4025_vm5, %v8202_v42, %v4024_v58  ;;  %v4031_v0 = vmul.f32 %v5503_v38, %v8209_v1  ;;  %v4077_v44 = vand.u32 2147483648, %v8238_v32  ;;  %v4109_v46 = vsel %vm766_vm6, %v4022_v13, 0.0 }
 0x99f   : > { %v4453_v27 = vrot.slane %v4452_v8, 1  ;;  %v5507_v54 = vpop.eup %5506  ;;  %v4029_v41 = vsel %vm4027_vm8, %v4028_v19, %v4026_v61  ;;  %v4038_v34 = vmul.f32 %v5505_v33, %v8213_v31  ;;  %vm4076_vm3 = vcmp.eq.f32.partialorder %v8238_v32, 0.0  ;;  %v8365_v61 = vld [vmem:[#allocation2 + $0x220] sm:$0xff] }
 0x9a0   : > { %v4110_v12 = vadd.f32 %v4109_v46, %v4108_v5  ;;  %v5509_v15 = vpop.eup %5508  ;;  %v4033_v16 = vsel %vm4032_vm9, %v8209_v1, %v4031_v0  ;;  %v4045_v56 = vmul.f32 %v5507_v54, %v8217_v22  ;;  %vm4081_vm5 = vcmp.eq.f32.partialorder %v8245_v49, inf  ;;  %v8374_v54 = vld [vmem:[#allocation2 + $0x230] sm:$0xff] }
 0x9a1   : > { %v4454_v50 = vadd.f32 %v4453_v27, %v4452_v8  ;;  %v4111_v25 = vsel %vm766_vm6, %v4029_v41, 0.0  ;;  %v5511_v63 = vpop.eup %5510  ;;  %v4036_v42 = vsel %vm4034_vm2, %v4035_v21, %v4033_v16  ;;  %v4040_v39 = vsel %vm4039_vm7, %v8213_v31, %v4038_v34  ;;  %v8350_v8 = vld [vmem:[#allocation2 + $0x218] sm:$0xff]  ;;  %v4138_v34 = vld [vmem:[#allocation3 + $0x1] sm:$0x1] }
 0x9a2   : > { %v4052_v55 = vmul.f32 %v5509_v15, %v8222_v20  ;;  %v5513_v11 = vpop.eup %5512  ;;  %v4047_v37 = vsel %vm4046_vm11, %v8217_v22, %v4045_v56  ;;  %v4059_v23 = vmul.f32 %v5511_v63, %v8227_v17  ;;  %vm4088_vm8 = vcmp.eq.f32.partialorder %v8249_v59, inf  ;;  %v8385_v56 = vld [vmem:[#allocation2 + $0x240] sm:$0xff] }
 0x9a3   : > { %v4455_v10 = vmul.f32 0.01, %v4454_v50  ;;  %v4112_v18 = vadd.f32 %v4111_v25, %v4110_v12  ;;  %v5515_v53 = vpop.eup %5514  ;;  %v4043_v2 = vsel %vm4041_vm10, %v4042_v24, %v4040_v39  ;;  %v4066_v4 = vmul.f32 %v5513_v11, %v8231_v35  ;;  %v8381_v12 = vld [vmem:[#allocation2 + $0x238] sm:$0xff] }
 0x9a4   : > { %v4054_v57 = vsel %vm4053_vm13, %v8222_v20, %v4052_v55  ;;  %v4050_v30 = vsel %vm4048_vm12, %v4049_v3, %v4047_v37  ;;  %v4061_v51 = vsel %vm4060_vm15, %v8227_v17, %v4059_v23  ;;  %v4113_v31 = vsel %vm766_vm6, %v4036_v42, 0.0  ;;  %v8397_v37 = vld [vmem:[#allocation2 + $0x248] sm:$0xff]  ;;  %v8400_v23 = vld [vmem:[#allocation2 + $0x250] sm:$0xff] }
 0x9a5   : > { %v4458_v1 = vadd.f32 %v8236_v9, %v4455_v10  ;;  %v4073_v9 = vmul.f32 %v5515_v53, %v8238_v32  ;;  %v5517_v14 = vpop.eup %5516  ;;  %v4057_v36 = vsel %vm4055_vm14, %v4056_v60, %v4054_v57  ;;  %v4091_v21 = vand.u32 2147483648, %v8249_v59  ;;  %v8407_v53 = vld [vmem:[#allocation2 + $0x258] sm:$0xff]  ;;  %v8411_v57 = vld [vmem:[#allocation2 + $0x260] sm:$0xff] }
 0x9a6   : > { %v4114_v24 = vadd.f32 %v4113_v31, %v4112_v18  ;;  %v5519_v7 = vpop.eup %5518  ;;  %vm9081_vm9 = vcmp.eq.f32.partialorder %v8227_v17, 0.0  ;;  %v4068_v3 = vsel %vm4067_vm1, %v8231_v35, %v4066_v4  ;;  %v4080_v6 = vmul.f32 %v5517_v14, %v8245_v49 }
 0x9a7   : > { %v4459_v19 = vmul.f32 0.5, %v4458_v1  ;;  %v4064_v22 = vsel %vm9081_vm9, %v4063_v52, %v4061_v51  ;;  %v4115_v29 = vsel %vm766_vm6, %v4043_v2, 0.0  ;;  %v4075_v20 = vsel %vm4074_vm0, %v8238_v32, %v4073_v9  ;;  %v8370_v32 = vld [vmem:[#allocation2 + $0x228] sm:$0xff] }
 0x9a8   : > { %v4087_v60 = vmul.f32 %v5519_v7, %v8249_v59  ;;  %v4116_v40 = vadd.f32 %v4115_v29, %v4114_v24  ;;  %v4117_v48 = vsel %vm766_vm6, %v4050_v30, 0.0  ;;  %v5521_v17 = vpop.eup %5520  ;;  %vm4090_vm2 = vcmp.eq.f32.partialorder %v8249_v59, 0.0  ;;  %v8417_v30 = vld [vmem:[#allocation2 + $0x268] sm:$0xff] }
 0x9a9   : > { %4462 = vperm.xlu1 %5415, %v4459_v19   ;;  %v4119_v47 = vsel %vm766_vm6, %v4057_v36, 0.0  ;;  %v4071_v52 = vsel %vm4069_vm4, %v4070_v43, %v4068_v3  ;;  %v4084_v5 = vand.u32 2147483648, %v8245_v49  ;;  %v4078_v27 = vsel %vm4076_vm3, %v4077_v44, %v4075_v20  ;;  %v8443_v20 = vld [vmem:[#allocation2 + $0x1a8] sm:$0xff] }
 0x9aa   : > { %v4089_v28 = vsel %vm4088_vm8, %v8249_v59, %v4087_v60  ;;  %v4118_v58 = vadd.f32 %v4117_v48, %v4116_v40  ;;  %v5523_v38 = vpop.eup %5522  ;;  %v4082_v13 = vsel %vm4081_vm5, %v8245_v49, %v4080_v6  ;;  %vm4083_vm7 = vcmp.eq.f32.partialorder %v8245_v49, 0.0 }
 0x9ab   : > { %v4121_v35 = vsel %vm766_vm6, %v4064_v22, 0.0  ;;  %v4092_v43 = vsel %vm4090_vm2, %v4091_v21, %v4089_v28  ;;  %v4639_v0 = vmul.f32 %v5521_v17, %v8263_v45  ;;  %5524 = vrsqrt.f32 %v8350_v8  ;;  %v8433_v21 = vld [vmem:[#allocation2 + $0x1a0] sm:$0xff] }
 0x9ac   : > { %v4120_v33 = vadd.f32 %v4119_v47, %v4118_v58  ;;  %v4123_v59 = vsel %vm766_vm6, %v4071_v52, 0.0  ;;  %vm4640_vm10 = vcmp.eq.f32.partialorder %v8263_v45, inf  ;;  %v4646_v44 = vmul.f32 %v5523_v38, %v8274_v26 }
 0x9ad   : > { %v4085_v46 = vsel %vm4083_vm7, %v4084_v5, %v4082_v13  ;;  %vm4642_vm11 = vcmp.eq.f32.partialorder %v8263_v45, 0.0  ;;  %vm4647_vm12 = vcmp.eq.f32.partialorder %v8274_v26, inf  ;;  %vm9082_vm13 = vcmp.lt.s32.totalorder %v6169_v62, 100 }
 0x9ae   : > { %v4122_v49 = vadd.f32 %v4121_v35, %v4120_v33  ;;  %v4105_v50 = vsel %vm9082_vm13, %v4092_v43, 0.0  ;;  %v4125_v41 = vsel %vm766_vm6, %v4078_v27, 0.0  ;;  %v4643_v15 = vand.u32 2147483648, %v8263_v45 }
 0x9af   : > { %5526 = vrsqrt.f32 %v8365_v61  ;;  %v4641_v25 = vsel %vm4640_vm10, %v8263_v45, %v4639_v0  ;;  %v4650_v63 = vand.u32 2147483648, %v8274_v26  ;;  %v4127_v10 = vsel %vm766_vm6, %v4085_v46, 0.0 }
 0x9b0   : > { %v4124_v16 = vadd.f32 %v4123_v59, %v4122_v49  ;;  %5528 = vrsqrt.f32 %v8370_v32  ;;  %v4648_v42 = vsel %vm4647_vm12, %v8274_v26, %v4646_v44  ;;  %vm4649_vm14 = vcmp.eq.f32.partialorder %v8274_v26, 0.0 }
 0x9b1   : > { %5530 = vrsqrt.f32 %v8374_v54  ;;  %v4129_v55 = vsel %vm766_vm6, %v4105_v50, 0.0  ;;  %v8395_v11 = vmul.f32 0.005, %v4138_v34  ;;  %v4644_v18 = vsel %vm4642_vm11, %v4643_v15, %v4641_v25 }
 0x9b2   : > { %v4126_v39 = vadd.f32 %v4125_v41, %v4124_v16  ;;  %5532 = vrsqrt.f32 %v8381_v12  ;;  %vm4654_vm15 = vcmp.eq.f32.partialorder %v8350_v8, inf  ;;  %vm4656_vm0 = vcmp.eq.f32.partialorder %v8350_v8, 0.0 }
 0x9b3   : > { %5534 = vrsqrt.f32 %v8385_v56  ;;  %v4651_v1 = vsel %vm4649_vm14, %v4650_v63, %v4648_v42  ;;  %v4657_v2 = vand.u32 2147483648, %v8350_v8  ;;  %vm4661_vm1 = vcmp.eq.f32.partialorder %v8365_v61, inf }
 0x9b4   : > { %v4128_v26 = vadd.f32 %v4127_v10, %v4126_v39  ;;  %vm4663_vm4 = vcmp.eq.f32.partialorder %v8365_v61, 0.0  ;;  %v4664_v45 = vand.u32 2147483648, %v8365_v61  ;;  %vm4668_vm3 = vcmp.eq.f32.partialorder %v8370_v32, inf }
 0x9b5   : > { %5536 = vrsqrt.f32 %v8397_v37  ;;  %vm4670_vm5 = vcmp.eq.f32.partialorder %v8370_v32, 0.0  ;;  %v4671_v51 = vand.u32 2147483648, %v8370_v32  ;;  %vm4675_vm8 = vcmp.eq.f32.partialorder %v8374_v54, inf }
 0x9b6   : > { %v4130_v4 = vadd.f32 %v4129_v55, %v4128_v26  ;;  %5538 = vrsqrt.f32 %v8400_v23  ;;  %vm4677_vm9 = vcmp.eq.f32.partialorder %v8374_v54, 0.0  ;;  %v4678_v9 = vand.u32 2147483648, %v8374_v54 }
 0x9b7   : > { %5540 = vrsqrt.f32 %v8407_v53  ;;  %vm4682_vm2 = vcmp.eq.f32.partialorder %v8381_v12, inf  ;;  %vm4684_vm7 = vcmp.eq.f32.partialorder %v8381_v12, 0.0  ;;  %v4685_v19 = vand.u32 2147483648, %v8381_v12 }
 0x9b8   : > { %v4131_v31 = vrot.slane %v4130_v4, 4  ;;  %5542 = vrsqrt.f32 %v8411_v57  ;;  %v5525_v14 = vpop.eup %5524  ;;  %vm4689_vm10 = vcmp.eq.f32.partialorder %v8385_v56, inf  ;;  %v4692_v36 = vand.u32 2147483648, %v8385_v56 }
 0x9b9   : > { %5544 = vrsqrt.f32 %v8417_v30  ;;  %v4653_v7 = vmul.f32 %v5525_v14, %v8350_v8  ;;  %vm4691_vm11 = vcmp.eq.f32.partialorder %v8385_v56, 0.0  ;;  %vm4696_vm12 = vcmp.eq.f32.partialorder %v8397_v37, inf }
 0x9ba   : > { %v4132_v24 = vadd.f32 %v4131_v31, %v4130_v4  ;;  %v4699_v22 = vand.u32 2147483648, %v8397_v37  ;;  %v4706_v3 = vand.u32 2147483648, %v8400_v23  ;;  %v4742_v6 = vsel %vm766_vm6, %v4644_v18, 0.0 }
 0x9bb   : > { %v4743_v29 = vsel %vm766_vm6, %v4651_v1, 0.0  ;;  %v4655_v48 = vsel %vm4654_vm15, %v8350_v8, %v4653_v7  ;;  %vm4698_vm14 = vcmp.eq.f32.partialorder %v8397_v37, 0.0  ;;  %5546 = vrsqrt.f32 %v8433_v21 }
 0x9bc   : > { %v5527_v60 = vpop.eup %5526  ;;  %v4133_v40 = vrot.slane %v4132_v24, 2  ;;  %v4744_v17 = vadd.f32 %v4743_v29, %v4742_v6  ;;  %v4658_v52 = vsel %vm4656_vm0, %v4657_v2, %v4655_v48  ;;  %vm4710_vm13 = vcmp.eq.f32.partialorder %v8407_v53, inf }
 0x9bd   : > { %v5529_v47 = vpop.eup %5528  ;;  %v4660_v5 = vmul.f32 %v5527_v60, %v8365_v61  ;;  %v4713_v28 = vand.u32 2147483648, %v8407_v53  ;;  %v4745_v13 = vsel %vm766_vm6, %v4658_v52, 0.0  ;;  %5548 = vrsqrt.f32 %v8443_v20  ;;  %v8524_v52 = vld [vmem:[#allocation2 + $0x1b0] sm:$0xff] }
 0x9be   : > { %v5531_v58 = vpop.eup %5530  ;;  %v4134_v38 = vadd.f32 %v4133_v40, %v4132_v24  ;;  %v4667_v27 = vmul.f32 %v5529_v47, %v8370_v32  ;;  %vm4717_vm0 = vcmp.eq.f32.partialorder %v8411_v57, inf  ;;  %v4746_v33 = vadd.f32 %v4745_v13, %v4744_v17 }
 0x9bf   : > { %v5533_v35 = vpop.eup %5532  ;;  %v4662_v8 = vsel %vm4661_vm1, %v8365_v61, %v4660_v5  ;;  %v4674_v43 = vmul.f32 %v5531_v58, %v8374_v54  ;;  %vm4712_vm15 = vcmp.eq.f32.partialorder %v8407_v53, 0.0  ;;  %vm4724_vm1 = vcmp.eq.f32.partialorder %v8417_v30, inf }
 0x9c0   : > { %v5535_v0 = vpop.eup %5534  ;;  %v4135_v59 = vrot.slane %v4134_v38, 1  ;;  %v4665_v44 = vsel %vm4663_vm4, %v4664_v45, %v4662_v8  ;;  %v4669_v46 = vsel %vm4668_vm3, %v8370_v32, %v4667_v27  ;;  %v4681_v49 = vmul.f32 %v5533_v35, %v8381_v12 }
 0x9c1   : > { %v4672_v50 = vsel %vm4670_vm5, %v4671_v51, %v4669_v46  ;;  %v4676_v41 = vsel %vm4675_vm8, %v8374_v54, %v4674_v43  ;;  %v4688_v34 = vmul.f32 %v5535_v0, %v8385_v56  ;;  %v4747_v61 = vsel %vm766_vm6, %v4665_v44, 0.0  ;;  %v8540_v43 = vld [vmem:[#allocation2 + $0x1c0] sm:$0xff]  ;;  %v8551_v46 = vld [vmem:[#allocation2 + $0x1d0] sm:$0xff] }
 0x9c2   : > { %v5537_v15 = vpop.eup %5536  ;;  %v4136_v16 = vadd.f32 %v4135_v59, %v4134_v38  ;;  %v4679_v25 = vsel %vm4677_vm9, %v4678_v9, %v4676_v41  ;;  %v4683_v63 = vsel %vm4682_vm2, %v8381_v12, %v4681_v49  ;;  %v4748_v10 = vadd.f32 %v4747_v61, %v4746_v33  ;;  %v4774_v44 = vld [vmem:[#allocation3 + $0x5] sm:$0x1]  ;;  %v8556_v41 = vld [vmem:[#allocation2 + $0x1d8] sm:$0xff] }
 0x9c3   : > { %v5539_v32 = vpop.eup %5538  ;;  %v4686_v42 = vsel %vm4684_vm7, %v4685_v19, %v4683_v63  ;;  %v4690_v39 = vsel %vm4689_vm10, %v8385_v56, %v4688_v34  ;;  %v4695_v55 = vmul.f32 %v5537_v15, %v8397_v37  ;;  %v4749_v18 = vsel %vm766_vm6, %v4672_v50, 0.0 }
 0x9c4   : > { %v5541_v26 = vpop.eup %5540  ;;  %v4137_v54 = vmul.f32 0.01, %v4136_v16  ;;  %v4702_v1 = vmul.f32 %v5539_v32, %v8400_v23  ;;  %v4750_v2 = vadd.f32 %v4749_v18, %v4748_v10  ;;  %v4693_v12 = vsel %vm4691_vm11, %v4692_v36, %v4690_v39  ;;  %v8561_v16 = vld [vmem:[#allocation2 + $0x1e0] sm:$0xff] }
 0x9c5   : > { %v5543_v45 = vpop.eup %5542  ;;  %v4697_v4 = vsel %vm4696_vm12, %v8397_v37, %v4695_v55  ;;  %v4709_v51 = vmul.f32 %v5541_v26, %v8407_v53  ;;  %v4751_v9 = vsel %vm766_vm6, %v4679_v25, 0.0  ;;  %vm9083_vm4 = vcmp.eq.f32.partialorder %v8400_v23, inf }
 0x9c6   : > { %v5545_v31 = vpop.eup %5544  ;;  %v4140_v14 = vadd.f32 %v8395_v11, %v4137_v54  ;;  %v4704_v19 = vsel %vm9083_vm4, %v8400_v23, %v4702_v1  ;;  %v4716_v24 = vmul.f32 %v5543_v45, %v8411_v57  ;;  %v4753_v56 = vsel %vm766_vm6, %v4686_v42, 0.0  ;;  %v8571_v42 = vld [vmem:[#allocation2 + $0x1e8] sm:$0xff]  ;;  %v8582_v54 = vld [vmem:[#allocation2 + $0x1f8] sm:$0xff]  ;;  %v8587_v1 = vld [vmem:[#allocation2 + $0x200] sm:$0xff] }
 0x9c7   : > { %v4700_v36 = vsel %vm4698_vm14, %v4699_v22, %v4697_v4  ;;  %v4720_v7 = vand.u32 2147483648, %v8411_v57  ;;  %v4723_v6 = vmul.f32 %v5545_v31, %v8417_v30  ;;  %v4752_v29 = vadd.f32 %v4751_v9, %v4750_v2 }
 0x9c8   : > { %v4141_v60 = vmul.f32 0.5, %v4140_v14  ;;  %v4711_v11 = vsel %vm4710_vm13, %v8407_v53, %v4709_v51  ;;  %v4727_v40 = vand.u32 2147483648, %v8417_v30  ;;  %v4755_v48 = vsel %vm766_vm6, %v4693_v12, 0.0  ;;  %v5547_v17 = vpop.eup %5546  ;;  %v8605_v14 = vld [vmem:[#allocation2 + $0x2d8] sm:$0xff] }
 0x9c9   : > { %vm9084_vm3 = vcmp.eq.f32.partialorder %v8400_v23, 0.0  ;;  %v4725_v22 = vsel %vm4724_vm1, %v8417_v30, %v4723_v6  ;;  %vm4726_vm5 = vcmp.eq.f32.partialorder %v8417_v30, 0.0  ;;  %v4754_v47 = vadd.f32 %v4753_v56, %v4752_v29  ;;  %v8535_v30 = vld [vmem:[#allocation2 + $0x1b8] sm:$0xff] }
 0x9ca   : > { %v4707_v37 = vsel %vm9084_vm3, %v4706_v3, %v4704_v19  ;;  %4144 = vperm.xlu0 %5414, %v4141_v60   ;;  %v4718_v5 = vsel %vm4717_vm0, %v8411_v57, %v4716_v24  ;;  %vm4719_vm8 = vcmp.eq.f32.partialorder %v8411_v57, 0.0  ;;  %v4757_v58 = vsel %vm766_vm6, %v4700_v36, 0.0  ;;  %v5549_v23 = vpop.eup %5548  ;;  %v8614_v60 = vld [vmem:[#allocation2 + $0x2e0] sm:$0xff] }
 0x9cb   : > { %v4714_v3 = vsel %vm4712_vm15, %v4713_v28, %v4711_v11  ;;  %v4756_v38 = vadd.f32 %v4755_v48, %v4754_v47  ;;  %v4728_v27 = vsel %vm4726_vm5, %v4727_v40, %v4725_v22  ;;  %v4759_v13 = vsel %vm766_vm6, %v4707_v37, 0.0  ;;  %v8545_v28 = vld [vmem:[#allocation2 + $0x1c8] sm:$0xff] }
 0x9cc   : > { %v4480_v35 = vmul.f32 %v5547_v17, %v8433_v21  ;;  %5550 = vrsqrt.f32 %v8524_v52  ;;  %v4721_v8 = vsel %vm4719_vm8, %v4720_v7, %v4718_v5  ;;  %vm4481_vm9 = vcmp.eq.f32.partialorder %v8433_v21, inf }
 0x9cd   : > { %v4758_v57 = vadd.f32 %v4757_v58, %v4756_v38  ;;  %v4487_v33 = vmul.f32 %v5549_v23, %v8443_v20  ;;  %v4761_v53 = vsel %vm766_vm6, %v4714_v3, 0.0  ;;  %vm4488_vm2 = vcmp.eq.f32.partialorder %v8443_v20, inf }
 0x9ce   : > { %5552 = vrsqrt.f32 %v8535_v30  ;;  %vm9085_vm7 = vcmp.lt.s32.totalorder %v6169_v62, 100  ;;  %vm4483_vm10 = vcmp.eq.f32.partialorder %v8433_v21, 0.0  ;;  %v4484_v49 = vand.u32 2147483648, %v8433_v21 }
 0x9cf   : > { %v4741_v0 = vsel %vm9085_vm7, %v4728_v27, 0.0  ;;  %v4760_v59 = vadd.f32 %v4759_v13, %v4758_v57  ;;  %v4763_v50 = vsel %vm766_vm6, %v4721_v8, 0.0  ;;  %v4482_v34 = vsel %vm4481_vm9, %v8433_v21, %v4480_v35 }
 0x9d0   : > { %v4491_v61 = vand.u32 2147483648, %v8443_v20  ;;  %5554 = vrsqrt.f32 %v8540_v43  ;;  %v4489_v25 = vsel %vm4488_vm2, %v8443_v20, %v4487_v33  ;;  %vm4490_vm11 = vcmp.eq.f32.partialorder %v8443_v20, 0.0  ;;  %v8577_v20 = vld [vmem:[#allocation2 + $0x1f0] sm:$0xff] }
 0x9d1   : > { %v4762_v15 = vadd.f32 %v4761_v53, %v4760_v59  ;;  %5556 = vrsqrt.f32 %v8545_v28  ;;  %v4765_v63 = vsel %vm766_vm6, %v4741_v0, 0.0  ;;  %v8567_v10 = vmul.f32 0.005, %v4774_v44 }
 0x9d2   : > { %vm4495_vm12 = vcmp.eq.f32.partialorder %v8524_v52, inf  ;;  %5558 = vrsqrt.f32 %v8551_v46  ;;  %v4485_v39 = vsel %vm4483_vm10, %v4484_v49, %v4482_v34  ;;  %vm4497_vm13 = vcmp.eq.f32.partialorder %v8524_v52, 0.0 }
 0x9d3   : > { %v4764_v32 = vadd.f32 %v4763_v50, %v4762_v15  ;;  %5560 = vrsqrt.f32 %v8556_v41  ;;  %v4492_v55 = vsel %vm4490_vm11, %v4491_v61, %v4489_v25  ;;  %v4498_v18 = vand.u32 2147483648, %v8524_v52 }
 0x9d4   : > { %vm4502_vm14 = vcmp.eq.f32.partialorder %v8535_v30, inf  ;;  %5562 = vrsqrt.f32 %v8561_v16  ;;  %vm4504_vm15 = vcmp.eq.f32.partialorder %v8535_v30, 0.0  ;;  %v4505_v21 = vand.u32 2147483648, %v8535_v30 }
 0x9d5   : > { %v4766_v26 = vadd.f32 %v4765_v63, %v4764_v32  ;;  %vm4509_vm0 = vcmp.eq.f32.partialorder %v8540_v43, inf  ;;  %vm4511_vm1 = vcmp.eq.f32.partialorder %v8540_v43, 0.0  ;;  %v4512_v2 = vand.u32 2147483648, %v8540_v43 }
 0x9d6   : > { %vm4516_vm4 = vcmp.eq.f32.partialorder %v8545_v28, inf  ;;  %5564 = vrsqrt.f32 %v8571_v42  ;;  %vm4518_vm3 = vcmp.eq.f32.partialorder %v8545_v28, 0.0  ;;  %v4519_v12 = vand.u32 2147483648, %v8545_v28 }
 0x9d7   : > { %v4767_v45 = vrot.slane %v4766_v26, 4  ;;  %vm4523_vm5 = vcmp.eq.f32.partialorder %v8551_v46, inf  ;;  %5566 = vrsqrt.f32 %v8577_v20  ;;  %vm4525_vm8 = vcmp.eq.f32.partialorder %v8551_v46, 0.0 }
 0x9d8   : > { %v4526_v4 = vand.u32 2147483648, %v8551_v46  ;;  %vm4530_vm9 = vcmp.eq.f32.partialorder %v8556_v41, inf  ;;  %5568 = vrsqrt.f32 %v8582_v54  ;;  %vm4532_vm2 = vcmp.eq.f32.partialorder %v8556_v41, 0.0 }
 0x9d9   : > { %v5551_v51 = vpop.eup %5550  ;;  %v4768_v9 = vadd.f32 %v4767_v45, %v4766_v26  ;;  %v4533_v31 = vand.u32 2147483648, %v8556_v41  ;;  %vm4537_vm7 = vcmp.eq.f32.partialorder %v8561_v16, inf  ;;  %5570 = vrsqrt.f32 %v8587_v1 }
 0x9da   : > { %v4494_v19 = vmul.f32 %v5551_v51, %v8524_v52  ;;  %v4540_v24 = vand.u32 2147483648, %v8561_v16  ;;  %v4583_v56 = vsel %vm766_vm6, %v4485_v39, 0.0  ;;  %v4547_v6 = vand.u32 2147483648, %v8571_v42 }
 0x9db   : > { %v5553_v36 = vpop.eup %5552  ;;  %v4769_v7 = vrot.slane %v4768_v9, 2  ;;  %v4584_v29 = vsel %vm766_vm6, %v4492_v55, 0.0  ;;  %vm4551_vm10 = vcmp.eq.f32.partialorder %v8577_v20, inf  ;;  %5572 = vrsqrt.f32 %v8605_v14 }
 0x9dc   : > { %v4496_v11 = vsel %vm4495_vm12, %v8524_v52, %v4494_v19  ;;  %v4501_v40 = vmul.f32 %v5553_v36, %v8535_v30  ;;  %v4585_v48 = vadd.f32 %v4584_v29, %v4583_v56  ;;  %vm4546_vm11 = vcmp.eq.f32.partialorder %v8571_v42, 0.0 }
 0x9dd   : > { %v5555_v17 = vpop.eup %5554  ;;  %v4770_v37 = vadd.f32 %v4769_v7, %v4768_v9  ;;  %v4499_v22 = vsel %vm4497_vm13, %v4498_v18, %v4496_v11  ;;  %v4554_v47 = vand.u32 2147483648, %v8577_v20  ;;  %v4561_v5 = vand.u32 2147483648, %v8582_v54 }
 0x9de   : > { %v5557_v58 = vpop.eup %5556  ;;  %v4503_v23 = vsel %vm4502_vm14, %v8535_v30, %v4501_v40  ;;  %v4508_v3 = vmul.f32 %v5555_v17, %v8540_v43  ;;  %vm4558_vm12 = vcmp.eq.f32.partialorder %v8582_v54, inf  ;;  %v4586_v38 = vsel %vm766_vm6, %v4499_v22, 0.0 }
 0x9df   : > { %5574 = vrsqrt.f32 %v8614_v60  ;;  %v5559_v52 = vpop.eup %5558  ;;  %v4771_v27 = vrot.slane %v4770_v37, 1  ;;  %v4506_v13 = vsel %vm4504_vm15, %v4505_v21, %v4503_v23  ;;  %v4515_v35 = vmul.f32 %v5557_v58, %v8545_v28 }
 0x9e0   : > { %vm4553_vm13 = vcmp.eq.f32.partialorder %v8577_v20, 0.0  ;;  %v4587_v8 = vadd.f32 %v4586_v38, %v4585_v48  ;;  %v5561_v57 = vpop.eup %5560  ;;  %v4510_v33 = vsel %vm4509_vm0, %v8540_v43, %v4508_v3  ;;  %v4522_v53 = vmul.f32 %v5559_v52, %v8551_v46  ;;  %v8704_v52 = vld [vmem:[#allocation2 + $0x2f0] sm:$0xff] }
 0x9e1   : > { %vm4565_vm14 = vcmp.eq.f32.partialorder %v8587_v1, inf  ;;  %v4588_v0 = vsel %vm766_vm6, %v4506_v13, 0.0  ;;  %v5563_v59 = vpop.eup %5562  ;;  %v4772_v44 = vadd.f32 %v4771_v27, %v4770_v37  ;;  %v4513_v30 = vsel %vm4511_vm1, %v4512_v2, %v4510_v33  ;;  %v8717_v33 = vld [vmem:[#allocation2 + $0x300] sm:$0xff] }
 0x9e2   : > { %v4517_v49 = vsel %vm4516_vm4, %v8545_v28, %v4515_v35  ;;  %v4529_v50 = vmul.f32 %v5561_v57, %v8556_v41  ;;  %v4524_v61 = vsel %vm4523_vm5, %v8551_v46, %v4522_v53  ;;  %v4536_v15 = vmul.f32 %v5563_v59, %v8561_v16  ;;  %v8722_v53 = vld [vmem:[#allocation2 + $0x308] sm:$0xff] }
 0x9e3   : > { %v4520_v34 = vsel %vm4518_vm3, %v4519_v12, %v4517_v49  ;;  %v4589_v25 = vadd.f32 %v4588_v0, %v4587_v8  ;;  %v5565_v63 = vpop.eup %5564  ;;  %v4773_v32 = vmul.f32 0.01, %v4772_v44  ;;  %v4527_v43 = vsel %vm4525_vm8, %v4526_v4, %v4524_v61  ;;  %v8711_v8 = vld [vmem:[#allocation2 + $0x2f8] sm:$0xff]  ;;  %v8726_v44 = vld [vmem:[#allocation2 + $0x310] sm:$0xff] }
 0x9e4   : > { %v4531_v39 = vsel %vm4530_vm9, %v8556_v41, %v4529_v50  ;;  %v4590_v55 = vsel %vm766_vm6, %v4513_v30, 0.0  ;;  %v5567_v28 = vpop.eup %5566  ;;  %v4538_v26 = vsel %vm4537_vm7, %v8561_v16, %v4536_v15  ;;  %v4543_v21 = vmul.f32 %v5565_v63, %v8571_v42  ;;  %v8739_v63 = vld [vmem:[#allocation2 + $0x320] sm:$0xff] }
 0x9e5   : > { %v4534_v18 = vsel %vm4532_vm2, %v4533_v31, %v4531_v39  ;;  %v4591_v2 = vadd.f32 %v4590_v55, %v4589_v25  ;;  %v5569_v45 = vpop.eup %5568  ;;  %v4776_v46 = vadd.f32 %v8567_v10, %v4773_v32  ;;  %vm9086_vm15 = vcmp.eq.f32.partialorder %v8561_v16, 0.0  ;;  %v8748_v39 = vld [vmem:[#allocation2 + $0x328] sm:$0xff] }
 0x9e6   : > { %v4541_v12 = vsel %vm9086_vm15, %v4540_v24, %v4538_v26  ;;  %v4550_v4 = vmul.f32 %v5567_v28, %v8577_v20  ;;  %v4592_v51 = vsel %vm766_vm6, %v4520_v34, 0.0  ;;  %v5571_v9 = vpop.eup %5570  ;;  %vm9087_vm0 = vcmp.eq.f32.partialorder %v8571_v42, inf  ;;  %v8732_v34 = vld [vmem:[#allocation2 + $0x318] sm:$0xff]  ;;  %v8752_v28 = vld [vmem:[#allocation2 + $0x330] sm:$0xff] }
 0x9e7   : > { %v4545_v41 = vsel %vm9087_vm0, %v8571_v42, %v4543_v21  ;;  %v4557_v31 = vmul.f32 %v5569_v45, %v8582_v54  ;;  %v4593_v19 = vadd.f32 %v4592_v51, %v4591_v2  ;;  %v4594_v56 = vsel %vm766_vm6, %v4527_v43, 0.0  ;;  %v4304_v40 = vpop.permute.xlu1 %4303  ;;  %v8758_v26 = vld [vmem:[#allocation2 + $0x338] sm:$0xff] }
 0x9e8   : > { %v4777_v36 = vmul.f32 0.5, %v4776_v46  ;;  %v4552_v16 = vsel %vm4551_vm10, %v8577_v20, %v4550_v4  ;;  %v4564_v10 = vmul.f32 %v5571_v9, %v8587_v1  ;;  %v4568_v24 = vand.u32 2147483648, %v8587_v1  ;;  %v5573_v48 = vpop.eup %5572  ;;  %4306 = vst [vmem:[#allocation5 + $0x2] sm:$0x1] %v4304_v40 }
 0x9e9   : > { %v4548_v7 = vsel %vm4546_vm11, %v4547_v6, %v4545_v41  ;;  %vm4567_vm1 = vcmp.eq.f32.partialorder %v8587_v1, 0.0  ;;  %v4595_v29 = vadd.f32 %v4594_v56, %v4593_v19  ;;  %v4596_v11 = vsel %vm766_vm6, %v4534_v18, 0.0  ;;  %v8697_v6 = vld [vmem:[#allocation2 + $0x2e8] sm:$0xff]  ;;  %v8780_v56 = vld [vmem:[#allocation2 + $0x278] sm:$0xff] }
 0x9ea   : > { %4780 = vperm.xlu1 %5415, %v4777_v36   ;;  %v4559_v17 = vsel %vm4558_vm12, %v8582_v54, %v4557_v31  ;;  %vm4560_vm4 = vcmp.eq.f32.partialorder %v8582_v54, 0.0  ;;  %v4566_v37 = vsel %vm4565_vm14, %v8587_v1, %v4564_v10  ;;  %v4598_v42 = vsel %vm766_vm6, %v4541_v12, 0.0  ;;  %v8771_v12 = vld [vmem:[#allocation2 + $0x270] sm:$0xff] }
 0x9eb   : > { %v4555_v22 = vsel %vm4553_vm13, %v4554_v47, %v4552_v16  ;;  %v4597_v58 = vadd.f32 %v4596_v11, %v4595_v29  ;;  %v4569_v3 = vsel %vm4567_vm1, %v4568_v24, %v4566_v37  ;;  %v4600_v38 = vsel %vm766_vm6, %v4548_v7, 0.0 }
 0x9ec   : > { %v5575_v23 = vpop.eup %5574  ;;  %v4562_v1 = vsel %vm4560_vm4, %v4561_v5, %v4559_v17  ;;  %v4957_v13 = vmul.f32 %v5573_v48, %v8605_v14  ;;  %5576 = vrsqrt.f32 %v8697_v6  ;;  %v4602_v35 = vsel %vm766_vm6, %v4555_v22, 0.0  ;;  %v4615_v5 = vld [vmem:[#allocation3 + $0x4] sm:$0x1] }
 0x9ed   : > { %v4599_v27 = vadd.f32 %v4598_v42, %v4597_v58  ;;  %vm4958_vm3 = vcmp.eq.f32.partialorder %v8605_v14, inf  ;;  %v4964_v20 = vmul.f32 %v5575_v23, %v8614_v60  ;;  %vm9088_vm5 = vcmp.lt.s32.totalorder %v6169_v62, 100 }
 0x9ee   : > { %v4582_v47 = vsel %vm9088_vm5, %v4569_v3, 0.0  ;;  %vm4965_vm8 = vcmp.eq.f32.partialorder %v8614_v60, inf  ;;  %5578 = vrsqrt.f32 %v8704_v52  ;;  %v4604_v54 = vsel %vm766_vm6, %v4562_v1, 0.0 }
 0x9ef   : > { %v4601_v57 = vadd.f32 %v4600_v38, %v4599_v27  ;;  %vm4960_vm9 = vcmp.eq.f32.partialorder %v8605_v14, 0.0  ;;  %v4961_v0 = vand.u32 2147483648, %v8605_v14  ;;  %v4959_v30 = vsel %vm4958_vm3, %v8605_v14, %v4957_v13 }
 0x9f0   : > { %v4968_v49 = vand.u32 2147483648, %v8614_v60  ;;  %5580 = vrsqrt.f32 %v8711_v8  ;;  %v4606_v50 = vsel %vm766_vm6, %v4582_v47, 0.0  ;;  %v4966_v61 = vsel %vm4965_vm8, %v8614_v60, %v4964_v20 }
 0x9f1   : > { %v4603_v59 = vadd.f32 %v4602_v35, %v4601_v57  ;;  %vm4967_vm2 = vcmp.eq.f32.partialorder %v8614_v60, 0.0  ;;  %5582 = vrsqrt.f32 %v8717_v33  ;;  %v8737_v25 = vmul.f32 0.005, %v4615_v5 }
 0x9f2   : > { %vm4972_vm7 = vcmp.eq.f32.partialorder %v8697_v6, inf  ;;  %5584 = vrsqrt.f32 %v8722_v53  ;;  %v4962_v32 = vsel %vm4960_vm9, %v4961_v0, %v4959_v30  ;;  %vm4974_vm10 = vcmp.eq.f32.partialorder %v8697_v6, 0.0 }
 0x9f3   : > { %v4605_v15 = vadd.f32 %v4604_v54, %v4603_v59  ;;  %v4975_v43 = vand.u32 2147483648, %v8697_v6  ;;  %5586 = vrsqrt.f32 %v8726_v44  ;;  %v4969_v55 = vsel %vm4967_vm2, %v4968_v49, %v4966_v61 }
 0x9f4   : > { %vm4979_vm11 = vcmp.eq.f32.partialorder %v8704_v52, inf  ;;  %5588 = vrsqrt.f32 %v8732_v34  ;;  %vm4981_vm12 = vcmp.eq.f32.partialorder %v8704_v52, 0.0  ;;  %v4982_v14 = vand.u32 2147483648, %v8704_v52 }
 0x9f5   : > { %v4607_v60 = vadd.f32 %v4606_v50, %v4605_v15  ;;  %vm4986_vm13 = vcmp.eq.f32.partialorder %v8711_v8, inf  ;;  %5590 = vrsqrt.f32 %v8739_v63  ;;  %vm4988_vm14 = vcmp.eq.f32.partialorder %v8711_v8, 0.0 }
 0x9f6   : > { %v4989_v21 = vand.u32 2147483648, %v8711_v8  ;;  %vm4993_vm15 = vcmp.eq.f32.partialorder %v8717_v33, inf  ;;  %vm4995_vm0 = vcmp.eq.f32.partialorder %v8717_v33, 0.0  ;;  %v4996_v2 = vand.u32 2147483648, %v8717_v33 }
 0x9f7   : > { %v4608_v18 = vrot.slane %v4607_v60, 4  ;;  %vm5000_vm1 = vcmp.eq.f32.partialorder %v8722_v53, inf  ;;  %5592 = vrsqrt.f32 %v8748_v39  ;;  %vm5002_vm4 = vcmp.eq.f32.partialorder %v8722_v53, 0.0 }
 0x9f8   : > { %v5003_v46 = vand.u32 2147483648, %v8722_v53  ;;  %vm5007_vm3 = vcmp.eq.f32.partialorder %v8726_v44, inf  ;;  %5594 = vrsqrt.f32 %v8752_v28  ;;  %vm5009_vm5 = vcmp.eq.f32.partialorder %v8726_v44, 0.0 }
 0x9f9   : > { %v4609_v45 = vadd.f32 %v4608_v18, %v4607_v60  ;;  %v5577_v4 = vpop.eup %5576  ;;  %v5010_v51 = vand.u32 2147483648, %v8726_v44  ;;  %vm5014_vm8 = vcmp.eq.f32.partialorder %v8732_v34, inf  ;;  %5596 = vrsqrt.f32 %v8758_v26 }
 0x9fa   : > { %v4971_v41 = vmul.f32 %v5577_v4, %v8697_v6  ;;  %v5017_v31 = vand.u32 2147483648, %v8732_v34  ;;  %v5060_v19 = vsel %vm766_vm6, %v4962_v32, 0.0  ;;  %v5024_v16 = vand.u32 2147483648, %v8739_v63 }
 0x9fb   : > { %v4610_v9 = vrot.slane %v4609_v45, 2  ;;  %v5579_v36 = vpop.eup %5578  ;;  %v5061_v10 = vsel %vm766_vm6, %v4969_v55, 0.0  ;;  %5598 = vrsqrt.f32 %v8771_v12  ;;  %vm5028_vm2 = vcmp.eq.f32.partialorder %v8748_v39, inf }
 0x9fc   : > { %v4973_v7 = vsel %vm4972_vm7, %v8697_v6, %v4971_v41  ;;  %v4978_v29 = vmul.f32 %v5579_v36, %v8704_v52  ;;  %v5062_v11 = vadd.f32 %v5061_v10, %v5060_v19  ;;  %v5031_v17 = vand.u32 2147483648, %v8748_v39 }
 0x9fd   : > { %v4611_v24 = vadd.f32 %v4610_v9, %v4609_v45  ;;  %v5581_v40 = vpop.eup %5580  ;;  %v4976_v48 = vsel %vm4974_vm10, %v4975_v43, %v4973_v7  ;;  %5600 = vrsqrt.f32 %v8780_v56  ;;  %vm5035_vm7 = vcmp.eq.f32.partialorder %v8752_v28, inf }
 0x9fe   : > { %v5583_v37 = vpop.eup %5582  ;;  %v4980_v22 = vsel %vm4979_vm11, %v8704_v52, %v4978_v29  ;;  %v4985_v58 = vmul.f32 %v5581_v40, %v8711_v8  ;;  %v5063_v6 = vsel %vm766_vm6, %v4976_v48, 0.0  ;;  %vm5030_vm10 = vcmp.eq.f32.partialorder %v8748_v39, 0.0 }
 0x9ff   : > { %v4612_v42 = vrot.slane %v4611_v24, 1  ;;  %v5585_v23 = vpop.eup %5584  ;;  %v4983_v3 = vsel %vm4981_vm12, %v4982_v14, %v4980_v22  ;;  %v4992_v38 = vmul.f32 %v5583_v37, %v8717_v33  ;;  %vm5042_vm9 = vcmp.eq.f32.partialorder %v8758_v26, inf  ;;  %v8869_v37 = vld [vmem:[#allocation2 + $0x280] sm:$0xff] }
 0xa00   : > { %v5064_v1 = vadd.f32 %v5063_v6, %v5062_v11  ;;  %v5587_v27 = vpop.eup %5586  ;;  %v4987_v35 = vsel %vm4986_vm13, %v8711_v8, %v4985_v58  ;;  %v4999_v20 = vmul.f32 %v5585_v23, %v8722_v53  ;;  %v5065_v47 = vsel %vm766_vm6, %v4983_v3, 0.0  ;;  %v8876_v6 = vld [vmem:[#allocation2 + $0x288] sm:$0xff]  ;;  %v8878_v3 = vld [vmem:[#allocation2 + $0x290] sm:$0xff] }
 0xa01   : > { %v4613_v13 = vadd.f32 %v4612_v42, %v4611_v24  ;;  %v5589_v57 = vpop.eup %5588  ;;  %v4990_v52 = vsel %vm4988_vm14, %v4989_v21, %v4987_v35  ;;  %v4994_v54 = vsel %vm4993_vm15, %v8717_v33, %v4992_v38  ;;  %v5006_v5 = vmul.f32 %v5587_v27, %v8726_v44  ;;  %v8887_v27 = vld [vmem:[#allocation2 + $0x298] sm:$0xff]  ;;  %v5092_v35 = vld [vmem:[#allocation3 + $0x7] sm:$0x1] }
 0xa02   : > { %v5066_v0 = vadd.f32 %v5065_v47, %v5064_v1  ;;  %v5591_v59 = vpop.eup %5590  ;;  %v4997_v49 = vsel %vm4995_vm0, %v4996_v2, %v4994_v54  ;;  %v5001_v50 = vsel %vm5000_vm1, %v8722_v53, %v4999_v20  ;;  %v5013_v61 = vmul.f32 %v5589_v57, %v8732_v34  ;;  %v8892_v20 = vld [vmem:[#allocation2 + $0x2a0] sm:$0xff] }
 0xa03   : > { %v4614_v30 = vmul.f32 0.01, %v4613_v13  ;;  %v5004_v8 = vsel %vm5002_vm4, %v5003_v46, %v5001_v50  ;;  %v5008_v15 = vsel %vm5007_vm3, %v8726_v44, %v5006_v5  ;;  %v5020_v32 = vmul.f32 %v5591_v59, %v8739_v63  ;;  %v8902_v59 = vld [vmem:[#allocation2 + $0x2b0] sm:$0xff] }
 0xa04   : > { %v5067_v43 = vsel %vm766_vm6, %v4990_v52, 0.0  ;;  %v5593_v60 = vpop.eup %5592  ;;  %v5011_v55 = vsel %vm5009_vm5, %v5010_v51, %v5008_v15  ;;  %v5015_v14 = vsel %vm5014_vm8, %v8732_v34, %v5013_v61  ;;  %v3986_v18 = vpop.permute.xlu0 %3985  ;;  %vm9089_vm11 = vcmp.eq.f32.partialorder %v8739_v63, inf  ;;  %v8896_v52 = vld [vmem:[#allocation2 + $0x2a8] sm:$0xff]  ;;  %v8909_v61 = vld [vmem:[#allocation2 + $0x2b8] sm:$0xff] }
 0xa05   : > { %v4617_v33 = vadd.f32 %v8737_v25, %v4614_v30  ;;  %v5068_v53 = vadd.f32 %v5067_v43, %v5066_v0  ;;  %v5595_v21 = vpop.eup %5594  ;;  %v5022_v2 = vsel %vm9089_vm11, %v8739_v63, %v5020_v32  ;;  %v5027_v45 = vmul.f32 %v5593_v60, %v8748_v39  ;;  %3988 = vst [vmem:[#allocation5] sm:$0x1] %v3986_v18 }
 0xa06   : > { %v5045_v46 = vand.u32 2147483648, %v8758_v26  ;;  %v5069_v25 = vsel %vm766_vm6, %v4997_v49, 0.0  ;;  %v5597_v44 = vpop.eup %5596  ;;  %vm9090_vm12 = vcmp.eq.f32.partialorder %v8732_v34, 0.0  ;;  %v5034_v9 = vmul.f32 %v5595_v21, %v8752_v28 }
 0xa07   : > { %v4618_v4 = vmul.f32 0.5, %v4617_v33  ;;  %v5018_v51 = vsel %vm9090_vm12, %v5017_v31, %v5015_v14  ;;  %v5070_v41 = vadd.f32 %v5069_v25, %v5068_v53  ;;  %v5029_v19 = vsel %vm5028_vm2, %v8748_v39, %v5027_v45 }
 0xa08   : > { %v5041_v36 = vmul.f32 %v5597_v44, %v8758_v26  ;;  %v5071_v10 = vsel %vm766_vm6, %v5004_v8, 0.0  ;;  %v5073_v24 = vsel %vm766_vm6, %v5011_v55, 0.0  ;;  %v5599_v7 = vpop.eup %5598  ;;  %vm9091_vm13 = vcmp.eq.f32.partialorder %v8739_v63, 0.0  ;;  %v8925_v55 = vld [vmem:[#allocation2 + $0x2d0] sm:$0xff] }
 0xa09   : > { %4621 = vperm.xlu0 %5414, %v4618_v4   ;;  %v5025_v34 = vsel %vm9091_vm13, %v5024_v16, %v5022_v2  ;;  %v5038_v31 = vand.u32 2147483648, %v8752_v28  ;;  %vm5044_vm14 = vcmp.eq.f32.partialorder %v8758_v26, 0.0  ;;  %v5072_v29 = vadd.f32 %v5071_v10, %v5070_v41 }
 0xa0a   : > { %v5036_v11 = vsel %vm5035_vm7, %v8752_v28, %v5034_v9  ;;  %vm5037_vm15 = vcmp.eq.f32.partialorder %v8752_v28, 0.0  ;;  %v5043_v40 = vsel %vm5042_vm9, %v8758_v26, %v5041_v36  ;;  %v5075_v48 = vsel %vm766_vm6, %v5018_v51, 0.0  ;;  %v5601_v63 = vpop.eup %5600 }
 0xa0b   : > { %v5032_v16 = vsel %vm5030_vm10, %v5031_v17, %v5029_v19  ;;  %v5074_v42 = vadd.f32 %v5073_v24, %v5072_v29  ;;  %v5046_v22 = vsel %vm5044_vm14, %v5045_v46, %v5043_v40  ;;  %v5077_v58 = vsel %vm766_vm6, %v5025_v34, 0.0 }
 0xa0c   : > { %v5039_v28 = vsel %vm5037_vm15, %v5038_v31, %v5036_v11  ;;  %v4798_v26 = vmul.f32 %v5599_v7, %v8771_v12  ;;  %5602 = vrsqrt.f32 %v8869_v37  ;;  %v5079_v38 = vsel %vm766_vm6, %v5032_v16, 0.0 }
 0xa0d   : > { %v5076_v23 = vadd.f32 %v5075_v48, %v5074_v42  ;;  %vm4799_vm0 = vcmp.eq.f32.partialorder %v8771_v12, inf  ;;  %v4805_v39 = vmul.f32 %v5601_v63, %v8780_v56  ;;  %vm9092_vm1 = vcmp.lt.s32.totalorder %v6169_v62, 100 }
 0xa0e   : > { %v5059_v17 = vsel %vm9092_vm1, %v5046_v22, 0.0  ;;  %vm4806_vm4 = vcmp.eq.f32.partialorder %v8780_v56, inf  ;;  %5604 = vrsqrt.f32 %v8876_v6  ;;  %v5081_v13 = vsel %vm766_vm6, %v5039_v28, 0.0 }
 0xa0f   : > { %v5078_v1 = vadd.f32 %v5077_v58, %v5076_v23  ;;  %v4802_v47 = vand.u32 2147483648, %v8771_v12  ;;  %5606 = vrsqrt.f32 %v8878_v3  ;;  %v4800_v54 = vsel %vm4799_vm0, %v8771_v12, %v4798_v26 }
 0xa10   : > { %vm4801_vm3 = vcmp.eq.f32.partialorder %v8771_v12, 0.0  ;;  %v4809_v5 = vand.u32 2147483648, %v8780_v56  ;;  %v5083_v0 = vsel %vm766_vm6, %v5059_v17, 0.0  ;;  %v4807_v30 = vsel %vm4806_vm4, %v8780_v56, %v4805_v39  ;;  %v8912_v12 = vld [vmem:[#allocation2 + $0x2c0] sm:$0xff] }
 0xa11   : > { %v5080_v57 = vadd.f32 %v5079_v38, %v5078_v1  ;;  %vm4808_vm5 = vcmp.eq.f32.partialorder %v8780_v56, 0.0  ;;  %5608 = vrsqrt.f32 %v8887_v27  ;;  %v8907_v50 = vmul.f32 0.005, %v5092_v35  ;;  %v8917_v56 = vld [vmem:[#allocation2 + $0x2c8] sm:$0xff] }
 0xa12   : > { %5610 = vrsqrt.f32 %v8892_v20  ;;  %v4803_v8 = vsel %vm4801_vm3, %v4802_v47, %v4800_v54  ;;  %vm4813_vm8 = vcmp.eq.f32.partialorder %v8869_v37, inf  ;;  %vm4815_vm9 = vcmp.eq.f32.partialorder %v8869_v37, 0.0 }
 0xa13   : > { %v5082_v49 = vadd.f32 %v5081_v13, %v5080_v57  ;;  %5612 = vrsqrt.f32 %v8896_v52  ;;  %v4810_v32 = vsel %vm4808_vm5, %v4809_v5, %v4807_v30  ;;  %v4816_v43 = vand.u32 2147483648, %v8869_v37 }
 0xa14   : > { %5614 = vrsqrt.f32 %v8902_v59  ;;  %vm4820_vm2 = vcmp.eq.f32.partialorder %v8876_v6, inf  ;;  %vm4822_vm7 = vcmp.eq.f32.partialorder %v8876_v6, 0.0  ;;  %v4823_v60 = vand.u32 2147483648, %v8876_v6 }
 0xa15   : > { %v5084_v15 = vadd.f32 %v5083_v0, %v5082_v49  ;;  %5616 = vrsqrt.f32 %v8909_v61  ;;  %vm4827_vm10 = vcmp.eq.f32.partialorder %v8878_v3, inf  ;;  %vm4829_vm11 = vcmp.eq.f32.partialorder %v8878_v3, 0.0 }
 0xa16   : > { %5618 = vrsqrt.f32 %v8912_v12  ;;  %v4830_v14 = vand.u32 2147483648, %v8878_v3  ;;  %vm4834_vm12 = vcmp.eq.f32.partialorder %v8887_v27, inf  ;;  %vm4836_vm13 = vcmp.eq.f32.partialorder %v8887_v27, 0.0 }
 0xa17   : > { %v5085_v33 = vrot.slane %v5084_v15, 4  ;;  %5620 = vrsqrt.f32 %v8917_v56  ;;  %v4837_v18 = vand.u32 2147483648, %v8887_v27  ;;  %vm4841_vm14 = vcmp.eq.f32.partialorder %v8892_v20, inf }
 0xa18   : > { %v4844_v21 = vand.u32 2147483648, %v8892_v20  ;;  %vm4843_vm15 = vcmp.eq.f32.partialorder %v8892_v20, 0.0  ;;  %vm4848_vm0 = vcmp.eq.f32.partialorder %v8896_v52, inf  ;;  %v4851_v45 = vand.u32 2147483648, %v8896_v52 }
 0xa19   : > { %v5086_v53 = vadd.f32 %v5085_v33, %v5084_v15  ;;  %v5603_v2 = vpop.eup %5602  ;;  %vm4855_vm1 = vcmp.eq.f32.partialorder %v8902_v59, inf  ;;  %5622 = vrsqrt.f32 %v8925_v55  ;;  %vm4850_vm4 = vcmp.eq.f32.partialorder %v8896_v52, 0.0 }
 0xa1a   : > { %v4812_v25 = vmul.f32 %v5603_v2, %v8869_v37  ;;  %v4901_v44 = vsel %vm766_vm6, %v4803_v8, 0.0  ;;  %v4902_v4 = vsel %vm766_vm6, %v4810_v32, 0.0  ;;  %v4858_v9 = vand.u32 2147483648, %v8902_v59 }
 0xa1b   : > { %v5087_v46 = vrot.slane %v5086_v53, 2  ;;  %v5605_v51 = vpop.eup %5604  ;;  %v4903_v41 = vadd.f32 %v4902_v4, %v4901_v44  ;;  %v4865_v7 = vand.u32 2147483648, %v8909_v61  ;;  %vm4864_vm3 = vcmp.eq.f32.partialorder %v8909_v61, 0.0 }
 0xa1c   : > { %v5607_v19 = vpop.eup %5606  ;;  %v4814_v10 = vsel %vm4813_vm8, %v8869_v37, %v4812_v25  ;;  %v4819_v24 = vmul.f32 %v5605_v51, %v8876_v6  ;;  %vm4869_vm5 = vcmp.eq.f32.partialorder %v8912_v12, inf  ;;  %v4872_v29 = vand.u32 2147483648, %v8912_v12 }
 0xa1d   : > { %v5088_v36 = vadd.f32 %v5087_v46, %v5086_v53  ;;  %v4817_v34 = vsel %vm4815_vm9, %v4816_v43, %v4814_v10  ;;  %v4826_v31 = vmul.f32 %v5607_v19, %v8878_v3  ;;  %vm4876_vm8 = vcmp.eq.f32.partialorder %v8917_v56, inf }
 0xa1e   : > { %v5609_v11 = vpop.eup %5608  ;;  %v4821_v48 = vsel %vm4820_vm2, %v8876_v6, %v4819_v24  ;;  %v4904_v63 = vsel %vm766_vm6, %v4817_v34, 0.0  ;;  %vm4871_vm9 = vcmp.eq.f32.partialorder %v8912_v12, 0.0  ;;  %v4879_v8 = vand.u32 2147483648, %v8917_v56 }
 0xa1f   : > { %v5089_v40 = vrot.slane %v5088_v36, 1  ;;  %v5611_v37 = vpop.eup %5610  ;;  %v4824_v16 = vsel %vm4822_vm7, %v4823_v60, %v4821_v48  ;;  %v4828_v42 = vsel %vm4827_vm10, %v8878_v3, %v4826_v31  ;;  %v4833_v22 = vmul.f32 %v5609_v11, %v8887_v27 }
 0xa20   : > { %v4905_v58 = vadd.f32 %v4904_v63, %v4903_v41  ;;  %v5613_v28 = vpop.eup %5612  ;;  %v4831_v26 = vsel %vm4829_vm11, %v4830_v14, %v4828_v42  ;;  %v4840_v38 = vmul.f32 %v5611_v37, %v8892_v20  ;;  %v4906_v39 = vsel %vm766_vm6, %v4824_v16, 0.0 }
 0xa21   : > { %v5090_v23 = vadd.f32 %v5089_v40, %v5088_v36  ;;  %v5615_v6 = vpop.eup %5614  ;;  %v4835_v17 = vsel %vm4834_vm12, %v8887_v27, %v4833_v22  ;;  %v4847_v1 = vmul.f32 %v5613_v28, %v8896_v52  ;;  %v4908_v35 = vsel %vm766_vm6, %v4831_v26, 0.0 }
 0xa22   : > { %v4907_v13 = vadd.f32 %v4906_v39, %v4905_v58  ;;  %v5617_v47 = vpop.eup %5616  ;;  %v4838_v3 = vsel %vm4836_vm13, %v4837_v18, %v4835_v17  ;;  %v4842_v54 = vsel %vm4841_vm14, %v8892_v20, %v4840_v38  ;;  %v4854_v5 = vmul.f32 %v5615_v6, %v8902_v59  ;;  %v4933_v58 = vld [vmem:[#allocation3 + $0x6] sm:$0x1] }
 0xa23   : > { %v5091_v57 = vmul.f32 0.01, %v5090_v23  ;;  %v5619_v0 = vpop.eup %5618  ;;  %v4849_v30 = vsel %vm4848_vm0, %v8896_v52, %v4847_v1  ;;  %v4861_v49 = vmul.f32 %v5617_v47, %v8909_v61  ;;  %v4845_v60 = vsel %vm4843_vm15, %v4844_v21, %v4842_v54 }
 0xa24   : > { %v4909_v15 = vadd.f32 %v4908_v35, %v4907_v13  ;;  %v4463_v32 = vpop.permute.xlu1 %4462  ;;  %v5621_v43 = vpop.eup %5620  ;;  %v4856_v33 = vsel %vm4855_vm1, %v8902_v59, %v4854_v5  ;;  %v4868_v14 = vmul.f32 %v5619_v0, %v8912_v12  ;;  %v4852_v53 = vsel %vm4850_vm4, %v4851_v45, %v4849_v30 }
 0xa25   : > { %v5094_v27 = vadd.f32 %v8907_v50, %v5091_v57  ;;  %4465 = vst [vmem:[#allocation5 + $0x3] sm:$0x1] %v4463_v32  ;;  %vm9093_vm2 = vcmp.eq.f32.partialorder %v8909_v61, inf  ;;  %v4875_v2 = vmul.f32 %v5621_v43, %v8917_v56  ;;  %v4910_v50 = vsel %vm766_vm6, %v4838_v3, 0.0 }
 0xa26   : > { %v4863_v18 = vsel %vm9093_vm2, %v8909_v61, %v4861_v49  ;;  %v5623_v20 = vpop.eup %5622  ;;  %vm9094_vm7 = vcmp.eq.f32.partialorder %v8902_v59, 0.0  ;;  %vm4883_vm10 = vcmp.eq.f32.partialorder %v8925_v55, inf  ;;  %v4911_v25 = vadd.f32 %v4910_v50, %v4909_v15 }
 0xa27   : > { %v5095_v21 = vmul.f32 0.5, %v5094_v27  ;;  %v4859_v46 = vsel %vm9094_vm7, %v4858_v9, %v4856_v33  ;;  %v4870_v52 = vsel %vm4869_vm5, %v8912_v12, %v4868_v14  ;;  %v4882_v45 = vmul.f32 %v5623_v20, %v8925_v55 }
 0xa28   : > { %v4886_v44 = vand.u32 2147483648, %v8925_v55  ;;  %v4912_v4 = vsel %vm766_vm6, %v4845_v60, 0.0  ;;  %v4866_v51 = vsel %vm4864_vm3, %v4865_v7, %v4863_v18  ;;  %vm4885_vm11 = vcmp.eq.f32.partialorder %v8925_v55, 0.0 }
 0xa29   : > { %5098 = vperm.xlu1 %5415, %v5095_v21   ;;  %v4913_v59 = vadd.f32 %v4912_v4, %v4911_v25  ;;  %v4914_v9 = vsel %vm766_vm6, %v4852_v53, 0.0  ;;  %v4877_v41 = vsel %vm4876_vm8, %v8917_v56, %v4875_v2  ;;  %vm4878_vm12 = vcmp.eq.f32.partialorder %v8917_v56, 0.0 }
 0xa2a   : > { %v4884_v19 = vsel %vm4883_vm10, %v8925_v55, %v4882_v45  ;;  %v4916_v36 = vsel %vm766_vm6, %v4859_v46, 0.0  ;;  %v4873_v10 = vsel %vm4871_vm9, %v4872_v29, %v4870_v52  ;;  %v4918_v7 = vsel %vm766_vm6, %v4866_v51, 0.0 }
 0xa2b   : > { %v4915_v61 = vadd.f32 %v4914_v9, %v4913_v59  ;;  %v4887_v24 = vsel %vm4885_vm11, %v4886_v44, %v4884_v19  ;;  %v4880_v34 = vsel %vm4878_vm12, %v4879_v8, %v4877_v41  ;;  %v4920_v11 = vsel %vm766_vm6, %v4873_v10, 0.0 }
 0xa2c   : > { %vm9095_vm13 = vcmp.lt.s32.totalorder %v6169_v62, 100  ;;  %v4922_v56 = vsel %vm766_vm6, %v4880_v34, 0.0  ;;  %v4934_v26 = vmul.f32 0.005, %v4933_v58 }
 0xa2d   : > { %v4917_v31 = vadd.f32 %v4916_v36, %v4915_v61  ;;  %v4900_v40 = vsel %vm9095_vm13, %v4887_v24, 0.0 }
 0xa2e   : > { %v4924_v63 = vsel %vm766_vm6, %v4900_v40, 0.0 }
 0xa2f   : > { %v4919_v48 = vadd.f32 %v4918_v7, %v4917_v31 }
 0xa31   : > { %v4921_v55 = vadd.f32 %v4920_v11, %v4919_v48 }
 0xa33   : > { %v4923_v37 = vadd.f32 %v4922_v56, %v4921_v55 }
 0xa35   : > { %v4925_v12 = vadd.f32 %v4924_v63, %v4923_v37 }
 0xa37   : > { %v4926_v29 = vrot.slane %v4925_v12, 4 }
 0xa39   : > { %v4927_v16 = vadd.f32 %v4926_v29, %v4925_v12 }
 0xa3b   : > { %v4928_v42 = vrot.slane %v4927_v16, 2 }
 0xa3d   : > { %v4929_v22 = vadd.f32 %v4928_v42, %v4927_v16 }
 0xa3f   : > { %v4930_v28 = vrot.slane %v4929_v22, 1 }
 0xa41   : > { %v4931_v23 = vadd.f32 %v4930_v28, %v4929_v22 }
 0xa43   : > { %v4932_v38 = vmul.f32 0.01, %v4931_v23 }
 0xa45   : > { %v4935_v39 = vadd.f32 %v4934_v26, %v4932_v38  ;;  %v4145_v62 = vpop.permute.xlu0 %4144 }
 0xa46   : > { %4147 = vst [vmem:[#allocation5 + $0x1] sm:$0x1] %v4145_v62 }
 0xa47   : > { %v4936_v6 = vmul.f32 0.5, %v4935_v39 }
 0xa49   : > { %4939 = vperm.xlu0 %5414, %v4936_v6  }
 0xa65   : > { %v4781_v17 = vpop.permute.xlu1 %4780 }
 0xa66   : > { %4783 = vst [vmem:[#allocation5 + $0x5] sm:$0x1] %v4781_v17 }
 0xa84   : > { %v4622_v1 = vpop.permute.xlu0 %4621 }
 0xa85   : > { %4624 = vst [vmem:[#allocation5 + $0x4] sm:$0x1] %v4622_v1 }
 0xaa4   : > { %v5099_v13 = vpop.permute.xlu1 %5098 }
 0xaa5   : > { %5101 = vst [vmem:[#allocation5 + $0x7] sm:$0x1] %v5099_v13 }
 0xac4   : > { %v4940_v35 = vpop.permute.xlu0 %4939 }
 0xac5   : > { %4942 = vst [vmem:[#allocation5 + $0x6] sm:$0x1] %v4940_v35 }
 0xac6 PF: > { %p9035_p11 = scmp.eq.s32.totalorder %s5184_s14, 1  ;;  %s5698_s28 = smov [#allocation5]  }
 0xac7   : > { %s5111_s16 = sshll.u32 %s5698_s28, 4  ;;  %s5112_s16 = int_to_ptr.vmem [resolvable:$true] %s5111_s16 }
 0xac8   : > { %s5624_s17 = scalar_lea.vmem %s5112_s16, 128  ;;  %p5631_p1 = scmp.lt.s32.totalorder %s5112_s16, %s5112_s16 }
 0xac9   : > { %p5625_p12 = scmp.ne.s32.totalorder %s5112_s16, %s5624_s17  ;;  %p5632_p2 = scmp.lt.s32.totalorder %s5624_s17, %s5624_s17 }
 0xacb   : > { %p5626_p13 = pnand %p5625_p12, %p9035_p11  ;;  %p5633_p3 = por %p5632_p2, %p5631_p1 }
 0xacd   : > { %p5627_p0 = pneg %p5626_p13 }
 0xacf   : > { %p5634_p4 = pnand %p5633_p3, %p5627_p0 }
 0xad1   : > { %5637 = shalt.err (!%p5634_p4)
}
 0xad2   : > { %5298 = dma.vmem_to_hbm [thread:$0]  (%p9035_p11), %s5112_s16, 128, %s9067_s2, [#allocation6]  }
 0xad3   : > { %5669 = dma.done.wait (%p9035_p11), [#allocation6], 128  }
 0xad4   : > { %5671 = vsyncadd (%p9035_p11), [#allocation6], 4294967168 }
 0xad5 PF: > { %s13_s13 = sadd.s32 1, %s5690_s13   ;;  %s9097_s9 = smov %s5678_s10 }
 0xad6   : > { %p10_p5 = scmp.ge.s32.totalorder %s13_s13, 4   ;;  %s9098_s10 = smov %s5750_s18 }
 0xad7   : > { %s9099_s11 = smov %s5686_s12  ;;  %s9100_s12 = smov %s9102_s15 }
 0xad8   :  { %12 = sbr.rel (!%p10_p5) target bundleno = 3 (0x3), region = 141 }
 0xadd   :  { %5124 = vsyncpa [#allocation6], 1 }
 0xade   :  { %5126 = vsyncpa [#allocation6 + $0x1], 1 }

</bundles_post_ra>
